<compile_context>
chip_gen: v7x
topology: tpu7x:2x2x1
jax: 0.10.0
libtpu: 0.0.40
codegen_flags: <defaults>
</compile_context>

<pallas_src>
import jax
import jax.numpy as jnp
import numpy as np
from jax import lax
from jax.experimental import pallas as pl
from jax.experimental.pallas import tpu as pltpu

_EPS = 1e-5                    # nn.BatchNorm2d default eps
_MAX_TB = 16                   # batch tile cap (fits VMEM on v5e/v6e/v7x in bf16)
_VMEM_LIMIT = 48 * 1024 * 1024  # raised scoped-VMEM limit (v5e default is 16 MiB)


def _cparams():
    return pltpu.CompilerParams(
        dimension_semantics=("parallel",),
        vmem_limit_bytes=_VMEM_LIMIT,
    )


# ----------------------------- stage-1 kernels ------------------------------ #
def _s1_stats_kernel(p_ref, w_ref, s_ref, ss_ref):
    """conv1 (one K=25 MXU matmul, bf16 in / f32 acc) + per-tile BN partials."""
    tb, _, _, k = p_ref.shape
    p = p_ref[...].reshape(tb * 4 * 144, k)
    y = jnp.dot(p, w_ref[...], preferred_element_type=jnp.float32)
    s_ref[...] = jnp.sum(y, axis=0, keepdims=True).reshape(1, 1, 64)
    ss_ref[...] = jnp.sum(y * y, axis=0, keepdims=True).reshape(1, 1, 64)


def _s1_apply_kernel(p_ref, w_ref, sh_ref, o_ref):
    """conv1 with BN-scale pre-folded into w + shift + phase-max pool + ReLU."""
    tb, _, _, k = p_ref.shape
    p = p_ref[...].reshape(tb * 4 * 144, k)
    y = jnp.dot(p, w_ref[...], preferred_element_type=jnp.float32)
    y = y + sh_ref[...]                                  # only the shift stays in-kernel
    y = y.reshape(tb, 4, 144, 64)                        # pool-phase-major rows
    o_ref[...] = jnp.maximum(jnp.max(y, axis=1), 0.0).astype(o_ref.dtype)


# ----------------------------- stage-2 kernels ------------------------------ #
def _s2_conv_kernel(x_ref, w_ref, conv_ref, s_ref, ss_ref, acc_ref):
    """conv2: 25 ref-sliced taps accumulated into a VMEM scratch; emits the
    f32 conv map (handed to the apply pass) plus per-tile BN partials."""
    tb = x_ref.shape[0]
    for di in range(5):
        for dj in range(5):
            xs = x_ref[:, di:di + 8, dj:dj + 8, :].reshape(tb * 64, 64)
            d = jnp.dot(xs, w_ref[di, dj], preferred_element_type=jnp.float32)
            if di == 0 and dj == 0:
                acc_ref[...] = d
            else:
                acc_ref[...] += d
    y = acc_ref[...]                                     # (tb*64, 64) f32
    conv_ref[...] = y.reshape(tb, 64, 64)
    s_ref[...] = jnp.sum(y, axis=0, keepdims=True).reshape(1, 1, 64)
    ss_ref[...] = jnp.sum(y * y, axis=0, keepdims=True).reshape(1, 1, 64)


def _s2_apply_kernel(conv_ref, sc_ref, sh_ref, o_ref):
    """BN affine on the precomputed conv map + 2x2 maxpool + ReLU, one store."""
    tb = conv_ref.shape[0]
    y = conv_ref[...].reshape(tb * 64, 64) * sc_ref[...] + sh_ref[...]
    y4 = y.reshape(tb, 8, 8, 64)                         # (b, oh, ow, c)
    rows = []
    for ph in range(4):
        a = jnp.maximum(y4[:, 2 * ph:2 * ph + 1], y4[:, 2 * ph + 1:2 * ph + 2])
        cols = [jnp.maximum(a[:, :, 2 * pw:2 * pw + 1, :],
                            a[:, :, 2 * pw + 1:2 * pw + 2, :]) for pw in range(4)]
        rows.append(jnp.concatenate(cols, axis=2))       # (tb, 1, 4, 64)
    out = jnp.concatenate(rows, axis=1)                  # (tb, 4, 4, 64)
    o_ref[...] = jnp.maximum(out, 0.0)                   # single full-block store


# --------------------------------- JAX glue --------------------------------- #
def _bn_affine(s, ss, count, gamma, beta):
    """Training-mode BN: biased batch stats -> per-channel scale/shift (f32)."""
    mean = s / count
    var = jnp.maximum(ss / count - mean * mean, 0.0)
    scale = gamma / jnp.sqrt(var + _EPS)
    shift = beta - mean * scale
    return scale.reshape(1, -1), shift.reshape(1, -1)


def _build_patches_s1(x_nhwc):
    """(N,28,28,Cin) -> (N, 4, 144, 25*Cin) pool-phase-major im2col patches.

    Row order (b, phase=(a,c), ph, pw) with output (oh,ow)=(2ph+a, 2pw+c), so the
    in-kernel 2x2 max-pool is just a max over the contiguous phase axis."""
    n, _, _, cin = x_nhwc.shape
    groups = []
    for a in range(2):
        for c in range(2):
            taps = [x_nhwc[:, a + di:a + di + 24:2, c + dj:c + dj + 24:2, :]
                    for di in range(5) for dj in range(5)]        # each (N,12,12,Cin)
            t = jnp.stack(taps, axis=3)                           # (N,12,12,25,Cin)
            groups.append(t.reshape(n, 144, 25 * cin))
    return jnp.stack(groups, axis=1)                              # (N,4,144,25*Cin)


def _pick_tb(n):
    """Largest tile <= _MAX_TB dividing N with >= 2 grid steps (both v7x cores)."""
    best = 1
    for t in range(1, min(_MAX_TB, n) + 1):
        if n % t == 0 and (n // t >= 2 or n == 1):
            best = t
    return best


def _stage1(x_nhwc, w1, gamma, beta, tb):
    n, _, _, cin = x_nhwc.shape
    g = n // tb
    k1 = 25 * cin
    patches = _build_patches_s1(x_nhwc.astype(jnp.bfloat16))      # (N,4,144,K1) bf16
    w1m = jnp.transpose(w1, (2, 3, 1, 0)).reshape(k1, 64)         # (K1, 64) f32 master

    p_spec = pl.BlockSpec((tb, 4, 144, k1), lambda i: (i, 0, 0, 0))
    w_spec = pl.BlockSpec((k1, 64), lambda i: (0, 0))
    st_spec = pl.BlockSpec((1, 1, 64), lambda i: (i, 0, 0))
    vec_spec = pl.BlockSpec((1, 64), lambda i: (0, 0))

    # Pass 1: conv + per-batch-tile partial sums / sums-of-squares.
    s, ss = pl.pallas_call(
        _s1_stats_kernel,
        grid=(g,),
        in_specs=[p_spec, w_spec],
        out_specs=[st_spec, st_spec],
        out_shape=[jax.ShapeDtypeStruct((g, 1, 64), jnp.float32)] * 2,
        compiler_params=_cparams(),
    )(patches, w1m.astype(jnp.bfloat16))

    scale, shift = _bn_affine(s.sum(axis=(0, 1)), ss.sum(axis=(0, 1)),
                              float(n * 24 * 24), gamma, beta)

    # Fold the BN scale into the conv weights (exact modulo bf16 rounding).
    w1m_scaled = (w1m * scale).astype(jnp.bfloat16)

    # Pass 2: conv (recomputed, K=25 is nearly free) + shift + pool + ReLU, fused.
    out = pl.pallas_call(
        _s1_apply_kernel,
        grid=(g,),
        in_specs=[p_spec, w_spec, vec_spec],
        out_specs=pl.BlockSpec((tb, 144, 64), lambda i: (i, 0, 0)),
        out_shape=jax.ShapeDtypeStruct((n, 144, 64), jnp.bfloat16),
        compiler_params=_cparams(),
    )(patches, w1m_scaled, shift)
    return out.reshape(n, 12, 12, 64)                             # NHWC bf16, free reshape


def _stage2(x2, w2, gamma, beta, tb):
    n = x2.shape[0]
    g = n // tb
    # Pad Cout 50 -> 64 (lane-dense); zero gamma/beta -> zero scale/shift there.
    w2m = jnp.zeros((5, 5, 64, 64), jnp.float32)
    w2m = w2m.at[:, :, :, :50].set(jnp.transpose(w2, (2, 3, 1, 0)))
    gp = jnp.zeros((64,), jnp.float32).at[:50].set(gamma)
    bp = jnp.zeros((64,), jnp.float32).at[:50].set(beta)

    x_spec = pl.BlockSpec((tb, 12, 12, 64), lambda i: (i, 0, 0, 0))
    w_spec = pl.BlockSpec((5, 5, 64, 64), lambda i: (0, 0, 0, 0))
    conv_spec = pl.BlockSpec((tb, 64, 64), lambda i: (i, 0, 0))
    st_spec = pl.BlockSpec((1, 1, 64), lambda i: (i, 0, 0))
    vec_spec = pl.BlockSpec((1, 64), lambda i: (0, 0))

    # Pass 1: conv (single read of x2) + conv-map handoff + BN partials.
    conv, s, ss = pl.pallas_call(
        _s2_conv_kernel,
        grid=(g,),
        in_specs=[x_spec, w_spec],
        out_specs=[conv_spec, st_spec, st_spec],
        out_shape=[jax.ShapeDtypeStruct((n, 64, 64), jnp.float32),
                   jax.ShapeDtypeStruct((g, 1, 64), jnp.float32),
                   jax.ShapeDtypeStruct((g, 1, 64), jnp.float32)],
        scratch_shapes=[pltpu.VMEM((tb * 64, 64), jnp.float32)],
        compiler_params=_cparams(),
    )(x2, w2m.astype(jnp.bfloat16))

    scale, shift = _bn_affine(s.sum(axis=(0, 1)), ss.sum(axis=(0, 1)),
                              float(n * 8 * 8), gp, bp)

    # Pass 2: BN affine + pool + ReLU on the precomputed conv map only.
    out = pl.pallas_call(
        _s2_apply_kernel,
        grid=(g,),
        in_specs=[conv_spec, vec_spec, vec_spec],
        out_specs=pl.BlockSpec((tb, 4, 4, 64), lambda i: (i, 0, 0, 0)),
        out_shape=jax.ShapeDtypeStruct((n, 4, 4, 64), jnp.float32),
        compiler_params=_cparams(),
    )(conv, scale, shift)
    return out                                                    # (N,4,4,64) NHWC f32


def feature_extractor_forward(x, params):
    x = x.astype(jnp.float32)
    if x.ndim == 3:
        x = x[:, None]
    n, c, h, w = x.shape
    assert (h, w) == (28, 28)
    if c == 1:
        # x.expand(N,3,28,28) yields 3 identical channels -> fold the expand into
        # the conv weights (exact); the 3x input copy never exists in HBM.
        w1 = params["w1"].sum(axis=1, keepdims=True)               # (64,1,5,5)
    else:
        w1 = params["w1"]                                          # c == 3: expand is a no-op
    # NOTE: conv biases b1/b2 are intentionally unused: with training-mode BN the
    # per-channel bias is exactly cancelled by the batch-mean subtraction.
    x_nhwc = jnp.transpose(x, (0, 2, 3, 1))                        # tiny layout fixup
    tb = _pick_tb(n)
    h1 = _stage1(x_nhwc, w1, params["g1"], params["be1"], tb)      # (N,12,12,64) bf16
    # Dropout2d(p=0) is the identity in both train and eval -> nothing to compute.
    h2 = _stage2(h1, params["w2"], params["g2"], params["be2"], tb)  # (N,4,4,64)
    h2 = h2[..., :50]
    # Match PyTorch's NCHW x.view(-1, 50*4*4): only this N*800 tensor is permuted.
    return jnp.transpose(h2, (0, 3, 1, 2)).reshape(n, 50 * 4 * 4)


# ----------------------------- pure-JAX reference --------------------------- #
def _ref_stage(x, w, b, g, be):
    y = lax.conv_general_dilated(x, w, (1, 1), "VALID",
                                 dimension_numbers=("NCHW", "OIHW", "NCHW"))
    y = y + b[None, :, None, None]
    mean = y.mean(axis=(0, 2, 3), keepdims=True)
    var = ((y - mean) ** 2).mean(axis=(0, 2, 3), keepdims=True)
    y = (y - mean) / jnp.sqrt(var + _EPS) * g[None, :, None, None] + be[None, :, None, None]
    n, c, hh, ww = y.shape
    y = y.reshape(n, c, hh // 2, 2, ww // 2, 2).max(axis=(3, 5))
    return jnp.maximum(y, 0.0)


def feature_extractor_ref(x, params):
    n = x.shape[0]
    x = jnp.broadcast_to(x, (n, 3, 28, 28)).astype(jnp.float32)
    h = _ref_stage(x, params["w1"], params["b1"], params["g1"], params["be1"])
    h = _ref_stage(h, params["w2"], params["b2"], params["g2"], params["be2"])
    return h.reshape(n, 50 * 4 * 4)


# ------------------------------------ main ----------------------------------- #
if __name__ == "__main__":
    key = jax.random.PRNGKey(0)
    ks = jax.random.split(key, 9)
    params = {
        "w1": 0.1 * jax.random.normal(ks[0], (64, 3, 5, 5), jnp.float32),
        "b1": 0.1 * jax.random.normal(ks[1], (64,), jnp.float32),
        "g1": 1.0 + 0.1 * jax.random.normal(ks[2], (64,), jnp.float32),
        "be1": 0.1 * jax.random.normal(ks[3], (64,), jnp.float32),
        "w2": 0.05 * jax.random.normal(ks[4], (50, 64, 5, 5), jnp.float32),
        "b2": 0.1 * jax.random.normal(ks[5], (50,), jnp.float32),
        "g2": 1.0 + 0.1 * jax.random.normal(ks[6], (50,), jnp.float32),
        "be2": 0.1 * jax.random.normal(ks[7], (50,), jnp.float32),
    }
    # MNIST-style single-channel input; forward folds the 3-channel expand away.
    x = jax.random.normal(ks[8], (2, 1, 28, 28), jnp.float32)

    out = jax.jit(feature_extractor_forward)(x, params)
    out = jax.block_until_ready(out)
    assert out.shape == (2, 50 * 4 * 4), out.shape

    ref = feature_extractor_ref(x, params)
    np.testing.assert_allclose(np.asarray(out), np.asarray(ref), rtol=5e-2, atol=5e-2)

    print("KERNEL_OK")
</pallas_src>

<mosaic_0001>
module attributes {stable_mosaic.version = 11 : i64} {
  func.func @_s1_stats_kernel(%arg0: i32, %arg1: memref<1x4x144x25xbf16, #tpu.memory_space<vmem>>, %arg2: memref<25x64xbf16, #tpu.memory_space<vmem>>, %arg3: memref<1x1x64xf32, #tpu.memory_space<vmem>>, %arg4: memref<1x1x64xf32, #tpu.memory_space<vmem>>) attributes {dimension_semantics = [#tpu.dimension_semantics<parallel>], iteration_bounds = array<i64: 2>, scalar_prefetch = 0 : i64, scratch_operands = 0 : i64, tpu.core_type = #tpu.core_type<tc>, window_params = [{transform_indices = @transform_0, window_bounds = array<i64: 1, 4, 144, 25>}, {pipeline_mode = #tpu.pipeline_mode<synchronous>, transform_indices = @transform_1, window_bounds = array<i64: 25, 64>}, {transform_indices = @transform_2, window_bounds = array<i64: 1, 1, 64>}, {transform_indices = @transform_3, window_bounds = array<i64: 1, 1, 64>}]} {
    %c0 = arith.constant 0 : index
    %c0_0 = arith.constant 0 : index
    %c0_1 = arith.constant 0 : index
    %c0_2 = arith.constant 0 : index
    %0 = vector.load %arg1[%c0, %c0_0, %c0_1, %c0_2] : memref<1x4x144x25xbf16, #tpu.memory_space<vmem>>, vector<1x4x144x25xbf16>
    %1 = vector.shape_cast %0 : vector<1x4x144x25xbf16> to vector<576x25xbf16>
    %c0_3 = arith.constant 0 : index
    %c0_4 = arith.constant 0 : index
    %2 = vector.load %arg2[%c0_3, %c0_4] : memref<25x64xbf16, #tpu.memory_space<vmem>>, vector<25x64xbf16>
    %cst = arith.constant dense<0.000000e+00> : vector<576x64xf32>
    %3 = tpu.matmul %1, %2, %cst {dimension_numbers = #tpu.dot_dimension_numbers<[1], [0], [0], [1], [0, 0, 1, 1], [], []>} : vector<576x25xbf16>, vector<25x64xbf16>, vector<576x64xf32> -> vector<576x64xf32>
    %cst_5 = arith.constant dense<0.000000e+00> : vector<64xf32>
    %4 = vector.multi_reduction <add>, %3, %cst_5 [0] : vector<576x64xf32> to vector<64xf32>
    %5 = vector.shape_cast %4 : vector<64xf32> to vector<1x64xf32>
    %6 = vector.shape_cast %5 : vector<1x64xf32> to vector<1x1x64xf32>
    %c0_6 = arith.constant 0 : index
    %c0_7 = arith.constant 0 : index
    %c0_8 = arith.constant 0 : index
    %7 = vector.load %arg3[%c0_6, %c0_7, %c0_8] : memref<1x1x64xf32, #tpu.memory_space<vmem>>, vector<1x1x64xf32>
    tpu.vector_store %arg3[%c0_6, %c0_7, %c0_8], %6 {strides = array<i32>} : memref<1x1x64xf32, #tpu.memory_space<vmem>>, vector<1x1x64xf32>,
    %8 = arith.mulf %3, %3 : vector<576x64xf32>
    %cst_9 = arith.constant dense<0.000000e+00> : vector<64xf32>
    %9 = vector.multi_reduction <add>, %8, %cst_9 [0] : vector<576x64xf32> to vector<64xf32>
    %10 = vector.shape_cast %9 : vector<64xf32> to vector<1x64xf32>
    %11 = vector.shape_cast %10 : vector<1x64xf32> to vector<1x1x64xf32>
    %c0_10 = arith.constant 0 : index
    %c0_11 = arith.constant 0 : index
    %c0_12 = arith.constant 0 : index
    %12 = vector.load %arg4[%c0_10, %c0_11, %c0_12] : memref<1x1x64xf32, #tpu.memory_space<vmem>>, vector<1x1x64xf32>
    tpu.vector_store %arg4[%c0_10, %c0_11, %c0_12], %11 {strides = array<i32>} : memref<1x1x64xf32, #tpu.memory_space<vmem>>, vector<1x1x64xf32>,
    return
  }
  func.func @transform_0(%arg0: i32) -> (i32, i32, i32, i32) {
    %c0_i32 = arith.constant 0 : i32
    %c0_i32_0 = arith.constant 0 : i32
    %c0_i32_1 = arith.constant 0 : i32
    %c0_i32_2 = arith.constant 0 : i32
    return %arg0, %c0_i32, %c0_i32_0, %c0_i32_1 : i32, i32, i32, i32
  }
  func.func @transform_1(%arg0: i32) -> (i32, i32) {
    %c0_i32 = arith.constant 0 : i32
    %c0_i32_0 = arith.constant 0 : i32
    %c0_i32_1 = arith.constant 0 : i32
    return %c0_i32, %c0_i32_0 : i32, i32
  }
  func.func @transform_2(%arg0: i32) -> (i32, i32, i32) {
    %c0_i32 = arith.constant 0 : i32
    %c0_i32_0 = arith.constant 0 : i32
    %c0_i32_1 = arith.constant 0 : i32
    return %arg0, %c0_i32, %c0_i32_0 : i32, i32, i32
  }
  func.func @transform_3(%arg0: i32) -> (i32, i32, i32) {
    %c0_i32 = arith.constant 0 : i32
    %c0_i32_0 = arith.constant 0 : i32
    %c0_i32_1 = arith.constant 0 : i32
    return %arg0, %c0_i32, %c0_i32_0 : i32, i32, i32
  }
}

module attributes {stable_mosaic.version = 11 : i64} {
  func.func @_s1_apply_kernel(%arg0: i32, %arg1: memref<1x4x144x25xbf16, #tpu.memory_space<vmem>>, %arg2: memref<25x64xbf16, #tpu.memory_space<vmem>>, %arg3: memref<1x64xf32, #tpu.memory_space<vmem>>, %arg4: memref<1x144x64xbf16, #tpu.memory_space<vmem>>) attributes {dimension_semantics = [#tpu.dimension_semantics<parallel>], iteration_bounds = array<i64: 2>, scalar_prefetch = 0 : i64, scratch_operands = 0 : i64, tpu.core_type = #tpu.core_type<tc>, window_params = [{transform_indices = @transform_0, window_bounds = array<i64: 1, 4, 144, 25>}, {pipeline_mode = #tpu.pipeline_mode<synchronous>, transform_indices = @transform_1, window_bounds = array<i64: 25, 64>}, {pipeline_mode = #tpu.pipeline_mode<synchronous>, transform_indices = @transform_2, window_bounds = array<i64: 1, 64>}, {transform_indices = @transform_3, window_bounds = array<i64: 1, 144, 64>}]} {
    %c0 = arith.constant 0 : index
    %c0_0 = arith.constant 0 : index
    %c0_1 = arith.constant 0 : index
    %c0_2 = arith.constant 0 : index
    %0 = vector.load %arg1[%c0, %c0_0, %c0_1, %c0_2] : memref<1x4x144x25xbf16, #tpu.memory_space<vmem>>, vector<1x4x144x25xbf16>
    %1 = vector.shape_cast %0 : vector<1x4x144x25xbf16> to vector<576x25xbf16>
    %c0_3 = arith.constant 0 : index
    %c0_4 = arith.constant 0 : index
    %2 = vector.load %arg2[%c0_3, %c0_4] : memref<25x64xbf16, #tpu.memory_space<vmem>>, vector<25x64xbf16>
    %cst = arith.constant dense<0.000000e+00> : vector<576x64xf32>
    %3 = tpu.matmul %1, %2, %cst {dimension_numbers = #tpu.dot_dimension_numbers<[1], [0], [0], [1], [0, 0, 1, 1], [], []>} : vector<576x25xbf16>, vector<25x64xbf16>, vector<576x64xf32> -> vector<576x64xf32>
    %c0_5 = arith.constant 0 : index
    %c0_6 = arith.constant 0 : index
    %4 = vector.load %arg3[%c0_5, %c0_6] : memref<1x64xf32, #tpu.memory_space<vmem>>, vector<1x64xf32>
    %5 = vector.broadcast %4 : vector<1x64xf32> to vector<576x64xf32>
    %6 = arith.addf %3, %5 : vector<576x64xf32>
    %7 = vector.shape_cast %6 : vector<576x64xf32> to vector<1x4x144x64xf32>
    %cst_7 = arith.constant dense<0xFF800000> : vector<1x144x64xf32>
    %8 = vector.multi_reduction <maximumf>, %7, %cst_7 [1] : vector<1x4x144x64xf32> to vector<1x144x64xf32>
    %cst_8 = arith.constant 0.000000e+00 : f32
    %9 = vector.broadcast %cst_8 : f32 to vector<1x144x64xf32>
    %10 = arith.maximumf %8, %9 : vector<1x144x64xf32>
    %11 = arith.truncf %10 : vector<1x144x64xf32> to vector<1x144x64xbf16>
    %c0_9 = arith.constant 0 : index
    %c0_10 = arith.constant 0 : index
    %c0_11 = arith.constant 0 : index
    %12 = vector.load %arg4[%c0_9, %c0_10, %c0_11] : memref<1x144x64xbf16, #tpu.memory_space<vmem>>, vector<1x144x64xbf16>
    tpu.vector_store %arg4[%c0_9, %c0_10, %c0_11], %11 {strides = array<i32>} : memref<1x144x64xbf16, #tpu.memory_space<vmem>>, vector<1x144x64xbf16>,
    return
  }
  func.func @transform_0(%arg0: i32) -> (i32, i32, i32, i32) {
    %c0_i32 = arith.constant 0 : i32
    %c0_i32_0 = arith.constant 0 : i32
    %c0_i32_1 = arith.constant 0 : i32
    %c0_i32_2 = arith.constant 0 : i32
    return %arg0, %c0_i32, %c0_i32_0, %c0_i32_1 : i32, i32, i32, i32
  }
  func.func @transform_1(%arg0: i32) -> (i32, i32) {
    %c0_i32 = arith.constant 0 : i32
    %c0_i32_0 = arith.constant 0 : i32
    %c0_i32_1 = arith.constant 0 : i32
    return %c0_i32, %c0_i32_0 : i32, i32
  }
  func.func @transform_2(%arg0: i32) -> (i32, i32) {
    %c0_i32 = arith.constant 0 : i32
    %c0_i32_0 = arith.constant 0 : i32
    %c0_i32_1 = arith.constant 0 : i32
    return %c0_i32, %c0_i32_0 : i32, i32
  }
  func.func @transform_3(%arg0: i32) -> (i32, i32, i32) {
    %c0_i32 = arith.constant 0 : i32
    %c0_i32_0 = arith.constant 0 : i32
    %c0_i32_1 = arith.constant 0 : i32
    return %arg0, %c0_i32, %c0_i32_0 : i32, i32, i32
  }
}

module attributes {stable_mosaic.version = 11 : i64} {
  func.func @_s2_apply_kernel(%arg0: i32, %arg1: memref<1x64x64xf32, #tpu.memory_space<vmem>>, %arg2: memref<1x64xf32, #tpu.memory_space<vmem>>, %arg3: memref<1x64xf32, #tpu.memory_space<vmem>>, %arg4: memref<1x4x4x64xf32, #tpu.memory_space<vmem>>) attributes {dimension_semantics = [#tpu.dimension_semantics<parallel>], iteration_bounds = array<i64: 2>, scalar_prefetch = 0 : i64, scratch_operands = 0 : i64, tpu.core_type = #tpu.core_type<tc>, window_params = [{transform_indices = @transform_0, window_bounds = array<i64: 1, 64, 64>}, {pipeline_mode = #tpu.pipeline_mode<synchronous>, transform_indices = @transform_1, window_bounds = array<i64: 1, 64>}, {pipeline_mode = #tpu.pipeline_mode<synchronous>, transform_indices = @transform_2, window_bounds = array<i64: 1, 64>}, {transform_indices = @transform_3, window_bounds = array<i64: 1, 4, 4, 64>}]} {
    %c0 = arith.constant 0 : index
    %c0_0 = arith.constant 0 : index
    %c0_1 = arith.constant 0 : index
    %0 = vector.load %arg1[%c0, %c0_0, %c0_1] : memref<1x64x64xf32, #tpu.memory_space<vmem>>, vector<1x64x64xf32>
    %1 = vector.shape_cast %0 : vector<1x64x64xf32> to vector<64x64xf32>
    %c0_2 = arith.constant 0 : index
    %c0_3 = arith.constant 0 : index
    %2 = vector.load %arg2[%c0_2, %c0_3] : memref<1x64xf32, #tpu.memory_space<vmem>>, vector<1x64xf32>
    %3 = vector.broadcast %2 : vector<1x64xf32> to vector<64x64xf32>
    %4 = arith.mulf %1, %3 : vector<64x64xf32>
    %c0_4 = arith.constant 0 : index
    %c0_5 = arith.constant 0 : index
    %5 = vector.load %arg3[%c0_4, %c0_5] : memref<1x64xf32, #tpu.memory_space<vmem>>, vector<1x64xf32>
    %6 = vector.broadcast %5 : vector<1x64xf32> to vector<64x64xf32>
    %7 = arith.addf %4, %6 : vector<64x64xf32>
    %8 = vector.shape_cast %7 : vector<64x64xf32> to vector<1x8x8x64xf32>
    %9 = vector.extract_strided_slice %8 {offsets = [0, 0, 0, 0], sizes = [1, 1, 8, 64], strides = [1, 1, 1, 1]} : vector<1x8x8x64xf32> to vector<1x1x8x64xf32>
    %10 = vector.extract_strided_slice %8 {offsets = [0, 1, 0, 0], sizes = [1, 1, 8, 64], strides = [1, 1, 1, 1]} : vector<1x8x8x64xf32> to vector<1x1x8x64xf32>
    %11 = arith.maximumf %9, %10 : vector<1x1x8x64xf32>
    %12 = vector.extract_strided_slice %11 {offsets = [0, 0, 0, 0], sizes = [1, 1, 1, 64], strides = [1, 1, 1, 1]} : vector<1x1x8x64xf32> to vector<1x1x1x64xf32>
    %13 = vector.extract_strided_slice %11 {offsets = [0, 0, 1, 0], sizes = [1, 1, 1, 64], strides = [1, 1, 1, 1]} : vector<1x1x8x64xf32> to vector<1x1x1x64xf32>
    %14 = arith.maximumf %12, %13 : vector<1x1x1x64xf32>
    %15 = vector.extract_strided_slice %11 {offsets = [0, 0, 2, 0], sizes = [1, 1, 1, 64], strides = [1, 1, 1, 1]} : vector<1x1x8x64xf32> to vector<1x1x1x64xf32>
    %16 = vector.extract_strided_slice %11 {offsets = [0, 0, 3, 0], sizes = [1, 1, 1, 64], strides = [1, 1, 1, 1]} : vector<1x1x8x64xf32> to vector<1x1x1x64xf32>
    %17 = arith.maximumf %15, %16 : vector<1x1x1x64xf32>
    %18 = vector.extract_strided_slice %11 {offsets = [0, 0, 4, 0], sizes = [1, 1, 1, 64], strides = [1, 1, 1, 1]} : vector<1x1x8x64xf32> to vector<1x1x1x64xf32>
    %19 = vector.extract_strided_slice %11 {offsets = [0, 0, 5, 0], sizes = [1, 1, 1, 64], strides = [1, 1, 1, 1]} : vector<1x1x8x64xf32> to vector<1x1x1x64xf32>
    %20 = arith.maximumf %18, %19 : vector<1x1x1x64xf32>
    %21 = vector.extract_strided_slice %11 {offsets = [0, 0, 6, 0], sizes = [1, 1, 1, 64], strides = [1, 1, 1, 1]} : vector<1x1x8x64xf32> to vector<1x1x1x64xf32>
    %22 = vector.extract_strided_slice %11 {offsets = [0, 0, 7, 0], sizes = [1, 1, 1, 64], strides = [1, 1, 1, 1]} : vector<1x1x8x64xf32> to vector<1x1x1x64xf32>
    %23 = arith.maximumf %21, %22 : vector<1x1x1x64xf32>
    %24 = tpu.concatenate %14, %17, %20, %23 in 2 : vector<1x1x1x64xf32>, vector<1x1x1x64xf32>, vector<1x1x1x64xf32>, vector<1x1x1x64xf32> -> vector<1x1x4x64xf32>
    %25 = vector.extract_strided_slice %8 {offsets = [0, 2, 0, 0], sizes = [1, 1, 8, 64], strides = [1, 1, 1, 1]} : vector<1x8x8x64xf32> to vector<1x1x8x64xf32>
    %26 = vector.extract_strided_slice %8 {offsets = [0, 3, 0, 0], sizes = [1, 1, 8, 64], strides = [1, 1, 1, 1]} : vector<1x8x8x64xf32> to vector<1x1x8x64xf32>
    %27 = arith.maximumf %25, %26 : vector<1x1x8x64xf32>
    %28 = vector.extract_strided_slice %27 {offsets = [0, 0, 0, 0], sizes = [1, 1, 1, 64], strides = [1, 1, 1, 1]} : vector<1x1x8x64xf32> to vector<1x1x1x64xf32>
    %29 = vector.extract_strided_slice %27 {offsets = [0, 0, 1, 0], sizes = [1, 1, 1, 64], strides = [1, 1, 1, 1]} : vector<1x1x8x64xf32> to vector<1x1x1x64xf32>
    %30 = arith.maximumf %28, %29 : vector<1x1x1x64xf32>
    %31 = vector.extract_strided_slice %27 {offsets = [0, 0, 2, 0], sizes = [1, 1, 1, 64], strides = [1, 1, 1, 1]} : vector<1x1x8x64xf32> to vector<1x1x1x64xf32>
    %32 = vector.extract_strided_slice %27 {offsets = [0, 0, 3, 0], sizes = [1, 1, 1, 64], strides = [1, 1, 1, 1]} : vector<1x1x8x64xf32> to vector<1x1x1x64xf32>
    %33 = arith.maximumf %31, %32 : vector<1x1x1x64xf32>
    %34 = vector.extract_strided_slice %27 {offsets = [0, 0, 4, 0], sizes = [1, 1, 1, 64], strides = [1, 1, 1, 1]} : vector<1x1x8x64xf32> to vector<1x1x1x64xf32>
    %35 = vector.extract_strided_slice %27 {offsets = [0, 0, 5, 0], sizes = [1, 1, 1, 64], strides = [1, 1, 1, 1]} : vector<1x1x8x64xf32> to vector<1x1x1x64xf32>
    %36 = arith.maximumf %34, %35 : vector<1x1x1x64xf32>
    %37 = vector.extract_strided_slice %27 {offsets = [0, 0, 6, 0], sizes = [1, 1, 1, 64], strides = [1, 1, 1, 1]} : vector<1x1x8x64xf32> to vector<1x1x1x64xf32>
    %38 = vector.extract_strided_slice %27 {offsets = [0, 0, 7, 0], sizes = [1, 1, 1, 64], strides = [1, 1, 1, 1]} : vector<1x1x8x64xf32> to vector<1x1x1x64xf32>
    %39 = arith.maximumf %37, %38 : vector<1x1x1x64xf32>
    %40 = tpu.concatenate %30, %33, %36, %39 in 2 : vector<1x1x1x64xf32>, vector<1x1x1x64xf32>, vector<1x1x1x64xf32>, vector<1x1x1x64xf32> -> vector<1x1x4x64xf32>
    %41 = vector.extract_strided_slice %8 {offsets = [0, 4, 0, 0], sizes = [1, 1, 8, 64], strides = [1, 1, 1, 1]} : vector<1x8x8x64xf32> to vector<1x1x8x64xf32>
    %42 = vector.extract_strided_slice %8 {offsets = [0, 5, 0, 0], sizes = [1, 1, 8, 64], strides = [1, 1, 1, 1]} : vector<1x8x8x64xf32> to vector<1x1x8x64xf32>
    %43 = arith.maximumf %41, %42 : vector<1x1x8x64xf32>
    %44 = vector.extract_strided_slice %43 {offsets = [0, 0, 0, 0], sizes = [1, 1, 1, 64], strides = [1, 1, 1, 1]} : vector<1x1x8x64xf32> to vector<1x1x1x64xf32>
    %45 = vector.extract_strided_slice %43 {offsets = [0, 0, 1, 0], sizes = [1, 1, 1, 64], strides = [1, 1, 1, 1]} : vector<1x1x8x64xf32> to vector<1x1x1x64xf32>
    %46 = arith.maximumf %44, %45 : vector<1x1x1x64xf32>
    %47 = vector.extract_strided_slice %43 {offsets = [0, 0, 2, 0], sizes = [1, 1, 1, 64], strides = [1, 1, 1, 1]} : vector<1x1x8x64xf32> to vector<1x1x1x64xf32>
    %48 = vector.extract_strided_slice %43 {offsets = [0, 0, 3, 0], sizes = [1, 1, 1, 64], strides = [1, 1, 1, 1]} : vector<1x1x8x64xf32> to vector<1x1x1x64xf32>
    %49 = arith.maximumf %47, %48 : vector<1x1x1x64xf32>
    %50 = vector.extract_strided_slice %43 {offsets = [0, 0, 4, 0], sizes = [1, 1, 1, 64], strides = [1, 1, 1, 1]} : vector<1x1x8x64xf32> to vector<1x1x1x64xf32>
    %51 = vector.extract_strided_slice %43 {offsets = [0, 0, 5, 0], sizes = [1, 1, 1, 64], strides = [1, 1, 1, 1]} : vector<1x1x8x64xf32> to vector<1x1x1x64xf32>
    %52 = arith.maximumf %50, %51 : vector<1x1x1x64xf32>
    %53 = vector.extract_strided_slice %43 {offsets = [0, 0, 6, 0], sizes = [1, 1, 1, 64], strides = [1, 1, 1, 1]} : vector<1x1x8x64xf32> to vector<1x1x1x64xf32>
    %54 = vector.extract_strided_slice %43 {offsets = [0, 0, 7, 0], sizes = [1, 1, 1, 64], strides = [1, 1, 1, 1]} : vector<1x1x8x64xf32> to vector<1x1x1x64xf32>
    %55 = arith.maximumf %53, %54 : vector<1x1x1x64xf32>
    %56 = tpu.concatenate %46, %49, %52, %55 in 2 : vector<1x1x1x64xf32>, vector<1x1x1x64xf32>, vector<1x1x1x64xf32>, vector<1x1x1x64xf32> -> vector<1x1x4x64xf32>
    %57 = vector.extract_strided_slice %8 {offsets = [0, 6, 0, 0], sizes = [1, 1, 8, 64], strides = [1, 1, 1, 1]} : vector<1x8x8x64xf32> to vector<1x1x8x64xf32>
    %58 = vector.extract_strided_slice %8 {offsets = [0, 7, 0, 0], sizes = [1, 1, 8, 64], strides = [1, 1, 1, 1]} : vector<1x8x8x64xf32> to vector<1x1x8x64xf32>
    %59 = arith.maximumf %57, %58 : vector<1x1x8x64xf32>
    %60 = vector.extract_strided_slice %59 {offsets = [0, 0, 0, 0], sizes = [1, 1, 1, 64], strides = [1, 1, 1, 1]} : vector<1x1x8x64xf32> to vector<1x1x1x64xf32>
    %61 = vector.extract_strided_slice %59 {offsets = [0, 0, 1, 0], sizes = [1, 1, 1, 64], strides = [1, 1, 1, 1]} : vector<1x1x8x64xf32> to vector<1x1x1x64xf32>
    %62 = arith.maximumf %60, %61 : vector<1x1x1x64xf32>
    %63 = vector.extract_strided_slice %59 {offsets = [0, 0, 2, 0], sizes = [1, 1, 1, 64], strides = [1, 1, 1, 1]} : vector<1x1x8x64xf32> to vector<1x1x1x64xf32>
    %64 = vector.extract_strided_slice %59 {offsets = [0, 0, 3, 0], sizes = [1, 1, 1, 64], strides = [1, 1, 1, 1]} : vector<1x1x8x64xf32> to vector<1x1x1x64xf32>
    %65 = arith.maximumf %63, %64 : vector<1x1x1x64xf32>
    %66 = vector.extract_strided_slice %59 {offsets = [0, 0, 4, 0], sizes = [1, 1, 1, 64], strides = [1, 1, 1, 1]} : vector<1x1x8x64xf32> to vector<1x1x1x64xf32>
    %67 = vector.extract_strided_slice %59 {offsets = [0, 0, 5, 0], sizes = [1, 1, 1, 64], strides = [1, 1, 1, 1]} : vector<1x1x8x64xf32> to vector<1x1x1x64xf32>
    %68 = arith.maximumf %66, %67 : vector<1x1x1x64xf32>
    %69 = vector.extract_strided_slice %59 {offsets = [0, 0, 6, 0], sizes = [1, 1, 1, 64], strides = [1, 1, 1, 1]} : vector<1x1x8x64xf32> to vector<1x1x1x64xf32>
    %70 = vector.extract_strided_slice %59 {offsets = [0, 0, 7, 0], sizes = [1, 1, 1, 64], strides = [1, 1, 1, 1]} : vector<1x1x8x64xf32> to vector<1x1x1x64xf32>
    %71 = arith.maximumf %69, %70 : vector<1x1x1x64xf32>
    %72 = tpu.concatenate %62, %65, %68, %71 in 2 : vector<1x1x1x64xf32>, vector<1x1x1x64xf32>, vector<1x1x1x64xf32>, vector<1x1x1x64xf32> -> vector<1x1x4x64xf32>
    %73 = tpu.concatenate %24, %40, %56, %72 in 1 : vector<1x1x4x64xf32>, vector<1x1x4x64xf32>, vector<1x1x4x64xf32>, vector<1x1x4x64xf32> -> vector<1x4x4x64xf32>
    %cst = arith.constant 0.000000e+00 : f32
    %74 = vector.broadcast %cst : f32 to vector<1x4x4x64xf32>
    %75 = arith.maximumf %73, %74 : vector<1x4x4x64xf32>
    %c0_6 = arith.constant 0 : index
    %c0_7 = arith.constant 0 : index
    %c0_8 = arith.constant 0 : index
    %c0_9 = arith.constant 0 : index
    %76 = vector.load %arg4[%c0_6, %c0_7, %c0_8, %c0_9] : memref<1x4x4x64xf32, #tpu.memory_space<vmem>>, vector<1x4x4x64xf32>
    tpu.vector_store %arg4[%c0_6, %c0_7, %c0_8, %c0_9], %75 {strides = array<i32>} : memref<1x4x4x64xf32, #tpu.memory_space<vmem>>, vector<1x4x4x64xf32>,
    return
  }
  func.func @transform_0(%arg0: i32) -> (i32, i32, i32) {
    %c0_i32 = arith.constant 0 : i32
    %c0_i32_0 = arith.constant 0 : i32
    %c0_i32_1 = arith.constant 0 : i32
    return %arg0, %c0_i32, %c0_i32_0 : i32, i32, i32
  }
  func.func @transform_1(%arg0: i32) -> (i32, i32) {
    %c0_i32 = arith.constant 0 : i32
    %c0_i32_0 = arith.constant 0 : i32
    %c0_i32_1 = arith.constant 0 : i32
    return %c0_i32, %c0_i32_0 : i32, i32
  }
  func.func @transform_2(%arg0: i32) -> (i32, i32) {
    %c0_i32 = arith.constant 0 : i32
    %c0_i32_0 = arith.constant 0 : i32
    %c0_i32_1 = arith.constant 0 : i32
    return %c0_i32, %c0_i32_0 : i32, i32
  }
  func.func @transform_3(%arg0: i32) -> (i32, i32, i32, i32) {
    %c0_i32 = arith.constant 0 : i32
    %c0_i32_0 = arith.constant 0 : i32
    %c0_i32_1 = arith.constant 0 : i32
    %c0_i32_2 = arith.constant 0 : i32
    return %arg0, %c0_i32, %c0_i32_0, %c0_i32_1 : i32, i32, i32, i32
  }
}

module attributes {stable_mosaic.version = 11 : i64} {
  func.func @_s2_conv_kernel(%arg0: i32, %arg1: memref<1x12x12x64xbf16, #tpu.memory_space<vmem>>, %arg2: memref<5x5x64x64xbf16, #tpu.memory_space<vmem>>, %arg3: memref<1x64x64xf32, #tpu.memory_space<vmem>>, %arg4: memref<1x1x64xf32, #tpu.memory_space<vmem>>, %arg5: memref<1x1x64xf32, #tpu.memory_space<vmem>>, %arg6: memref<64x64xf32, #tpu.memory_space<vmem>>) attributes {dimension_semantics = [#tpu.dimension_semantics<parallel>], iteration_bounds = array<i64: 2>, scalar_prefetch = 0 : i64, scratch_operands = 1 : i64, tpu.core_type = #tpu.core_type<tc>, window_params = [{transform_indices = @transform_0, window_bounds = array<i64: 1, 12, 12, 64>}, {pipeline_mode = #tpu.pipeline_mode<synchronous>, transform_indices = @transform_1, window_bounds = array<i64: 5, 5, 64, 64>}, {transform_indices = @transform_2, window_bounds = array<i64: 1, 64, 64>}, {transform_indices = @transform_3, window_bounds = array<i64: 1, 1, 64>}, {transform_indices = @transform_4, window_bounds = array<i64: 1, 1, 64>}]} {
    %c0 = arith.constant 0 : index
    %c0_0 = arith.constant 0 : index
    %c0_1 = arith.constant 0 : index
    %c0_2 = arith.constant 0 : index
    %0 = vector.load %arg1[%c0, %c0_0, %c0_1, %c0_2] : memref<1x12x12x64xbf16, #tpu.memory_space<vmem>>, vector<1x8x8x64xbf16>
    %1 = vector.shape_cast %0 : vector<1x8x8x64xbf16> to vector<64x64xbf16>
    %c0_3 = arith.constant 0 : index
    %c0_4 = arith.constant 0 : index
    %c0_5 = arith.constant 0 : index
    %c0_6 = arith.constant 0 : index
    %2 = vector.load %arg2[%c0_3, %c0_4, %c0_5, %c0_6] : memref<5x5x64x64xbf16, #tpu.memory_space<vmem>>, vector<1x1x64x64xbf16>
    %3 = vector.shape_cast %2 : vector<1x1x64x64xbf16> to vector<64x64xbf16>
    %cst = arith.constant dense<0.000000e+00> : vector<64x64xf32>
    %4 = tpu.matmul %1, %3, %cst {dimension_numbers = #tpu.dot_dimension_numbers<[1], [0], [0], [1], [0, 0, 1, 1], [], []>} : vector<64x64xbf16>, vector<64x64xbf16>, vector<64x64xf32> -> vector<64x64xf32>
    %c0_7 = arith.constant 0 : index
    %c0_8 = arith.constant 0 : index
    %5 = vector.load %arg6[%c0_7, %c0_8] : memref<64x64xf32, #tpu.memory_space<vmem>>, vector<64x64xf32>
    tpu.vector_store %arg6[%c0_7, %c0_8], %4 {strides = array<i32>} : memref<64x64xf32, #tpu.memory_space<vmem>>, vector<64x64xf32>,
    %c0_9 = arith.constant 0 : index
    %c0_10 = arith.constant 0 : index
    %c1 = arith.constant 1 : index
    %c0_11 = arith.constant 0 : index
    %6 = vector.load %arg1[%c0_9, %c0_10, %c1, %c0_11] : memref<1x12x12x64xbf16, #tpu.memory_space<vmem>>, vector<1x8x8x64xbf16>
    %7 = vector.shape_cast %6 : vector<1x8x8x64xbf16> to vector<64x64xbf16>
    %c0_12 = arith.constant 0 : index
    %c1_13 = arith.constant 1 : index
    %c0_14 = arith.constant 0 : index
    %c0_15 = arith.constant 0 : index
    %8 = vector.load %arg2[%c0_12, %c1_13, %c0_14, %c0_15] : memref<5x5x64x64xbf16, #tpu.memory_space<vmem>>, vector<1x1x64x64xbf16>
    %9 = vector.shape_cast %8 : vector<1x1x64x64xbf16> to vector<64x64xbf16>
    %cst_16 = arith.constant dense<0.000000e+00> : vector<64x64xf32>
    %10 = tpu.matmul %7, %9, %cst_16 {dimension_numbers = #tpu.dot_dimension_numbers<[1], [0], [0], [1], [0, 0, 1, 1], [], []>} : vector<64x64xbf16>, vector<64x64xbf16>, vector<64x64xf32> -> vector<64x64xf32>
    %c0_17 = arith.constant 0 : index
    %c0_18 = arith.constant 0 : index
    %11 = vector.load %arg6[%c0_17, %c0_18] : memref<64x64xf32, #tpu.memory_space<vmem>>, vector<64x64xf32>
    %12 = arith.addf %11, %10 : vector<64x64xf32>
    %c0_19 = arith.constant 0 : index
    %c0_20 = arith.constant 0 : index
    %13 = vector.load %arg6[%c0_19, %c0_20] : memref<64x64xf32, #tpu.memory_space<vmem>>, vector<64x64xf32>
    tpu.vector_store %arg6[%c0_19, %c0_20], %12 {strides = array<i32>} : memref<64x64xf32, #tpu.memory_space<vmem>>, vector<64x64xf32>,
    %c0_21 = arith.constant 0 : index
    %c0_22 = arith.constant 0 : index
    %c2 = arith.constant 2 : index
    %c0_23 = arith.constant 0 : index
    %14 = vector.load %arg1[%c0_21, %c0_22, %c2, %c0_23] : memref<1x12x12x64xbf16, #tpu.memory_space<vmem>>, vector<1x8x8x64xbf16>
    %15 = vector.shape_cast %14 : vector<1x8x8x64xbf16> to vector<64x64xbf16>
    %c0_24 = arith.constant 0 : index
    %c2_25 = arith.constant 2 : index
    %c0_26 = arith.constant 0 : index
    %c0_27 = arith.constant 0 : index
    %16 = vector.load %arg2[%c0_24, %c2_25, %c0_26, %c0_27] : memref<5x5x64x64xbf16, #tpu.memory_space<vmem>>, vector<1x1x64x64xbf16>
    %17 = vector.shape_cast %16 : vector<1x1x64x64xbf16> to vector<64x64xbf16>
    %cst_28 = arith.constant dense<0.000000e+00> : vector<64x64xf32>
    %18 = tpu.matmul %15, %17, %cst_28 {dimension_numbers = #tpu.dot_dimension_numbers<[1], [0], [0], [1], [0, 0, 1, 1], [], []>} : vector<64x64xbf16>, vector<64x64xbf16>, vector<64x64xf32> -> vector<64x64xf32>
    %c0_29 = arith.constant 0 : index
    %c0_30 = arith.constant 0 : index
    %19 = vector.load %arg6[%c0_29, %c0_30] : memref<64x64xf32, #tpu.memory_space<vmem>>, vector<64x64xf32>
    %20 = arith.addf %19, %18 : vector<64x64xf32>
    %c0_31 = arith.constant 0 : index
    %c0_32 = arith.constant 0 : index
    %21 = vector.load %arg6[%c0_31, %c0_32] : memref<64x64xf32, #tpu.memory_space<vmem>>, vector<64x64xf32>
    tpu.vector_store %arg6[%c0_31, %c0_32], %20 {strides = array<i32>} : memref<64x64xf32, #tpu.memory_space<vmem>>, vector<64x64xf32>,
    %c0_33 = arith.constant 0 : index
    %c0_34 = arith.constant 0 : index
    %c3 = arith.constant 3 : index
    %c0_35 = arith.constant 0 : index
    %22 = vector.load %arg1[%c0_33, %c0_34, %c3, %c0_35] : memref<1x12x12x64xbf16, #tpu.memory_space<vmem>>, vector<1x8x8x64xbf16>
    %23 = vector.shape_cast %22 : vector<1x8x8x64xbf16> to vector<64x64xbf16>
    %c0_36 = arith.constant 0 : index
    %c3_37 = arith.constant 3 : index
    %c0_38 = arith.constant 0 : index
    %c0_39 = arith.constant 0 : index
    %24 = vector.load %arg2[%c0_36, %c3_37, %c0_38, %c0_39] : memref<5x5x64x64xbf16, #tpu.memory_space<vmem>>, vector<1x1x64x64xbf16>
    %25 = vector.shape_cast %24 : vector<1x1x64x64xbf16> to vector<64x64xbf16>
    %cst_40 = arith.constant dense<0.000000e+00> : vector<64x64xf32>
    %26 = tpu.matmul %23, %25, %cst_40 {dimension_numbers = #tpu.dot_dimension_numbers<[1], [0], [0], [1], [0, 0, 1, 1], [], []>} : vector<64x64xbf16>, vector<64x64xbf16>, vector<64x64xf32> -> vector<64x64xf32>
    %c0_41 = arith.constant 0 : index
    %c0_42 = arith.constant 0 : index
    %27 = vector.load %arg6[%c0_41, %c0_42] : memref<64x64xf32, #tpu.memory_space<vmem>>, vector<64x64xf32>
    %28 = arith.addf %27, %26 : vector<64x64xf32>
    %c0_43 = arith.constant 0 : index
    %c0_44 = arith.constant 0 : index
    %29 = vector.load %arg6[%c0_43, %c0_44] : memref<64x64xf32, #tpu.memory_space<vmem>>, vector<64x64xf32>
    tpu.vector_store %arg6[%c0_43, %c0_44], %28 {strides = array<i32>} : memref<64x64xf32, #tpu.memory_space<vmem>>, vector<64x64xf32>,
    %c0_45 = arith.constant 0 : index
    %c0_46 = arith.constant 0 : index
    %c4 = arith.constant 4 : index
    %c0_47 = arith.constant 0 : index
    %30 = vector.load %arg1[%c0_45, %c0_46, %c4, %c0_47] : memref<1x12x12x64xbf16, #tpu.memory_space<vmem>>, vector<1x8x8x64xbf16>
    %31 = vector.shape_cast %30 : vector<1x8x8x64xbf16> to vector<64x64xbf16>
    %c0_48 = arith.constant 0 : index
    %c4_49 = arith.constant 4 : index
    %c0_50 = arith.constant 0 : index
    %c0_51 = arith.constant 0 : index
    %32 = vector.load %arg2[%c0_48, %c4_49, %c0_50, %c0_51] : memref<5x5x64x64xbf16, #tpu.memory_space<vmem>>, vector<1x1x64x64xbf16>
    %33 = vector.shape_cast %32 : vector<1x1x64x64xbf16> to vector<64x64xbf16>
    %cst_52 = arith.constant dense<0.000000e+00> : vector<64x64xf32>
    %34 = tpu.matmul %31, %33, %cst_52 {dimension_numbers = #tpu.dot_dimension_numbers<[1], [0], [0], [1], [0, 0, 1, 1], [], []>} : vector<64x64xbf16>, vector<64x64xbf16>, vector<64x64xf32> -> vector<64x64xf32>
    %c0_53 = arith.constant 0 : index
    %c0_54 = arith.constant 0 : index
    %35 = vector.load %arg6[%c0_53, %c0_54] : memref<64x64xf32, #tpu.memory_space<vmem>>, vector<64x64xf32>
    %36 = arith.addf %35, %34 : vector<64x64xf32>
    %c0_55 = arith.constant 0 : index
    %c0_56 = arith.constant 0 : index
    %37 = vector.load %arg6[%c0_55, %c0_56] : memref<64x64xf32, #tpu.memory_space<vmem>>, vector<64x64xf32>
    tpu.vector_store %arg6[%c0_55, %c0_56], %36 {strides = array<i32>} : memref<64x64xf32, #tpu.memory_space<vmem>>, vector<64x64xf32>,
    %c0_57 = arith.constant 0 : index
    %c1_58 = arith.constant 1 : index
    %c0_59 = arith.constant 0 : index
    %c0_60 = arith.constant 0 : index
    %38 = vector.load %arg1[%c0_57, %c1_58, %c0_59, %c0_60] : memref<1x12x12x64xbf16, #tpu.memory_space<vmem>>, vector<1x8x8x64xbf16>
    %39 = vector.shape_cast %38 : vector<1x8x8x64xbf16> to vector<64x64xbf16>
    %c1_61 = arith.constant 1 : index
    %c0_62 = arith.constant 0 : index
    %c0_63 = arith.constant 0 : index
    %c0_64 = arith.constant 0 : index
    %40 = vector.load %arg2[%c1_61, %c0_62, %c0_63, %c0_64] : memref<5x5x64x64xbf16, #tpu.memory_space<vmem>>, vector<1x1x64x64xbf16>
    %41 = vector.shape_cast %40 : vector<1x1x64x64xbf16> to vector<64x64xbf16>
    %cst_65 = arith.constant dense<0.000000e+00> : vector<64x64xf32>
    %42 = tpu.matmul %39, %41, %cst_65 {dimension_numbers = #tpu.dot_dimension_numbers<[1], [0], [0], [1], [0, 0, 1, 1], [], []>} : vector<64x64xbf16>, vector<64x64xbf16>, vector<64x64xf32> -> vector<64x64xf32>
    %c0_66 = arith.constant 0 : index
    %c0_67 = arith.constant 0 : index
    %43 = vector.load %arg6[%c0_66, %c0_67] : memref<64x64xf32, #tpu.memory_space<vmem>>, vector<64x64xf32>
    %44 = arith.addf %43, %42 : vector<64x64xf32>
    %c0_68 = arith.constant 0 : index
    %c0_69 = arith.constant 0 : index
    %45 = vector.load %arg6[%c0_68, %c0_69] : memref<64x64xf32, #tpu.memory_space<vmem>>, vector<64x64xf32>
    tpu.vector_store %arg6[%c0_68, %c0_69], %44 {strides = array<i32>} : memref<64x64xf32, #tpu.memory_space<vmem>>, vector<64x64xf32>,
    %c0_70 = arith.constant 0 : index
    %c1_71 = arith.constant 1 : index
    %c1_72 = arith.constant 1 : index
    %c0_73 = arith.constant 0 : index
    %46 = vector.load %arg1[%c0_70, %c1_71, %c1_72, %c0_73] : memref<1x12x12x64xbf16, #tpu.memory_space<vmem>>, vector<1x8x8x64xbf16>
    %47 = vector.shape_cast %46 : vector<1x8x8x64xbf16> to vector<64x64xbf16>
    %c1_74 = arith.constant 1 : index
    %c1_75 = arith.constant 1 : index
    %c0_76 = arith.constant 0 : index
    %c0_77 = arith.constant 0 : index
    %48 = vector.load %arg2[%c1_74, %c1_75, %c0_76, %c0_77] : memref<5x5x64x64xbf16, #tpu.memory_space<vmem>>, vector<1x1x64x64xbf16>
    %49 = vector.shape_cast %48 : vector<1x1x64x64xbf16> to vector<64x64xbf16>
    %cst_78 = arith.constant dense<0.000000e+00> : vector<64x64xf32>
    %50 = tpu.matmul %47, %49, %cst_78 {dimension_numbers = #tpu.dot_dimension_numbers<[1], [0], [0], [1], [0, 0, 1, 1], [], []>} : vector<64x64xbf16>, vector<64x64xbf16>, vector<64x64xf32> -> vector<64x64xf32>
    %c0_79 = arith.constant 0 : index
    %c0_80 = arith.constant 0 : index
    %51 = vector.load %arg6[%c0_79, %c0_80] : memref<64x64xf32, #tpu.memory_space<vmem>>, vector<64x64xf32>
    %52 = arith.addf %51, %50 : vector<64x64xf32>
    %c0_81 = arith.constant 0 : index
    %c0_82 = arith.constant 0 : index
    %53 = vector.load %arg6[%c0_81, %c0_82] : memref<64x64xf32, #tpu.memory_space<vmem>>, vector<64x64xf32>
    tpu.vector_store %arg6[%c0_81, %c0_82], %52 {strides = array<i32>} : memref<64x64xf32, #tpu.memory_space<vmem>>, vector<64x64xf32>,
    %c0_83 = arith.constant 0 : index
    %c1_84 = arith.constant 1 : index
    %c2_85 = arith.constant 2 : index
    %c0_86 = arith.constant 0 : index
    %54 = vector.load %arg1[%c0_83, %c1_84, %c2_85, %c0_86] : memref<1x12x12x64xbf16, #tpu.memory_space<vmem>>, vector<1x8x8x64xbf16>
    %55 = vector.shape_cast %54 : vector<1x8x8x64xbf16> to vector<64x64xbf16>
    %c1_87 = arith.constant 1 : index
    %c2_88 = arith.constant 2 : index
    %c0_89 = arith.constant 0 : index
    %c0_90 = arith.constant 0 : index
    %56 = vector.load %arg2[%c1_87, %c2_88, %c0_89, %c0_90] : memref<5x5x64x64xbf16, #tpu.memory_space<vmem>>, vector<1x1x64x64xbf16>
    %57 = vector.shape_cast %56 : vector<1x1x64x64xbf16> to vector<64x64xbf16>
    %cst_91 = arith.constant dense<0.000000e+00> : vector<64x64xf32>
    %58 = tpu.matmul %55, %57, %cst_91 {dimension_numbers = #tpu.dot_dimension_numbers<[1], [0], [0], [1], [0, 0, 1, 1], [], []>} : vector<64x64xbf16>, vector<64x64xbf16>, vector<64x64xf32> -> vector<64x64xf32>
    %c0_92 = arith.constant 0 : index
    %c0_93 = arith.constant 0 : index
    %59 = vector.load %arg6[%c0_92, %c0_93] : memref<64x64xf32, #tpu.memory_space<vmem>>, vector<64x64xf32>
    %60 = arith.addf %59, %58 : vector<64x64xf32>
    %c0_94 = arith.constant 0 : index
    %c0_95 = arith.constant 0 : index
    %61 = vector.load %arg6[%c0_94, %c0_95] : memref<64x64xf32, #tpu.memory_space<vmem>>, vector<64x64xf32>
    tpu.vector_store %arg6[%c0_94, %c0_95], %60 {strides = array<i32>} : memref<64x64xf32, #tpu.memory_space<vmem>>, vector<64x64xf32>,
    %c0_96 = arith.constant 0 : index
    %c1_97 = arith.constant 1 : index
    %c3_98 = arith.constant 3 : index
    %c0_99 = arith.constant 0 : index
    %62 = vector.load %arg1[%c0_96, %c1_97, %c3_98, %c0_99] : memref<1x12x12x64xbf16, #tpu.memory_space<vmem>>, vector<1x8x8x64xbf16>
    %63 = vector.shape_cast %62 : vector<1x8x8x64xbf16> to vector<64x64xbf16>
    %c1_100 = arith.constant 1 : index
    %c3_101 = arith.constant 3 : index
    %c0_102 = arith.constant 0 : index
    %c0_103 = arith.constant 0 : index
    %64 = vector.load %arg2[%c1_100, %c3_101, %c0_102, %c0_103] : memref<5x5x64x64xbf16, #tpu.memory_space<vmem>>, vector<1x1x64x64xbf16>
    %65 = vector.shape_cast %64 : vector<1x1x64x64xbf16> to vector<64x64xbf16>
    %cst_104 = arith.constant dense<0.000000e+00> : vector<64x64xf32>
    %66 = tpu.matmul %63, %65, %cst_104 {dimension_numbers = #tpu.dot_dimension_numbers<[1], [0], [0], [1], [0, 0, 1, 1], [], []>} : vector<64x64xbf16>, vector<64x64xbf16>, vector<64x64xf32> -> vector<64x64xf32>
    %c0_105 = arith.constant 0 : index
    %c0_106 = arith.constant 0 : index
    %67 = vector.load %arg6[%c0_105, %c0_106] : memref<64x64xf32, #tpu.memory_space<vmem>>, vector<64x64xf32>
    %68 = arith.addf %67, %66 : vector<64x64xf32>
    %c0_107 = arith.constant 0 : index
    %c0_108 = arith.constant 0 : index
    %69 = vector.load %arg6[%c0_107, %c0_108] : memref<64x64xf32, #tpu.memory_space<vmem>>, vector<64x64xf32>
    tpu.vector_store %arg6[%c0_107, %c0_108], %68 {strides = array<i32>} : memref<64x64xf32, #tpu.memory_space<vmem>>, vector<64x64xf32>,
    %c0_109 = arith.constant 0 : index
    %c1_110 = arith.constant 1 : index
    %c4_111 = arith.constant 4 : index
    %c0_112 = arith.constant 0 : index
    %70 = vector.load %arg1[%c0_109, %c1_110, %c4_111, %c0_112] : memref<1x12x12x64xbf16, #tpu.memory_space<vmem>>, vector<1x8x8x64xbf16>
    %71 = vector.shape_cast %70 : vector<1x8x8x64xbf16> to vector<64x64xbf16>
    %c1_113 = arith.constant 1 : index
    %c4_114 = arith.constant 4 : index
    %c0_115 = arith.constant 0 : index
    %c0_116 = arith.constant 0 : index
    %72 = vector.load %arg2[%c1_113, %c4_114, %c0_115, %c0_116] : memref<5x5x64x64xbf16, #tpu.memory_space<vmem>>, vector<1x1x64x64xbf16>
    %73 = vector.shape_cast %72 : vector<1x1x64x64xbf16> to vector<64x64xbf16>
    %cst_117 = arith.constant dense<0.000000e+00> : vector<64x64xf32>
    %74 = tpu.matmul %71, %73, %cst_117 {dimension_numbers = #tpu.dot_dimension_numbers<[1], [0], [0], [1], [0, 0, 1, 1], [], []>} : vector<64x64xbf16>, vector<64x64xbf16>, vector<64x64xf32> -> vector<64x64xf32>
    %c0_118 = arith.constant 0 : index
    %c0_119 = arith.constant 0 : index
    %75 = vector.load %arg6[%c0_118, %c0_119] : memref<64x64xf32, #tpu.memory_space<vmem>>, vector<64x64xf32>
    %76 = arith.addf %75, %74 : vector<64x64xf32>
    %c0_120 = arith.constant 0 : index
    %c0_121 = arith.constant 0 : index
    %77 = vector.load %arg6[%c0_120, %c0_121] : memref<64x64xf32, #tpu.memory_space<vmem>>, vector<64x64xf32>
    tpu.vector_store %arg6[%c0_120, %c0_121], %76 {strides = array<i32>} : memref<64x64xf32, #tpu.memory_space<vmem>>, vector<64x64xf32>,
    %c0_122 = arith.constant 0 : index
    %c2_123 = arith.constant 2 : index
    %c0_124 = arith.constant 0 : index
    %c0_125 = arith.constant 0 : index
    %78 = vector.load %arg1[%c0_122, %c2_123, %c0_124, %c0_125] : memref<1x12x12x64xbf16, #tpu.memory_space<vmem>>, vector<1x8x8x64xbf16>
    %79 = vector.shape_cast %78 : vector<1x8x8x64xbf16> to vector<64x64xbf16>
    %c2_126 = arith.constant 2 : index
    %c0_127 = arith.constant 0 : index
    %c0_128 = arith.constant 0 : index
    %c0_129 = arith.constant 0 : index
    %80 = vector.load %arg2[%c2_126, %c0_127, %c0_128, %c0_129] : memref<5x5x64x64xbf16, #tpu.memory_space<vmem>>, vector<1x1x64x64xbf16>
    %81 = vector.shape_cast %80 : vector<1x1x64x64xbf16> to vector<64x64xbf16>
    %cst_130 = arith.constant dense<0.000000e+00> : vector<64x64xf32>
    %82 = tpu.matmul %79, %81, %cst_130 {dimension_numbers = #tpu.dot_dimension_numbers<[1], [0], [0], [1], [0, 0, 1, 1], [], []>} : vector<64x64xbf16>, vector<64x64xbf16>, vector<64x64xf32> -> vector<64x64xf32>
    %c0_131 = arith.constant 0 : index
    %c0_132 = arith.constant 0 : index
    %83 = vector.load %arg6[%c0_131, %c0_132] : memref<64x64xf32, #tpu.memory_space<vmem>>, vector<64x64xf32>
    %84 = arith.addf %83, %82 : vector<64x64xf32>
    %c0_133 = arith.constant 0 : index
    %c0_134 = arith.constant 0 : index
    %85 = vector.load %arg6[%c0_133, %c0_134] : memref<64x64xf32, #tpu.memory_space<vmem>>, vector<64x64xf32>
    tpu.vector_store %arg6[%c0_133, %c0_134], %84 {strides = array<i32>} : memref<64x64xf32, #tpu.memory_space<vmem>>, vector<64x64xf32>,
    %c0_135 = arith.constant 0 : index
    %c2_136 = arith.constant 2 : index
    %c1_137 = arith.constant 1 : index
    %c0_138 = arith.constant 0 : index
    %86 = vector.load %arg1[%c0_135, %c2_136, %c1_137, %c0_138] : memref<1x12x12x64xbf16, #tpu.memory_space<vmem>>, vector<1x8x8x64xbf16>
    %87 = vector.shape_cast %86 : vector<1x8x8x64xbf16> to vector<64x64xbf16>
    %c2_139 = arith.constant 2 : index
    %c1_140 = arith.constant 1 : index
    %c0_141 = arith.constant 0 : index
    %c0_142 = arith.constant 0 : index
    %88 = vector.load %arg2[%c2_139, %c1_140, %c0_141, %c0_142] : memref<5x5x64x64xbf16, #tpu.memory_space<vmem>>, vector<1x1x64x64xbf16>
    %89 = vector.shape_cast %88 : vector<1x1x64x64xbf16> to vector<64x64xbf16>
    %cst_143 = arith.constant dense<0.000000e+00> : vector<64x64xf32>
    %90 = tpu.matmul %87, %89, %cst_143 {dimension_numbers = #tpu.dot_dimension_numbers<[1], [0], [0], [1], [0, 0, 1, 1], [], []>} : vector<64x64xbf16>, vector<64x64xbf16>, vector<64x64xf32> -> vector<64x64xf32>
    %c0_144 = arith.constant 0 : index
    %c0_145 = arith.constant 0 : index
    %91 = vector.load %arg6[%c0_144, %c0_145] : memref<64x64xf32, #tpu.memory_space<vmem>>, vector<64x64xf32>
    %92 = arith.addf %91, %90 : vector<64x64xf32>
    %c0_146 = arith.constant 0 : index
    %c0_147 = arith.constant 0 : index
    %93 = vector.load %arg6[%c0_146, %c0_147] : memref<64x64xf32, #tpu.memory_space<vmem>>, vector<64x64xf32>
    tpu.vector_store %arg6[%c0_146, %c0_147], %92 {strides = array<i32>} : memref<64x64xf32, #tpu.memory_space<vmem>>, vector<64x64xf32>,
    %c0_148 = arith.constant 0 : index
    %c2_149 = arith.constant 2 : index
    %c2_150 = arith.constant 2 : index
    %c0_151 = arith.constant 0 : index
    %94 = vector.load %arg1[%c0_148, %c2_149, %c2_150, %c0_151] : memref<1x12x12x64xbf16, #tpu.memory_space<vmem>>, vector<1x8x8x64xbf16>
    %95 = vector.shape_cast %94 : vector<1x8x8x64xbf16> to vector<64x64xbf16>
    %c2_152 = arith.constant 2 : index
    %c2_153 = arith.constant 2 : index
    %c0_154 = arith.constant 0 : index
    %c0_155 = arith.constant 0 : index
    %96 = vector.load %arg2[%c2_152, %c2_153, %c0_154, %c0_155] : memref<5x5x64x64xbf16, #tpu.memory_space<vmem>>, vector<1x1x64x64xbf16>
    %97 = vector.shape_cast %96 : vector<1x1x64x64xbf16> to vector<64x64xbf16>
    %cst_156 = arith.constant dense<0.000000e+00> : vector<64x64xf32>
    %98 = tpu.matmul %95, %97, %cst_156 {dimension_numbers = #tpu.dot_dimension_numbers<[1], [0], [0], [1], [0, 0, 1, 1], [], []>} : vector<64x64xbf16>, vector<64x64xbf16>, vector<64x64xf32> -> vector<64x64xf32>
    %c0_157 = arith.constant 0 : index
    %c0_158 = arith.constant 0 : index
    %99 = vector.load %arg6[%c0_157, %c0_158] : memref<64x64xf32, #tpu.memory_space<vmem>>, vector<64x64xf32>
    %100 = arith.addf %99, %98 : vector<64x64xf32>
    %c0_159 = arith.constant 0 : index
    %c0_160 = arith.constant 0 : index
    %101 = vector.load %arg6[%c0_159, %c0_160] : memref<64x64xf32, #tpu.memory_space<vmem>>, vector<64x64xf32>
    tpu.vector_store %arg6[%c0_159, %c0_160], %100 {strides = array<i32>} : memref<64x64xf32, #tpu.memory_space<vmem>>, vector<64x64xf32>,
    %c0_161 = arith.constant 0 : index
    %c2_162 = arith.constant 2 : index
    %c3_163 = arith.constant 3 : index
    %c0_164 = arith.constant 0 : index
    %102 = vector.load %arg1[%c0_161, %c2_162, %c3_163, %c0_164] : memref<1x12x12x64xbf16, #tpu.memory_space<vmem>>, vector<1x8x8x64xbf16>
    %103 = vector.shape_cast %102 : vector<1x8x8x64xbf16> to vector<64x64xbf16>
    %c2_165 = arith.constant 2 : index
    %c3_166 = arith.constant 3 : index
    %c0_167 = arith.constant 0 : index
    %c0_168 = arith.constant 0 : index
    %104 = vector.load %arg2[%c2_165, %c3_166, %c0_167, %c0_168] : memref<5x5x64x64xbf16, #tpu.memory_space<vmem>>, vector<1x1x64x64xbf16>
    %105 = vector.shape_cast %104 : vector<1x1x64x64xbf16> to vector<64x64xbf16>
    %cst_169 = arith.constant dense<0.000000e+00> : vector<64x64xf32>
    %106 = tpu.matmul %103, %105, %cst_169 {dimension_numbers = #tpu.dot_dimension_numbers<[1], [0], [0], [1], [0, 0, 1, 1], [], []>} : vector<64x64xbf16>, vector<64x64xbf16>, vector<64x64xf32> -> vector<64x64xf32>
    %c0_170 = arith.constant 0 : index
    %c0_171 = arith.constant 0 : index
    %107 = vector.load %arg6[%c0_170, %c0_171] : memref<64x64xf32, #tpu.memory_space<vmem>>, vector<64x64xf32>
    %108 = arith.addf %107, %106 : vector<64x64xf32>
    %c0_172 = arith.constant 0 : index
    %c0_173 = arith.constant 0 : index
    %109 = vector.load %arg6[%c0_172, %c0_173] : memref<64x64xf32, #tpu.memory_space<vmem>>, vector<64x64xf32>
    tpu.vector_store %arg6[%c0_172, %c0_173], %108 {strides = array<i32>} : memref<64x64xf32, #tpu.memory_space<vmem>>, vector<64x64xf32>,
    %c0_174 = arith.constant 0 : index
    %c2_175 = arith.constant 2 : index
    %c4_176 = arith.constant 4 : index
    %c0_177 = arith.constant 0 : index
    %110 = vector.load %arg1[%c0_174, %c2_175, %c4_176, %c0_177] : memref<1x12x12x64xbf16, #tpu.memory_space<vmem>>, vector<1x8x8x64xbf16>
    %111 = vector.shape_cast %110 : vector<1x8x8x64xbf16> to vector<64x64xbf16>
    %c2_178 = arith.constant 2 : index
    %c4_179 = arith.constant 4 : index
    %c0_180 = arith.constant 0 : index
    %c0_181 = arith.constant 0 : index
    %112 = vector.load %arg2[%c2_178, %c4_179, %c0_180, %c0_181] : memref<5x5x64x64xbf16, #tpu.memory_space<vmem>>, vector<1x1x64x64xbf16>
    %113 = vector.shape_cast %112 : vector<1x1x64x64xbf16> to vector<64x64xbf16>
    %cst_182 = arith.constant dense<0.000000e+00> : vector<64x64xf32>
    %114 = tpu.matmul %111, %113, %cst_182 {dimension_numbers = #tpu.dot_dimension_numbers<[1], [0], [0], [1], [0, 0, 1, 1], [], []>} : vector<64x64xbf16>, vector<64x64xbf16>, vector<64x64xf32> -> vector<64x64xf32>
    %c0_183 = arith.constant 0 : index
    %c0_184 = arith.constant 0 : index
    %115 = vector.load %arg6[%c0_183, %c0_184] : memref<64x64xf32, #tpu.memory_space<vmem>>, vector<64x64xf32>
    %116 = arith.addf %115, %114 : vector<64x64xf32>
    %c0_185 = arith.constant 0 : index
    %c0_186 = arith.constant 0 : index
    %117 = vector.load %arg6[%c0_185, %c0_186] : memref<64x64xf32, #tpu.memory_space<vmem>>, vector<64x64xf32>
    tpu.vector_store %arg6[%c0_185, %c0_186], %116 {strides = array<i32>} : memref<64x64xf32, #tpu.memory_space<vmem>>, vector<64x64xf32>,
    %c0_187 = arith.constant 0 : index
    %c3_188 = arith.constant 3 : index
    %c0_189 = arith.constant 0 : index
    %c0_190 = arith.constant 0 : index
    %118 = vector.load %arg1[%c0_187, %c3_188, %c0_189, %c0_190] : memref<1x12x12x64xbf16, #tpu.memory_space<vmem>>, vector<1x8x8x64xbf16>
    %119 = vector.shape_cast %118 : vector<1x8x8x64xbf16> to vector<64x64xbf16>
    %c3_191 = arith.constant 3 : index
    %c0_192 = arith.constant 0 : index
    %c0_193 = arith.constant 0 : index
    %c0_194 = arith.constant 0 : index
    %120 = vector.load %arg2[%c3_191, %c0_192, %c0_193, %c0_194] : memref<5x5x64x64xbf16, #tpu.memory_space<vmem>>, vector<1x1x64x64xbf16>
    %121 = vector.shape_cast %120 : vector<1x1x64x64xbf16> to vector<64x64xbf16>
    %cst_195 = arith.constant dense<0.000000e+00> : vector<64x64xf32>
    %122 = tpu.matmul %119, %121, %cst_195 {dimension_numbers = #tpu.dot_dimension_numbers<[1], [0], [0], [1], [0, 0, 1, 1], [], []>} : vector<64x64xbf16>, vector<64x64xbf16>, vector<64x64xf32> -> vector<64x64xf32>
    %c0_196 = arith.constant 0 : index
    %c0_197 = arith.constant 0 : index
    %123 = vector.load %arg6[%c0_196, %c0_197] : memref<64x64xf32, #tpu.memory_space<vmem>>, vector<64x64xf32>
    %124 = arith.addf %123, %122 : vector<64x64xf32>
    %c0_198 = arith.constant 0 : index
    %c0_199 = arith.constant 0 : index
    %125 = vector.load %arg6[%c0_198, %c0_199] : memref<64x64xf32, #tpu.memory_space<vmem>>, vector<64x64xf32>
    tpu.vector_store %arg6[%c0_198, %c0_199], %124 {strides = array<i32>} : memref<64x64xf32, #tpu.memory_space<vmem>>, vector<64x64xf32>,
    %c0_200 = arith.constant 0 : index
    %c3_201 = arith.constant 3 : index
    %c1_202 = arith.constant 1 : index
    %c0_203 = arith.constant 0 : index
    %126 = vector.load %arg1[%c0_200, %c3_201, %c1_202, %c0_203] : memref<1x12x12x64xbf16, #tpu.memory_space<vmem>>, vector<1x8x8x64xbf16>
    %127 = vector.shape_cast %126 : vector<1x8x8x64xbf16> to vector<64x64xbf16>
    %c3_204 = arith.constant 3 : index
    %c1_205 = arith.constant 1 : index
    %c0_206 = arith.constant 0 : index
    %c0_207 = arith.constant 0 : index
    %128 = vector.load %arg2[%c3_204, %c1_205, %c0_206, %c0_207] : memref<5x5x64x64xbf16, #tpu.memory_space<vmem>>, vector<1x1x64x64xbf16>
    %129 = vector.shape_cast %128 : vector<1x1x64x64xbf16> to vector<64x64xbf16>
    %cst_208 = arith.constant dense<0.000000e+00> : vector<64x64xf32>
    %130 = tpu.matmul %127, %129, %cst_208 {dimension_numbers = #tpu.dot_dimension_numbers<[1], [0], [0], [1], [0, 0, 1, 1], [], []>} : vector<64x64xbf16>, vector<64x64xbf16>, vector<64x64xf32> -> vector<64x64xf32>
    %c0_209 = arith.constant 0 : index
    %c0_210 = arith.constant 0 : index
    %131 = vector.load %arg6[%c0_209, %c0_210] : memref<64x64xf32, #tpu.memory_space<vmem>>, vector<64x64xf32>
    %132 = arith.addf %131, %130 : vector<64x64xf32>
    %c0_211 = arith.constant 0 : index
    %c0_212 = arith.constant 0 : index
    %133 = vector.load %arg6[%c0_211, %c0_212] : memref<64x64xf32, #tpu.memory_space<vmem>>, vector<64x64xf32>
    tpu.vector_store %arg6[%c0_211, %c0_212], %132 {strides = array<i32>} : memref<64x64xf32, #tpu.memory_space<vmem>>, vector<64x64xf32>,
    %c0_213 = arith.constant 0 : index
    %c3_214 = arith.constant 3 : index
    %c2_215 = arith.constant 2 : index
    %c0_216 = arith.constant 0 : index
    %134 = vector.load %arg1[%c0_213, %c3_214, %c2_215, %c0_216] : memref<1x12x12x64xbf16, #tpu.memory_space<vmem>>, vector<1x8x8x64xbf16>
    %135 = vector.shape_cast %134 : vector<1x8x8x64xbf16> to vector<64x64xbf16>
    %c3_217 = arith.constant 3 : index
    %c2_218 = arith.constant 2 : index
    %c0_219 = arith.constant 0 : index
    %c0_220 = arith.constant 0 : index
    %136 = vector.load %arg2[%c3_217, %c2_218, %c0_219, %c0_220] : memref<5x5x64x64xbf16, #tpu.memory_space<vmem>>, vector<1x1x64x64xbf16>
    %137 = vector.shape_cast %136 : vector<1x1x64x64xbf16> to vector<64x64xbf16>
    %cst_221 = arith.constant dense<0.000000e+00> : vector<64x64xf32>
    %138 = tpu.matmul %135, %137, %cst_221 {dimension_numbers = #tpu.dot_dimension_numbers<[1], [0], [0], [1], [0, 0, 1, 1], [], []>} : vector<64x64xbf16>, vector<64x64xbf16>, vector<64x64xf32> -> vector<64x64xf32>
    %c0_222 = arith.constant 0 : index
    %c0_223 = arith.constant 0 : index
    %139 = vector.load %arg6[%c0_222, %c0_223] : memref<64x64xf32, #tpu.memory_space<vmem>>, vector<64x64xf32>
    %140 = arith.addf %139, %138 : vector<64x64xf32>
    %c0_224 = arith.constant 0 : index
    %c0_225 = arith.constant 0 : index
    %141 = vector.load %arg6[%c0_224, %c0_225] : memref<64x64xf32, #tpu.memory_space<vmem>>, vector<64x64xf32>
    tpu.vector_store %arg6[%c0_224, %c0_225], %140 {strides = array<i32>} : memref<64x64xf32, #tpu.memory_space<vmem>>, vector<64x64xf32>,
    %c0_226 = arith.constant 0 : index
    %c3_227 = arith.constant 3 : index
    %c3_228 = arith.constant 3 : index
    %c0_229 = arith.constant 0 : index
    %142 = vector.load %arg1[%c0_226, %c3_227, %c3_228, %c0_229] : memref<1x12x12x64xbf16, #tpu.memory_space<vmem>>, vector<1x8x8x64xbf16>
    %143 = vector.shape_cast %142 : vector<1x8x8x64xbf16> to vector<64x64xbf16>
    %c3_230 = arith.constant 3 : index
    %c3_231 = arith.constant 3 : index
    %c0_232 = arith.constant 0 : index
    %c0_233 = arith.constant 0 : index
    %144 = vector.load %arg2[%c3_230, %c3_231, %c0_232, %c0_233] : memref<5x5x64x64xbf16, #tpu.memory_space<vmem>>, vector<1x1x64x64xbf16>
    %145 = vector.shape_cast %144 : vector<1x1x64x64xbf16> to vector<64x64xbf16>
    %cst_234 = arith.constant dense<0.000000e+00> : vector<64x64xf32>
    %146 = tpu.matmul %143, %145, %cst_234 {dimension_numbers = #tpu.dot_dimension_numbers<[1], [0], [0], [1], [0, 0, 1, 1], [], []>} : vector<64x64xbf16>, vector<64x64xbf16>, vector<64x64xf32> -> vector<64x64xf32>
    %c0_235 = arith.constant 0 : index
    %c0_236 = arith.constant 0 : index
    %147 = vector.load %arg6[%c0_235, %c0_236] : memref<64x64xf32, #tpu.memory_space<vmem>>, vector<64x64xf32>
    %148 = arith.addf %147, %146 : vector<64x64xf32>
    %c0_237 = arith.constant 0 : index
    %c0_238 = arith.constant 0 : index
    %149 = vector.load %arg6[%c0_237, %c0_238] : memref<64x64xf32, #tpu.memory_space<vmem>>, vector<64x64xf32>
    tpu.vector_store %arg6[%c0_237, %c0_238], %148 {strides = array<i32>} : memref<64x64xf32, #tpu.memory_space<vmem>>, vector<64x64xf32>,
    %c0_239 = arith.constant 0 : index
    %c3_240 = arith.constant 3 : index
    %c4_241 = arith.constant 4 : index
    %c0_242 = arith.constant 0 : index
    %150 = vector.load %arg1[%c0_239, %c3_240, %c4_241, %c0_242] : memref<1x12x12x64xbf16, #tpu.memory_space<vmem>>, vector<1x8x8x64xbf16>
    %151 = vector.shape_cast %150 : vector<1x8x8x64xbf16> to vector<64x64xbf16>
    %c3_243 = arith.constant 3 : index
    %c4_244 = arith.constant 4 : index
    %c0_245 = arith.constant 0 : index
    %c0_246 = arith.constant 0 : index
    %152 = vector.load %arg2[%c3_243, %c4_244, %c0_245, %c0_246] : memref<5x5x64x64xbf16, #tpu.memory_space<vmem>>, vector<1x1x64x64xbf16>
    %153 = vector.shape_cast %152 : vector<1x1x64x64xbf16> to vector<64x64xbf16>
    %cst_247 = arith.constant dense<0.000000e+00> : vector<64x64xf32>
    %154 = tpu.matmul %151, %153, %cst_247 {dimension_numbers = #tpu.dot_dimension_numbers<[1], [0], [0], [1], [0, 0, 1, 1], [], []>} : vector<64x64xbf16>, vector<64x64xbf16>, vector<64x64xf32> -> vector<64x64xf32>
    %c0_248 = arith.constant 0 : index
    %c0_249 = arith.constant 0 : index
    %155 = vector.load %arg6[%c0_248, %c0_249] : memref<64x64xf32, #tpu.memory_space<vmem>>, vector<64x64xf32>
    %156 = arith.addf %155, %154 : vector<64x64xf32>
    %c0_250 = arith.constant 0 : index
    %c0_251 = arith.constant 0 : index
    %157 = vector.load %arg6[%c0_250, %c0_251] : memref<64x64xf32, #tpu.memory_space<vmem>>, vector<64x64xf32>
    tpu.vector_store %arg6[%c0_250, %c0_251], %156 {strides = array<i32>} : memref<64x64xf32, #tpu.memory_space<vmem>>, vector<64x64xf32>,
    %c0_252 = arith.constant 0 : index
    %c4_253 = arith.constant 4 : index
    %c0_254 = arith.constant 0 : index
    %c0_255 = arith.constant 0 : index
    %158 = vector.load %arg1[%c0_252, %c4_253, %c0_254, %c0_255] : memref<1x12x12x64xbf16, #tpu.memory_space<vmem>>, vector<1x8x8x64xbf16>
    %159 = vector.shape_cast %158 : vector<1x8x8x64xbf16> to vector<64x64xbf16>
    %c4_256 = arith.constant 4 : index
    %c0_257 = arith.constant 0 : index
    %c0_258 = arith.constant 0 : index
    %c0_259 = arith.constant 0 : index
    %160 = vector.load %arg2[%c4_256, %c0_257, %c0_258, %c0_259] : memref<5x5x64x64xbf16, #tpu.memory_space<vmem>>, vector<1x1x64x64xbf16>
    %161 = vector.shape_cast %160 : vector<1x1x64x64xbf16> to vector<64x64xbf16>
    %cst_260 = arith.constant dense<0.000000e+00> : vector<64x64xf32>
    %162 = tpu.matmul %159, %161, %cst_260 {dimension_numbers = #tpu.dot_dimension_numbers<[1], [0], [0], [1], [0, 0, 1, 1], [], []>} : vector<64x64xbf16>, vector<64x64xbf16>, vector<64x64xf32> -> vector<64x64xf32>
    %c0_261 = arith.constant 0 : index
    %c0_262 = arith.constant 0 : index
    %163 = vector.load %arg6[%c0_261, %c0_262] : memref<64x64xf32, #tpu.memory_space<vmem>>, vector<64x64xf32>
    %164 = arith.addf %163, %162 : vector<64x64xf32>
    %c0_263 = arith.constant 0 : index
    %c0_264 = arith.constant 0 : index
    %165 = vector.load %arg6[%c0_263, %c0_264] : memref<64x64xf32, #tpu.memory_space<vmem>>, vector<64x64xf32>
    tpu.vector_store %arg6[%c0_263, %c0_264], %164 {strides = array<i32>} : memref<64x64xf32, #tpu.memory_space<vmem>>, vector<64x64xf32>,
    %c0_265 = arith.constant 0 : index
    %c4_266 = arith.constant 4 : index
    %c1_267 = arith.constant 1 : index
    %c0_268 = arith.constant 0 : index
    %166 = vector.load %arg1[%c0_265, %c4_266, %c1_267, %c0_268] : memref<1x12x12x64xbf16, #tpu.memory_space<vmem>>, vector<1x8x8x64xbf16>
    %167 = vector.shape_cast %166 : vector<1x8x8x64xbf16> to vector<64x64xbf16>
    %c4_269 = arith.constant 4 : index
    %c1_270 = arith.constant 1 : index
    %c0_271 = arith.constant 0 : index
    %c0_272 = arith.constant 0 : index
    %168 = vector.load %arg2[%c4_269, %c1_270, %c0_271, %c0_272] : memref<5x5x64x64xbf16, #tpu.memory_space<vmem>>, vector<1x1x64x64xbf16>
    %169 = vector.shape_cast %168 : vector<1x1x64x64xbf16> to vector<64x64xbf16>
    %cst_273 = arith.constant dense<0.000000e+00> : vector<64x64xf32>
    %170 = tpu.matmul %167, %169, %cst_273 {dimension_numbers = #tpu.dot_dimension_numbers<[1], [0], [0], [1], [0, 0, 1, 1], [], []>} : vector<64x64xbf16>, vector<64x64xbf16>, vector<64x64xf32> -> vector<64x64xf32>
    %c0_274 = arith.constant 0 : index
    %c0_275 = arith.constant 0 : index
    %171 = vector.load %arg6[%c0_274, %c0_275] : memref<64x64xf32, #tpu.memory_space<vmem>>, vector<64x64xf32>
    %172 = arith.addf %171, %170 : vector<64x64xf32>
    %c0_276 = arith.constant 0 : index
    %c0_277 = arith.constant 0 : index
    %173 = vector.load %arg6[%c0_276, %c0_277] : memref<64x64xf32, #tpu.memory_space<vmem>>, vector<64x64xf32>
    tpu.vector_store %arg6[%c0_276, %c0_277], %172 {strides = array<i32>} : memref<64x64xf32, #tpu.memory_space<vmem>>, vector<64x64xf32>,
    %c0_278 = arith.constant 0 : index
    %c4_279 = arith.constant 4 : index
    %c2_280 = arith.constant 2 : index
    %c0_281 = arith.constant 0 : index
    %174 = vector.load %arg1[%c0_278, %c4_279, %c2_280, %c0_281] : memref<1x12x12x64xbf16, #tpu.memory_space<vmem>>, vector<1x8x8x64xbf16>
    %175 = vector.shape_cast %174 : vector<1x8x8x64xbf16> to vector<64x64xbf16>
    %c4_282 = arith.constant 4 : index
    %c2_283 = arith.constant 2 : index
    %c0_284 = arith.constant 0 : index
    %c0_285 = arith.constant 0 : index
    %176 = vector.load %arg2[%c4_282, %c2_283, %c0_284, %c0_285] : memref<5x5x64x64xbf16, #tpu.memory_space<vmem>>, vector<1x1x64x64xbf16>
    %177 = vector.shape_cast %176 : vector<1x1x64x64xbf16> to vector<64x64xbf16>
    %cst_286 = arith.constant dense<0.000000e+00> : vector<64x64xf32>
    %178 = tpu.matmul %175, %177, %cst_286 {dimension_numbers = #tpu.dot_dimension_numbers<[1], [0], [0], [1], [0, 0, 1, 1], [], []>} : vector<64x64xbf16>, vector<64x64xbf16>, vector<64x64xf32> -> vector<64x64xf32>
    %c0_287 = arith.constant 0 : index
    %c0_288 = arith.constant 0 : index
    %179 = vector.load %arg6[%c0_287, %c0_288] : memref<64x64xf32, #tpu.memory_space<vmem>>, vector<64x64xf32>
    %180 = arith.addf %179, %178 : vector<64x64xf32>
    %c0_289 = arith.constant 0 : index
    %c0_290 = arith.constant 0 : index
    %181 = vector.load %arg6[%c0_289, %c0_290] : memref<64x64xf32, #tpu.memory_space<vmem>>, vector<64x64xf32>
    tpu.vector_store %arg6[%c0_289, %c0_290], %180 {strides = array<i32>} : memref<64x64xf32, #tpu.memory_space<vmem>>, vector<64x64xf32>,
    %c0_291 = arith.constant 0 : index
    %c4_292 = arith.constant 4 : index
    %c3_293 = arith.constant 3 : index
    %c0_294 = arith.constant 0 : index
    %182 = vector.load %arg1[%c0_291, %c4_292, %c3_293, %c0_294] : memref<1x12x12x64xbf16, #tpu.memory_space<vmem>>, vector<1x8x8x64xbf16>
    %183 = vector.shape_cast %182 : vector<1x8x8x64xbf16> to vector<64x64xbf16>
    %c4_295 = arith.constant 4 : index
    %c3_296 = arith.constant 3 : index
    %c0_297 = arith.constant 0 : index
    %c0_298 = arith.constant 0 : index
    %184 = vector.load %arg2[%c4_295, %c3_296, %c0_297, %c0_298] : memref<5x5x64x64xbf16, #tpu.memory_space<vmem>>, vector<1x1x64x64xbf16>
    %185 = vector.shape_cast %184 : vector<1x1x64x64xbf16> to vector<64x64xbf16>
    %cst_299 = arith.constant dense<0.000000e+00> : vector<64x64xf32>
    %186 = tpu.matmul %183, %185, %cst_299 {dimension_numbers = #tpu.dot_dimension_numbers<[1], [0], [0], [1], [0, 0, 1, 1], [], []>} : vector<64x64xbf16>, vector<64x64xbf16>, vector<64x64xf32> -> vector<64x64xf32>
    %c0_300 = arith.constant 0 : index
    %c0_301 = arith.constant 0 : index
    %187 = vector.load %arg6[%c0_300, %c0_301] : memref<64x64xf32, #tpu.memory_space<vmem>>, vector<64x64xf32>
    %188 = arith.addf %187, %186 : vector<64x64xf32>
    %c0_302 = arith.constant 0 : index
    %c0_303 = arith.constant 0 : index
    %189 = vector.load %arg6[%c0_302, %c0_303] : memref<64x64xf32, #tpu.memory_space<vmem>>, vector<64x64xf32>
    tpu.vector_store %arg6[%c0_302, %c0_303], %188 {strides = array<i32>} : memref<64x64xf32, #tpu.memory_space<vmem>>, vector<64x64xf32>,
    %c0_304 = arith.constant 0 : index
    %c4_305 = arith.constant 4 : index
    %c4_306 = arith.constant 4 : index
    %c0_307 = arith.constant 0 : index
    %190 = vector.load %arg1[%c0_304, %c4_305, %c4_306, %c0_307] : memref<1x12x12x64xbf16, #tpu.memory_space<vmem>>, vector<1x8x8x64xbf16>
    %191 = vector.shape_cast %190 : vector<1x8x8x64xbf16> to vector<64x64xbf16>
    %c4_308 = arith.constant 4 : index
    %c4_309 = arith.constant 4 : index
    %c0_310 = arith.constant 0 : index
    %c0_311 = arith.constant 0 : index
    %192 = vector.load %arg2[%c4_308, %c4_309, %c0_310, %c0_311] : memref<5x5x64x64xbf16, #tpu.memory_space<vmem>>, vector<1x1x64x64xbf16>
    %193 = vector.shape_cast %192 : vector<1x1x64x64xbf16> to vector<64x64xbf16>
    %cst_312 = arith.constant dense<0.000000e+00> : vector<64x64xf32>
    %194 = tpu.matmul %191, %193, %cst_312 {dimension_numbers = #tpu.dot_dimension_numbers<[1], [0], [0], [1], [0, 0, 1, 1], [], []>} : vector<64x64xbf16>, vector<64x64xbf16>, vector<64x64xf32> -> vector<64x64xf32>
    %c0_313 = arith.constant 0 : index
    %c0_314 = arith.constant 0 : index
    %195 = vector.load %arg6[%c0_313, %c0_314] : memref<64x64xf32, #tpu.memory_space<vmem>>, vector<64x64xf32>
    %196 = arith.addf %195, %194 : vector<64x64xf32>
    %c0_315 = arith.constant 0 : index
    %c0_316 = arith.constant 0 : index
    %197 = vector.load %arg6[%c0_315, %c0_316] : memref<64x64xf32, #tpu.memory_space<vmem>>, vector<64x64xf32>
    tpu.vector_store %arg6[%c0_315, %c0_316], %196 {strides = array<i32>} : memref<64x64xf32, #tpu.memory_space<vmem>>, vector<64x64xf32>,
    %c0_317 = arith.constant 0 : index
    %c0_318 = arith.constant 0 : index
    %198 = vector.load %arg6[%c0_317, %c0_318] : memref<64x64xf32, #tpu.memory_space<vmem>>, vector<64x64xf32>
    %199 = vector.shape_cast %198 : vector<64x64xf32> to vector<1x64x64xf32>
    %c0_319 = arith.constant 0 : index
    %c0_320 = arith.constant 0 : index
    %c0_321 = arith.constant 0 : index
    %200 = vector.load %arg3[%c0_319, %c0_320, %c0_321] : memref<1x64x64xf32, #tpu.memory_space<vmem>>, vector<1x64x64xf32>
    tpu.vector_store %arg3[%c0_319, %c0_320, %c0_321], %199 {strides = array<i32>} : memref<1x64x64xf32, #tpu.memory_space<vmem>>, vector<1x64x64xf32>,
    %cst_322 = arith.constant dense<0.000000e+00> : vector<64xf32>
    %201 = vector.multi_reduction <add>, %198, %cst_322 [0] : vector<64x64xf32> to vector<64xf32>
    %202 = vector.shape_cast %201 : vector<64xf32> to vector<1x64xf32>
    %203 = vector.shape_cast %202 : vector<1x64xf32> to vector<1x1x64xf32>
    %c0_323 = arith.constant 0 : index
    %c0_324 = arith.constant 0 : index
    %c0_325 = arith.constant 0 : index
    %204 = vector.load %arg4[%c0_323, %c0_324, %c0_325] : memref<1x1x64xf32, #tpu.memory_space<vmem>>, vector<1x1x64xf32>
    tpu.vector_store %arg4[%c0_323, %c0_324, %c0_325], %203 {strides = array<i32>} : memref<1x1x64xf32, #tpu.memory_space<vmem>>, vector<1x1x64xf32>,
    %205 = arith.mulf %198, %198 : vector<64x64xf32>
    %cst_326 = arith.constant dense<0.000000e+00> : vector<64xf32>
    %206 = vector.multi_reduction <add>, %205, %cst_326 [0] : vector<64x64xf32> to vector<64xf32>
    %207 = vector.shape_cast %206 : vector<64xf32> to vector<1x64xf32>
    %208 = vector.shape_cast %207 : vector<1x64xf32> to vector<1x1x64xf32>
    %c0_327 = arith.constant 0 : index
    %c0_328 = arith.constant 0 : index
    %c0_329 = arith.constant 0 : index
    %209 = vector.load %arg5[%c0_327, %c0_328, %c0_329] : memref<1x1x64xf32, #tpu.memory_space<vmem>>, vector<1x1x64xf32>
    tpu.vector_store %arg5[%c0_327, %c0_328, %c0_329], %208 {strides = array<i32>} : memref<1x1x64xf32, #tpu.memory_space<vmem>>, vector<1x1x64xf32>,
    return
  }
  func.func @transform_0(%arg0: i32) -> (i32, i32, i32, i32) {
    %c0_i32 = arith.constant 0 : i32
    %c0_i32_0 = arith.constant 0 : i32
    %c0_i32_1 = arith.constant 0 : i32
    %c0_i32_2 = arith.constant 0 : i32
    return %arg0, %c0_i32, %c0_i32_0, %c0_i32_1 : i32, i32, i32, i32
  }
  func.func @transform_1(%arg0: i32) -> (i32, i32, i32, i32) {
    %c0_i32 = arith.constant 0 : i32
    %c0_i32_0 = arith.constant 0 : i32
    %c0_i32_1 = arith.constant 0 : i32
    %c0_i32_2 = arith.constant 0 : i32
    %c0_i32_3 = arith.constant 0 : i32
    return %c0_i32, %c0_i32_0, %c0_i32_1, %c0_i32_2 : i32, i32, i32, i32
  }
  func.func @transform_2(%arg0: i32) -> (i32, i32, i32) {
    %c0_i32 = arith.constant 0 : i32
    %c0_i32_0 = arith.constant 0 : i32
    %c0_i32_1 = arith.constant 0 : i32
    return %arg0, %c0_i32, %c0_i32_0 : i32, i32, i32
  }
  func.func @transform_3(%arg0: i32) -> (i32, i32, i32) {
    %c0_i32 = arith.constant 0 : i32
    %c0_i32_0 = arith.constant 0 : i32
    %c0_i32_1 = arith.constant 0 : i32
    return %arg0, %c0_i32, %c0_i32_0 : i32, i32, i32
  }
  func.func @transform_4(%arg0: i32) -> (i32, i32, i32) {
    %c0_i32 = arith.constant 0 : i32
    %c0_i32_0 = arith.constant 0 : i32
    %c0_i32_1 = arith.constant 0 : i32
    return %arg0, %c0_i32, %c0_i32_0 : i32, i32, i32
  }
}

</mosaic_0001>

<bundles_post_ra>
// kernel: feature_extractor_forward.5
= control target key start
LH: loop header
LB: loop body
LE: loop exit
PB: predicated region body
PF: predicated region fallthrough
CT: control target
= control target key end

     0   :  { %s1490_s12 = smov 0   ;;  %s1886_s0 = inlined_call_operand.vmem [shape: bf16[2,4,144,25], index: 0, kind: input, shape index: {}]   ;;  %s1887_s1 = inlined_call_operand.vmem [shape: bf16[25,64], index: 1, kind: input, shape index: {}]   ;;  %s1888_s2 = inlined_call_operand.vmem [shape: f32[1,64], index: 2, kind: input, shape index: {}]   ;;  %s1889_s3 = inlined_call_operand.vmem [shape: bf16[2,144,64], index: 3, kind: output, shape index: {}]  }
   0x1 LB: > { %s1174_s13 = sadd.s32 4294967295, %s1467_s12   ;;  %p1178_p0 = scmp.ge.s32.totalorder %s1467_s12, 1  ;;  %s1467_s12 = sphi %s1490_s12, %s13_s12  }
   0x2   : > { %p137_p1 = scmp.lt.s32.totalorder %s1467_s12, 3 }
   0x4   : > { %p138_p2 = pnand %p1178_p0, %p137_p1 }
   0x5   : > { %v1423_v0 = vld [vmem:[%s1887_s1] sm:$0xff] (!%p138_p2)   ;;  %vm555_vm0 = vcmask (!%p138_p2), 1043456   ;;  %v1424_v1 = vld [vmem:[%s1887_s1 + $0x8] sm:$0x1f] (!%p138_p2)   ;;  %vm556_vm1 = vcmask (!%p138_p2), 1044480   ;;  %p161_p3 = scmp.lt.s32.totalorder (!%p138_p2), %s1174_s13, 1 }
   0x6   : > { %141 = sbr.rel (%p138_p2) target bundleno = 316 (0x13c), region = 32  ;;  %1332 = vmatprep.subr.bf16.mxu0 (!%p138_p2), %v1423_v0  ;;  %1408 = vmatprep.subr.bf16.mxu1 (!%p138_p2), %v1423_v0  ;;  %v1469_v2 = vmov (!%p138_p2), 65535   ;;  %vm446_vm2 = vcmask (!%p138_p2), 203776   ;;  %v1587_v58 = vld [vmem:[%s1888_s2] ss:$0 sm:$0xff] (!%p138_p2)  ;;  %vm883_vm3 = vcmask (!%p138_p2), 523264  }
   0x7   : > { %1333 = vmatpush3.bf16.msra.mxu0 (!%p138_p2), %v1423_v0  ;;  %1410 = vmatpush3.bf16.msra.mxu1 (!%p138_p2), %v1423_v0  ;;  %v557_v3 = vsel (!%p138_p2), %vm555_vm0, 4294967295, %v1469_v2  ;;  %vm1100_vm4 = vcmask (!%p138_p2), 519168  }
   0x8   : > { %v558_v4 = vsel (!%p138_p2), %vm556_vm1, %v557_v3, 0 }
   0x9   : > { %v560_v5 = vand.u32 (!%p138_p2), %v1424_v1, %v558_v4 }
   0xb   : > { %1334 = vmatprep.subr.bf16.mxu0 (!%p138_p2), %v560_v5  ;;  %1409 = vmatprep.subr.bf16.mxu1 (!%p138_p2), %v560_v5 }
   0xc   : > { %1335 = vmatpush3.bf16.msra.mxu0 (!%p138_p2), %v560_v5  ;;  %1411 = vmatpush3.bf16.msra.mxu1 (!%p138_p2), %v560_v5 }
   0xd   : > { %s1891_s13 = smov (!%p161_p3, %s1174_s13), 1 }
   0xe   : > { %s1412_s18 = smul.u32 288, %s1891_s13 }
   0xf   : > { %s1413_s24 = smul.u32 72, %s1891_s13 }
  0x10   : > { %s1510_s21 = scalar_lea.vmem %s1886_s0, %s1412_s18 }
  0x11   : > { %v1425_v6 = vld [vmem:[%s1510_s21] sm:$0xff]   ;;  %v1426_v7 = vld [vmem:[%s1510_s21 + $0x8] sm:$0xff]   ;;  %v1427_v8 = vld [vmem:[%s1510_s21 + $0x90] sm:$0xff]   ;;  %s1746_s27 = scalar_lea.vmem %s1889_s3, %s1413_s24 }
  0x12   : > { %1336 = vmatprep.mubr.msk.bf16.mxu0 %vm446_vm2, %v1425_v6  ;;  %v1428_v9 = vld [vmem:[%s1510_s21 + $0x98] sm:$0xff]   ;;  %1372 = vmatprep.mubr.msk.bf16.mxu1 %vm446_vm2, %v1427_v8  ;;  %v1429_v10 = vld [vmem:[%s1510_s21 + $0x10] sm:$0xff]   ;;  %v1431_v11 = vld [vmem:[%s1510_s21 + $0xa0] sm:$0xff]  }
  0x13   : > { %1337 = vmatmul.mubr.msk.bf16.vlgmr.msra.gmra.mrb[0].mxu0 %vm446_vm2, %v1426_v7  ;;  %1373 = vmatmul.mubr.msk.bf16.vlgmr.msra.gmra.mrb[0].mxu1 %vm446_vm2, %v1428_v9  ;;  %v1430_v12 = vld [vmem:[%s1510_s21 + $0x18] sm:$0xff]   ;;  %v1433_v13 = vld [vmem:[%s1510_s21 + $0x20] sm:$0xff]   ;;  %v1432_v14 = vld [vmem:[%s1510_s21 + $0xa8] sm:$0xff]  }
  0x14   : > { %1340 = vmatprep.mubr.msk.bf16.mxu0 %vm446_vm2, %v1429_v10  ;;  %1376 = vmatprep.mubr.msk.bf16.mxu1 %vm446_vm2, %v1431_v11  ;;  %v1435_v15 = vld [vmem:[%s1510_s21 + $0xb0] sm:$0xff]   ;;  %v1434_v16 = vld [vmem:[%s1510_s21 + $0x28] sm:$0xff]   ;;  %v1436_v18 = vld [vmem:[%s1510_s21 + $0xb8] sm:$0xff]  }
  0x15   : > { %v1437_v17 = vld [vmem:[%s1510_s21 + $0x30] sm:$0xff]   ;;  %v1439_v19 = vld [vmem:[%s1510_s21 + $0xc0] sm:$0xff]   ;;  %v1438_v20 = vld [vmem:[%s1510_s21 + $0x38] sm:$0xff]  }
  0x16   : > { %v1441_v21 = vld [vmem:[%s1510_s21 + $0x40] sm:$0xff]   ;;  %v1440_v22 = vld [vmem:[%s1510_s21 + $0xc8] sm:$0xff]   ;;  %v1443_v23 = vld [vmem:[%s1510_s21 + $0xd0] sm:$0xff]  }
  0x17   : > { %v1442_v24 = vld [vmem:[%s1510_s21 + $0x48] sm:$0xff]   ;;  %v1445_v25 = vld [vmem:[%s1510_s21 + $0x50] sm:$0xff]   ;;  %v1444_v26 = vld [vmem:[%s1510_s21 + $0xd8] sm:$0xff]  }
  0x18   : > { %v1447_v27 = vld [vmem:[%s1510_s21 + $0xe0] sm:$0xff]   ;;  %v1446_v28 = vld [vmem:[%s1510_s21 + $0x58] sm:$0xff]   ;;  %v1448_v30 = vld [vmem:[%s1510_s21 + $0xe8] sm:$0xff]  }
  0x19   : > { %v1449_v29 = vld [vmem:[%s1510_s21 + $0x60] sm:$0xff]   ;;  %v1451_v31 = vld [vmem:[%s1510_s21 + $0xf0] sm:$0xff]   ;;  %v1450_v32 = vld [vmem:[%s1510_s21 + $0x68] sm:$0xff]  }
  0x1a   : > { %v1453_v33 = vld [vmem:[%s1510_s21 + $0x70] sm:$0xff]   ;;  %v1452_v34 = vld [vmem:[%s1510_s21 + $0xf8] sm:$0xff]   ;;  %v1455_v35 = vld [vmem:[%s1510_s21 + $0x100] sm:$0xff]  }
  0x1b   : > { %1341 = vmatmul.mubr.msk.bf16.gmra.mrb[4].mxu0 %vm446_vm2, %v1430_v12  ;;  %1377 = vmatmul.mubr.msk.bf16.gmra.mrb[4].mxu1 %vm446_vm2, %v1432_v14  ;;  %v1454_v36 = vld [vmem:[%s1510_s21 + $0x78] sm:$0xff]   ;;  %v1457_v37 = vld [vmem:[%s1510_s21 + $0x80] sm:$0xff]   ;;  %v1456_v38 = vld [vmem:[%s1510_s21 + $0x108] sm:$0xff]  }
  0x1c   : > { %1344 = vmatprep.mubr.msk.bf16.mxu0 %vm446_vm2, %v1433_v13  ;;  %1380 = vmatprep.mubr.msk.bf16.mxu1 %vm446_vm2, %v1435_v15  ;;  %v1459_v39 = vld [vmem:[%s1510_s21 + $0x110] sm:$0xff]   ;;  %v1458_v40 = vld [vmem:[%s1510_s21 + $0x88] sm:$0xff]   ;;  %v1460_v41 = vld [vmem:[%s1510_s21 + $0x118] sm:$0xff]  }
  0x23   : > { %1345 = vmatmul.mubr.msk.bf16.gmra.mrb[8].mxu0 %vm446_vm2, %v1434_v16  ;;  %1381 = vmatmul.mubr.msk.bf16.gmra.mrb[8].mxu1 %vm446_vm2, %v1436_v18 }
  0x24   : > { %1348 = vmatprep.mubr.msk.bf16.mxu0 %vm446_vm2, %v1437_v17  ;;  %1384 = vmatprep.mubr.msk.bf16.mxu1 %vm446_vm2, %v1439_v19 }
  0x2b   : > { %1349 = vmatmul.mubr.msk.bf16.gmra.mrb[12].mxu0 %vm446_vm2, %v1438_v20  ;;  %1385 = vmatmul.mubr.msk.bf16.gmra.mrb[12].mxu1 %vm446_vm2, %v1440_v22 }
  0x2c   : > { %1352 = vmatprep.mubr.msk.bf16.mxu0 %vm446_vm2, %v1441_v21  ;;  %1388 = vmatprep.mubr.msk.bf16.mxu1 %vm446_vm2, %v1443_v23 }
  0x33   : > { %1353 = vmatmul.mubr.msk.bf16.gmra.mrb[16].mxu0 %vm446_vm2, %v1442_v24  ;;  %1389 = vmatmul.mubr.msk.bf16.gmra.mrb[16].mxu1 %vm446_vm2, %v1444_v26 }
  0x34   : > { %1356 = vmatprep.mubr.msk.bf16.mxu0 %vm446_vm2, %v1445_v25  ;;  %1392 = vmatprep.mubr.msk.bf16.mxu1 %vm446_vm2, %v1447_v27 }
  0x3b   : > { %1357 = vmatmul.mubr.msk.bf16.gmra.mrb[20].mxu0 %vm446_vm2, %v1446_v28  ;;  %1393 = vmatmul.mubr.msk.bf16.gmra.mrb[20].mxu1 %vm446_vm2, %v1448_v30 }
  0x3c   : > { %1360 = vmatprep.mubr.msk.bf16.mxu0 %vm446_vm2, %v1449_v29  ;;  %1396 = vmatprep.mubr.msk.bf16.mxu1 %vm446_vm2, %v1451_v31 }
  0x43   : > { %1361 = vmatmul.mubr.msk.bf16.gmra.mrb[24].mxu0 %vm446_vm2, %v1450_v32  ;;  %1397 = vmatmul.mubr.msk.bf16.gmra.mrb[24].mxu1 %vm446_vm2, %v1452_v34 }
  0x44   : > { %1364 = vmatprep.mubr.msk.bf16.mxu0 %vm446_vm2, %v1453_v33  ;;  %1400 = vmatprep.mubr.msk.bf16.mxu1 %vm446_vm2, %v1455_v35 }
  0x4b   : > { %1365 = vmatmul.mubr.msk.bf16.gmra.mrb[28].mxu0 %vm446_vm2, %v1454_v36  ;;  %1401 = vmatmul.mubr.msk.bf16.gmra.mrb[28].mxu1 %vm446_vm2, %v1456_v38 }
  0x4c   : > { %1368 = vmatprep.mubr.msk.bf16.mxu0 %vm446_vm2, %v1457_v37  ;;  %1404 = vmatprep.mubr.msk.bf16.mxu1 %vm446_vm2, %v1459_v39 }
  0x53   : > { %1369 = vmatmul.mubr.msk.bf16.gmra.mrb[32].mxu0 %vm446_vm2, %v1458_v40  ;;  %1405 = vmatmul.mubr.msk.bf16.gmra.mrb[32].mxu1 %vm446_vm2, %v1460_v41 }
  0xe6   : > { %v1338_v42 = vpop.f32.mrb[0].mxu0  ;;  %v1374_v44 = vpop.f32.mrb[0].mxu1 }
  0xe7   : > { %v596_v43 = vpop.f32.mrb[1].mxu0  ;;  %v740_v46 = vpop.f32.mrb[1].mxu1  ;;  %v605_v63 = vadd.f32 %v1338_v42, %v1587_v58  ;;  %v749_v3 = vadd.f32 %v1374_v44, %v1587_v58 }
  0xe8   : > { %v1339_v45 = vpop.f32.mrb[2].mxu0  ;;  %v1375_v48 = vpop.f32.mrb[2].mxu1  ;;  %v597_v2 = vadd.f32 %v1587_v58, %v596_v43  ;;  %v741_v5 = vadd.f32 %v1587_v58, %v740_v46 }
  0xe9   : > { %v599_v47 = vpop.f32.mrb[3].mxu0  ;;  %v743_v49 = vpop.f32.mrb[3].mxu1  ;;  %v608_v4 = vadd.f32 %v1339_v45, %v1587_v58  ;;  %v752_v8 = vadd.f32 %v1375_v48, %v1587_v58  ;;  %v1599_v12 = vsel %vm883_vm3, %v605_v63, -inf  ;;  %v1605_v14 = vsel %vm883_vm3, %v749_v3, -inf }
  0xea   : > { %v600_v7 = vadd.f32 %v1587_v58, %v599_v47  ;;  %v744_v9 = vadd.f32 %v1587_v58, %v743_v49  ;;  %v1602_v13 = vsel %vm883_vm3, %v597_v2, -inf  ;;  %v1611_v16 = vsel %vm883_vm3, %v741_v5, -inf }
  0xeb   : > { %v1608_v15 = vsel %vm883_vm3, %v608_v4, -inf  ;;  %v1617_v19 = vsel %vm883_vm3, %v752_v8, -inf }
  0xec   : > { %v1614_v18 = vsel %vm883_vm3, %v600_v7, -inf  ;;  %v1620_v20 = vsel %vm883_vm3, %v744_v9, -inf }
  0xee   : > { %v1342_v50 = vpop.f32.mrb[4].mxu0  ;;  %v1378_v52 = vpop.f32.mrb[4].mxu1 }
  0xef   : > { %v612_v51 = vpop.f32.mrb[5].mxu0  ;;  %v756_v54 = vpop.f32.mrb[5].mxu1  ;;  %v621_v11 = vadd.f32 %v1342_v50, %v1587_v58  ;;  %v765_v24 = vadd.f32 %v1378_v52, %v1587_v58 }
  0xf0   : > { %v1343_v53 = vpop.f32.mrb[6].mxu0  ;;  %v1379_v56 = vpop.f32.mrb[6].mxu1  ;;  %v613_v21 = vadd.f32 %v1587_v58, %v612_v51  ;;  %v757_v26 = vadd.f32 %v1587_v58, %v756_v54 }
  0xf1   : > { %v615_v55 = vpop.f32.mrb[7].mxu0  ;;  %v759_v57 = vpop.f32.mrb[7].mxu1  ;;  %v1624_v23 = vsel %vm883_vm3, %v621_v11, -inf  ;;  %v624_v25 = vadd.f32 %v1343_v53, %v1587_v58  ;;  %v768_v30 = vadd.f32 %v1379_v56, %v1587_v58  ;;  %v1644_v45 = vsel %vm883_vm3, %v765_v24, -inf }
  0xf2   : > { %v616_v29 = vadd.f32 %v1587_v58, %v615_v55  ;;  %v760_v31 = vadd.f32 %v1587_v58, %v759_v57  ;;  %v1638_v40 = vsel %vm883_vm3, %v613_v21, -inf  ;;  %v1650_v47 = vsel %vm883_vm3, %v757_v26, -inf }
  0xf3   : > { %v1647_v46 = vsel %vm883_vm3, %v624_v25, -inf  ;;  %v1657_v50 = vsel %vm883_vm3, %v768_v30, -inf }
  0xf4   : > { %v1654_v49 = vsel %vm883_vm3, %v616_v29, -inf  ;;  %v1660_v51 = vsel %vm883_vm3, %v760_v31, -inf }
  0xf6   : > { %v1346_v59 = vpop.f32.mrb[8].mxu0  ;;  %v1382_v61 = vpop.f32.mrb[8].mxu1 }
  0xf7   : > { %v628_v60 = vpop.f32.mrb[9].mxu0  ;;  %v772_v0 = vpop.f32.mrb[9].mxu1  ;;  %v637_v32 = vadd.f32 %v1346_v59, %v1587_v58  ;;  %v781_v36 = vadd.f32 %v1382_v61, %v1587_v58 }
  0xf8   : > { %v1347_v62 = vpop.f32.mrb[10].mxu0  ;;  %v1383_v6 = vpop.f32.mrb[10].mxu1  ;;  %v629_v35 = vadd.f32 %v1587_v58, %v628_v60  ;;  %v773_v38 = vadd.f32 %v1587_v58, %v772_v0 }
  0xf9   : > { %v631_v1 = vpop.f32.mrb[11].mxu0  ;;  %v775_v10 = vpop.f32.mrb[11].mxu1  ;;  %v640_v37 = vadd.f32 %v1347_v62, %v1587_v58  ;;  %v784_v42 = vadd.f32 %v1383_v6, %v1587_v58  ;;  %v1663_v52 = vsel %vm883_vm3, %v637_v32, -inf  ;;  %v1669_v54 = vsel %vm883_vm3, %v781_v36, -inf }
  0xfa   : > { %v632_v41 = vadd.f32 %v1587_v58, %v631_v1  ;;  %v776_v43 = vadd.f32 %v1587_v58, %v775_v10  ;;  %v1666_v53 = vsel %vm883_vm3, %v629_v35, -inf  ;;  %v1675_v56 = vsel %vm883_vm3, %v773_v38, -inf }
  0xfb   : > { %v1672_v55 = vsel %vm883_vm3, %v640_v37, -inf  ;;  %v1681_v60 = vsel %vm883_vm3, %v784_v42, -inf }
  0xfc   : > { %v1678_v59 = vsel %vm883_vm3, %v632_v41, -inf  ;;  %v1684_v61 = vsel %vm883_vm3, %v776_v43, -inf }
  0xfe   : > { %v1350_v17 = vpop.f32.mrb[12].mxu0  ;;  %v1386_v27 = vpop.f32.mrb[12].mxu1 }
  0xff   : > { %v644_v22 = vpop.f32.mrb[13].mxu0  ;;  %v788_v33 = vpop.f32.mrb[13].mxu1  ;;  %v653_v48 = vadd.f32 %v1350_v17, %v1587_v58  ;;  %v797_v2 = vadd.f32 %v1386_v27, %v1587_v58 }
 0x100   : > { %v1351_v28 = vpop.f32.mrb[14].mxu0  ;;  %v1387_v39 = vpop.f32.mrb[14].mxu1  ;;  %v645_v1 = vadd.f32 %v1587_v58, %v644_v22  ;;  %v789_v6 = vadd.f32 %v1587_v58, %v788_v33 }
 0x101   : > { %v647_v34 = vpop.f32.mrb[15].mxu0  ;;  %v791_v44 = vpop.f32.mrb[15].mxu1  ;;  %v1688_v0 = vsel %vm883_vm3, %v653_v48, -inf  ;;  %v656_v3 = vadd.f32 %v1351_v28, %v1587_v58  ;;  %v1721_v37 = vadd.f32 %v1387_v39, %v1587_v58 }
 0x102   : > { %v648_v17 = vadd.f32 %v1587_v58, %v647_v34  ;;  %v792_v21 = vadd.f32 %v1587_v58, %v791_v44  ;;  %v1706_v31 = vsel %vm883_vm3, %v645_v1, -inf  ;;  %v1712_v34 = vsel %vm883_vm3, %v797_v2, -inf }
 0x103   : > { %v1715_v35 = vsel %vm883_vm3, %v656_v3, -inf  ;;  %v1718_v36 = vsel %vm883_vm3, %v789_v6, -inf }
 0x104   : > { %v1725_v38 = vsel %vm883_vm3, %v648_v17, -inf }
 0x106   : > { %v1354_v57 = vpop.f32.mrb[16].mxu0  ;;  %v1390_v4 = vpop.f32.mrb[16].mxu1 }
 0x107   : > { %v669_v62 = vadd.f32 %v1354_v57, %v1587_v58  ;;  %v660_v63 = vpop.f32.mrb[17].mxu0  ;;  %v813_v8 = vadd.f32 %v1390_v4, %v1587_v58  ;;  %v804_v10 = vpop.f32.mrb[17].mxu1 }
 0x108   : > { %v1355_v5 = vpop.f32.mrb[18].mxu0  ;;  %v661_v24 = vadd.f32 %v1587_v58, %v660_v63  ;;  %v1391_v25 = vpop.f32.mrb[18].mxu1  ;;  %v805_v28 = vadd.f32 %v1587_v58, %v804_v10 }
 0x109   : > { %v885_v7 = vsel %vm883_vm3, %v669_v62, -inf  ;;  %v672_v9 = vadd.f32 %v1355_v5, %v1587_v58  ;;  %v663_v11 = vpop.f32.mrb[19].mxu0  ;;  %v889_v26 = vsel %vm883_vm3, %v813_v8, -inf  ;;  %v816_v29 = vadd.f32 %v1391_v25, %v1587_v58  ;;  %v807_v30 = vpop.f32.mrb[19].mxu1 }
 0x10a   : > { %v886_v22 = vmax.f32 %v1602_v13, %v885_v7  ;;  %v664_v33 = vadd.f32 %v1587_v58, %v663_v11  ;;  %v1732_v43 = vsel %vm883_vm3, %v661_v24, -inf  ;;  %v1735_v44 = vsel %vm883_vm3, %v805_v28, -inf }
 0x10b   : > { %v892_v27 = vsel %vm883_vm3, %v672_v9, -inf  ;;  %v896_v39 = vsel %vm883_vm3, %v816_v29, -inf  ;;  %v808_v4 = vadd.f32 %v1587_v58, %v807_v30 }
 0x10c   : > { %v888_v32 = vmax.f32 %v886_v22, %v1611_v16  ;;  %v893_v13 = vmax.f32 %v1614_v18, %v892_v27  ;;  %v1728_v16 = vsel %vm883_vm3, %v792_v21, -inf  ;;  %v1740_v63 = vsel %vm883_vm3, %v664_v33, -inf }
 0x10e   : > { %v890_v18 = vmax.f32 %v888_v32, %v889_v26  ;;  %v895_v41 = vmax.f32 %v893_v13, %v1620_v20  ;;  %v1358_v42 = vpop.f32.mrb[20].mxu0  ;;  %v1394_v20 = vpop.f32.mrb[20].mxu1 }
 0x10f   : > { %v685_v48 = vadd.f32 %v1358_v42, %v1587_v58  ;;  %v676_v57 = vpop.f32.mrb[21].mxu0  ;;  %v829_v6 = vadd.f32 %v1394_v20, %v1587_v58  ;;  %v820_v8 = vpop.f32.mrb[21].mxu1 }
 0x110   : > { %v1010_v62 = vmax.f32 %v890_v18, 0.0  ;;  %v897_v1 = vmax.f32 %v895_v41, %v896_v39  ;;  %v677_v2 = vadd.f32 %v1587_v58, %v676_v57  ;;  %v1359_v3 = vpop.f32.mrb[22].mxu0  ;;  %v1395_v22 = vpop.f32.mrb[22].mxu1  ;;  %v821_v27 = vadd.f32 %v1587_v58, %v820_v8 }
 0x111   : > { %v913_v5 = vsel %vm883_vm3, %v685_v48, -inf  ;;  %v688_v7 = vadd.f32 %v1359_v3, %v1587_v58  ;;  %v679_v9 = vpop.f32.mrb[23].mxu0  ;;  %v917_v25 = vsel %vm883_vm3, %v829_v6, -inf  ;;  %v823_v28 = vpop.f32.mrb[23].mxu1  ;;  %v832_v33 = vadd.f32 %v1395_v22, %v1587_v58 }
 0x112   : > { %v1276_v10 = vpack.c.bf16 %v1010_v62, %v1010_v62  ;;  %v1011_v11 = vmax.f32 %v897_v1, 0.0  ;;  %v914_v17 = vmax.f32 %v1638_v40, %v913_v5  ;;  %v899_v21 = vsel %vm883_vm3, %v677_v2, -inf }
 0x113   : > { %v900_v24 = vmax.f32 %v1599_v12, %v899_v21  ;;  %v920_v26 = vsel %vm883_vm3, %v688_v7, -inf  ;;  %v680_v32 = vadd.f32 %v1587_v58, %v679_v9  ;;  %v903_v12 = vsel %vm883_vm3, %v821_v27, -inf }
 0x114   : > { %1101 = vst.msk [vmem:[%s1746_s27] sm:$0xf] %vm1100_vm4, %v1276_v10  ;;  %v1277_v29 = vpack.c.bf16 %v1011_v11, %v1011_v11  ;;  %v916_v30 = vmax.f32 %v914_v17, %v1650_v47  ;;  %v921_v40 = vmax.f32 %v1654_v49, %v920_v26  ;;  %v824_v18 = vadd.f32 %v1587_v58, %v823_v28 }
 0x115   : > { %v902_v13 = vmax.f32 %v900_v24, %v1605_v14  ;;  %v1770_v41 = vsel %vm883_vm3, %v808_v4, -inf  ;;  %v906_v47 = vsel %vm883_vm3, %v680_v32, -inf  ;;  %v924_v57 = vsel %vm883_vm3, %v832_v33, -inf }
 0x116   : > { %1102 = vst.msk [vmem:[%s1746_s27 + $0x4] sm:$0xf] %vm1100_vm4, %v1277_v29  ;;  %v918_v42 = vmax.f32 %v916_v30, %v917_v25  ;;  %v923_v49 = vmax.f32 %v921_v40, %v1660_v51  ;;  %v1362_v39 = vpop.f32.mrb[24].mxu0  ;;  %v907_v14 = vmax.f32 %v1608_v15, %v906_v47  ;;  %v910_v62 = vsel %vm883_vm3, %v824_v18, -inf  ;;  %v1398_v5 = vpop.f32.mrb[24].mxu1 }
 0x117   : > { %v904_v48 = vmax.f32 %v902_v13, %v903_v12  ;;  %v692_v1 = vpop.f32.mrb[25].mxu0  ;;  %v701_v3 = vadd.f32 %v1362_v39, %v1587_v58  ;;  %v845_v8 = vadd.f32 %v1398_v5, %v1587_v58  ;;  %v836_v9 = vpop.f32.mrb[25].mxu1 }
 0x118   : > { %v1014_v2 = vmax.f32 %v918_v42, 0.0  ;;  %v925_v20 = vmax.f32 %v923_v49, %v924_v57  ;;  %v693_v4 = vadd.f32 %v1587_v58, %v692_v1  ;;  %v1363_v6 = vpop.f32.mrb[26].mxu0  ;;  %v909_v51 = vmax.f32 %v907_v14, %v1617_v19  ;;  %v1399_v24 = vpop.f32.mrb[26].mxu1 }
 0x119   : > { %v1012_v7 = vmax.f32 %v904_v48, 0.0  ;;  %v704_v15 = vadd.f32 %v1363_v6, %v1587_v58  ;;  %v695_v10 = vpop.f32.mrb[27].mxu0  ;;  %v941_v21 = vsel %vm883_vm3, %v701_v3, -inf  ;;  %v839_v28 = vpop.f32.mrb[27].mxu1  ;;  %v945_v30 = vsel %vm883_vm3, %v845_v8, -inf }
 0x11a   : > { %v1280_v11 = vpack.c.bf16 %v1014_v2, %v1014_v2  ;;  %v1015_v17 = vmax.f32 %v925_v20, 0.0  ;;  %v927_v22 = vsel %vm883_vm3, %v693_v4, -inf  ;;  %v911_v26 = vmax.f32 %v909_v51, %v910_v62 }
 0x11b   : > { %v1278_v25 = vpack.c.bf16 %v1012_v7, %v1012_v7  ;;  %v942_v27 = vmax.f32 %v1666_v53, %v941_v21  ;;  %v928_v19 = vmax.f32 %v1624_v23, %v927_v22  ;;  %v948_v40 = vsel %vm883_vm3, %v704_v15, -inf }
 0x11c   : > { %1105 = vst.msk [vmem:[%s1746_s27 + $0x10] sm:$0xf] %vm1100_vm4, %v1280_v11  ;;  %v1281_v29 = vpack.c.bf16 %v1015_v17, %v1015_v17  ;;  %v837_v32 = vadd.f32 %v1587_v58, %v836_v9  ;;  %v1013_v13 = vmax.f32 %v911_v26, 0.0  ;;  %v949_v33 = vmax.f32 %v1678_v59, %v948_v40 }
 0x11d   : > { %1103 = vst.msk [vmem:[%s1746_s27 + $0x8] sm:$0xf] %vm1100_vm4, %v1278_v25  ;;  %v944_v12 = vmax.f32 %v942_v27, %v1675_v56  ;;  %v930_v53 = vmax.f32 %v928_v19, %v1644_v45  ;;  %v696_v18 = vadd.f32 %v1587_v58, %v695_v10  ;;  %v848_v42 = vadd.f32 %v1399_v24, %v1587_v58 }
 0x11e   : > { %1106 = vst.msk [vmem:[%s1746_s27 + $0x14] sm:$0xf] %vm1100_vm4, %v1281_v29  ;;  %v931_v23 = vsel %vm883_vm3, %v837_v32, -inf  ;;  %v840_v47 = vadd.f32 %v1587_v58, %v839_v28  ;;  %v1366_v49 = vpop.f32.mrb[28].mxu0  ;;  %v1279_v39 = vpack.c.bf16 %v1013_v13, %v1013_v13  ;;  %v951_v56 = vmax.f32 %v949_v33, %v1684_v61  ;;  %v1402_v2 = vpop.f32.mrb[28].mxu1 }
 0x11f   : > { %v946_v48 = vmax.f32 %v944_v12, %v945_v30  ;;  %v932_v14 = vmax.f32 %v930_v53, %v931_v23  ;;  %v708_v59 = vpop.f32.mrb[29].mxu0  ;;  %v934_v45 = vsel %vm883_vm3, %v696_v18, -inf  ;;  %v952_v57 = vsel %vm883_vm3, %v848_v42, -inf  ;;  %v852_v7 = vpop.f32.mrb[29].mxu1 }
 0x120   : > { %v938_v62 = vsel %vm883_vm3, %v840_v47, -inf  ;;  %v717_v1 = vadd.f32 %v1366_v49, %v1587_v58  ;;  %v1367_v20 = vpop.f32.mrb[30].mxu0  ;;  %1104 = vst.msk [vmem:[%s1746_s27 + $0xc] sm:$0xf] %vm1100_vm4, %v1279_v39  ;;  %v935_v5 = vmax.f32 %v1647_v46, %v934_v45  ;;  %v953_v6 = vmax.f32 %v951_v56, %v952_v57  ;;  %v1403_v10 = vpop.f32.mrb[30].mxu1 }
 0x121   : > { %v1018_v3 = vmax.f32 %v946_v48, 0.0  ;;  %v1016_v4 = vmax.f32 %v932_v14, 0.0  ;;  %v711_v61 = vpop.f32.mrb[31].mxu0  ;;  %v709_v8 = vadd.f32 %v1587_v58, %v708_v59  ;;  %v861_v15 = vadd.f32 %v1402_v2, %v1587_v58  ;;  %v855_v46 = vpop.f32.mrb[31].mxu1 }
 0x122   : > { %v969_v51 = vsel %vm883_vm3, %v717_v1, -inf  ;;  %v720_v9 = vadd.f32 %v1367_v20, %v1587_v58  ;;  %v1019_v21 = vmax.f32 %v953_v6, 0.0  ;;  %v937_v22 = vmax.f32 %v935_v5, %v1657_v50 }
 0x123   : > { %v1284_v11 = vpack.c.bf16 %v1018_v3, %v1018_v3  ;;  %v1282_v17 = vpack.c.bf16 %v1016_v4, %v1016_v4  ;;  %v970_v24 = vmax.f32 %v1706_v31, %v969_v51  ;;  %v955_v25 = vsel %vm883_vm3, %v709_v8, -inf }
 0x124   : > { %v973_v26 = vsel %vm883_vm3, %v861_v15, -inf  ;;  %v976_v27 = vsel %vm883_vm3, %v720_v9, -inf  ;;  %v1285_v19 = vpack.c.bf16 %v1019_v21, %v1019_v21  ;;  %v939_v28 = vmax.f32 %v937_v22, %v938_v62 }
 0x125   : > { %1109 = vst.msk [vmem:[%s1746_s27 + $0x20] sm:$0xf] %vm1100_vm4, %v1284_v11  ;;  %1107 = vst.msk [vmem:[%s1746_s27 + $0x18] sm:$0xf] %vm1100_vm4, %v1282_v17  ;;  %v956_v29 = vmax.f32 %v1663_v52, %v955_v25  ;;  %v977_v50 = vmax.f32 %v1725_v38, %v976_v27  ;;  %v972_v30 = vmax.f32 %v970_v24, %v1718_v36 }
 0x126   : > { %v853_v31 = vadd.f32 %v1587_v58, %v852_v7  ;;  %v712_v40 = vadd.f32 %v1587_v58, %v711_v61  ;;  %v864_v32 = vadd.f32 %v1403_v10, %v1587_v58  ;;  %v1370_v13 = vpop.f32.mrb[32].mxu0  ;;  %1110 = vst.msk [vmem:[%s1746_s27 + $0x24] sm:$0xf] %vm1100_vm4, %v1285_v19  ;;  %v1017_v12 = vmax.f32 %v939_v28, 0.0  ;;  %v1406_v47 = vpop.f32.mrb[32].mxu1 }
 0x127   : > { %v958_v33 = vmax.f32 %v956_v29, %v1669_v54  ;;  %v979_v53 = vmax.f32 %v977_v50, %v1728_v16  ;;  %v856_v52 = vadd.f32 %v1587_v58, %v855_v46  ;;  %v724_v23 = vpop.f32.mrb[33].mxu0  ;;  %v974_v38 = vmax.f32 %v972_v30, %v973_v26  ;;  %v868_v56 = vpop.f32.mrb[33].mxu1 }
 0x128   : > { %v959_v36 = vsel %vm883_vm3, %v853_v31, -inf  ;;  %v962_v18 = vsel %vm883_vm3, %v712_v40, -inf  ;;  %v980_v42 = vsel %vm883_vm3, %v864_v32, -inf  ;;  %v1371_v49 = vpop.f32.mrb[34].mxu0  ;;  %v1283_v39 = vpack.c.bf16 %v1017_v12, %v1017_v12  ;;  %v1407_v1 = vpop.f32.mrb[34].mxu1 }
 0x129   : > { %v960_v48 = vmax.f32 %v958_v33, %v959_v36  ;;  %v963_v14 = vmax.f32 %v1672_v55, %v962_v18  ;;  %v981_v54 = vmax.f32 %v979_v53, %v980_v42  ;;  %v727_v16 = vpop.f32.mrb[35].mxu0  ;;  %v1022_v59 = vmax.f32 %v974_v38, 0.0  ;;  %v871_v4 = vpop.f32.mrb[35].mxu1 }
 0x12a   : > { %v966_v45 = vsel %vm883_vm3, %v856_v52, -inf  ;;  %v733_v57 = vadd.f32 %v1370_v13, %v1587_v58  ;;  %v725_v62 = vadd.f32 %v1587_v58, %v724_v23  ;;  %1108 = vst.msk [vmem:[%s1746_s27 + $0x1c] sm:$0xf] %vm1100_vm4, %v1283_v39  ;;  %v877_v55 = vadd.f32 %v1406_v47, %v1587_v58 }
 0x12b   : > { %v1020_v2 = vmax.f32 %v960_v48, 0.0  ;;  %v1023_v20 = vmax.f32 %v981_v54, 0.0  ;;  %v965_v3 = vmax.f32 %v963_v14, %v1681_v60  ;;  %v1288_v5 = vpack.c.bf16 %v1022_v59, %v1022_v59 }
 0x12c   : > { %v997_v6 = vsel %vm883_vm3, %v733_v57, -inf  ;;  %v983_v7 = vsel %vm883_vm3, %v725_v62, -inf  ;;  %v736_v61 = vadd.f32 %v1371_v49, %v1587_v58  ;;  %v1001_v10 = vsel %vm883_vm3, %v877_v55, -inf }
 0x12d   : > { %v1286_v51 = vpack.c.bf16 %v1020_v2, %v1020_v2  ;;  %v1289_v8 = vpack.c.bf16 %v1023_v20, %v1023_v20  ;;  %v967_v15 = vmax.f32 %v965_v3, %v966_v45  ;;  %v998_v9 = vmax.f32 %v1732_v43, %v997_v6  ;;  %1113 = vst.msk [vmem:[%s1746_s27 + $0x30] sm:$0xf] %vm1100_vm4, %v1288_v5 }
 0x12e   : > { %v984_v60 = vmax.f32 %v1688_v0, %v983_v7  ;;  %v1004_v11 = vsel %vm883_vm3, %v736_v61, -inf  ;;  %v869_v17 = vadd.f32 %v1587_v58, %v868_v56  ;;  %v728_v46 = vadd.f32 %v1587_v58, %v727_v16 }
 0x12f   : > { %1111 = vst.msk [vmem:[%s1746_s27 + $0x28] sm:$0xf] %vm1100_vm4, %v1286_v51  ;;  %1114 = vst.msk [vmem:[%s1746_s27 + $0x34] sm:$0xf] %vm1100_vm4, %v1289_v8  ;;  %v1021_v21 = vmax.f32 %v967_v15, 0.0  ;;  %v1000_v22 = vmax.f32 %v998_v9, %v1735_v44  ;;  %v1005_v43 = vmax.f32 %v1740_v63, %v1004_v11  ;;  %v880_v25 = vadd.f32 %v1407_v1, %v1587_v58 }
 0x130   : > { %v986_v0 = vmax.f32 %v984_v60, %v1712_v34  ;;  %v987_v24 = vsel %vm883_vm3, %v869_v17, -inf  ;;  %v872_v26 = vadd.f32 %v1587_v58, %v871_v4  ;;  %v990_v28 = vsel %vm883_vm3, %v728_v46, -inf }
 0x131   : > { %v1287_v27 = vpack.c.bf16 %v1021_v21, %v1021_v21  ;;  %v1002_v19 = vmax.f32 %v1000_v22, %v1001_v10  ;;  %v1007_v29 = vmax.f32 %v1005_v43, %v1770_v41  ;;  %v991_v63 = vmax.f32 %v1715_v35, %v990_v28 }
 0x132   : > { %v988_v44 = vmax.f32 %v986_v0, %v987_v24  ;;  %v1008_v50 = vsel %vm883_vm3, %v880_v25, -inf  ;;  %v992_v34 = vsel %vm883_vm3, %v1721_v37, -inf  ;;  %v994_v41 = vsel %vm883_vm3, %v872_v26, -inf }
 0x133   : > { %1112 = vst.msk [vmem:[%s1746_s27 + $0x2c] sm:$0xf] %vm1100_vm4, %v1287_v27  ;;  %v1026_v58 = vmax.f32 %v1002_v19, 0.0  ;;  %v1009_v30 = vmax.f32 %v1007_v29, %v1008_v50  ;;  %v993_v40 = vmax.f32 %v991_v63, %v992_v34 }
 0x134   : > { %v1024_v31 = vmax.f32 %v988_v44, 0.0 }
 0x135   : > { %v1292_v32 = vpack.c.bf16 %v1026_v58, %v1026_v58  ;;  %v1027_v13 = vmax.f32 %v1009_v30, 0.0  ;;  %v995_v33 = vmax.f32 %v993_v40, %v994_v41 }
 0x136   : > { %v1290_v12 = vpack.c.bf16 %v1024_v31, %v1024_v31 }
 0x137   : > { %1117 = vst.msk [vmem:[%s1746_s27 + $0x40] sm:$0xf] %vm1100_vm4, %v1292_v32  ;;  %v1293_v35 = vpack.c.bf16 %v1027_v13, %v1027_v13  ;;  %v1025_v53 = vmax.f32 %v995_v33, 0.0 }
 0x138   : > { %1115 = vst.msk [vmem:[%s1746_s27 + $0x38] sm:$0xf] %vm1100_vm4, %v1290_v12 }
 0x139   : > { %1118 = vst.msk [vmem:[%s1746_s27 + $0x44] sm:$0xf] %vm1100_vm4, %v1293_v35  ;;  %v1291_v37 = vpack.c.bf16 %v1025_v53, %v1025_v53 }
 0x13b   : > { %1116 = vst.msk [vmem:[%s1746_s27 + $0x3c] sm:$0xf] %vm1100_vm4, %v1291_v37 }
 0x13c PF: > { %s13_s12 = sadd.s32 1, %s1467_s12  }
 0x13d   : > { %p10_p4 = scmp.ge.s32.totalorder %s13_s12, 4  }
 0x13f   :  { %12 = sbr.rel (!%p10_p4) target bundleno = 1 (0x1), region = 62 }

// kernel: feature_extractor_forward.4
= control target key start
LH: loop header
LB: loop body
LE: loop exit
PB: predicated region body
PF: predicated region fallthrough
CT: control target
= control target key end

     0   :  { %s1604_s12 = smov 0   ;;  %s2033_s0 = inlined_call_operand.vmem [shape: bf16[2,4,144,25], index: 0, kind: input, shape index: {}]   ;;  %s2034_s1 = inlined_call_operand.vmem [shape: bf16[25,64], index: 1, kind: input, shape index: {}]   ;;  %s2035_s2 = inlined_call_operand.vmem [shape: f32[2,1,64], index: 2, kind: output, shape index: {0}]   ;;  %s2036_s3 = inlined_call_operand.vmem [shape: f32[2,1,64], index: 3, kind: output, shape index: {1}]  }
   0x1 LB: > { %s1327_s13 = sadd.s32 4294967295, %s1581_s12   ;;  %p1331_p0 = scmp.ge.s32.totalorder %s1581_s12, 1  ;;  %s1581_s12 = sphi %s1604_s12, %s14_s12  }
   0x2   : > { %p140_p1 = scmp.lt.s32.totalorder %s1581_s12, 3 }
   0x4   : > { %p141_p2 = pnand %p1331_p0, %p140_p1 }
   0x5   : > { %v1537_v0 = vld [vmem:[%s2034_s1] sm:$0xff] (!%p141_p2)   ;;  %vm553_vm0 = vcmask (!%p141_p2), 1043456   ;;  %v1538_v1 = vld [vmem:[%s2034_s1 + $0x8] sm:$0x1f] (!%p141_p2)   ;;  %vm554_vm1 = vcmask (!%p141_p2), 1044480   ;;  %p165_p3 = scmp.lt.s32.totalorder (!%p141_p2), %s1327_s13, 1 }
   0x6   : > { %144 = sbr.rel (%p141_p2) target bundleno = 392 (0x188), region = 28  ;;  %1447 = vmatprep.subr.bf16.mxu0 (!%p141_p2), %v1537_v0  ;;  %1523 = vmatprep.subr.bf16.mxu1 (!%p141_p2), %v1537_v0  ;;  %v1583_v2 = vmov (!%p141_p2), 65535   ;;  %vm444_vm2 = vcmask (!%p141_p2), 203776   ;;  %vm881_vm3 = vcmask (!%p141_p2), 523264   ;;  %vm1031_vm4 = vcmask (!%p141_p2), 516096  }
   0x7   : > { %1448 = vmatpush3.bf16.msra.mxu0 (!%p141_p2), %v1537_v0  ;;  %v555_v3 = vsel (!%p141_p2), %vm553_vm0, 4294967295, %v1583_v2  ;;  %1525 = vmatpush3.bf16.msra.mxu1 (!%p141_p2), %v1537_v0 }
   0x8   : > { %v556_v4 = vsel (!%p141_p2), %vm554_vm1, %v555_v3, 0 }
   0x9   : > { %v558_v5 = vand.u32 (!%p141_p2), %v1538_v1, %v556_v4 }
   0xb   : > { %1449 = vmatprep.subr.bf16.mxu0 (!%p141_p2), %v558_v5  ;;  %1524 = vmatprep.subr.bf16.mxu1 (!%p141_p2), %v558_v5 }
   0xc   : > { %1450 = vmatpush3.bf16.msra.mxu0 (!%p141_p2), %v558_v5  ;;  %1526 = vmatpush3.bf16.msra.mxu1 (!%p141_p2), %v558_v5 }
   0xd   : > { %s2038_s13 = smov (!%p165_p3, %s1327_s13), 1 }
   0xe   : > { %s1527_s18 = smul.u32 288, %s2038_s13  ;;  %s172_s24 = scalar_lea.vmem %s2035_s2, %s2038_s13 }
   0xf   : > { %s175_s27 = scalar_lea.vmem %s2036_s3, %s2038_s13 }
  0x10   : > { %s1624_s21 = scalar_lea.vmem %s2033_s0, %s1527_s18 }
  0x11   : > { %v1539_v6 = vld [vmem:[%s1624_s21] sm:$0xff]   ;;  %v1540_v7 = vld [vmem:[%s1624_s21 + $0x8] sm:$0xff]   ;;  %v1541_v8 = vld [vmem:[%s1624_s21 + $0x10] sm:$0xff]  }
  0x12   : > { %1451 = vmatprep.mubr.msk.bf16.mxu0 %vm444_vm2, %v1539_v6  ;;  %v1542_v9 = vld [vmem:[%s1624_s21 + $0x18] sm:$0xff]   ;;  %v1543_v10 = vld [vmem:[%s1624_s21 + $0x20] sm:$0xff]   ;;  %v1544_v11 = vld [vmem:[%s1624_s21 + $0x28] sm:$0xff]  }
  0x13   : > { %1452 = vmatmul.mubr.msk.bf16.vlgmr.msra.gmra.mrb[0].mxu0 %vm444_vm2, %v1540_v7  ;;  %v1545_v12 = vld [vmem:[%s1624_s21 + $0x30] sm:$0xff]   ;;  %v1558_v14 = vld [vmem:[%s1624_s21 + $0x98] sm:$0xff]   ;;  %v1559_v15 = vld [vmem:[%s1624_s21 + $0xa0] sm:$0xff]  }
  0x14   : > { %1455 = vmatprep.mubr.msk.bf16.mxu0 %vm444_vm2, %v1541_v8  ;;  %v1557_v13 = vld [vmem:[%s1624_s21 + $0x90] sm:$0xff]   ;;  %v1546_v16 = vld [vmem:[%s1624_s21 + $0x38] sm:$0xff]   ;;  %v1547_v17 = vld [vmem:[%s1624_s21 + $0x40] sm:$0xff]  }
  0x15   : > { %1487 = vmatprep.mubr.msk.bf16.mxu1 %vm444_vm2, %v1557_v13  ;;  %v1560_v18 = vld [vmem:[%s1624_s21 + $0xa8] sm:$0xff]   ;;  %v1561_v19 = vld [vmem:[%s1624_s21 + $0xb0] sm:$0xff]   ;;  %v1562_v22 = vld [vmem:[%s1624_s21 + $0xb8] sm:$0xff]  }
  0x16   : > { %1488 = vmatmul.mubr.msk.bf16.vlgmr.msra.gmra.mrb[0].mxu1 %vm444_vm2, %v1558_v14  ;;  %v1548_v20 = vld [vmem:[%s1624_s21 + $0x48] sm:$0xff]   ;;  %v1549_v21 = vld [vmem:[%s1624_s21 + $0x50] sm:$0xff]   ;;  %v1563_v23 = vld [vmem:[%s1624_s21 + $0xc0] sm:$0xff]  }
  0x17   : > { %1491 = vmatprep.mubr.msk.bf16.mxu1 %vm444_vm2, %v1559_v15  ;;  %v1550_v24 = vld [vmem:[%s1624_s21 + $0x58] sm:$0xff]   ;;  %v1551_v25 = vld [vmem:[%s1624_s21 + $0x60] sm:$0xff]   ;;  %v1564_v26 = vld [vmem:[%s1624_s21 + $0xc8] sm:$0xff]  }
  0x18   : > { %v1565_v27 = vld [vmem:[%s1624_s21 + $0xd0] sm:$0xff]   ;;  %v1552_v28 = vld [vmem:[%s1624_s21 + $0x68] sm:$0xff]   ;;  %v1566_v30 = vld [vmem:[%s1624_s21 + $0xd8] sm:$0xff]  }
  0x19   : > { %v1553_v29 = vld [vmem:[%s1624_s21 + $0x70] sm:$0xff]   ;;  %v1567_v31 = vld [vmem:[%s1624_s21 + $0xe0] sm:$0xff]   ;;  %v1554_v32 = vld [vmem:[%s1624_s21 + $0x78] sm:$0xff]  }
  0x1a   : > { %v1555_v33 = vld [vmem:[%s1624_s21 + $0x80] sm:$0xff]   ;;  %v1568_v34 = vld [vmem:[%s1624_s21 + $0xe8] sm:$0xff]   ;;  %v1569_v35 = vld [vmem:[%s1624_s21 + $0xf0] sm:$0xff]  }
  0x1b   : > { %1456 = vmatmul.mubr.msk.bf16.gmra.mrb[4].mxu0 %vm444_vm2, %v1542_v9  ;;  %v1556_v36 = vld [vmem:[%s1624_s21 + $0x88] sm:$0xff]   ;;  %v1570_v37 = vld [vmem:[%s1624_s21 + $0xf8] sm:$0xff]   ;;  %v1571_v38 = vld [vmem:[%s1624_s21 + $0x100] sm:$0xff]  }
  0x1c   : > { %1459 = vmatprep.mubr.msk.bf16.mxu0 %vm444_vm2, %v1543_v10  ;;  %v1572_v39 = vld [vmem:[%s1624_s21 + $0x108] sm:$0xff]   ;;  %v1573_v40 = vld [vmem:[%s1624_s21 + $0x110] sm:$0xff]   ;;  %v1574_v41 = vld [vmem:[%s1624_s21 + $0x118] sm:$0xff]  }
  0x1e   : > { %1492 = vmatmul.mubr.msk.bf16.gmra.mrb[4].mxu1 %vm444_vm2, %v1560_v18 }
  0x1f   : > { %1495 = vmatprep.mubr.msk.bf16.mxu1 %vm444_vm2, %v1561_v19 }
  0x23   : > { %1460 = vmatmul.mubr.msk.bf16.gmra.mrb[8].mxu0 %vm444_vm2, %v1544_v11 }
  0x24   : > { %1463 = vmatprep.mubr.msk.bf16.mxu0 %vm444_vm2, %v1545_v12 }
  0x26   : > { %1496 = vmatmul.mubr.msk.bf16.gmra.mrb[8].mxu1 %vm444_vm2, %v1562_v22 }
  0x27   : > { %1499 = vmatprep.mubr.msk.bf16.mxu1 %vm444_vm2, %v1563_v23 }
  0x2b   : > { %1464 = vmatmul.mubr.msk.bf16.gmra.mrb[12].mxu0 %vm444_vm2, %v1546_v16 }
  0x2c   : > { %1467 = vmatprep.mubr.msk.bf16.mxu0 %vm444_vm2, %v1547_v17 }
  0x2e   : > { %1500 = vmatmul.mubr.msk.bf16.gmra.mrb[12].mxu1 %vm444_vm2, %v1564_v26 }
  0x2f   : > { %1503 = vmatprep.mubr.msk.bf16.mxu1 %vm444_vm2, %v1565_v27 }
  0x33   : > { %1468 = vmatmul.mubr.msk.bf16.gmra.mrb[16].mxu0 %vm444_vm2, %v1548_v20 }
  0x34   : > { %1471 = vmatprep.mubr.msk.bf16.mxu0 %vm444_vm2, %v1549_v21 }
  0x36   : > { %1504 = vmatmul.mubr.msk.bf16.gmra.mrb[16].mxu1 %vm444_vm2, %v1566_v30 }
  0x37   : > { %1507 = vmatprep.mubr.msk.bf16.mxu1 %vm444_vm2, %v1567_v31 }
  0x3b   : > { %1472 = vmatmul.mubr.msk.bf16.gmra.mrb[20].mxu0 %vm444_vm2, %v1550_v24 }
  0x3c   : > { %1475 = vmatprep.mubr.msk.bf16.mxu0 %vm444_vm2, %v1551_v25 }
  0x3e   : > { %1508 = vmatmul.mubr.msk.bf16.gmra.mrb[20].mxu1 %vm444_vm2, %v1568_v34 }
  0x3f   : > { %1511 = vmatprep.mubr.msk.bf16.mxu1 %vm444_vm2, %v1569_v35 }
  0x43   : > { %1476 = vmatmul.mubr.msk.bf16.gmra.mrb[24].mxu0 %vm444_vm2, %v1552_v28 }
  0x44   : > { %1479 = vmatprep.mubr.msk.bf16.mxu0 %vm444_vm2, %v1553_v29 }
  0x46   : > { %1512 = vmatmul.mubr.msk.bf16.gmra.mrb[24].mxu1 %vm444_vm2, %v1570_v37 }
  0x47   : > { %1515 = vmatprep.mubr.msk.bf16.mxu1 %vm444_vm2, %v1571_v38 }
  0x4b   : > { %1480 = vmatmul.mubr.msk.bf16.gmra.mrb[28].mxu0 %vm444_vm2, %v1554_v32 }
  0x4c   : > { %1483 = vmatprep.mubr.msk.bf16.mxu0 %vm444_vm2, %v1555_v33 }
  0x4e   : > { %1516 = vmatmul.mubr.msk.bf16.gmra.mrb[28].mxu1 %vm444_vm2, %v1572_v39 }
  0x4f   : > { %1519 = vmatprep.mubr.msk.bf16.mxu1 %vm444_vm2, %v1573_v40 }
  0x53   : > { %1484 = vmatmul.mubr.msk.bf16.gmra.mrb[32].mxu0 %vm444_vm2, %v1556_v36 }
  0x56   : > { %1520 = vmatmul.mubr.msk.bf16.gmra.mrb[32].mxu1 %vm444_vm2, %v1574_v41 }
  0xe6   : > { %v1453_v42 = vpop.f32.mrb[0].mxu0 }
  0xe7   : > { %v594_v43 = vpop.f32.mrb[1].mxu0  ;;  %v1035_v47 = vmul.f32 %v1453_v42, %v1453_v42  ;;  %v885_v52 = vsel %vm881_vm3, %v1453_v42, 0.0 }
  0xe8   : > { %v1033_v44 = vmul.f32 %v594_v43, %v594_v43  ;;  %v1454_v45 = vpop.f32.mrb[2].mxu0  ;;  %v882_v48 = vsel %vm881_vm3, %v594_v43, 0.0 }
  0xe9   : > { %v597_v46 = vpop.f32.mrb[3].mxu0  ;;  %v1036_v54 = vmul.f32 %v1454_v45, %v1454_v45  ;;  %v1108_v58 = vsel %vm881_vm3, %v1035_v47, 0.0  ;;  %v887_v59 = vsel %vm881_vm3, %v1454_v45, 0.0  ;;  %v1715_v28 = vpop.f32.mrb[0].mxu1 }
  0xea   : > { %v883_v49 = vsel %vm881_vm3, %v597_v46, 0.0  ;;  %v1034_v50 = vmul.f32 %v597_v46, %v597_v46  ;;  %v1105_v53 = vsel %vm881_vm3, %v1033_v44, 0.0  ;;  %v1717_v32 = vpop.f32.mrb[1].mxu1 }
  0xeb   : > { %v884_v51 = vadd.f32 %v883_v49, %v882_v48  ;;  %v1110_v0 = vsel %vm881_vm3, %v1036_v54, 0.0  ;;  %v1721_v37 = vpop.f32.mrb[2].mxu1 }
  0xec   : > { %v1106_v55 = vsel %vm881_vm3, %v1034_v50, 0.0  ;;  %v1723_v40 = vpop.f32.mrb[3].mxu1 }
  0xed   : > { %v886_v56 = vadd.f32 %v885_v52, %v884_v51  ;;  %v1107_v57 = vadd.f32 %v1106_v55, %v1105_v53 }
  0xee   : > { %v1457_v60 = vpop.f32.mrb[4].mxu0 }
  0xef   : > { %v1109_v61 = vadd.f32 %v1108_v58, %v1107_v57  ;;  %v610_v62 = vpop.f32.mrb[5].mxu0  ;;  %v888_v63 = vadd.f32 %v887_v59, %v886_v56  ;;  %v1039_v7 = vmul.f32 %v1457_v60, %v1457_v60  ;;  %v893_v13 = vsel %vm881_vm3, %v1457_v60, 0.0 }
  0xf0   : > { %v889_v1 = vsel %vm881_vm3, %v610_v62, 0.0  ;;  %v1037_v2 = vmul.f32 %v610_v62, %v610_v62  ;;  %v1458_v3 = vpop.f32.mrb[6].mxu0 }
  0xf1   : > { %v890_v4 = vadd.f32 %v889_v1, %v888_v63  ;;  %v1111_v5 = vadd.f32 %v1110_v0, %v1109_v61  ;;  %v613_v6 = vpop.f32.mrb[7].mxu0  ;;  %v1040_v14 = vmul.f32 %v1458_v3, %v1458_v3  ;;  %v1116_v18 = vsel %vm881_vm3, %v1039_v7, 0.0  ;;  %v1731_v56 = vpop.f32.mrb[4].mxu1 }
  0xf2   : > { %v1112_v8 = vsel %vm881_vm3, %v1037_v2, 0.0  ;;  %v891_v9 = vsel %vm881_vm3, %v613_v6, 0.0  ;;  %v1038_v10 = vmul.f32 %v613_v6, %v613_v6  ;;  %v895_v19 = vsel %vm881_vm3, %v1458_v3, 0.0  ;;  %v1733_v60 = vpop.f32.mrb[5].mxu1 }
  0xf3   : > { %v1113_v11 = vadd.f32 %v1112_v8, %v1111_v5  ;;  %v892_v12 = vadd.f32 %v891_v9, %v890_v4  ;;  %v1118_v24 = vsel %vm881_vm3, %v1040_v14, 0.0  ;;  %v1737_v1 = vpop.f32.mrb[6].mxu1 }
  0xf4   : > { %v1114_v15 = vsel %vm881_vm3, %v1038_v10, 0.0  ;;  %v1739_v4 = vpop.f32.mrb[7].mxu1 }
  0xf5   : > { %v894_v16 = vadd.f32 %v893_v13, %v892_v12  ;;  %v1115_v17 = vadd.f32 %v1114_v15, %v1113_v11 }
  0xf6   : > { %v1461_v20 = vpop.f32.mrb[8].mxu0 }
  0xf7   : > { %v1117_v21 = vadd.f32 %v1116_v18, %v1115_v17  ;;  %v626_v22 = vpop.f32.mrb[9].mxu0  ;;  %v896_v23 = vadd.f32 %v895_v19, %v894_v16  ;;  %v1043_v33 = vmul.f32 %v1461_v20, %v1461_v20  ;;  %v901_v41 = vsel %vm881_vm3, %v1461_v20, 0.0 }
  0xf8   : > { %v897_v25 = vsel %vm881_vm3, %v626_v22, 0.0  ;;  %v1041_v26 = vmul.f32 %v626_v22, %v626_v22  ;;  %v1462_v27 = vpop.f32.mrb[10].mxu0 }
  0xf9   : > { %v898_v29 = vadd.f32 %v897_v25, %v896_v23  ;;  %v1119_v30 = vadd.f32 %v1118_v24, %v1117_v21  ;;  %v629_v31 = vpop.f32.mrb[11].mxu0  ;;  %v1044_v42 = vmul.f32 %v1462_v27, %v1462_v27  ;;  %v1124_v46 = vsel %vm881_vm3, %v1043_v33, 0.0  ;;  %v1747_v20 = vpop.f32.mrb[8].mxu1 }
  0xfa   : > { %v1120_v34 = vsel %vm881_vm3, %v1041_v26, 0.0  ;;  %v899_v35 = vsel %vm881_vm3, %v629_v31, 0.0  ;;  %v1042_v36 = vmul.f32 %v629_v31, %v629_v31  ;;  %v903_v47 = vsel %vm881_vm3, %v1462_v27, 0.0  ;;  %v1749_v24 = vpop.f32.mrb[9].mxu1 }
  0xfb   : > { %v1121_v38 = vadd.f32 %v1120_v34, %v1119_v30  ;;  %v900_v39 = vadd.f32 %v899_v35, %v898_v29  ;;  %v1126_v52 = vsel %vm881_vm3, %v1044_v42, 0.0  ;;  %v1753_v30 = vpop.f32.mrb[10].mxu1 }
  0xfc   : > { %v1122_v43 = vsel %vm881_vm3, %v1042_v36, 0.0  ;;  %v1755_v34 = vpop.f32.mrb[11].mxu1 }
  0xfd   : > { %v902_v44 = vadd.f32 %v901_v41, %v900_v39  ;;  %v1123_v45 = vadd.f32 %v1122_v43, %v1121_v38 }
  0xfe   : > { %v1465_v48 = vpop.f32.mrb[12].mxu0 }
  0xff   : > { %v1125_v49 = vadd.f32 %v1124_v46, %v1123_v45  ;;  %v642_v50 = vpop.f32.mrb[13].mxu0  ;;  %v904_v51 = vadd.f32 %v903_v47, %v902_v44  ;;  %v1047_v61 = vmul.f32 %v1465_v48, %v1465_v48  ;;  %v909_v5 = vsel %vm881_vm3, %v1465_v48, 0.0 }
 0x100   : > { %v905_v53 = vsel %vm881_vm3, %v642_v50, 0.0  ;;  %v1045_v54 = vmul.f32 %v642_v50, %v642_v50  ;;  %v1466_v55 = vpop.f32.mrb[14].mxu0 }
 0x101   : > { %v906_v57 = vadd.f32 %v905_v53, %v904_v51  ;;  %v1127_v58 = vadd.f32 %v1126_v52, %v1125_v49  ;;  %v645_v59 = vpop.f32.mrb[15].mxu0  ;;  %v1048_v6 = vmul.f32 %v1466_v55, %v1466_v55  ;;  %v1132_v10 = vsel %vm881_vm3, %v1047_v61, 0.0  ;;  %v1763_v52 = vpop.f32.mrb[12].mxu1 }
 0x102   : > { %v1128_v62 = vsel %vm881_vm3, %v1045_v54, 0.0  ;;  %v907_v63 = vsel %vm881_vm3, %v645_v59, 0.0  ;;  %v1046_v0 = vmul.f32 %v645_v59, %v645_v59  ;;  %v911_v11 = vsel %vm881_vm3, %v1466_v55, 0.0 }
 0x103   : > { %v1129_v2 = vadd.f32 %v1128_v62, %v1127_v58  ;;  %v908_v3 = vadd.f32 %v907_v63, %v906_v57  ;;  %v1134_v16 = vsel %vm881_vm3, %v1048_v6, 0.0  ;;  %v1765_v57 = vpop.f32.mrb[13].mxu1 }
 0x104   : > { %v1130_v7 = vsel %vm881_vm3, %v1046_v0, 0.0  ;;  %v1769_v63 = vpop.f32.mrb[14].mxu1 }
 0x105   : > { %v910_v8 = vadd.f32 %v909_v5, %v908_v3  ;;  %v1131_v9 = vadd.f32 %v1130_v7, %v1129_v2  ;;  %v1771_v3 = vpop.f32.mrb[15].mxu1 }
 0x106   : > { %v1469_v12 = vpop.f32.mrb[16].mxu0 }
 0x107   : > { %v1133_v13 = vadd.f32 %v1132_v10, %v1131_v9  ;;  %v658_v14 = vpop.f32.mrb[17].mxu0  ;;  %v912_v15 = vadd.f32 %v911_v11, %v910_v8  ;;  %v1051_v25 = vmul.f32 %v1469_v12, %v1469_v12  ;;  %v917_v35 = vsel %vm881_vm3, %v1469_v12, 0.0 }
 0x108   : > { %v913_v17 = vsel %vm881_vm3, %v658_v14, 0.0  ;;  %v1049_v18 = vmul.f32 %v658_v14, %v658_v14  ;;  %v1470_v19 = vpop.f32.mrb[18].mxu0 }
 0x109   : > { %v914_v21 = vadd.f32 %v913_v17, %v912_v15  ;;  %v1135_v22 = vadd.f32 %v1134_v16, %v1133_v13  ;;  %v661_v23 = vpop.f32.mrb[19].mxu0  ;;  %v1052_v36 = vmul.f32 %v1470_v19, %v1470_v19  ;;  %v1140_v42 = vsel %vm881_vm3, %v1051_v25, 0.0 }
 0x10a   : > { %v1136_v26 = vsel %vm881_vm3, %v1049_v18, 0.0  ;;  %v915_v27 = vsel %vm881_vm3, %v661_v23, 0.0  ;;  %v1050_v29 = vmul.f32 %v661_v23, %v661_v23  ;;  %v919_v43 = vsel %vm881_vm3, %v1470_v19, 0.0 }
 0x10b   : > { %v1137_v31 = vadd.f32 %v1136_v26, %v1135_v22  ;;  %v916_v33 = vadd.f32 %v915_v27, %v914_v21  ;;  %v1142_v48 = vsel %vm881_vm3, %v1052_v36, 0.0  ;;  %v1779_v21 = vpop.f32.mrb[16].mxu1 }
 0x10c   : > { %v1138_v38 = vsel %vm881_vm3, %v1050_v29, 0.0  ;;  %v1781_v26 = vpop.f32.mrb[17].mxu1 }
 0x10d   : > { %v918_v39 = vadd.f32 %v917_v35, %v916_v33  ;;  %v1139_v41 = vadd.f32 %v1138_v38, %v1137_v31  ;;  %v1785_v35 = vpop.f32.mrb[18].mxu1 }
 0x10e   : > { %v1473_v44 = vpop.f32.mrb[20].mxu0 }
 0x10f   : > { %v1141_v45 = vadd.f32 %v1140_v42, %v1139_v41  ;;  %v674_v46 = vpop.f32.mrb[21].mxu0  ;;  %v920_v47 = vadd.f32 %v919_v43, %v918_v39  ;;  %v1055_v58 = vmul.f32 %v1473_v44, %v1473_v44  ;;  %v925_v5 = vsel %vm881_vm3, %v1473_v44, 0.0  ;;  %v1787_v39 = vpop.f32.mrb[19].mxu1 }
 0x110   : > { %v921_v49 = vsel %vm881_vm3, %v674_v46, 0.0  ;;  %v1053_v50 = vmul.f32 %v674_v46, %v674_v46  ;;  %v1474_v51 = vpop.f32.mrb[22].mxu0 }
 0x111   : > { %v922_v53 = vadd.f32 %v921_v49, %v920_v47  ;;  %v1143_v54 = vadd.f32 %v1142_v48, %v1141_v45  ;;  %v677_v55 = vpop.f32.mrb[23].mxu0  ;;  %v1056_v6 = vmul.f32 %v1474_v51, %v1474_v51  ;;  %v1148_v10 = vsel %vm881_vm3, %v1055_v58, 0.0 }
 0x112   : > { %v1144_v59 = vsel %vm881_vm3, %v1053_v50, 0.0  ;;  %v923_v61 = vsel %vm881_vm3, %v677_v55, 0.0  ;;  %v1054_v62 = vmul.f32 %v677_v55, %v677_v55  ;;  %v927_v11 = vsel %vm881_vm3, %v1474_v51, 0.0 }
 0x113   : > { %v1145_v0 = vadd.f32 %v1144_v59, %v1143_v54  ;;  %v924_v2 = vadd.f32 %v923_v61, %v922_v53  ;;  %v1150_v16 = vsel %vm881_vm3, %v1056_v6, 0.0  ;;  %v1795_v59 = vpop.f32.mrb[20].mxu1 }
 0x114   : > { %v1146_v7 = vsel %vm881_vm3, %v1054_v62, 0.0 }
 0x115   : > { %v926_v8 = vadd.f32 %v925_v5, %v924_v2  ;;  %v1147_v9 = vadd.f32 %v1146_v7, %v1145_v0  ;;  %v1797_v2 = vpop.f32.mrb[21].mxu1 }
 0x116   : > { %v1477_v12 = vpop.f32.mrb[24].mxu0 }
 0x117   : > { %v1149_v13 = vadd.f32 %v1148_v10, %v1147_v9  ;;  %v690_v14 = vpop.f32.mrb[25].mxu0  ;;  %v928_v15 = vadd.f32 %v927_v11, %v926_v8  ;;  %v1059_v27 = vmul.f32 %v1477_v12, %v1477_v12  ;;  %v933_v41 = vsel %vm881_vm3, %v1477_v12, 0.0  ;;  %v1801_v9 = vpop.f32.mrb[22].mxu1 }
 0x118   : > { %v929_v17 = vsel %vm881_vm3, %v690_v14, 0.0  ;;  %v1057_v18 = vmul.f32 %v690_v14, %v690_v14  ;;  %v1478_v19 = vpop.f32.mrb[26].mxu0  ;;  %v1803_v12 = vpop.f32.mrb[23].mxu1 }
 0x119   : > { %v930_v22 = vadd.f32 %v929_v17, %v928_v15  ;;  %v1151_v23 = vadd.f32 %v1150_v16, %v1149_v13  ;;  %v693_v25 = vpop.f32.mrb[27].mxu0  ;;  %v1060_v42 = vmul.f32 %v1478_v19, %v1478_v19  ;;  %v1156_v46 = vsel %vm881_vm3, %v1059_v27, 0.0 }
 0x11a   : > { %v1152_v29 = vsel %vm881_vm3, %v1057_v18, 0.0  ;;  %v931_v31 = vsel %vm881_vm3, %v693_v25, 0.0  ;;  %v1058_v33 = vmul.f32 %v693_v25, %v693_v25  ;;  %v935_v47 = vsel %vm881_vm3, %v1478_v19, 0.0 }
 0x11b   : > { %v1153_v36 = vadd.f32 %v1152_v29, %v1151_v23  ;;  %v932_v38 = vadd.f32 %v931_v31, %v930_v22  ;;  %v1158_v53 = vsel %vm881_vm3, %v1060_v42, 0.0 }
 0x11c   : > { %v1154_v43 = vsel %vm881_vm3, %v1058_v33, 0.0 }
 0x11d   : > { %v934_v44 = vadd.f32 %v933_v41, %v932_v38  ;;  %v1155_v45 = vadd.f32 %v1154_v43, %v1153_v36  ;;  %v1811_v38 = vpop.f32.mrb[24].mxu1 }
 0x11e   : > { %v1481_v48 = vpop.f32.mrb[28].mxu0 }
 0x11f   : > { %v1157_v49 = vadd.f32 %v1156_v46, %v1155_v45  ;;  %v706_v50 = vpop.f32.mrb[29].mxu0  ;;  %v936_v51 = vadd.f32 %v935_v47, %v934_v44  ;;  %v1063_v5 = vmul.f32 %v1481_v48, %v1481_v48  ;;  %v941_v13 = vsel %vm881_vm3, %v1481_v48, 0.0  ;;  %v1813_v44 = vpop.f32.mrb[25].mxu1 }
 0x120   : > { %v937_v54 = vsel %vm881_vm3, %v706_v50, 0.0  ;;  %v1061_v55 = vmul.f32 %v706_v50, %v706_v50  ;;  %v1482_v58 = vpop.f32.mrb[30].mxu0 }
 0x121   : > { %v938_v61 = vadd.f32 %v937_v54, %v936_v51  ;;  %v1159_v62 = vadd.f32 %v1158_v53, %v1157_v49  ;;  %v709_v0 = vpop.f32.mrb[31].mxu0  ;;  %v1064_v14 = vmul.f32 %v1482_v58, %v1482_v58  ;;  %v1164_v18 = vsel %vm881_vm3, %v1063_v5, 0.0  ;;  %v1817_v49 = vpop.f32.mrb[26].mxu1 }
 0x122   : > { %v1160_v6 = vsel %vm881_vm3, %v1061_v55, 0.0  ;;  %v939_v7 = vsel %vm881_vm3, %v709_v0, 0.0  ;;  %v1062_v8 = vmul.f32 %v709_v0, %v709_v0  ;;  %v943_v19 = vsel %vm881_vm3, %v1482_v58, 0.0  ;;  %v1819_v53 = vpop.f32.mrb[27].mxu1 }
 0x123   : > { %v1161_v10 = vadd.f32 %v1160_v6, %v1159_v62  ;;  %v940_v11 = vadd.f32 %v939_v7, %v938_v61  ;;  %v1166_v29 = vsel %vm881_vm3, %v1064_v14, 0.0  ;;  %v1069_v61 = vmul.f32 %v1717_v32, %v1717_v32 }
 0x124   : > { %v1162_v15 = vsel %vm881_vm3, %v1062_v8, 0.0  ;;  %v953_v7 = vsel %vm881_vm3, %v1717_v32, 0.0  ;;  %v1070_v14 = vmul.f32 %v1723_v40, %v1723_v40  ;;  %v955_v32 = vsel %vm881_vm3, %v1723_v40, 0.0 }
 0x125   : > { %v942_v16 = vadd.f32 %v941_v13, %v940_v11  ;;  %v1163_v17 = vadd.f32 %v1162_v15, %v1161_v10  ;;  %v1176_v13 = vsel %vm881_vm3, %v1069_v61, 0.0  ;;  %v1833_v15 = vpop.f32.mrb[28].mxu1 }
 0x126   : > { %v1485_v22 = vpop.f32.mrb[32].mxu0 }
 0x127   : > { %v1165_v23 = vadd.f32 %v1164_v18, %v1163_v17  ;;  %v722_v25 = vpop.f32.mrb[33].mxu0  ;;  %v944_v27 = vadd.f32 %v943_v19, %v942_v16  ;;  %v1067_v45 = vmul.f32 %v1485_v22, %v1485_v22  ;;  %v949_v54 = vsel %vm881_vm3, %v1485_v22, 0.0  ;;  %v1835_v18 = vpop.f32.mrb[29].mxu1 }
 0x128   : > { %v945_v31 = vsel %vm881_vm3, %v722_v25, 0.0  ;;  %v1065_v33 = vmul.f32 %v722_v25, %v722_v25  ;;  %v1486_v36 = vpop.f32.mrb[34].mxu0  ;;  %v1071_v19 = vmul.f32 %v1715_v28, %v1715_v28  ;;  %v1841_v22 = vpop.f32.mrb[30].mxu1 }
 0x129   : > { %v946_v41 = vadd.f32 %v945_v31, %v944_v27  ;;  %v1167_v42 = vadd.f32 %v1166_v29, %v1165_v23  ;;  %v725_v43 = vpop.f32.mrb[35].mxu0  ;;  %v1068_v55 = vmul.f32 %v1486_v36, %v1486_v36  ;;  %v1172_v5 = vsel %vm881_vm3, %v1067_v45, 0.0  ;;  %v1843_v27 = vpop.f32.mrb[31].mxu1 }
 0x12a   : > { %v1168_v46 = vsel %vm881_vm3, %v1065_v33, 0.0  ;;  %v947_v47 = vsel %vm881_vm3, %v725_v43, 0.0  ;;  %v1066_v48 = vmul.f32 %v725_v43, %v725_v43  ;;  %v951_v6 = vsel %vm881_vm3, %v1486_v36, 0.0 }
 0x12b   : > { %v1169_v50 = vadd.f32 %v1168_v46, %v1167_v42  ;;  %v948_v51 = vadd.f32 %v947_v47, %v946_v41  ;;  %v1174_v11 = vsel %vm881_vm3, %v1068_v55, 0.0  ;;  %v957_v29 = vsel %vm881_vm3, %v1715_v28, 0.0 }
 0x12c   : > { %v1170_v58 = vsel %vm881_vm3, %v1066_v48, 0.0  ;;  %v1072_v31 = vmul.f32 %v1721_v37, %v1721_v37  ;;  %v1178_v33 = vsel %vm881_vm3, %v1070_v14, 0.0  ;;  %v1073_v36 = vmul.f32 %v1733_v60, %v1733_v60 }
 0x12d   : > { %v950_v62 = vadd.f32 %v949_v54, %v948_v51  ;;  %v1171_v0 = vadd.f32 %v1170_v58, %v1169_v50  ;;  %v1180_v40 = vsel %vm881_vm3, %v1071_v19, 0.0  ;;  %v959_v43 = vsel %vm881_vm3, %v1721_v37, 0.0  ;;  %v1861_v51 = vpop.f32.mrb[32].mxu1 }
 0x12e   : > { %v961_v45 = vsel %vm881_vm3, %v1733_v60, 0.0  ;;  %v1182_v47 = vsel %vm881_vm3, %v1072_v31, 0.0  ;;  %v1184_v48 = vsel %vm881_vm3, %v1073_v36, 0.0  ;;  %v1074_v50 = vmul.f32 %v1739_v4, %v1739_v4  ;;  %v1863_v58 = vpop.f32.mrb[33].mxu1 }
 0x12f   : > { %v1173_v8 = vadd.f32 %v1172_v5, %v1171_v0  ;;  %v952_v10 = vadd.f32 %v951_v6, %v950_v62  ;;  %v1075_v37 = vmul.f32 %v1731_v56, %v1731_v56  ;;  %v963_v60 = vsel %vm881_vm3, %v1739_v4, 0.0  ;;  %v1869_v61 = vpop.f32.mrb[34].mxu1 }
 0x130   : > { %v1871_v5 = vpop.f32.mrb[35].mxu1  ;;  %v965_v6 = vsel %vm881_vm3, %v1731_v56, 0.0  ;;  %v967_v14 = vsel %vm881_vm3, %v1737_v1, 0.0  ;;  %v1079_v31 = vmul.f32 %v1747_v20, %v1747_v20 }
 0x131   : > { %v954_v16 = vadd.f32 %v953_v7, %v952_v10  ;;  %v1175_v17 = vadd.f32 %v1174_v11, %v1173_v8  ;;  %v1076_v7 = vmul.f32 %v1737_v1, %v1737_v1  ;;  %v1186_v8 = vsel %vm881_vm3, %v1074_v50, 0.0 }
 0x132   : > { %v1077_v10 = vmul.f32 %v1749_v24, %v1749_v24  ;;  %v1188_v4 = vsel %vm881_vm3, %v1075_v37, 0.0  ;;  %v971_v1 = vsel %vm881_vm3, %v1755_v34, 0.0 }
 0x133   : > { %v1177_v23 = vadd.f32 %v1176_v13, %v1175_v17  ;;  %v956_v25 = vadd.f32 %v955_v32, %v954_v16  ;;  %v969_v16 = vsel %vm881_vm3, %v1749_v24, 0.0  ;;  %v1190_v19 = vsel %vm881_vm3, %v1076_v7, 0.0 }
 0x134   : > { %v1192_v32 = vsel %vm881_vm3, %v1077_v10, 0.0  ;;  %v973_v24 = vsel %vm881_vm3, %v1747_v20, 0.0 }
 0x135   : > { %v958_v41 = vadd.f32 %v957_v29, %v956_v25  ;;  %v1179_v42 = vadd.f32 %v1178_v33, %v1177_v23  ;;  %v1078_v23 = vmul.f32 %v1755_v34, %v1755_v34  ;;  %v975_v34 = vsel %vm881_vm3, %v1753_v30, 0.0 }
 0x137   : > { %v1181_v46 = vadd.f32 %v1180_v40, %v1179_v42  ;;  %v960_v28 = vadd.f32 %v959_v43, %v958_v41  ;;  %v1080_v41 = vmul.f32 %v1753_v30, %v1753_v30  ;;  %v1194_v42 = vsel %vm881_vm3, %v1078_v23, 0.0 }
 0x138   : > { %v1081_v40 = vmul.f32 %v1765_v57, %v1765_v57  ;;  %v979_v30 = vsel %vm881_vm3, %v1771_v3, 0.0  ;;  %v1087_v23 = vmul.f32 %v1779_v21, %v1779_v21 }
 0x139   : > { %v962_v54 = vadd.f32 %v961_v45, %v960_v28  ;;  %v1183_v55 = vadd.f32 %v1182_v47, %v1181_v46  ;;  %v1196_v46 = vsel %vm881_vm3, %v1079_v31, 0.0  ;;  %v977_v28 = vsel %vm881_vm3, %v1765_v57, 0.0 }
 0x13a   : > { %v1200_v50 = vsel %vm881_vm3, %v1081_v40, 0.0  ;;  %v981_v57 = vsel %vm881_vm3, %v1763_v52, 0.0  ;;  %v1088_v31 = vmul.f32 %v1785_v35, %v1785_v35 }
 0x13b   : > { %v1185_v62 = vadd.f32 %v1184_v48, %v1183_v55  ;;  %v964_v0 = vadd.f32 %v963_v60, %v962_v54  ;;  %v1198_v48 = vsel %vm881_vm3, %v1080_v41, 0.0  ;;  %v1082_v54 = vmul.f32 %v1771_v3, %v1771_v3 }
 0x13c   : > { %v1083_v60 = vmul.f32 %v1763_v52, %v1763_v52  ;;  %v983_v3 = vsel %vm881_vm3, %v1769_v63, 0.0  ;;  %v1212_v41 = vsel %vm881_vm3, %v1087_v23, 0.0 }
 0x13d   : > { %v966_v11 = vadd.f32 %v965_v6, %v964_v0  ;;  %v1187_v13 = vadd.f32 %v1186_v8, %v1185_v62  ;;  %v1084_v6 = vmul.f32 %v1769_v63, %v1769_v63  ;;  %v1202_v7 = vsel %vm881_vm3, %v1082_v54, 0.0 }
 0x13e   : > { %v1085_v8 = vmul.f32 %v1781_v26, %v1781_v26  ;;  %v987_v63 = vsel %vm881_vm3, %v1787_v39, 0.0 }
 0x13f   : > { %v1189_v17 = vadd.f32 %v1188_v4, %v1187_v13  ;;  %v968_v56 = vadd.f32 %v967_v14, %v966_v11  ;;  %v1204_v13 = vsel %vm881_vm3, %v1083_v60, 0.0  ;;  %v985_v4 = vsel %vm881_vm3, %v1781_v26, 0.0 }
 0x140   : > { %v989_v26 = vsel %vm881_vm3, %v1779_v21, 0.0 }
 0x141   : > { %v970_v25 = vadd.f32 %v969_v16, %v968_v56  ;;  %v1191_v29 = vadd.f32 %v1190_v19, %v1189_v17  ;;  %v1206_v16 = vsel %vm881_vm3, %v1084_v6, 0.0  ;;  %v1208_v17 = vsel %vm881_vm3, %v1085_v8, 0.0 }
 0x142   : > { %v1086_v56 = vmul.f32 %v1787_v39, %v1787_v39  ;;  %v991_v39 = vsel %vm881_vm3, %v1785_v35, 0.0  ;;  %v995_v35 = vsel %vm881_vm3, %v1803_v12, 0.0 }
 0x143   : > { %v1193_v33 = vadd.f32 %v1192_v32, %v1191_v29  ;;  %v972_v36 = vadd.f32 %v971_v1, %v970_v25 }
 0x144   : > { %v1210_v1 = vsel %vm881_vm3, %v1086_v56, 0.0 }
 0x145   : > { %v974_v43 = vadd.f32 %v973_v24, %v972_v36  ;;  %v1195_v45 = vadd.f32 %v1194_v42, %v1193_v33  ;;  %v1089_v33 = vmul.f32 %v1797_v2, %v1797_v2  ;;  %v993_v42 = vsel %vm881_vm3, %v1797_v2, 0.0 }
 0x146   : > { %v997_v2 = vsel %vm881_vm3, %v1795_v59, 0.0 }
 0x147   : > { %v1197_v47 = vadd.f32 %v1196_v46, %v1195_v45  ;;  %v976_v20 = vadd.f32 %v975_v34, %v974_v43  ;;  %v1214_v43 = vsel %vm881_vm3, %v1088_v31, 0.0  ;;  %v1216_v45 = vsel %vm881_vm3, %v1089_v33, 0.0 }
 0x148   : > { %v1090_v46 = vmul.f32 %v1803_v12, %v1803_v12  ;;  %v999_v12 = vsel %vm881_vm3, %v1801_v9, 0.0  ;;  %v1099_v31 = vmul.f32 %v1833_v15, %v1833_v15 }
 0x149   : > { %v978_v55 = vadd.f32 %v977_v28, %v976_v20  ;;  %v1199_v37 = vadd.f32 %v1198_v48, %v1197_v47  ;;  %v1091_v47 = vmul.f32 %v1795_v59, %v1795_v59 }
 0x14a   : > { %v1218_v54 = vsel %vm881_vm3, %v1090_v46, 0.0 }
 0x14b   : > { %v1201_v62 = vadd.f32 %v1200_v50, %v1199_v37  ;;  %v980_v0 = vadd.f32 %v979_v30, %v978_v55  ;;  %v1092_v50 = vmul.f32 %v1801_v9, %v1801_v9  ;;  %v1093_v55 = vmul.f32 %v1813_v44, %v1813_v44 }
 0x14c   : > { %v1220_v30 = vsel %vm881_vm3, %v1091_v47, 0.0  ;;  %v1003_v9 = vsel %vm881_vm3, %v1819_v53, 0.0 }
 0x14d   : > { %v982_v10 = vadd.f32 %v981_v57, %v980_v0  ;;  %v1203_v11 = vadd.f32 %v1202_v7, %v1201_v62  ;;  %v1001_v62 = vsel %vm881_vm3, %v1813_v44, 0.0  ;;  %v1222_v57 = vsel %vm881_vm3, %v1092_v50, 0.0 }
 0x14e   : > { %v1224_v6 = vsel %vm881_vm3, %v1093_v55, 0.0  ;;  %v1094_v7 = vmul.f32 %v1819_v53, %v1819_v53  ;;  %v1005_v44 = vsel %vm881_vm3, %v1811_v38, 0.0  ;;  %v1007_v53 = vsel %vm881_vm3, %v1817_v49, 0.0 }
 0x14f   : > { %v1205_v14 = vadd.f32 %v1204_v13, %v1203_v11  ;;  %v984_v52 = vadd.f32 %v983_v3, %v982_v10  ;;  %v1095_v11 = vmul.f32 %v1811_v38, %v1811_v38 }
 0x151   : > { %v986_v19 = vadd.f32 %v985_v4, %v984_v52  ;;  %v1207_v32 = vadd.f32 %v1206_v16, %v1205_v14  ;;  %v1096_v4 = vmul.f32 %v1817_v49, %v1817_v49  ;;  %v1226_v14 = vsel %vm881_vm3, %v1094_v7, 0.0 }
 0x152   : > { %v1097_v52 = vmul.f32 %v1835_v18, %v1835_v18  ;;  %v1228_v56 = vsel %vm881_vm3, %v1095_v11, 0.0  ;;  %v1011_v49 = vsel %vm881_vm3, %v1843_v27, 0.0 }
 0x153   : > { %v1209_v25 = vadd.f32 %v1208_v17, %v1207_v32  ;;  %v988_v29 = vadd.f32 %v987_v63, %v986_v19  ;;  %v1009_v19 = vsel %vm881_vm3, %v1835_v18, 0.0  ;;  %v1230_v23 = vsel %vm881_vm3, %v1096_v4, 0.0 }
 0x154   : > { %v1232_v63 = vsel %vm881_vm3, %v1097_v52, 0.0  ;;  %v1013_v18 = vsel %vm881_vm3, %v1833_v15, 0.0 }
 0x155   : > { %v990_v36 = vadd.f32 %v989_v26, %v988_v29  ;;  %v1211_v24 = vadd.f32 %v1210_v1, %v1209_v25  ;;  %v1098_v25 = vmul.f32 %v1843_v27, %v1843_v27  ;;  %v1015_v27 = vsel %vm881_vm3, %v1841_v22, 0.0 }
 0x157   : > { %v1213_v40 = vadd.f32 %v1212_v41, %v1211_v24  ;;  %v992_v21 = vadd.f32 %v991_v39, %v990_v36  ;;  %v1100_v36 = vmul.f32 %v1841_v22, %v1841_v22  ;;  %v1234_v24 = vsel %vm881_vm3, %v1098_v25, 0.0 }
 0x158   : > { %v1101_v41 = vmul.f32 %v1863_v58, %v1863_v58  ;;  %v1019_v22 = vsel %vm881_vm3, %v1871_v5, 0.0 }
 0x159   : > { %v994_v34 = vadd.f32 %v993_v42, %v992_v21  ;;  %v1215_v28 = vadd.f32 %v1214_v43, %v1213_v40  ;;  %v1236_v40 = vsel %vm881_vm3, %v1099_v31, 0.0  ;;  %v1017_v21 = vsel %vm881_vm3, %v1863_v58, 0.0 }
 0x15a   : > { %v1240_v46 = vsel %vm881_vm3, %v1101_v41, 0.0  ;;  %v1021_v58 = vsel %vm881_vm3, %v1861_v51, 0.0 }
 0x15b   : > { %v1217_v20 = vadd.f32 %v1216_v45, %v1215_v28  ;;  %v996_v48 = vadd.f32 %v995_v35, %v994_v34  ;;  %v1238_v45 = vsel %vm881_vm3, %v1100_v36, 0.0  ;;  %v1102_v34 = vmul.f32 %v1871_v5, %v1871_v5 }
 0x15c   : > { %v1103_v35 = vmul.f32 %v1861_v51, %v1861_v51 }
 0x15d   : > { %v998_v37 = vadd.f32 %v997_v2, %v996_v48  ;;  %v1219_v60 = vadd.f32 %v1218_v54, %v1217_v20  ;;  %v1104_v2 = vmul.f32 %v1869_v61, %v1869_v61  ;;  %v1242_v50 = vsel %vm881_vm3, %v1102_v34, 0.0 }
 0x15f   : > { %v1221_v0 = vadd.f32 %v1220_v30, %v1219_v60  ;;  %v1000_v59 = vadd.f32 %v999_v12, %v998_v37  ;;  %v1244_v37 = vsel %vm881_vm3, %v1103_v35, 0.0  ;;  %v1023_v60 = vsel %vm881_vm3, %v1869_v61, 0.0 }
 0x160   : > { %v1246_v12 = vsel %vm881_vm3, %v1104_v2, 0.0 }
 0x161   : > { %v1002_v8 = vadd.f32 %v1001_v62, %v1000_v59  ;;  %v1223_v10 = vadd.f32 %v1222_v57, %v1221_v0 }
 0x163   : > { %v1225_v13 = vadd.f32 %v1224_v6, %v1223_v10  ;;  %v1004_v3 = vadd.f32 %v1003_v9, %v1002_v8 }
 0x165   : > { %v1006_v16 = vadd.f32 %v1005_v44, %v1004_v3  ;;  %v1227_v17 = vadd.f32 %v1226_v14, %v1225_v13 }
 0x167   : > { %v1229_v32 = vadd.f32 %v1228_v56, %v1227_v17  ;;  %v1008_v38 = vadd.f32 %v1007_v53, %v1006_v16 }
 0x169   : > { %v1010_v29 = vadd.f32 %v1009_v19, %v1008_v38  ;;  %v1231_v26 = vadd.f32 %v1230_v23, %v1229_v32 }
 0x16b   : > { %v1233_v1 = vadd.f32 %v1232_v63, %v1231_v26  ;;  %v1012_v33 = vadd.f32 %v1011_v49, %v1010_v29 }
 0x16d   : > { %v1014_v39 = vadd.f32 %v1013_v18, %v1012_v33  ;;  %v1235_v42 = vadd.f32 %v1234_v24, %v1233_v1 }
 0x16f   : > { %v1237_v43 = vadd.f32 %v1236_v40, %v1235_v42  ;;  %v1016_v15 = vadd.f32 %v1015_v27, %v1014_v39 }
 0x171   : > { %v1018_v28 = vadd.f32 %v1017_v21, %v1016_v15  ;;  %v1239_v47 = vadd.f32 %v1238_v45, %v1237_v43 }
 0x173   : > { %v1241_v20 = vadd.f32 %v1240_v46, %v1239_v47  ;;  %v1020_v48 = vadd.f32 %v1019_v22, %v1018_v28 }
 0x175   : > { %v1022_v54 = vadd.f32 %v1021_v58, %v1020_v48  ;;  %v1243_v55 = vadd.f32 %v1242_v50, %v1241_v20 }
 0x177   : > { %v1024_v30 = vadd.f32 %v1023_v60, %v1022_v54  ;;  %v1245_v5 = vadd.f32 %v1244_v37, %v1243_v55 }
 0x179   : > { %v1025_v62 = vrot.slane %v1024_v30, 4  ;;  %v1247_v51 = vadd.f32 %v1246_v12, %v1245_v5 }
 0x17b   : > { %v1026_v0 = vadd.f32 %v1025_v62, %v1024_v30  ;;  %v1248_v59 = vrot.slane %v1247_v51, 4 }
 0x17d   : > { %v1027_v57 = vrot.slane %v1026_v0, 2  ;;  %v1249_v6 = vadd.f32 %v1248_v59, %v1247_v51 }
 0x17f   : > { %v1028_v7 = vadd.f32 %v1027_v57, %v1026_v0  ;;  %v1250_v8 = vrot.slane %v1249_v6, 2 }
 0x181   : > { %v1029_v10 = vrot.slane %v1028_v7, 1  ;;  %v1251_v11 = vadd.f32 %v1250_v8, %v1249_v6 }
 0x183   : > { %v1030_v61 = vadd.f32 %v1029_v10, %v1028_v7  ;;  %v1252_v9 = vrot.slane %v1251_v11, 1 }
 0x185   : > { %1032 = vst.msk [vmem:[%s172_s24] sm:$0x1] %vm1031_vm4, %v1030_v61  ;;  %v1253_v13 = vadd.f32 %v1252_v9, %v1251_v11 }
 0x187   : > { %1254 = vst.msk [vmem:[%s175_s27] sm:$0x1] %vm1031_vm4, %v1253_v13 }
 0x188 PF: > { %s14_s12 = sadd.s32 1, %s1581_s12  }
 0x189   : > { %p11_p4 = scmp.ge.s32.totalorder %s14_s12, 4  }
 0x18b   :  { %13 = sbr.rel (!%p11_p4) target bundleno = 1 (0x1), region = 70 }

// kernel: feature_extractor_forward.7
= control target key start
LH: loop header
LB: loop body
LE: loop exit
PB: predicated region body
PF: predicated region fallthrough
CT: control target
= control target key end

     0   :  { %s387_s12 = smov 0   ;;  %s430_s0 = inlined_call_operand.vmem [shape: f32[2,64,64], index: 0, kind: input, shape index: {}]   ;;  %s431_s1 = inlined_call_operand.vmem [shape: f32[1,64], index: 1, kind: input, shape index: {}]   ;;  %s432_s2 = inlined_call_operand.vmem [shape: f32[1,64], index: 2, kind: input, shape index: {}]   ;;  %s433_s3 = inlined_call_operand.vmem [shape: f32[2,4,4,64], index: 3, kind: output, shape index: {}]  }
   0x1 LB: > { %s336_s13 = sadd.s32 4294967295, %s365_s12   ;;  %p340_p0 = scmp.ge.s32.totalorder %s365_s12, 1  ;;  %s365_s12 = sphi %s387_s12, %s13_s12  }
   0x2   : > { %p137_p1 = scmp.lt.s32.totalorder %s365_s12, 3 }
   0x4   : > { %p138_p2 = pnand %p340_p0, %p137_p1 }
   0x5   : > { %p161_p3 = scmp.lt.s32.totalorder (!%p138_p2), %s336_s13, 1  ;;  %v345_v0 = vld [vmem:[%s431_s1] ss:$0 sm:$0xff] (!%p138_p2)  ;;  %vm221_vm0 = vcmask (!%p138_p2), 1040384   ;;  %vm223_vm1 = vcmask (!%p138_p2), 1041408   ;;  %vm225_vm2 = vcmask (!%p138_p2), 1042432  }
   0x6   : > { %141 = sbr.rel (%p138_p2) target bundleno = 39 (0x27), region = 32  ;;  %v346_v1 = vld [vmem:[%s432_s2] ss:$0 sm:$0xff] (!%p138_p2)  ;;  %vm276_vm3 = vcmask (!%p138_p2), 519168  }
   0xd   : > { %s435_s13 = smov (!%p161_p3, %s336_s13), 1 }
   0xe   : > { %s349_s14 = sshll.u32 %s435_s13, 6  ;;  %s350_s22 = sshll.u32 %s435_s13, 4 }
   0xf   : > { %s165_s19 = scalar_lea.vmem %s430_s0, %s349_s14  ;;  %s170_s25 = scalar_lea.vmem %s433_s3, %s350_s22 }
  0x10   : > { %v171_v2 = vld [vmem:[%s165_s19] sm:$0xff]  ;;  %v172_v3 = vld [vmem:[%s165_s19 + $0x8] sm:$0xff]  ;;  %v173_v4 = vld [vmem:[%s165_s19 + $0x10] sm:$0xff] }
  0x11   : > { %v186_v5 = vmul.f32 %v345_v0, %v171_v2  ;;  %v187_v6 = vmul.f32 %v345_v0, %v172_v3  ;;  %v174_v7 = vld [vmem:[%s165_s19 + $0x18] sm:$0xff]  ;;  %v188_v8 = vmul.f32 %v345_v0, %v173_v4  ;;  %v175_v9 = vld [vmem:[%s165_s19 + $0x20] sm:$0xff]  ;;  %v176_v10 = vld [vmem:[%s165_s19 + $0x28] sm:$0xff] }
  0x12   : > { %v189_v11 = vmul.f32 %v345_v0, %v174_v7  ;;  %v190_v12 = vmul.f32 %v345_v0, %v175_v9  ;;  %v191_v13 = vmul.f32 %v345_v0, %v176_v10  ;;  %v177_v14 = vld [vmem:[%s165_s19 + $0x30] sm:$0xff]  ;;  %v178_v15 = vld [vmem:[%s165_s19 + $0x38] sm:$0xff] }
  0x13   : > { %v201_v16 = vadd.f32 %v346_v1, %v186_v5  ;;  %v202_v17 = vadd.f32 %v346_v1, %v187_v6  ;;  %v203_v18 = vadd.f32 %v346_v1, %v188_v8  ;;  %v192_v19 = vmul.f32 %v345_v0, %v177_v14 }
  0x14   : > { %v204_v20 = vadd.f32 %v346_v1, %v189_v11  ;;  %v205_v21 = vadd.f32 %v346_v1, %v190_v12  ;;  %v206_v22 = vadd.f32 %v346_v1, %v191_v13  ;;  %v193_v23 = vmul.f32 %v345_v0, %v178_v15 }
  0x15   : > { %v209_v24 = vmax.f32 %v201_v16, %v202_v17  ;;  %v207_v25 = vadd.f32 %v346_v1, %v192_v19 }
  0x16   : > { %v227_v26 = vmax.f32 %v203_v18, %v204_v20  ;;  %v242_v27 = vmax.f32 %v205_v21, %v206_v22  ;;  %v208_v28 = vadd.f32 %v346_v1, %v193_v23 }
  0x17   : > { %v211_v29 = vrot.slane %v209_v24, 1 }
  0x18   : > { %v229_v30 = vrot.slane %v227_v26, 1  ;;  %v244_v31 = vrot.slane %v242_v27, 1  ;;  %v257_v32 = vmax.f32 %v207_v25, %v208_v28 }
  0x19   : > { %v213_v33 = vmax.f32 %v209_v24, %v211_v29 }
  0x1a   : > { %v231_v34 = vmax.f32 %v227_v26, %v229_v30  ;;  %v246_v35 = vmax.f32 %v242_v27, %v244_v31  ;;  %v259_v36 = vrot.slane %v257_v32, 1 }
  0x1b   : > { %v215_v37 = vrot.slane %v213_v33, 1  ;;  %v217_v38 = vrot.slane %v213_v33, 2  ;;  %v219_v39 = vrot.slane %v213_v33, 3 }
  0x1c   : > { %v233_v40 = vrot.slane %v231_v34, 1  ;;  %v235_v41 = vrot.slane %v231_v34, 2  ;;  %v237_v42 = vrot.slane %v231_v34, 3  ;;  %v248_v43 = vrot.slane %v246_v35, 1 }
  0x1d   : > { %v222_v44 = vsel %vm221_vm0, %v213_v33, %v215_v37  ;;  %v250_v45 = vrot.slane %v246_v35, 2  ;;  %v252_v46 = vrot.slane %v246_v35, 3  ;;  %v261_v47 = vmax.f32 %v257_v32, %v259_v36 }
  0x1e   : > { %v224_v48 = vsel %vm223_vm1, %v222_v44, %v217_v38  ;;  %v239_v49 = vsel %vm221_vm0, %v231_v34, %v233_v40  ;;  %v254_v50 = vsel %vm221_vm0, %v246_v35, %v248_v43 }
  0x1f   : > { %v226_v51 = vsel %vm225_vm2, %v224_v48, %v219_v39  ;;  %v240_v52 = vsel %vm223_vm1, %v239_v49, %v235_v41  ;;  %v255_v53 = vsel %vm223_vm1, %v254_v50, %v250_v45  ;;  %v263_v54 = vrot.slane %v261_v47, 1 }
  0x20   : > { %v272_v55 = vmax.f32 %v226_v51, 0.0  ;;  %v241_v56 = vsel %vm225_vm2, %v240_v52, %v237_v42  ;;  %v256_v57 = vsel %vm225_vm2, %v255_v53, %v252_v46  ;;  %v265_v58 = vrot.slane %v261_v47, 2 }
  0x21   : > { %v273_v59 = vmax.f32 %v241_v56, 0.0  ;;  %v274_v60 = vmax.f32 %v256_v57, 0.0  ;;  %v267_v61 = vrot.slane %v261_v47, 3  ;;  %v269_v62 = vsel %vm221_vm0, %v261_v47, %v263_v54 }
  0x22   : > { %277 = vst.msk [vmem:[%s170_s25] sm:$0xf] %vm276_vm3, %v272_v55  ;;  %v270_v63 = vsel %vm223_vm1, %v269_v62, %v265_v58 }
  0x23   : > { %278 = vst.msk [vmem:[%s170_s25 + $0x4] sm:$0xf] %vm276_vm3, %v273_v59  ;;  %279 = vst.msk [vmem:[%s170_s25 + $0x8] sm:$0xf] %vm276_vm3, %v274_v60  ;;  %v271_v0 = vsel %vm225_vm2, %v270_v63, %v267_v61 }
  0x24   : > { %v275_v1 = vmax.f32 %v271_v0, 0.0 }
  0x26   : > { %280 = vst.msk [vmem:[%s170_s25 + $0xc] sm:$0xf] %vm276_vm3, %v275_v1 }
  0x27 PF: > { %s13_s12 = sadd.s32 1, %s365_s12  }
  0x28   : > { %p10_p4 = scmp.ge.s32.totalorder %s13_s12, 4  }
  0x2a   :  { %12 = sbr.rel (!%p10_p4) target bundleno = 1 (0x1), region = 62 }

// kernel: feature_extractor_forward.6
= control target key start
LH: loop header
LB: loop body
LE: loop exit
PB: predicated region body
PF: predicated region fallthrough
CT: control target
= control target key end

     0   :  { %s7841_s15 = smov 0   ;;  %s9636_s0 = inlined_call_operand.vmem [shape: bf16[2,12,12,64], index: 0, kind: input, shape index: {}]   ;;  %s9637_s1 = inlined_call_operand.vmem [shape: bf16[5,5,64,64], index: 1, kind: input, shape index: {}]   ;;  %s9638_s2 = inlined_call_operand.vmem [shape: f32[2,64,64], index: 2, kind: output, shape index: {0}]   ;;  %s9639_s3 = inlined_call_operand.vmem [shape: f32[2,1,64], index: 3, kind: output, shape index: {1}]   ;;  %s9640_s4 = inlined_call_operand.vmem [shape: f32[2,1,64], index: 4, kind: output, shape index: {2}]  }
   0x1 LB: > { %s6200_s16 = sadd.s32 4294967295, %s7814_s15   ;;  %p6204_p0 = scmp.ge.s32.totalorder %s7814_s15, 1  ;;  %s7814_s15 = sphi %s7841_s15, %s15_s15  }
   0x2   : > { %p167_p1 = scmp.lt.s32.totalorder %s7814_s15, 3 }
   0x4   : > { %p168_p2 = pnand %p6204_p0, %p167_p1 }
   0x5   : > { %v7688_v0 = vld [vmem:[%s9637_s1] sm:$0xff] (!%p168_p2)   ;;  %p199_p3 = scmp.lt.s32.totalorder (!%p168_p2), %s6200_s16, 1  ;;  %v7689_v1 = vld [vmem:[%s9637_s1 + $0x8] sm:$0xff] (!%p168_p2)   ;;  %v7691_v3 = vld [vmem:[%s9637_s1 + $0x10] sm:$0xff] (!%p168_p2)   ;;  %vm276_vm0 = vcmask (!%p168_p2), 523264   ;;  %vm671_vm4 = vcmask (!%p168_p2), 1042432  }
   0x6   : > { %171 = sbr.rel (%p168_p2) target bundleno = 569 (0x239), region = 28  ;;  %7271 = vmatprep.subr.bf16.mxu0 (!%p168_p2), %v7688_v0  ;;  %v7690_v2 = vld [vmem:[%s9637_s1 + $0x20] sm:$0xff] (!%p168_p2)   ;;  %v7692_v4 = vld [vmem:[%s9637_s1 + $0x28] sm:$0xff] (!%p168_p2)   ;;  %v7694_v5 = vld [vmem:[%s9637_s1 + $0x30] sm:$0xff] (!%p168_p2)   ;;  %vm378_vm1 = vsmask.f32 (!%p168_p2), 3328 }
   0x7   : > { %7272 = vmatpush3.bf16.msra.mxu0 (!%p168_p2), %v7688_v0  ;;  %7287 = vmatprep.subr.bf16.mxu1 (!%p168_p2), %v7690_v2  ;;  %v7693_v7 = vld [vmem:[%s9637_s1 + $0x18] sm:$0xff] (!%p168_p2)   ;;  %v7697_v8 = vld [vmem:[%s9637_s1 + $0x40] sm:$0xff] (!%p168_p2)   ;;  %vm379_vm2 = vsmask.f32 (!%p168_p2), 7440  ;;  %v7699_v21 = vld [vmem:[%s9637_s1 + $0x48] sm:$0xff] (!%p168_p2)   ;;  %vm672_vm5 = vcmask (!%p168_p2), 1046532  }
   0x8   : > { %7273 = vmatprep.subr.bf16.mxu0 (!%p168_p2), %v7689_v1  ;;  %7288 = vmatpush3.bf16.msra.mxu1 (!%p168_p2), %v7690_v2  ;;  %v7698_v9 = vld [vmem:[%s9637_s1 + $0x38] sm:$0xff] (!%p168_p2)   ;;  %v7901_v36 = vld [vmem:[%s9637_s1 + $0x60] sm:$0xff] (!%p168_p2)   ;;  %vm7906_vm3 = vmor (!%p168_p2), %vm378_vm1, %vm379_vm2  ;;  %vm868_vm7 = vsmask.f32 (!%p168_p2), 2304  ;;  %vm869_vm8 = vsmask.f32 (!%p168_p2), 6416 }
   0x9   : > { %7289 = vmatprep.subr.bf16.mxu1 (!%p168_p2), %v7692_v4  ;;  %v7702_v42 = vld [vmem:[%s9637_s1 + $0x50] sm:$0xff] (!%p168_p2)   ;;  %v7704_v60 = vld [vmem:[%s9637_s1 + $0x58] sm:$0xff] (!%p168_p2)   ;;  %vm7959_vm6 = vmor (!%p168_p2), %vm671_vm4, %vm672_vm5  ;;  %vm1193_vm10 = vcmask (!%p168_p2), 1041408   ;;  %vm1194_vm11 = vcmask (!%p168_p2), 1045508   ;;  %vm6063_vm13 = vcmask (!%p168_p2), 516096  }
   0xa   : > { %vm8033_vm9 = vmor (!%p168_p2), %vm868_vm7, %vm869_vm8 }
   0xb   : > { %7274 = vmatpush3.bf16.msra.mxu0 (!%p168_p2), %v7689_v1  ;;  %vm8078_vm12 = vmor (!%p168_p2), %vm1193_vm10, %vm1194_vm11 }
   0xc   : > { %7275 = vmatprep.subr.bf16.mxu0 (!%p168_p2), %v7691_v3  ;;  %7290 = vmatpush3.bf16.msra.mxu1 (!%p168_p2), %v7692_v4 }
   0xd   : > { %s9650_s16 = smov (!%p199_p3, %s6200_s16), 1  ;;  %7291 = vmatprep.subr.bf16.mxu1 %v7694_v5 }
   0xe   : > { %s7679_s27 = smul.u32 96, %s9650_s16  ;;  %s211_s18 = scalar_lea.vmem %s9639_s3, %s9650_s16 }
   0xf   : > { %7276 = vmatpush3.bf16.msra.mxu0 %v7691_v3  ;;  %s214_s21 = scalar_lea.vmem %s9640_s4, %s9650_s16 }
  0x10   : > { %s7873_s6 = scalar_lea.vmem %s9636_s0, %s7679_s27  ;;  %7277 = vmatprep.subr.bf16.mxu0 %v7693_v7  ;;  %7292 = vmatpush3.bf16.msra.mxu1 %v7694_v5 }
  0x11   : > { %v7695_v6 = vld [vmem:[%s7873_s6] ss:$8 sps:$4 sm:$0xff]   ;;  %v363_v11 = vld [vmem:[%s7873_s6 + $0x4] sm:$0x1]  ;;  %v7696_v13 = vld [vmem:[%s7873_s6 + $0x10] ss:$8 sps:$4 sm:$0xff]   ;;  %7293 = vmatprep.subr.bf16.mxu1 %v7698_v9 }
  0x12   : > { %7279 = vmatprep.mubr.msk.bf16.mxu0 %vm276_vm0, %v7695_v6  ;;  %v362_v10 = vld [vmem:[%s7873_s6] sm:$0xf]  ;;  %v364_v12 = vld [vmem:[%s7873_s6 + $0x8] sm:$0xf]  ;;  %v365_v14 = vld [vmem:[%s7873_s6 + $0xc] sm:$0x1] }
  0x13   : > { %v382_v15 = vshrl.u32 %v362_v10, 16  ;;  %v385_v16 = vshll.u32 %v362_v10, 16  ;;  %v391_v17 = vshll.u32 %v363_v11, 16  ;;  %v396_v18 = vshrl.u32 %v364_v12, 16  ;;  %7278 = vmatpush3.bf16.msra.mxu0 %v7693_v7  ;;  %v366_v26 = vld [vmem:[%s7873_s6 + $0x10] sm:$0xf] }
  0x14   : > { %v399_v19 = vshll.u32 %v364_v12, 16  ;;  %v405_v20 = vshll.u32 %v365_v14, 16  ;;  %7303 = vmatprep.subr.bf16.mxu0 %v7697_v8  ;;  %v367_v29 = vld [vmem:[%s7873_s6 + $0x14] sm:$0x1]  ;;  %v368_v30 = vld [vmem:[%s7873_s6 + $0x18] sm:$0xf]  ;;  %7294 = vmatpush3.bf16.msra.mxu1 %v7698_v9 }
  0x15   : > { %v384_v22 = vrot.slane %v382_v15, 4  ;;  %v387_v23 = vrot.slane %v385_v16, 5  ;;  %v393_v24 = vrot.slane %v391_v17, 5  ;;  %v398_v25 = vrot.slane %v396_v18, 4  ;;  %v369_v32 = vld [vmem:[%s7873_s6 + $0x1c] sm:$0x1]  ;;  %7319 = vmatprep.subr.bf16.mxu1 %v7901_v36 }
  0x16   : > { %v401_v27 = vrot.slane %v399_v19, 5  ;;  %v407_v28 = vrot.slane %v405_v20, 5  ;;  %v410_v33 = vshrl.u32 %v366_v26, 16  ;;  %v413_v34 = vshll.u32 %v366_v26, 16  ;;  %7280 = vmatmul.mubr.msk.bf16.vlgmr.msra.gmra.mrb[0].mxu0 %vm276_vm0, %v7696_v13  ;;  %v7700_v51 = vld [vmem:[%s7873_s6 + $0x20] ss:$8 sps:$4 sm:$0xff]  }
  0x17   : > { %v388_v31 = vor.u32 %v387_v23, %v384_v22  ;;  %v419_v35 = vshll.u32 %v367_v29, 16  ;;  %v424_v39 = vshrl.u32 %v368_v30, 16  ;;  %v427_v40 = vshll.u32 %v368_v30, 16  ;;  %7304 = vmatpush3.bf16.msra.mxu0 %v7697_v8  ;;  %v7701_v54 = vld [vmem:[%s7873_s6 + $0x30] ss:$8 sps:$4 sm:$0xff]   ;;  %7283 = vmatprep.mubr.msk.bf16.mxu0 %vm276_vm0, %v7700_v51  ;;  %v7705_v10 = vld [vmem:[%s9637_s1 + $0x68] sm:$0xff]  }
  0x18   : > { %v402_v38 = vor.u32 %v401_v27, %v398_v25  ;;  %v433_v41 = vshll.u32 %v369_v32, 16  ;;  %v412_v44 = vrot.slane %v410_v33, 4  ;;  %v415_v45 = vrot.slane %v413_v34, 5  ;;  %7305 = vmatprep.subr.bf16.mxu0 %v7699_v21  ;;  %v370_v59 = vld [vmem:[%s7873_s6 + $0x20] sm:$0xf]  ;;  %v7706_v29 = vld [vmem:[%s9637_s1 + $0x70] sm:$0xff]  }
  0x19   : > { %v389_v43 = vrot.slane %v388_v31, 4  ;;  %v421_v46 = vrot.slane %v419_v35, 5  ;;  %v426_v48 = vrot.slane %v424_v39, 4  ;;  %v429_v49 = vrot.slane %v427_v40, 5  ;;  %v371_v62 = vld [vmem:[%s7873_s6 + $0x24] sm:$0x1] }
  0x1a   : > { %v403_v47 = vrot.slane %v402_v38, 4  ;;  %v435_v50 = vrot.slane %v433_v41, 5  ;;  %v416_v53 = vor.u32 %v415_v45, %v412_v44  ;;  %v372_v63 = vld [vmem:[%s7873_s6 + $0x28] sm:$0xf]  ;;  %v438_v0 = vshrl.u32 %v370_v59, 16  ;;  %v7940_v15 = vld [vmem:[%s9637_s1 + $0x80] sm:$0xff]  }
  0x1b   : > { %v394_v52 = vsel %vm7906_vm3, %v389_v43, %v393_v24  ;;  %v430_v56 = vor.u32 %v429_v49, %v426_v48  ;;  %7306 = vmatpush3.bf16.msra.mxu0 %v7699_v21  ;;  %v373_v2 = vld [vmem:[%s7873_s6 + $0x2c] sm:$0x1]  ;;  %v441_v3 = vshll.u32 %v370_v59, 16  ;;  %v447_v4 = vshll.u32 %v371_v62, 16  ;;  %v374_v18 = vld [vmem:[%s7873_s6 + $0x30] sm:$0xf] }
  0x1c   : > { %v408_v55 = vsel %vm7906_vm3, %v403_v47, %v407_v28  ;;  %v417_v58 = vrot.slane %v416_v53, 4  ;;  %7307 = vmatprep.subr.bf16.mxu0 %v7702_v42  ;;  %v452_v5 = vshrl.u32 %v372_v63, 16  ;;  %v440_v7 = vrot.slane %v438_v0, 4  ;;  %v375_v19 = vld [vmem:[%s7873_s6 + $0x34] sm:$0x1]  ;;  %v7708_v47 = vld [vmem:[%s9637_s1 + $0x78] sm:$0xff]  }
  0x1d   : > { %v6228_v57 = vcombine.low %v394_v52, %v408_v55  ;;  %v431_v61 = vrot.slane %v430_v56, 4  ;;  %v455_v8 = vshll.u32 %v372_v63, 16  ;;  %v461_v9 = vshll.u32 %v373_v2, 16  ;;  %v376_v21 = vld [vmem:[%s7873_s6 + $0x38] sm:$0xf] }
  0x1e   : > { %v422_v1 = vsel %vm7906_vm3, %v417_v58, %v421_v46  ;;  %7284 = vmatmul.mubr.msk.bf16.gmra.mrb[4].mxu0 %vm276_vm0, %v7701_v54  ;;  %v443_v12 = vrot.slane %v441_v3, 5  ;;  %v449_v13 = vrot.slane %v447_v4, 5  ;;  %v454_v14 = vrot.slane %v452_v5, 4  ;;  %v377_v22 = vld [vmem:[%s7873_s6 + $0x3c] sm:$0x1] }
  0x1f   : > { %7295 = vmatprep.mubr.msk.bf16.mxu1 %vm276_vm0, %v6228_v57  ;;  %v436_v6 = vsel %vm7906_vm3, %v431_v61, %v435_v50  ;;  %7308 = vmatpush3.bf16.msra.mxu0 %v7702_v42  ;;  %v457_v16 = vrot.slane %v455_v8, 5  ;;  %v463_v17 = vrot.slane %v461_v9, 5  ;;  %v466_v23 = vshrl.u32 %v374_v18, 16  ;;  %v639_v39 = vld [vmem:[%s7873_s6] sm:$0xe] }
  0x20   : > { %v6229_v11 = vcombine.low %v422_v1, %v436_v6  ;;  %7309 = vmatprep.subr.bf16.mxu0 %v7704_v60  ;;  %v444_v20 = vor.u32 %v443_v12, %v440_v7  ;;  %v469_v24 = vshll.u32 %v374_v18, 16  ;;  %v475_v26 = vshll.u32 %v375_v19, 16  ;;  %v640_v43 = vld [vmem:[%s7873_s6 + $0x4] sm:$0x1]  ;;  %v641_v44 = vld [vmem:[%s7873_s6 + $0x8] sm:$0xe] }
  0x21   : > { %v458_v25 = vor.u32 %v457_v16, %v454_v14  ;;  %v480_v27 = vshrl.u32 %v376_v21, 16  ;;  %v483_v28 = vshll.u32 %v376_v21, 16  ;;  %v468_v31 = vrot.slane %v466_v23, 4  ;;  %v642_v50 = vld [vmem:[%s7873_s6 + $0xc] sm:$0x1] }
  0x22   : > { %7296 = vmatmul.mubr.msk.bf16.vlgmr.msra.gmra.mrb[0].mxu1 %vm276_vm0, %v6229_v11  ;;  %v445_v30 = vrot.slane %v444_v20, 4  ;;  %v471_v32 = vrot.slane %v469_v24, 5  ;;  %v489_v33 = vshll.u32 %v377_v22, 16  ;;  %v477_v35 = vrot.slane %v475_v26, 5  ;;  %v643_v53 = vld [vmem:[%s7873_s6 + $0x10] sm:$0xe] }
  0x23   : > { %7320 = vmatpush3.bf16.msra.mxu1 %v7901_v36  ;;  %7310 = vmatpush3.bf16.msra.mxu0 %v7704_v60  ;;  %v459_v34 = vrot.slane %v458_v25, 4  ;;  %v482_v36 = vrot.slane %v480_v27, 4  ;;  %v485_v38 = vrot.slane %v483_v28, 5  ;;  %v6240_v46 = vrot.slane %v639_v39, 9  ;;  %v644_v57 = vld [vmem:[%s7873_s6 + $0x14] sm:$0x1] }
  0x24   : > { %7321 = vmatprep.subr.bf16.mxu1 %v7705_v10  ;;  %7335 = vmatprep.subr.bf16.mxu0 %v7940_v15  ;;  %v450_v40 = vsel %vm7906_vm3, %v445_v30, %v449_v13  ;;  %v472_v41 = vor.u32 %v471_v32, %v468_v31  ;;  %v491_v42 = vrot.slane %v489_v33, 5  ;;  %v676_v51 = vrot.slane %v640_v43, 5  ;;  %v645_v58 = vld [vmem:[%s7873_s6 + $0x18] sm:$0xe]  ;;  %v646_v61 = vld [vmem:[%s7873_s6 + $0x1c] sm:$0x1] }
  0x25   : > { %v464_v48 = vsel %vm7906_vm3, %v459_v34, %v463_v17  ;;  %v486_v49 = vor.u32 %v485_v38, %v482_v36  ;;  %v6241_v52 = vrot.slane %v641_v44, 9  ;;  %v680_v56 = vrot.slane %v642_v50, 5  ;;  %v7709_v7 = vld [vmem:[%s9637_s1 + $0x88] sm:$0xff]   ;;  %v648_v11 = vld [vmem:[%s7873_s6 + $0x24] sm:$0x1] }
  0x26   : > { %v6230_v54 = vcombine.low %v450_v40, %v464_v48  ;;  %v473_v55 = vrot.slane %v472_v41, 4  ;;  %v677_v60 = vsel %vm7959_vm6, %v6240_v46, %v676_v51  ;;  %v6242_v62 = vrot.slane %v643_v53, 9  ;;  %v649_v13 = vld [vmem:[%s7873_s6 + $0x28] sm:$0xe]  ;;  %v650_v14 = vld [vmem:[%s7873_s6 + $0x2c] sm:$0x1] }
  0x27   : > { %7322 = vmatpush3.bf16.msra.mxu1 %v7705_v10  ;;  %v487_v59 = vrot.slane %v486_v49, 4  ;;  %v684_v63 = vrot.slane %v644_v57, 5  ;;  %v681_v1 = vsel %vm7959_vm6, %v6241_v52, %v680_v56  ;;  %v6243_v2 = vrot.slane %v645_v58, 9  ;;  %v647_v10 = vld [vmem:[%s7873_s6 + $0x20] sm:$0xe] }
  0x28   : > { %7323 = vmatprep.subr.bf16.mxu1 %v7706_v29  ;;  %7299 = vmatprep.mubr.msk.bf16.mxu1 %vm276_vm0, %v6230_v54  ;;  %v478_v0 = vsel %vm7906_vm3, %v473_v55, %v477_v35  ;;  %v688_v3 = vrot.slane %v646_v61, 5  ;;  %v6256_v5 = vcombine.low %v677_v60, %v681_v1  ;;  %v6244_v16 = vrot.slane %v647_v10, 9  ;;  %v651_v21 = vld [vmem:[%s7873_s6 + $0x30] sm:$0xe]  ;;  %v652_v22 = vld [vmem:[%s7873_s6 + $0x34] sm:$0x1] }
  0x29   : > { %v492_v4 = vsel %vm7906_vm3, %v487_v59, %v491_v42  ;;  %v685_v6 = vsel %vm7959_vm6, %v6242_v62, %v684_v63  ;;  %v692_v17 = vrot.slane %v648_v11, 5  ;;  %v6245_v18 = vrot.slane %v649_v13, 9  ;;  %v653_v23 = vld [vmem:[%s7873_s6 + $0x38] sm:$0xe]  ;;  %v654_v25 = vld [vmem:[%s7873_s6 + $0x3c] sm:$0x1] }
  0x2a   : > { %v6231_v8 = vcombine.low %v478_v0, %v492_v4  ;;  %v689_v9 = vsel %vm7959_vm6, %v6243_v2, %v688_v3  ;;  %7311 = vmatprep.mubr.msk.bf16.mxu0 %vm276_vm0, %v6256_v5  ;;  %v696_v19 = vrot.slane %v650_v14, 5  ;;  %v6246_v26 = vrot.slane %v651_v21, 9  ;;  %v852_v32 = vld [vmem:[%s7873_s6] sm:$0xe]  ;;  %v853_v33 = vld [vmem:[%s7873_s6 + $0x4] sm:$0x3] }
  0x2b   : > { %7324 = vmatpush3.bf16.msra.mxu1 %v7706_v29  ;;  %v6257_v12 = vcombine.low %v685_v6, %v689_v9  ;;  %v693_v20 = vsel %vm7959_vm6, %v6244_v16, %v692_v17  ;;  %v700_v27 = vrot.slane %v652_v22, 5  ;;  %v6247_v28 = vrot.slane %v653_v23, 9  ;;  %v8008_v29 = vld [vmem:[%s9637_s1 + $0xa0] sm:$0xff]   ;;  %v854_v35 = vld [vmem:[%s7873_s6 + $0x8] sm:$0xe] }
  0x2c   : > { %7325 = vmatprep.subr.bf16.mxu1 %v7708_v47  ;;  %7300 = vmatmul.mubr.msk.bf16.gmra.mrb[4].mxu1 %vm276_vm0, %v6231_v8  ;;  %v697_v24 = vsel %vm7959_vm6, %v6245_v18, %v696_v19  ;;  %v704_v31 = vrot.slane %v654_v25, 5  ;;  %v855_v36 = vld [vmem:[%s7873_s6 + $0xc] sm:$0x3]  ;;  %v872_v39 = vshrl.u32 %v852_v32, 16  ;;  %v875_v40 = vshll.u32 %v852_v32, 16  ;;  %v8040_v8 = vld [vmem:[%s9637_s1 + $0xc0] sm:$0xff]  }
  0x2d   : > { %7312 = vmatmul.mubr.msk.bf16.vlgmr.msra.gmra.mrb[8].mxu0 %vm276_vm0, %v6257_v12  ;;  %v6258_v30 = vcombine.low %v693_v20, %v697_v24  ;;  %v701_v34 = vsel %vm7959_vm6, %v6246_v26, %v700_v27  ;;  %v881_v42 = vshrl.u32 %v853_v33, 16  ;;  %v884_v43 = vshll.u32 %v853_v33, 16  ;;  %v856_v46 = vld [vmem:[%s7873_s6 + $0x10] sm:$0xe]  ;;  %v857_v52 = vld [vmem:[%s7873_s6 + $0x14] sm:$0x3] }
  0x2e   : > { %7336 = vmatpush3.bf16.msra.mxu0 %v7940_v15  ;;  %v7710_v15 = vld [vmem:[%s9637_s1 + $0x90] sm:$0xff]   ;;  %v705_v38 = vsel %vm7959_vm6, %v6247_v28, %v704_v31  ;;  %v890_v44 = vshrl.u32 %v854_v35, 16  ;;  %v874_v48 = vrot.slane %v872_v39, 5  ;;  %v877_v49 = vrot.slane %v875_v40, 6  ;;  %v858_v57 = vld [vmem:[%s7873_s6 + $0x18] sm:$0xe] }
  0x2f   : > { %7326 = vmatpush3.bf16.msra.mxu1 %v7708_v47  ;;  %7337 = vmatprep.subr.bf16.mxu0 %v7709_v7  ;;  %v6259_v41 = vcombine.low %v701_v34, %v705_v38  ;;  %v7712_v47 = vld [vmem:[%s9637_s1 + $0x98] sm:$0xff]   ;;  %v893_v50 = vshll.u32 %v854_v35, 16  ;;  %v899_v51 = vshrl.u32 %v855_v36, 16  ;;  %v883_v53 = vrot.slane %v881_v42, 5  ;;  %v860_v25 = vld [vmem:[%s7873_s6 + $0x20] sm:$0xe] }
  0x30   : > { %7351 = vmatprep.subr.bf16.mxu1 %v8008_v29  ;;  %7315 = vmatprep.mubr.msk.bf16.mxu0 %vm276_vm0, %v6258_v30  ;;  %v886_v54 = vrot.slane %v884_v43, 6  ;;  %v892_v55 = vrot.slane %v890_v44, 5  ;;  %v902_v56 = vshll.u32 %v855_v36, 16  ;;  %v878_v58 = vor.u32 %v877_v49, %v874_v48  ;;  %v859_v61 = vld [vmem:[%s7873_s6 + $0x1c] sm:$0x3] }
  0x31   : > { %v895_v59 = vrot.slane %v893_v50, 6  ;;  %v901_v60 = vrot.slane %v899_v51, 5  ;;  %v908_v62 = vshrl.u32 %v856_v46, 16  ;;  %v911_v2 = vshll.u32 %v856_v46, 16  ;;  %v861_v26 = vld [vmem:[%s7873_s6 + $0x24] sm:$0x3] }
  0x32   : > { %7338 = vmatpush3.bf16.msra.mxu0 %v7709_v7  ;;  %v887_v0 = vor.u32 %v886_v54, %v883_v53  ;;  %v904_v1 = vrot.slane %v902_v56, 6  ;;  %v917_v3 = vshrl.u32 %v857_v52, 16  ;;  %v879_v4 = vrot.slane %v878_v58, 4  ;;  %v862_v32 = vld [vmem:[%s7873_s6 + $0x28] sm:$0xe] }
  0x33   : > { %7339 = vmatprep.subr.bf16.mxu0 %v7710_v15  ;;  %v896_v5 = vor.u32 %v895_v59, %v892_v55  ;;  %v910_v6 = vrot.slane %v908_v62, 5  ;;  %v920_v7 = vshll.u32 %v857_v52, 16  ;;  %v913_v10 = vrot.slane %v911_v2, 6  ;;  %v864_v42 = vld [vmem:[%s7873_s6 + $0x30] sm:$0xe] }
  0x34   : > { %v905_v9 = vor.u32 %v904_v1, %v901_v60  ;;  %v919_v11 = vrot.slane %v917_v3, 5  ;;  %v926_v12 = vshrl.u32 %v858_v57, 16  ;;  %v888_v13 = vsel %vm8033_vm9, %v879_v4, %v887_v0  ;;  %v865_v48 = vld [vmem:[%s7873_s6 + $0x34] sm:$0x3]  ;;  %v866_v53 = vld [vmem:[%s7873_s6 + $0x38] sm:$0xe] }
  0x35   : > { %7316 = vmatmul.mubr.msk.bf16.gmra.mrb[12].mxu0 %vm276_vm0, %v6259_v41  ;;  %v897_v14 = vrot.slane %v896_v5, 4  ;;  %v922_v16 = vrot.slane %v920_v7, 6  ;;  %v929_v17 = vshll.u32 %v858_v57, 16  ;;  %v914_v18 = vor.u32 %v913_v10, %v910_v6  ;;  %v867_v62 = vld [vmem:[%s7873_s6 + $0x3c] sm:$0x3]  ;;  %v7713_v0 = vld [vmem:[%s9637_s1 + $0xa8] sm:$0xff]  }
  0x36   : > { %7340 = vmatpush3.bf16.msra.mxu0 %v7710_v15  ;;  %v928_v19 = vrot.slane %v926_v12, 5  ;;  %v935_v20 = vshrl.u32 %v859_v61, 16  ;;  %v938_v21 = vshll.u32 %v859_v61, 16  ;;  %v863_v15 = vld [vmem:[%s7873_s6 + $0x2c] sm:$0x3]  ;;  %v944_v34 = vshrl.u32 %v860_v25, 16 }
  0x37   : > { %7341 = vmatprep.subr.bf16.mxu0 %v7712_v47  ;;  %v906_v22 = vsel %vm8033_vm9, %v897_v14, %v905_v9  ;;  %v923_v23 = vor.u32 %v922_v16, %v919_v11  ;;  %v931_v24 = vrot.slane %v929_v17, 6  ;;  %v915_v28 = vrot.slane %v914_v18, 4  ;;  %v1161_v5 = vld [vmem:[%s7873_s6] sm:$0xc]  ;;  %v1162_v11 = vld [vmem:[%s7873_s6 + $0x4] sm:$0x3] }
  0x38   : > { %v6276_v27 = vcombine.low %v888_v13, %v906_v22  ;;  %v937_v30 = vrot.slane %v935_v20, 5  ;;  %v940_v31 = vrot.slane %v938_v21, 6  ;;  %v947_v35 = vshll.u32 %v860_v25, 16  ;;  %v7714_v12 = vld [vmem:[%s9637_s1 + $0xb0] sm:$0xff]   ;;  %v1163_v18 = vld [vmem:[%s7873_s6 + $0x8] sm:$0xc] }
  0x39   : > { %v932_v33 = vor.u32 %v931_v24, %v928_v19  ;;  %v953_v36 = vshrl.u32 %v861_v26, 16  ;;  %v924_v38 = vsel %vm8033_vm9, %v915_v28, %v923_v23  ;;  %v956_v40 = vshll.u32 %v861_v26, 16  ;;  %v1164_v19 = vld [vmem:[%s7873_s6 + $0xc] sm:$0x3]  ;;  %v1165_v24 = vld [vmem:[%s7873_s6 + $0x10] sm:$0xc] }
  0x3a   : > { %7342 = vmatpush3.bf16.msra.mxu0 %v7712_v47  ;;  %7327 = vmatprep.mubr.msk.bf16.mxu1 %vm276_vm0, %v6276_v27  ;;  %v941_v39 = vor.u32 %v940_v31, %v937_v30  ;;  %v962_v41 = vshrl.u32 %v862_v32, 16  ;;  %v946_v44 = vrot.slane %v944_v34, 5  ;;  %v949_v46 = vrot.slane %v947_v35, 6  ;;  %v1166_v25 = vld [vmem:[%s7873_s6 + $0x14] sm:$0x3] }
  0x3b   : > { %7367 = vmatprep.subr.bf16.mxu0 %v8040_v8  ;;  %v933_v43 = vrot.slane %v932_v33, 4  ;;  %v955_v47 = vrot.slane %v953_v36, 5  ;;  %v958_v49 = vrot.slane %v956_v40, 6  ;;  %v965_v51 = vshll.u32 %v862_v32, 16  ;;  %v1167_v31 = vld [vmem:[%s7873_s6 + $0x18] sm:$0xc] }
  0x3c   : > { %v964_v50 = vrot.slane %v962_v41, 5  ;;  %v971_v52 = vshrl.u32 %v863_v15, 16  ;;  %v950_v55 = vor.u32 %v949_v46, %v946_v44  ;;  %v974_v56 = vshll.u32 %v863_v15, 16  ;;  %v1168_v32 = vld [vmem:[%s7873_s6 + $0x1c] sm:$0x3] }
  0x3d   : > { %v942_v54 = vsel %vm8033_vm9, %v933_v43, %v941_v39  ;;  %v980_v57 = vshrl.u32 %v864_v42, 16  ;;  %v959_v59 = vor.u32 %v958_v49, %v955_v47  ;;  %v967_v60 = vrot.slane %v965_v51, 6  ;;  %v7716_v46 = vld [vmem:[%s9637_s1 + $0xb8] sm:$0xff]  }
  0x3e   : > { %v6277_v58 = vcombine.low %v924_v38, %v942_v54  ;;  %v973_v61 = vrot.slane %v971_v52, 5  ;;  %v951_v1 = vrot.slane %v950_v55, 4  ;;  %v976_v2 = vrot.slane %v974_v56, 6  ;;  %v1169_v55 = vld [vmem:[%s7873_s6 + $0x20] sm:$0xc] }
  0x3f   : > { %v982_v3 = vrot.slane %v980_v57, 5  ;;  %v983_v4 = vshll.u32 %v864_v42, 16  ;;  %v968_v6 = vor.u32 %v967_v60, %v964_v50  ;;  %v989_v7 = vshrl.u32 %v865_v48, 16  ;;  %v1170_v56 = vld [vmem:[%s7873_s6 + $0x24] sm:$0x3] }
  0x40   : > { %7328 = vmatmul.mubr.msk.bf16.vlgmr.msra.gmra.mrb[8].mxu1 %vm276_vm0, %v6277_v58  ;;  %v992_v9 = vshll.u32 %v865_v48, 16  ;;  %v998_v10 = vshrl.u32 %v866_v53, 16  ;;  %v960_v13 = vsel %vm8033_vm9, %v951_v1, %v959_v59  ;;  %v977_v14 = vor.u32 %v976_v2, %v973_v61  ;;  %v1171_v59 = vld [vmem:[%s7873_s6 + $0x28] sm:$0xc]  ;;  %v1172_v60 = vld [vmem:[%s7873_s6 + $0x2c] sm:$0x3] }
  0x41   : > { %7352 = vmatpush3.bf16.msra.mxu1 %v8008_v29  ;;  %v985_v16 = vrot.slane %v983_v4, 6  ;;  %v1001_v17 = vshll.u32 %v866_v53, 16  ;;  %v969_v20 = vrot.slane %v968_v6, 4  ;;  %v991_v21 = vrot.slane %v989_v7, 5  ;;  %v1173_v4 = vld [vmem:[%s7873_s6 + $0x30] sm:$0xc] }
  0x42   : > { %v994_v22 = vrot.slane %v992_v9, 6  ;;  %v1000_v23 = vrot.slane %v998_v10, 5  ;;  %7353 = vmatprep.subr.bf16.mxu1 %v7713_v0  ;;  %v1007_v29 = vshrl.u32 %v867_v62, 16  ;;  %v1010_v28 = vshll.u32 %v867_v62, 16  ;;  %v1175_v10 = vld [vmem:[%s7873_s6 + $0x38] sm:$0xc] }
  0x43   : > { %v986_v26 = vor.u32 %v985_v16, %v982_v3  ;;  %v1003_v27 = vrot.slane %v1001_v17, 6  ;;  %v978_v33 = vsel %vm8033_vm9, %v969_v20, %v977_v14  ;;  %v6288_v34 = vrot.slane %v1161_v5, 10  ;;  %v1174_v5 = vld [vmem:[%s7873_s6 + $0x34] sm:$0x3] }
  0x44   : > { %v995_v15 = vor.u32 %v994_v22, %v991_v21  ;;  %v1198_v35 = vrot.slane %v1162_v11, 6  ;;  %v6278_v36 = vcombine.low %v960_v13, %v978_v33  ;;  %v1009_v40 = vrot.slane %v1007_v29, 5  ;;  %v1176_v11 = vld [vmem:[%s7873_s6 + $0x3c] sm:$0x3]  ;;  %v7717_v13 = vld [vmem:[%s9637_s1 + $0xc8] sm:$0xff]   ;;  %v7720_v21 = vld [vmem:[%s9637_s1 + $0xd0] sm:$0xff]  }
  0x45   : > { %v987_v38 = vrot.slane %v986_v26, 4  ;;  %v1004_v39 = vor.u32 %v1003_v27, %v1000_v23  ;;  %7354 = vmatpush3.bf16.msra.mxu1 %v7713_v0  ;;  %v1012_v41 = vrot.slane %v1010_v28, 6  ;;  %v6289_v43 = vrot.slane %v1163_v18, 10  ;;  %v7722_v26 = vld [vmem:[%s9637_s1 + $0xd8] sm:$0xff]   ;;  %v7725_v27 = vld [vmem:[%s9637_s1 + $0xe8] sm:$0xff]  }
  0x46   : > { %v1199_v42 = vsel %vm8078_vm12, %v6288_v34, %v1198_v35  ;;  %v1202_v44 = vrot.slane %v1164_v19, 6  ;;  %7355 = vmatprep.subr.bf16.mxu1 %v7714_v12  ;;  %7331 = vmatprep.mubr.msk.bf16.mxu1 %vm276_vm0, %v6278_v36  ;;  %v6290_v49 = vrot.slane %v1165_v24, 10  ;;  %v1206_v50 = vrot.slane %v1166_v25, 6  ;;  %v7721_v19 = vld [vmem:[%s9637_s1 + $0xe0] sm:$0xff]   ;;  %v7718_v24 = vld [vmem:[%s7873_s6 + $0x8] ss:$8 sps:$4 sm:$0xff]  }
  0x47   : > { %v996_v47 = vsel %vm8033_vm9, %v987_v38, %v995_v15  ;;  %v1005_v48 = vrot.slane %v1004_v39, 4  ;;  %v1013_v51 = vor.u32 %v1012_v41, %v1009_v40  ;;  %v6291_v53 = vrot.slane %v1167_v31, 10  ;;  %v7719_v25 = vld [vmem:[%s7873_s6 + $0x18] ss:$8 sps:$4 sm:$0xff]   ;;  %v7723_v29 = vld [vmem:[%s7873_s6 + $0x28] ss:$8 sps:$4 sm:$0xff]  }
  0x48   : > { %v1203_v52 = vsel %vm8078_vm12, %v6289_v43, %v1202_v44  ;;  %v1210_v54 = vrot.slane %v1168_v32, 6  ;;  %v1207_v58 = vsel %vm8078_vm12, %v6290_v49, %v1206_v50  ;;  %v6292_v61 = vrot.slane %v1169_v55, 10  ;;  %v6344_v28 = vld [vmem:[%s7873_s6 + $0x8] sm:$0xf]  ;;  %v6345_v31 = vld [vmem:[%s7873_s6 + $0xc] sm:$0x1] }
  0x49   : > { %v6304_v57 = vcombine.low %v1199_v42, %v1203_v52  ;;  %7356 = vmatpush3.bf16.msra.mxu1 %v7714_v12  ;;  %v1214_v62 = vrot.slane %v1170_v56, 6  ;;  %v1014_v0 = vsel %vm8033_vm9, %v1005_v48, %v1013_v51  ;;  %v6293_v2 = vrot.slane %v1171_v59, 10  ;;  %v6346_v32 = vld [vmem:[%s7873_s6 + $0x10] sm:$0xf]  ;;  %v6347_v33 = vld [vmem:[%s7873_s6 + $0x14] sm:$0x1] }
  0x4a   : > { %v1211_v1 = vsel %vm8078_vm12, %v6291_v53, %v1210_v54  ;;  %7357 = vmatprep.subr.bf16.mxu1 %v7716_v46  ;;  %v1218_v3 = vrot.slane %v1172_v60, 6  ;;  %v6279_v6 = vcombine.low %v996_v47, %v1014_v0  ;;  %v6294_v12 = vrot.slane %v1173_v4, 10  ;;  %v7726_v38 = vld [vmem:[%s9637_s1 + $0xf0] sm:$0xff]   ;;  %v8154_v39 = vld [vmem:[%s9637_s1 + $0x100] sm:$0xff]   ;;  %v6348_v42 = vld [vmem:[%s7873_s6 + $0x18] sm:$0xf] }
  0x4b   : > { %7343 = vmatprep.mubr.msk.bf16.mxu0 %vm276_vm0, %v6304_v57  ;;  %v6305_v7 = vcombine.low %v1207_v58, %v1211_v1  ;;  %v1215_v9 = vsel %vm8078_vm12, %v6292_v61, %v1214_v62  ;;  %v1222_v16 = vrot.slane %v1174_v5, 6  ;;  %v6295_v17 = vrot.slane %v1175_v10, 10  ;;  %v6349_v43 = vld [vmem:[%s7873_s6 + $0x1c] sm:$0x1]  ;;  %v7724_v44 = vld [vmem:[%s7873_s6 + $0x38] ss:$8 sps:$4 sm:$0xff]  }
  0x4c   : > { %v1219_v14 = vsel %vm8078_vm12, %v6293_v2, %v1218_v3  ;;  %v1226_v18 = vrot.slane %v1176_v11, 6  ;;  %7332 = vmatmul.mubr.msk.bf16.gmra.mrb[12].mxu1 %vm276_vm0, %v6279_v6  ;;  %v1554_v15 = vshrl.u32 %v6344_v28, 16  ;;  %v1557_v34 = vshll.u32 %v6344_v28, 16  ;;  %v6350_v50 = vld [vmem:[%s7873_s6 + $0x20] sm:$0xf]  ;;  %v7728_v1 = vld [vmem:[%s9637_s1 + $0xf8] sm:$0xff]  }
  0x4d   : > { %7344 = vmatmul.mubr.msk.bf16.vlgmr.msra.gmra.mrb[16].mxu0 %vm276_vm0, %v6305_v7  ;;  %v6306_v20 = vcombine.low %v1215_v9, %v1219_v14  ;;  %7358 = vmatpush3.bf16.msra.mxu1 %v7716_v46  ;;  %v1223_v22 = vsel %vm8078_vm12, %v6294_v12, %v1222_v16  ;;  %v1563_v35 = vshll.u32 %v6345_v31, 16  ;;  %v1568_v36 = vshrl.u32 %v6346_v32, 16  ;;  %v6351_v53 = vld [vmem:[%s7873_s6 + $0x24] sm:$0x1]  ;;  %v6352_v12 = vld [vmem:[%s7873_s6 + $0x28] sm:$0xf] }
  0x4e   : > { %7368 = vmatpush3.bf16.msra.mxu0 %v8040_v8  ;;  %v1227_v23 = vsel %vm8078_vm12, %v6295_v17, %v1226_v18  ;;  %7359 = vmatprep.mubr.msk.bf16.mxu1 %vm276_vm0, %v7718_v24  ;;  %v1571_v40 = vshll.u32 %v6346_v32, 16  ;;  %v1577_v41 = vshll.u32 %v6347_v33, 16  ;;  %v1556_v46 = vrot.slane %v1554_v15, 4  ;;  %v6354_v17 = vld [vmem:[%s7873_s6 + $0x30] sm:$0xf] }
  0x4f   : > { %7347 = vmatprep.mubr.msk.bf16.mxu0 %vm276_vm0, %v6306_v20  ;;  %7369 = vmatprep.subr.bf16.mxu0 %v7717_v13  ;;  %v6307_v8 = vcombine.low %v1223_v22, %v1227_v23  ;;  %v1559_v47 = vrot.slane %v1557_v34, 5  ;;  %v1565_v48 = vrot.slane %v1563_v35, 5  ;;  %v1570_v49 = vrot.slane %v1568_v36, 4  ;;  %v6355_v18 = vld [vmem:[%s7873_s6 + $0x34] sm:$0x1] }
  0x50   : > { %7383 = vmatprep.subr.bf16.mxu1 %v7721_v19  ;;  %v1573_v51 = vrot.slane %v1571_v40, 5  ;;  %v1579_v52 = vrot.slane %v1577_v41, 5  ;;  %v1582_v54 = vshrl.u32 %v6348_v42, 16  ;;  %v1585_v55 = vshll.u32 %v6348_v42, 16  ;;  %v6356_v24 = vld [vmem:[%s7873_s6 + $0x38] sm:$0xf] }
  0x51   : > { %v1560_v56 = vor.u32 %v1559_v47, %v1556_v46  ;;  %v1591_v57 = vshll.u32 %v6349_v43, 16  ;;  %v1596_v58 = vshrl.u32 %v6350_v50, 16  ;;  %v1599_v59 = vshll.u32 %v6350_v50, 16  ;;  %v6357_v28 = vld [vmem:[%s7873_s6 + $0x3c] sm:$0x1]  ;;  %v7729_v42 = vld [vmem:[%s9637_s1 + $0x108] sm:$0xff]  }
  0x52   : > { %7370 = vmatpush3.bf16.msra.mxu0 %v7717_v13  ;;  %v1574_v60 = vor.u32 %v1573_v51, %v1570_v49  ;;  %v1584_v61 = vrot.slane %v1582_v54, 4  ;;  %v1587_v62 = vrot.slane %v1585_v55, 5  ;;  %v1605_v0 = vshll.u32 %v6351_v53, 16  ;;  %v6353_v13 = vld [vmem:[%s7873_s6 + $0x2c] sm:$0x1] }
  0x53   : > { %7371 = vmatprep.subr.bf16.mxu0 %v7720_v21  ;;  %v1561_v2 = vrot.slane %v1560_v56, 4  ;;  %v1593_v3 = vrot.slane %v1591_v57, 5  ;;  %v1598_v4 = vrot.slane %v1596_v58, 4  ;;  %v1601_v5 = vrot.slane %v1599_v59, 5  ;;  %v6358_v34 = vld [vmem:[%s7873_s6 + $0x40] sm:$0xf] }
  0x54   : > { %7360 = vmatmul.mubr.msk.bf16.vlgmr.msra.gmra.mrb[16].mxu1 %vm276_vm0, %v7719_v25  ;;  %v1575_v6 = vrot.slane %v1574_v60, 4  ;;  %v1588_v7 = vor.u32 %v1587_v62, %v1584_v61  ;;  %v1607_v9 = vrot.slane %v1605_v0, 5  ;;  %v1613_v22 = vshll.u32 %v6352_v12, 16  ;;  %v8179_v25 = vld [vmem:[%s9637_s1 + $0x120] sm:$0xff]   ;;  %v6380_v57 = vld [vmem:[%s7873_s6 + $0x8] sm:$0xe] }
  0x55   : > { %7348 = vmatmul.mubr.msk.bf16.gmra.mrb[20].mxu0 %vm276_vm0, %v6307_v8  ;;  %7384 = vmatpush3.bf16.msra.mxu1 %v7721_v19  ;;  %v1566_v10 = vsel %vm7906_vm3, %v1561_v2, %v1565_v48  ;;  %v1602_v11 = vor.u32 %v1601_v5, %v1598_v4  ;;  %v1610_v19 = vshrl.u32 %v6352_v12, 16  ;;  %v1619_v23 = vshll.u32 %v6353_v13, 16  ;;  %v6359_v40 = vld [vmem:[%s7873_s6 + $0x44] sm:$0x1]  ;;  %v6381_v61 = vld [vmem:[%s7873_s6 + $0xc] sm:$0x1] }
  0x56   : > { %7372 = vmatpush3.bf16.msra.mxu0 %v7720_v21  ;;  %7363 = vmatprep.mubr.msk.bf16.mxu1 %vm276_vm0, %v7723_v29  ;;  %v1580_v14 = vsel %vm7906_vm3, %v1575_v6, %v1579_v52  ;;  %v1589_v16 = vrot.slane %v1588_v7, 4  ;;  %v1627_v29 = vshll.u32 %v6354_v17, 16  ;;  %v1615_v32 = vrot.slane %v1613_v22, 5  ;;  %v7730_v52 = vld [vmem:[%s9637_s1 + $0x110] sm:$0xff]  }
  0x57   : > { %7373 = vmatprep.subr.bf16.mxu0 %v7722_v26  ;;  %7385 = vmatprep.subr.bf16.mxu1 %v7725_v27  ;;  %v6368_v20 = vcombine.low %v1566_v10, %v1580_v14  ;;  %v1603_v21 = vrot.slane %v1602_v11, 4  ;;  %v1621_v33 = vrot.slane %v1619_v23, 5  ;;  %v1633_v15 = vshll.u32 %v6355_v18, 16  ;;  %v6382_v2 = vld [vmem:[%s7873_s6 + $0x10] sm:$0xe]  ;;  %v7732_v23 = vld [vmem:[%s9637_s1 + $0x118] sm:$0xff]  }
  0x58   : > { %v1594_v8 = vsel %vm7906_vm3, %v1589_v16, %v1593_v3  ;;  %v1638_v41 = vshrl.u32 %v6356_v24, 16  ;;  %v1641_v46 = vshll.u32 %v6356_v24, 16  ;;  %v1647_v47 = vshll.u32 %v6357_v28, 16  ;;  %v6383_v3 = vld [vmem:[%s7873_s6 + $0x14] sm:$0x1]  ;;  %v7733_v28 = vld [vmem:[%s9637_s1 + $0x128] sm:$0xff]  }
  0x59   : > { %7386 = vmatpush3.bf16.msra.mxu1 %v7725_v27  ;;  %v1624_v27 = vshrl.u32 %v6354_v17, 16  ;;  %7375 = vmatprep.mubr.msk.bf16.mxu0 %vm276_vm0, %v6368_v20  ;;  %v1608_v31 = vsel %vm7906_vm3, %v1603_v21, %v1607_v9  ;;  %v1652_v50 = vshrl.u32 %v6358_v34, 16  ;;  %v1655_v51 = vshll.u32 %v6358_v34, 16  ;;  %v6384_v10 = vld [vmem:[%s7873_s6 + $0x18] sm:$0xe] }
  0x5a   : > { %7374 = vmatpush3.bf16.msra.mxu0 %v7722_v26  ;;  %7387 = vmatprep.subr.bf16.mxu1 %v7726_v38  ;;  %v1612_v26 = vrot.slane %v1610_v19, 4  ;;  %v6369_v35 = vcombine.low %v1594_v8, %v1608_v31  ;;  %v1640_v49 = vrot.slane %v1638_v41, 4  ;;  %v1643_v54 = vrot.slane %v1641_v46, 5  ;;  %v6385_v11 = vld [vmem:[%s7873_s6 + $0x1c] sm:$0x1] }
  0x5b   : > { %7399 = vmatprep.subr.bf16.mxu0 %v8154_v39  ;;  %v1626_v36 = vrot.slane %v1624_v27, 4  ;;  %v1649_v55 = vrot.slane %v1647_v47, 5  ;;  %v1661_v56 = vshll.u32 %v6359_v40, 16  ;;  %v1654_v59 = vrot.slane %v1652_v50, 4  ;;  %v6386_v16 = vld [vmem:[%s7873_s6 + $0x20] sm:$0xe] }
  0x5c   : > { %7364 = vmatmul.mubr.msk.bf16.gmra.mrb[20].mxu1 %vm276_vm0, %v7724_v44  ;;  %v1616_v43 = vor.u32 %v1615_v32, %v1612_v26  ;;  %v1635_v44 = vrot.slane %v1633_v15, 5  ;;  %v1657_v60 = vrot.slane %v1655_v51, 5  ;;  %v6396_v62 = vrot.slane %v6380_v57, 9  ;;  %v6387_v17 = vld [vmem:[%s7873_s6 + $0x24] sm:$0x1] }
  0x5d   : > { %7388 = vmatpush3.bf16.msra.mxu1 %v7726_v38  ;;  %v1629_v38 = vrot.slane %v1627_v29, 5  ;;  %7376 = vmatmul.mubr.msk.bf16.vlgmr.msra.gmra.mrb[24].mxu0 %vm276_vm0, %v6369_v35  ;;  %v1845_v4 = vrot.slane %v6381_v61, 5  ;;  %v6397_v7 = vrot.slane %v6382_v2, 9  ;;  %v1849_v9 = vrot.slane %v6383_v3, 5  ;;  %v6389_v15 = vld [vmem:[%s7873_s6 + $0x2c] sm:$0x1] }
  0x5e   : > { %7389 = vmatprep.subr.bf16.mxu1 %v7728_v1  ;;  %7400 = vmatpush3.bf16.msra.mxu0 %v8154_v39  ;;  %v1617_v53 = vrot.slane %v1616_v43, 4  ;;  %v1663_v39 = vrot.slane %v1661_v56, 5  ;;  %v1658_v6 = vor.u32 %v1657_v60, %v1654_v59  ;;  %v6398_v18 = vrot.slane %v6384_v10, 9  ;;  %v6390_v34 = vld [vmem:[%s7873_s6 + $0x30] sm:$0xe] }
  0x5f   : > { %v1630_v48 = vor.u32 %v1629_v38, %v1626_v36  ;;  %7401 = vmatprep.subr.bf16.mxu0 %v7729_v42  ;;  %v1846_v14 = vsel %vm7959_vm6, %v6396_v62, %v1845_v4  ;;  %v1850_v20 = vsel %vm7959_vm6, %v6397_v7, %v1849_v9  ;;  %v1853_v21 = vrot.slane %v6385_v11, 5  ;;  %v6391_v36 = vld [vmem:[%s7873_s6 + $0x34] sm:$0x1]  ;;  %v6393_v46 = vld [vmem:[%s7873_s6 + $0x3c] sm:$0x1] }
  0x60   : > { %v1622_v0 = vsel %vm7906_vm3, %v1617_v53, %v1621_v33  ;;  %v1659_v19 = vrot.slane %v1658_v6, 4  ;;  %v6399_v22 = vrot.slane %v6386_v16, 9  ;;  %v6412_v8 = vcombine.low %v1846_v14, %v1850_v20  ;;  %v6388_v33 = vld [vmem:[%s7873_s6 + $0x28] sm:$0xe]  ;;  %v6425_v59 = vld [vmem:[%s7873_s6 + $0xc] sm:$0x3] }
  0x61   : > { %7390 = vmatpush3.bf16.msra.mxu1 %v7728_v1  ;;  %v1631_v58 = vrot.slane %v1630_v48, 4  ;;  %v1644_v1 = vor.u32 %v1643_v54, %v1640_v49  ;;  %v1857_v26 = vrot.slane %v6387_v17, 5  ;;  %v1854_v29 = vsel %vm7959_vm6, %v6398_v18, %v1853_v21  ;;  %v6394_v48 = vld [vmem:[%s7873_s6 + $0x40] sm:$0xe]  ;;  %v6395_v49 = vld [vmem:[%s7873_s6 + $0x44] sm:$0x1] }
  0x62   : > { %7415 = vmatprep.subr.bf16.mxu1 %v8179_v25  ;;  %7402 = vmatpush3.bf16.msra.mxu0 %v7729_v42  ;;  %v1664_v27 = vsel %vm7906_vm3, %v1659_v19, %v1663_v39  ;;  %v6400_v38 = vrot.slane %v6388_v33, 9  ;;  %v1861_v40 = vrot.slane %v6389_v15, 5  ;;  %v6401_v41 = vrot.slane %v6390_v34, 9  ;;  %v8237_v42 = vld [vmem:[%s9637_s1 + $0x140] sm:$0xff]   ;;  %v6426_v60 = vld [vmem:[%s7873_s6 + $0x10] sm:$0xe] }
  0x63   : > { %v1636_v5 = vsel %vm7906_vm3, %v1631_v58, %v1635_v44  ;;  %v1645_v13 = vrot.slane %v1644_v1, 4  ;;  %7403 = vmatprep.subr.bf16.mxu0 %v7730_v52  ;;  %7391 = vmatprep.mubr.msk.bf16.mxu1 %vm276_vm0, %v6412_v8  ;;  %v1858_v32 = vsel %vm7959_vm6, %v6399_v22, %v1857_v26  ;;  %v1865_v43 = vrot.slane %v6391_v36, 5  ;;  %v6392_v44 = vld [vmem:[%s7873_s6 + $0x38] sm:$0xe]  ;;  %v6424_v58 = vld [vmem:[%s7873_s6 + $0x8] sm:$0xe] }
  0x64   : > { %v6370_v12 = vcombine.low %v1622_v0, %v1636_v5  ;;  %v6413_v35 = vcombine.low %v1854_v29, %v1858_v32  ;;  %v1862_v47 = vsel %vm7959_vm6, %v6400_v38, %v1861_v40  ;;  %v6402_v50 = vrot.slane %v6392_v44, 9  ;;  %v6427_v61 = vld [vmem:[%s7873_s6 + $0x14] sm:$0x3]  ;;  %v6428_v5 = vld [vmem:[%s7873_s6 + $0x18] sm:$0xe]  ;;  %v8274_v36 = vld [vmem:[%s9637_s1 + $0x160] sm:$0xff]  }
  0x65   : > { %v1650_v24 = vsel %vm7906_vm3, %v1645_v13, %v1649_v55  ;;  %v1869_v51 = vrot.slane %v6393_v46, 5  ;;  %v1866_v53 = vsel %vm7959_vm6, %v6401_v41, %v1865_v43  ;;  %v6403_v54 = vrot.slane %v6394_v48, 9  ;;  %v7736_v6 = vld [vmem:[%s9637_s1 + $0x138] sm:$0xff]   ;;  %v6430_v18 = vld [vmem:[%s7873_s6 + $0x20] sm:$0xe] }
  0x66   : > { %7379 = vmatprep.mubr.msk.bf16.mxu0 %vm276_vm0, %v6370_v12  ;;  %v6371_v31 = vcombine.low %v1650_v24, %v1664_v27  ;;  %7404 = vmatpush3.bf16.msra.mxu0 %v7730_v52  ;;  %v7734_v52 = vld [vmem:[%s9637_s1 + $0x130] sm:$0xff]   ;;  %v1873_v55 = vrot.slane %v6395_v49, 5  ;;  %v6414_v56 = vcombine.low %v1862_v47, %v1866_v53  ;;  %v2038_v62 = vshrl.u32 %v6424_v58, 16  ;;  %v6429_v12 = vld [vmem:[%s7873_s6 + $0x1c] sm:$0x3] }
  0x67   : > { %7405 = vmatprep.subr.bf16.mxu0 %v7732_v23  ;;  %7392 = vmatmul.mubr.msk.bf16.vlgmr.msra.gmra.mrb[24].mxu1 %vm276_vm0, %v6413_v35  ;;  %v1870_v57 = vsel %vm7959_vm6, %v6402_v50, %v1869_v51  ;;  %v2041_v0 = vshll.u32 %v6424_v58, 16  ;;  %v2047_v1 = vshrl.u32 %v6425_v59, 16  ;;  %v2050_v2 = vshll.u32 %v6425_v59, 16  ;;  %v6431_v21 = vld [vmem:[%s7873_s6 + $0x24] sm:$0x3] }
  0x68   : > { %7380 = vmatmul.mubr.msk.bf16.gmra.mrb[28].mxu0 %vm276_vm0, %v6371_v31  ;;  %7416 = vmatpush3.bf16.msra.mxu1 %v8179_v25  ;;  %v1874_v25 = vsel %vm7959_vm6, %v6403_v54, %v1873_v55  ;;  %v2056_v3 = vshrl.u32 %v6426_v60, 16  ;;  %v2059_v4 = vshll.u32 %v6426_v60, 16  ;;  %v2040_v7 = vrot.slane %v2038_v62, 5  ;;  %v6432_v49 = vld [vmem:[%s7873_s6 + $0x28] sm:$0xe] }
  0x69   : > { %7417 = vmatprep.subr.bf16.mxu1 %v7733_v28  ;;  %7395 = vmatprep.mubr.msk.bf16.mxu1 %vm276_vm0, %v6414_v56  ;;  %v6415_v39 = vcombine.low %v1870_v57, %v1874_v25  ;;  %v2043_v9 = vrot.slane %v2041_v0, 6  ;;  %v2049_v10 = vrot.slane %v2047_v1, 5  ;;  %v2065_v11 = vshrl.u32 %v6427_v61, 16  ;;  %v6433_v54 = vld [vmem:[%s7873_s6 + $0x2c] sm:$0x3] }
  0x6a   : > { %7406 = vmatpush3.bf16.msra.mxu0 %v7732_v23  ;;  %v2052_v13 = vrot.slane %v2050_v2, 6  ;;  %v2058_v14 = vrot.slane %v2056_v3, 5  ;;  %v2061_v16 = vrot.slane %v2059_v4, 6  ;;  %v2068_v17 = vshll.u32 %v6427_v61, 16  ;;  %v6434_v55 = vld [vmem:[%s7873_s6 + $0x30] sm:$0xe] }
  0x6b   : > { %7431 = vmatprep.subr.bf16.mxu0 %v8237_v42  ;;  %v2044_v19 = vor.u32 %v2043_v9, %v2040_v7  ;;  %v2067_v20 = vrot.slane %v2065_v11, 5  ;;  %v2074_v22 = vshrl.u32 %v6428_v5, 16  ;;  %v2077_v23 = vshll.u32 %v6428_v5, 16  ;;  %v6435_v61 = vld [vmem:[%s7873_s6 + $0x34] sm:$0x3] }
  0x6c   : > { %7418 = vmatpush3.bf16.msra.mxu1 %v7733_v28  ;;  %v2053_v24 = vor.u32 %v2052_v13, %v2049_v10  ;;  %v2062_v8 = vor.u32 %v2061_v16, %v2058_v14  ;;  %v2070_v26 = vrot.slane %v2068_v17, 6  ;;  %v2083_v27 = vshrl.u32 %v6429_v12, 16  ;;  %v6436_v4 = vld [vmem:[%s7873_s6 + $0x38] sm:$0xe]  ;;  %v6437_v10 = vld [vmem:[%s7873_s6 + $0x3c] sm:$0x3] }
  0x6d   : > { %7419 = vmatprep.subr.bf16.mxu1 %v7734_v52  ;;  %v2045_v29 = vrot.slane %v2044_v19, 4  ;;  %v2076_v28 = vrot.slane %v2074_v22, 5  ;;  %v2079_v31 = vrot.slane %v2077_v23, 6  ;;  %v2086_v32 = vshll.u32 %v6429_v12, 16  ;;  %v6438_v19 = vld [vmem:[%s7873_s6 + $0x40] sm:$0xe] }
  0x6e   : > { %v2063_v33 = vrot.slane %v2062_v8, 4  ;;  %v2071_v15 = vor.u32 %v2070_v26, %v2067_v20  ;;  %v2085_v34 = vrot.slane %v2083_v27, 5  ;;  %v2092_v35 = vshrl.u32 %v6430_v18, 16  ;;  %v6439_v8 = vld [vmem:[%s7873_s6 + $0x44] sm:$0x3]  ;;  %v7737_v26 = vld [vmem:[%s9637_s1 + $0x148] sm:$0xff]  }
  0x6f   : > { %7396 = vmatmul.mubr.msk.bf16.gmra.mrb[28].mxu1 %vm276_vm0, %v6415_v39  ;;  %v2054_v38 = vsel %vm8033_vm9, %v2045_v29, %v2053_v24  ;;  %v2080_v40 = vor.u32 %v2079_v31, %v2076_v28  ;;  %v2088_v41 = vrot.slane %v2086_v32, 6  ;;  %v2095_v43 = vshll.u32 %v6430_v18, 16  ;;  %v6460_v32 = vld [vmem:[%s7873_s6 + $0x8] sm:$0xc] }
  0x70   : > { %7420 = vmatpush3.bf16.msra.mxu1 %v7734_v52  ;;  %v2072_v44 = vsel %vm8033_vm9, %v2063_v33, %v2071_v15  ;;  %v2094_v46 = vrot.slane %v2092_v35, 5  ;;  %v2101_v47 = vshrl.u32 %v6431_v21, 16  ;;  %v2104_v48 = vshll.u32 %v6431_v21, 16 }
  0x71   : > { %7421 = vmatprep.subr.bf16.mxu1 %v7736_v6  ;;  %v6448_v50 = vcombine.low %v2054_v38, %v2072_v44  ;;  %v2081_v51 = vrot.slane %v2080_v40, 4  ;;  %v2089_v52 = vor.u32 %v2088_v41, %v2085_v34  ;;  %v2097_v53 = vrot.slane %v2095_v43, 6  ;;  %v6461_v38 = vld [vmem:[%s7873_s6 + $0xc] sm:$0x3]  ;;  %v6462_v40 = vld [vmem:[%s7873_s6 + $0x10] sm:$0xc] }
  0x72   : > { %v2103_v56 = vrot.slane %v2101_v47, 5  ;;  %v2106_v57 = vrot.slane %v2104_v48, 6  ;;  %v2110_v58 = vshrl.u32 %v6432_v49, 16  ;;  %v2113_v59 = vshll.u32 %v6432_v49, 16  ;;  %v7738_v41 = vld [vmem:[%s9637_s1 + $0x150] sm:$0xff]  }
  0x73   : > { %7407 = vmatprep.mubr.msk.bf16.mxu0 %vm276_vm0, %v6448_v50  ;;  %v2090_v60 = vsel %vm8033_vm9, %v2081_v51, %v2089_v52  ;;  %v2098_v25 = vor.u32 %v2097_v53, %v2094_v46  ;;  %v2119_v62 = vshrl.u32 %v6433_v54, 16  ;;  %v2122_v0 = vshll.u32 %v6433_v54, 16  ;;  %v6463_v48 = vld [vmem:[%s7873_s6 + $0x14] sm:$0x3]  ;;  %v6464_v49 = vld [vmem:[%s7873_s6 + $0x18] sm:$0xc] }
  0x74   : > { %7422 = vmatpush3.bf16.msra.mxu1 %v7736_v6  ;;  %v2107_v1 = vor.u32 %v2106_v57, %v2103_v56  ;;  %v2112_v39 = vrot.slane %v2110_v58, 5  ;;  %v2115_v2 = vrot.slane %v2113_v59, 6  ;;  %v2128_v3 = vshrl.u32 %v6434_v55, 16  ;;  %v6465_v50 = vld [vmem:[%s7873_s6 + $0x1c] sm:$0x3] }
  0x75   : > { %7447 = vmatprep.subr.bf16.mxu1 %v8274_v36  ;;  %v2099_v5 = vrot.slane %v2098_v25, 4  ;;  %v2121_v6 = vrot.slane %v2119_v62, 5  ;;  %v2124_v7 = vrot.slane %v2122_v0, 6  ;;  %v2131_v9 = vshll.u32 %v6434_v55, 16  ;;  %v6466_v55 = vld [vmem:[%s7873_s6 + $0x20] sm:$0xc] }
  0x76   : > { %v2116_v11 = vor.u32 %v2115_v2, %v2112_v39  ;;  %v2130_v12 = vrot.slane %v2128_v3, 5  ;;  %v2137_v13 = vshrl.u32 %v6435_v61, 16  ;;  %v2140_v14 = vshll.u32 %v6435_v61, 16  ;;  %v6467_v59 = vld [vmem:[%s7873_s6 + $0x24] sm:$0x3] }
  0x77   : > { %v2108_v16 = vsel %vm8033_vm9, %v2099_v5, %v2107_v1  ;;  %v2125_v17 = vor.u32 %v2124_v7, %v2121_v6  ;;  %v2133_v18 = vrot.slane %v2131_v9, 6  ;;  %v2146_v20 = vshrl.u32 %v6436_v4, 16  ;;  %v7740_v7 = vld [vmem:[%s9637_s1 + $0x158] sm:$0xff]  }
  0x78   : > { %v6449_v21 = vcombine.low %v2090_v60, %v2108_v16  ;;  %v2117_v22 = vrot.slane %v2116_v11, 4  ;;  %v2139_v23 = vrot.slane %v2137_v13, 5  ;;  %v2142_v24 = vrot.slane %v2140_v14, 6  ;;  %v6468_v13 = vld [vmem:[%s7873_s6 + $0x28] sm:$0xc] }
  0x79   : > { %v2134_v27 = vor.u32 %v2133_v18, %v2130_v12  ;;  %v2148_v29 = vrot.slane %v2146_v20, 5  ;;  %v2149_v28 = vshll.u32 %v6436_v4, 16  ;;  %v2155_v31 = vshrl.u32 %v6437_v10, 16  ;;  %v6469_v18 = vld [vmem:[%s7873_s6 + $0x2c] sm:$0x3] }
  0x7a   : > { %7408 = vmatmul.mubr.msk.bf16.vlgmr.msra.gmra.mrb[32].mxu0 %vm276_vm0, %v6449_v21  ;;  %v2126_v33 = vsel %vm8033_vm9, %v2117_v22, %v2125_v17  ;;  %v2143_v15 = vor.u32 %v2142_v24, %v2139_v23  ;;  %v2158_v34 = vshll.u32 %v6437_v10, 16  ;;  %v2164_v35 = vshrl.u32 %v6438_v19, 16  ;;  %v7745_v21 = vld [vmem:[%s9637_s1 + $0x180] sm:$0xff]   ;;  %v6471_v24 = vld [vmem:[%s7873_s6 + $0x34] sm:$0x3] }
  0x7b   : > { %7432 = vmatpush3.bf16.msra.mxu0 %v8237_v42  ;;  %v2135_v43 = vrot.slane %v2134_v27, 4  ;;  %v2151_v44 = vrot.slane %v2149_v28, 6  ;;  %v2157_v46 = vrot.slane %v2155_v31, 5  ;;  %v2167_v47 = vshll.u32 %v6438_v19, 16  ;;  %v6470_v19 = vld [vmem:[%s7873_s6 + $0x30] sm:$0xc] }
  0x7c   : > { %v2160_v51 = vrot.slane %v2158_v34, 6  ;;  %v2166_v52 = vrot.slane %v2164_v35, 5  ;;  %v2173_v53 = vshrl.u32 %v6439_v8, 16  ;;  %v2176_v54 = vshll.u32 %v6439_v8, 16  ;;  %7433 = vmatprep.subr.bf16.mxu0 %v7737_v26  ;;  %v6472_v27 = vld [vmem:[%s7873_s6 + $0x38] sm:$0xc] }
  0x7d   : > { %v2144_v56 = vsel %vm8033_vm9, %v2135_v43, %v2143_v15  ;;  %v2152_v57 = vor.u32 %v2151_v44, %v2148_v29  ;;  %v2169_v58 = vrot.slane %v2167_v47, 6  ;;  %v6476_v42 = vrot.slane %v6460_v32, 10  ;;  %v7741_v29 = vld [vmem:[%s9637_s1 + $0x168] sm:$0xff]   ;;  %v6474_v15 = vld [vmem:[%s7873_s6 + $0x40] sm:$0xc] }
  0x7e   : > { %v6450_v60 = vcombine.low %v2126_v33, %v2144_v56  ;;  %v2161_v25 = vor.u32 %v2160_v51, %v2157_v46  ;;  %v2175_v61 = vrot.slane %v2173_v53, 5  ;;  %v2178_v62 = vrot.slane %v2176_v54, 6  ;;  %v6473_v33 = vld [vmem:[%s7873_s6 + $0x3c] sm:$0x3]  ;;  %v7749_v54 = vld [vmem:[%s9637_s1 + $0x188] sm:$0xff]  }
  0x7f   : > { %v2153_v0 = vrot.slane %v2152_v57, 4  ;;  %v2170_v1 = vor.u32 %v2169_v58, %v2166_v52  ;;  %v2361_v39 = vrot.slane %v6461_v38, 6  ;;  %v6477_v2 = vrot.slane %v6462_v40, 10  ;;  %7434 = vmatpush3.bf16.msra.mxu0 %v7737_v26  ;;  %v6475_v40 = vld [vmem:[%s7873_s6 + $0x44] sm:$0x3] }
  0x80   : > { %7411 = vmatprep.mubr.msk.bf16.mxu0 %vm276_vm0, %v6450_v60  ;;  %v2179_v3 = vor.u32 %v2178_v62, %v2175_v61  ;;  %v2365_v4 = vrot.slane %v6463_v48, 6  ;;  %v6478_v5 = vrot.slane %v6464_v49, 10  ;;  %v2369_v6 = vrot.slane %v6465_v50, 6  ;;  %7435 = vmatprep.subr.bf16.mxu0 %v7738_v41  ;;  %v7742_v48 = vld [vmem:[%s7873_s6 + $0x10] ss:$8 sps:$4 sm:$0xff]  }
  0x81   : > { %v2162_v9 = vsel %vm8033_vm9, %v2153_v0, %v2161_v25  ;;  %v2171_v10 = vrot.slane %v2170_v1, 4  ;;  %v2362_v11 = vsel %vm8078_vm12, %v6476_v42, %v2361_v39  ;;  %v6479_v12 = vrot.slane %v6466_v55, 10  ;;  %v7744_v49 = vld [vmem:[%s9637_s1 + $0x170] sm:$0xff]   ;;  %v7743_v52 = vld [vmem:[%s7873_s6 + $0x20] ss:$8 sps:$4 sm:$0xff]  }
  0x82   : > { %v2366_v14 = vsel %vm8078_vm12, %v6477_v2, %v2365_v4  ;;  %v2370_v16 = vsel %vm8078_vm12, %v6478_v5, %v2369_v6  ;;  %v2373_v17 = vrot.slane %v6467_v59, 6  ;;  %v6480_v20 = vrot.slane %v6468_v13, 10  ;;  %v7747_v55 = vld [vmem:[%s7873_s6 + $0x30] ss:$8 sps:$4 sm:$0xff]   ;;  %v6533_v57 = vld [vmem:[%s7873_s6 + $0x14] sm:$0x1] }
  0x83   : > { %v2180_v22 = vsel %vm8033_vm9, %v2171_v10, %v2179_v3  ;;  %v6492_v23 = vcombine.low %v2362_v11, %v2366_v14  ;;  %7436 = vmatpush3.bf16.msra.mxu0 %v7738_v41  ;;  %v2377_v8 = vrot.slane %v6469_v18, 6  ;;  %v6481_v26 = vrot.slane %v6470_v19, 10  ;;  %v6532_v56 = vld [vmem:[%s7873_s6 + $0x10] sm:$0xf]  ;;  %v6534_v58 = vld [vmem:[%s7873_s6 + $0x18] sm:$0xf] }
  0x84   : > { %v6451_v28 = vcombine.low %v2162_v9, %v2180_v22  ;;  %v2374_v31 = vsel %vm8078_vm12, %v6479_v12, %v2373_v17  ;;  %7437 = vmatprep.subr.bf16.mxu0 %v7740_v7  ;;  %v2381_v32 = vrot.slane %v6471_v24, 6  ;;  %v6482_v34 = vrot.slane %v6472_v27, 10  ;;  %v6535_v42 = vld [vmem:[%s7873_s6 + $0x1c] sm:$0x1]  ;;  %v7750_v25 = vld [vmem:[%s9637_s1 + $0x190] sm:$0xff]   ;;  %v8383_v2 = vld [vmem:[%s9637_s1 + $0x1a0] sm:$0xff]  }
  0x85   : > { %7423 = vmatprep.mubr.msk.bf16.mxu1 %vm276_vm0, %v6492_v23  ;;  %v6493_v35 = vcombine.low %v2370_v16, %v2374_v31  ;;  %v2378_v38 = vsel %vm8078_vm12, %v6480_v20, %v2377_v8  ;;  %v2385_v41 = vrot.slane %v6473_v33, 6  ;;  %v6483_v43 = vrot.slane %v6474_v15, 10  ;;  %v6536_v39 = vld [vmem:[%s7873_s6 + $0x20] sm:$0xf]  ;;  %v6537_v6 = vld [vmem:[%s7873_s6 + $0x24] sm:$0x1] }
  0x86   : > { %7412 = vmatmul.mubr.msk.bf16.gmra.mrb[36].mxu0 %vm276_vm0, %v6451_v28  ;;  %v2382_v44 = vsel %vm8078_vm12, %v6481_v26, %v2381_v32  ;;  %v2389_v46 = vrot.slane %v6475_v40, 6  ;;  %v2717_v59 = vshrl.u32 %v6532_v56, 16  ;;  %v2720_v60 = vshll.u32 %v6532_v56, 16  ;;  %v7748_v3 = vld [vmem:[%s7873_s6 + $0x40] ss:$8 sps:$4 sm:$0xff]   ;;  %v7752_v23 = vld [vmem:[%s9637_s1 + $0x198] sm:$0xff]  }
  0x87   : > { %7424 = vmatmul.mubr.msk.bf16.vlgmr.msra.gmra.mrb[32].mxu1 %vm276_vm0, %v6493_v35  ;;  %v6494_v47 = vcombine.low %v2378_v38, %v2382_v44  ;;  %7438 = vmatpush3.bf16.msra.mxu0 %v7740_v7  ;;  %v2386_v50 = vsel %vm8078_vm12, %v6482_v34, %v2385_v41  ;;  %v2726_v61 = vshll.u32 %v6533_v57, 16  ;;  %v2731_v62 = vshrl.u32 %v6534_v58, 16  ;;  %v6538_v7 = vld [vmem:[%s7873_s6 + $0x28] sm:$0xf]  ;;  %v6539_v13 = vld [vmem:[%s7873_s6 + $0x2c] sm:$0x1] }
  0x88   : > { %7448 = vmatpush3.bf16.msra.mxu1 %v8274_v36  ;;  %v2390_v51 = vsel %vm8078_vm12, %v6483_v43, %v2389_v46  ;;  %7463 = vmatprep.subr.bf16.mxu0 %v7745_v21  ;;  %v7746_v36 = vld [vmem:[%s9637_s1 + $0x178] sm:$0xff]   ;;  %v2734_v0 = vshll.u32 %v6534_v58, 16  ;;  %v2740_v1 = vshll.u32 %v6535_v42, 16  ;;  %v2719_v4 = vrot.slane %v2717_v59, 4  ;;  %v6540_v34 = vld [vmem:[%s7873_s6 + $0x30] sm:$0xf] }
  0x89   : > { %7427 = vmatprep.mubr.msk.bf16.mxu1 %vm276_vm0, %v6494_v47  ;;  %7449 = vmatprep.subr.bf16.mxu1 %v7741_v29  ;;  %v6495_v53 = vcombine.low %v2386_v50, %v2390_v51  ;;  %v2722_v5 = vrot.slane %v2720_v60, 5  ;;  %v2728_v9 = vrot.slane %v2726_v61, 5  ;;  %v2733_v10 = vrot.slane %v2731_v62, 4  ;;  %v6541_v40 = vld [vmem:[%s7873_s6 + $0x34] sm:$0x1]  ;;  %v8407_v50 = vld [vmem:[%s9637_s1 + $0x1c0] sm:$0xff]  }
  0x8a   : > { %7439 = vmatprep.mubr.msk.bf16.mxu0 %vm276_vm0, %v7742_v48  ;;  %v2736_v11 = vrot.slane %v2734_v0, 5  ;;  %v2742_v12 = vrot.slane %v2740_v1, 5  ;;  %v2745_v16 = vshrl.u32 %v6536_v39, 16  ;;  %v2748_v17 = vshll.u32 %v6536_v39, 16  ;;  %v6542_v41 = vld [vmem:[%s7873_s6 + $0x38] sm:$0xf] }
  0x8b   : > { %v2723_v14 = vor.u32 %v2722_v5, %v2719_v4  ;;  %v2754_v18 = vshll.u32 %v6537_v6, 16  ;;  %v2759_v20 = vshrl.u32 %v6538_v7, 16  ;;  %v2768_v22 = vshll.u32 %v6539_v13, 16  ;;  %v6543_v43 = vld [vmem:[%s7873_s6 + $0x3c] sm:$0x1]  ;;  %v7753_v0 = vld [vmem:[%s9637_s1 + $0x1a8] sm:$0xff]  }
  0x8c   : > { %7450 = vmatpush3.bf16.msra.mxu1 %v7741_v29  ;;  %v2737_v19 = vor.u32 %v2736_v11, %v2733_v10  ;;  %v2747_v8 = vrot.slane %v2745_v16, 4  ;;  %v2750_v26 = vrot.slane %v2748_v17, 5  ;;  %v2773_v47 = vshrl.u32 %v6540_v34, 16  ;;  %v6546_v42 = vld [vmem:[%s7873_s6 + $0x48] sm:$0xf] }
  0x8d   : > { %7451 = vmatprep.subr.bf16.mxu1 %v7744_v49  ;;  %v2724_v24 = vrot.slane %v2723_v14, 4  ;;  %v2756_v27 = vrot.slane %v2754_v18, 5  ;;  %v2761_v28 = vrot.slane %v2759_v20, 4  ;;  %v2770_v32 = vrot.slane %v2768_v22, 5  ;;  %v6547_v62 = vld [vmem:[%s7873_s6 + $0x4c] sm:$0x1] }
  0x8e   : > { %7440 = vmatmul.mubr.msk.bf16.vlgmr.msra.gmra.mrb[40].mxu0 %vm276_vm0, %v7743_v52  ;;  %v2738_v29 = vrot.slane %v2737_v19, 4  ;;  %v2751_v15 = vor.u32 %v2750_v26, %v2747_v8  ;;  %v2776_v48 = vshll.u32 %v6540_v34, 16  ;;  %v2782_v52 = vshll.u32 %v6541_v40, 16  ;;  %v6568_v10 = vld [vmem:[%s7873_s6 + $0x10] sm:$0xe] }
  0x8f   : > { %7428 = vmatmul.mubr.msk.bf16.gmra.mrb[36].mxu1 %vm276_vm0, %v6495_v53  ;;  %7464 = vmatpush3.bf16.msra.mxu0 %v7745_v21  ;;  %v2762_v21 = vshll.u32 %v6538_v7, 16  ;;  %v2729_v33 = vsel %vm7906_vm3, %v2724_v24, %v2728_v9  ;;  %v2787_v53 = vshrl.u32 %v6542_v41, 16  ;;  %v2775_v56 = vrot.slane %v2773_v47, 4  ;;  %v6569_v16 = vld [vmem:[%s7873_s6 + $0x14] sm:$0x1] }
  0x90   : > { %7452 = vmatpush3.bf16.msra.mxu1 %v7744_v49  ;;  %7443 = vmatprep.mubr.msk.bf16.mxu0 %vm276_vm0, %v7747_v55  ;;  %v2743_v35 = vsel %vm7906_vm3, %v2738_v29, %v2742_v12  ;;  %v2752_v46 = vrot.slane %v2751_v15, 4  ;;  %v6544_v49 = vld [vmem:[%s7873_s6 + $0x40] sm:$0xf]  ;;  %v2778_v57 = vrot.slane %v2776_v48, 5  ;;  %v2796_v58 = vshll.u32 %v6543_v43, 16  ;;  %v7756_v48 = vld [vmem:[%s9637_s1 + $0x1b8] sm:$0xff]  }
  0x91   : > { %7453 = vmatprep.subr.bf16.mxu1 %v7746_v36  ;;  %7465 = vmatprep.subr.bf16.mxu0 %v7749_v54  ;;  %v2764_v31 = vrot.slane %v2762_v21, 5  ;;  %v6556_v44 = vcombine.low %v2729_v33, %v2743_v35  ;;  %v2784_v60 = vrot.slane %v2782_v52, 5  ;;  %v2801_v4 = vshrl.u32 %v6544_v49, 16  ;;  %v6570_v21 = vld [vmem:[%s7873_s6 + $0x18] sm:$0xe] }
  0x92   : > { %v2757_v55 = vsel %vm7906_vm3, %v2752_v46, %v2756_v27  ;;  %v2779_v39 = vor.u32 %v2778_v57, %v2775_v56  ;;  %v2804_v6 = vshll.u32 %v6544_v49, 16  ;;  %v2815_v9 = vshrl.u32 %v6546_v42, 16  ;;  %v6571_v8 = vld [vmem:[%s7873_s6 + $0x1c] sm:$0x1]  ;;  %v6573_v33 = vld [vmem:[%s7873_s6 + $0x24] sm:$0x1] }
  0x93   : > { %7466 = vmatpush3.bf16.msra.mxu0 %v7749_v54  ;;  %v2765_v38 = vor.u32 %v2764_v31, %v2761_v28  ;;  %v6545_v54 = vld [vmem:[%s7873_s6 + $0x44] sm:$0x1]  ;;  %7455 = vmatprep.mubr.msk.bf16.mxu1 %vm276_vm0, %v6556_v44  ;;  %v2803_v12 = vrot.slane %v2801_v4, 4  ;;  %v2818_v13 = vshll.u32 %v6546_v42, 16  ;;  %v2824_v14 = vshll.u32 %v6547_v62, 16 }
  0x94   : > { %7454 = vmatpush3.bf16.msra.mxu1 %v7746_v36  ;;  %7467 = vmatprep.subr.bf16.mxu0 %v7750_v25  ;;  %v2790_v36 = vshll.u32 %v6542_v41, 16  ;;  %v2810_v7 = vshll.u32 %v6545_v54, 16  ;;  %v2780_v11 = vrot.slane %v2779_v39, 4  ;;  %v2806_v18 = vrot.slane %v2804_v6, 5  ;;  %v6575_v40 = vld [vmem:[%s7873_s6 + $0x2c] sm:$0x1] }
  0x95   : > { %7479 = vmatprep.subr.bf16.mxu1 %v8383_v2  ;;  %v2766_v51 = vrot.slane %v2765_v38, 4  ;;  %v2817_v20 = vrot.slane %v2815_v9, 4  ;;  %v2826_v24 = vrot.slane %v2824_v14, 5  ;;  %v6584_v26 = vrot.slane %v6568_v10, 9  ;;  %v6574_v38 = vld [vmem:[%s7873_s6 + $0x28] sm:$0xe] }
  0x96   : > { %7444 = vmatmul.mubr.msk.bf16.gmra.mrb[44].mxu0 %vm276_vm0, %v7748_v3  ;;  %v2792_v61 = vrot.slane %v2790_v36, 5  ;;  %v2798_v3 = vrot.slane %v2796_v58, 5  ;;  %v2812_v19 = vrot.slane %v2810_v7, 5  ;;  %v2785_v22 = vsel %vm7906_vm3, %v2780_v11, %v2784_v60  ;;  %v6576_v58 = vld [vmem:[%s7873_s6 + $0x30] sm:$0xe]  ;;  %v8463_v60 = vld [vmem:[%s9637_s1 + $0x1e0] sm:$0xff]  }
  0x97   : > { %7468 = vmatpush3.bf16.msra.mxu0 %v7750_v25  ;;  %v2771_v59 = vsel %vm7906_vm3, %v2766_v51, %v2770_v32  ;;  %v2789_v25 = vrot.slane %v2787_v53, 4  ;;  %v2807_v29 = vor.u32 %v2806_v18, %v2803_v12  ;;  %v3008_v28 = vrot.slane %v6569_v16, 5  ;;  %v6572_v32 = vld [vmem:[%s7873_s6 + $0x20] sm:$0xe]  ;;  %v6577_v42 = vld [vmem:[%s7873_s6 + $0x34] sm:$0x1] }
  0x98   : > { %7469 = vmatprep.subr.bf16.mxu0 %v7752_v23  ;;  %v6557_v1 = vcombine.low %v2757_v55, %v2771_v59  ;;  %v6585_v31 = vrot.slane %v6570_v21, 9  ;;  %v3012_v35 = vrot.slane %v6571_v8, 5  ;;  %v6586_v41 = vrot.slane %v6572_v32, 9  ;;  %v7757_v55 = vld [vmem:[%s9637_s1 + $0x1c8] sm:$0xff]   ;;  %v6578_v59 = vld [vmem:[%s7873_s6 + $0x38] sm:$0xe] }
  0x99   : > { %v2793_v5 = vor.u32 %v2792_v61, %v2789_v25  ;;  %v2808_v43 = vrot.slane %v2807_v29, 4  ;;  %v3009_v44 = vsel %vm7959_vm6, %v6584_v26, %v3008_v28  ;;  %v3016_v46 = vrot.slane %v6573_v33, 5  ;;  %v6579_v62 = vld [vmem:[%s7873_s6 + $0x3c] sm:$0x1]  ;;  %v6580_v39 = vld [vmem:[%s7873_s6 + $0x40] sm:$0xe] }
  0x9a   : > { %7456 = vmatmul.mubr.msk.bf16.vlgmr.msra.gmra.mrb[40].mxu1 %vm276_vm0, %v6557_v1  ;;  %v6587_v47 = vrot.slane %v6574_v38, 9  ;;  %v3013_v51 = vsel %vm7959_vm6, %v6585_v31, %v3012_v35  ;;  %v3020_v52 = vrot.slane %v6575_v40, 5  ;;  %v3024_v1 = vrot.slane %v6577_v42, 5  ;;  %v6582_v6 = vld [vmem:[%s7873_s6 + $0x48] sm:$0xe]  ;;  %v7758_v16 = vld [vmem:[%s9637_s1 + $0x1d0] sm:$0xff]  }
  0x9b   : > { %7470 = vmatpush3.bf16.msra.mxu0 %v7752_v23  ;;  %7480 = vmatpush3.bf16.msra.mxu1 %v8383_v2  ;;  %v2794_v17 = vrot.slane %v2793_v5, 4  ;;  %v2820_v23 = vrot.slane %v2818_v13, 5  ;;  %v7754_v2 = vld [vmem:[%s9637_s1 + $0x1b0] sm:$0xff]   ;;  %v2813_v53 = vsel %vm7906_vm3, %v2808_v43, %v2812_v19  ;;  %v6600_v36 = vcombine.low %v3009_v44, %v3013_v51  ;;  %v6581_v5 = vld [vmem:[%s7873_s6 + $0x44] sm:$0x1]  ;;  %v7760_v31 = vld [vmem:[%s9637_s1 + $0x1d8] sm:$0xff]  }
  0x9c   : > { %7495 = vmatprep.subr.bf16.mxu0 %v8407_v50  ;;  %7481 = vmatprep.subr.bf16.mxu1 %v7753_v0  ;;  %v3017_v54 = vsel %vm7959_vm6, %v6586_v41, %v3016_v46  ;;  %v3021_v57 = vsel %vm7959_vm6, %v6587_v47, %v3020_v52  ;;  %v3028_v4 = vrot.slane %v6579_v62, 5  ;;  %v6583_v9 = vld [vmem:[%s7873_s6 + $0x4c] sm:$0x1]  ;;  %v6590_v10 = vrot.slane %v6580_v39, 9  ;;  %v6612_v19 = vld [vmem:[%s7873_s6 + $0x10] sm:$0xe] }
  0x9d   : > { %v2799_v27 = vsel %vm7906_vm3, %v2794_v17, %v2798_v3  ;;  %v2821_v34 = vor.u32 %v2820_v23, %v2817_v20  ;;  %7471 = vmatprep.mubr.msk.bf16.mxu0 %vm276_vm0, %v6600_v36  ;;  %v6601_v61 = vcombine.low %v3017_v54, %v3021_v57  ;;  %v6589_v3 = vrot.slane %v6578_v59, 9  ;;  %v6613_v20 = vld [vmem:[%s7873_s6 + $0x14] sm:$0x3]  ;;  %v6614_v21 = vld [vmem:[%s7873_s6 + $0x18] sm:$0xe]  ;;  %v8502_v62 = vld [vmem:[%s9637_s1 + $0x200] sm:$0xff]  }
  0x9e   : > { %v6558_v15 = vcombine.low %v2785_v22, %v2799_v27  ;;  %v3032_v11 = vrot.slane %v6581_v5, 5  ;;  %v6591_v12 = vrot.slane %v6582_v6, 9  ;;  %v3036_v14 = vrot.slane %v6583_v9, 5  ;;  %v6615_v22 = vld [vmem:[%s7873_s6 + $0x1c] sm:$0x3] }
  0x9f   : > { %7482 = vmatpush3.bf16.msra.mxu1 %v7753_v0  ;;  %v2822_v49 = vrot.slane %v2821_v34, 4  ;;  %v6588_v0 = vrot.slane %v6576_v58, 9  ;;  %7472 = vmatmul.mubr.msk.bf16.vlgmr.msra.gmra.mrb[48].mxu0 %vm276_vm0, %v6601_v61  ;;  %v3029_v13 = vsel %vm7959_vm6, %v6589_v3, %v3028_v4  ;;  %v3201_v23 = vshrl.u32 %v6612_v19, 16  ;;  %v6616_v28 = vld [vmem:[%s7873_s6 + $0x20] sm:$0xe] }
  0xa0   : > { %7459 = vmatprep.mubr.msk.bf16.mxu1 %vm276_vm0, %v6558_v15  ;;  %7483 = vmatprep.subr.bf16.mxu1 %v7754_v2  ;;  %v3033_v18 = vsel %vm7959_vm6, %v6590_v10, %v3032_v11  ;;  %v3210_v8 = vshrl.u32 %v6613_v20, 16  ;;  %v3219_v27 = vshrl.u32 %v6614_v21, 16  ;;  %v3222_v29 = vshll.u32 %v6614_v21, 16  ;;  %v6617_v35 = vld [vmem:[%s7873_s6 + $0x24] sm:$0x3] }
  0xa1   : > { %v2827_v56 = vsel %vm7906_vm3, %v2822_v49, %v2826_v24  ;;  %v3025_v7 = vsel %vm7959_vm6, %v6588_v0, %v3024_v1  ;;  %7496 = vmatpush3.bf16.msra.mxu0 %v8407_v50  ;;  %v3037_v50 = vsel %vm7959_vm6, %v6591_v12, %v3036_v14  ;;  %v3204_v24 = vshll.u32 %v6612_v19, 16  ;;  %v6618_v44 = vld [vmem:[%s7873_s6 + $0x28] sm:$0xe]  ;;  %v6620_v9 = vld [vmem:[%s7873_s6 + $0x30] sm:$0xe] }
  0xa2   : > { %v6559_v25 = vcombine.low %v2813_v53, %v2827_v56  ;;  %v6602_v17 = vcombine.low %v3025_v7, %v3029_v13  ;;  %7497 = vmatprep.subr.bf16.mxu0 %v7757_v55  ;;  %v6603_v26 = vcombine.low %v3033_v18, %v3037_v50  ;;  %v3203_v32 = vrot.slane %v3201_v23, 5  ;;  %v6621_v14 = vld [vmem:[%s7873_s6 + $0x34] sm:$0x3] }
  0xa3   : > { %7484 = vmatpush3.bf16.msra.mxu1 %v7754_v2  ;;  %v3213_v2 = vshll.u32 %v6613_v20, 16  ;;  %v3206_v33 = vrot.slane %v3204_v24, 6  ;;  %v3212_v15 = vrot.slane %v3210_v8, 5  ;;  %v3228_v34 = vshrl.u32 %v6615_v22, 16 }
  0xa4   : > { %7485 = vmatprep.subr.bf16.mxu1 %v7756_v48  ;;  %7460 = vmatmul.mubr.msk.bf16.gmra.mrb[44].mxu1 %vm276_vm0, %v6559_v25  ;;  %v3221_v40 = vrot.slane %v3219_v27, 5  ;;  %v3224_v41 = vrot.slane %v3222_v29, 6  ;;  %v3231_v43 = vshll.u32 %v6615_v22, 16  ;;  %v3237_v49 = vshrl.u32 %v6616_v28, 16  ;;  %v6623_v22 = vld [vmem:[%s7873_s6 + $0x3c] sm:$0x3] }
  0xa5   : > { %7475 = vmatprep.mubr.msk.bf16.mxu0 %vm276_vm0, %v6602_v17  ;;  %7498 = vmatpush3.bf16.msra.mxu0 %v7757_v55  ;;  %v3215_v38 = vrot.slane %v3213_v2, 6  ;;  %v3207_v46 = vor.u32 %v3206_v33, %v3203_v32  ;;  %v3230_v47 = vrot.slane %v3228_v34, 5  ;;  %v3240_v51 = vshll.u32 %v6616_v28, 16  ;;  %v6624_v29 = vld [vmem:[%s7873_s6 + $0x40] sm:$0xe] }
  0xa6   : > { %7499 = vmatprep.subr.bf16.mxu0 %v7758_v16  ;;  %v3225_v53 = vor.u32 %v3224_v41, %v3221_v40  ;;  %v3233_v36 = vrot.slane %v3231_v43, 6  ;;  %v3246_v54 = vshrl.u32 %v6617_v35, 16  ;;  %v3239_v55 = vrot.slane %v3237_v49, 5 }
  0xa7   : > { %7486 = vmatpush3.bf16.msra.mxu1 %v7756_v48  ;;  %v6619_v48 = vld [vmem:[%s7873_s6 + $0x2c] sm:$0x3]  ;;  %7476 = vmatmul.mubr.msk.bf16.gmra.mrb[52].mxu0 %vm276_vm0, %v6603_v26  ;;  %v3216_v52 = vor.u32 %v3215_v38, %v3212_v15  ;;  %v3208_v56 = vrot.slane %v3207_v46, 4  ;;  %v3242_v57 = vrot.slane %v3240_v51, 6  ;;  %v3249_v58 = vshll.u32 %v6617_v35, 16 }
  0xa8   : > { %7511 = vmatprep.subr.bf16.mxu1 %v8463_v60  ;;  %v3226_v42 = vrot.slane %v3225_v53, 4  ;;  %v3234_v59 = vor.u32 %v3233_v36, %v3230_v47  ;;  %v3248_v25 = vrot.slane %v3246_v54, 5  ;;  %v3255_v61 = vshrl.u32 %v6618_v44, 16  ;;  %v6625_v15 = vld [vmem:[%s7873_s6 + $0x44] sm:$0x3]  ;;  %v7761_v36 = vld [vmem:[%s9637_s1 + $0x1e8] sm:$0xff]  }
  0xa9   : > { %7500 = vmatpush3.bf16.msra.mxu0 %v7758_v16  ;;  %v3217_v0 = vsel %vm8033_vm9, %v3208_v56, %v3216_v52  ;;  %v3243_v1 = vor.u32 %v3242_v57, %v3239_v55  ;;  %v3251_v39 = vrot.slane %v3249_v58, 6  ;;  %v3258_v3 = vshll.u32 %v6618_v44, 16  ;;  %v6622_v16 = vld [vmem:[%s7873_s6 + $0x38] sm:$0xe]  ;;  %v6626_v46 = vld [vmem:[%s7873_s6 + $0x48] sm:$0xe] }
  0xaa   : > { %7501 = vmatprep.subr.bf16.mxu0 %v7760_v31  ;;  %v3235_v4 = vsel %vm8033_vm9, %v3226_v42, %v3234_v59  ;;  %v3257_v5 = vrot.slane %v3255_v61, 5  ;;  %v3264_v6 = vshrl.u32 %v6619_v48, 16  ;;  %v3267_v7 = vshll.u32 %v6619_v48, 16  ;;  %v6627_v53 = vld [vmem:[%s7873_s6 + $0x4c] sm:$0x3] }
  0xab   : > { %v6636_v10 = vcombine.low %v3217_v0, %v3235_v4  ;;  %v3244_v11 = vrot.slane %v3243_v1, 4  ;;  %v3252_v12 = vor.u32 %v3251_v39, %v3248_v25  ;;  %v3260_v13 = vrot.slane %v3258_v3, 6  ;;  %v6648_v58 = vld [vmem:[%s7873_s6 + $0x10] sm:$0xc]  ;;  %v6649_v0 = vld [vmem:[%s7873_s6 + $0x14] sm:$0x3] }
  0xac   : > { %v3266_v17 = vrot.slane %v3264_v6, 5  ;;  %v3269_v18 = vrot.slane %v3267_v7, 6  ;;  %v3273_v19 = vshrl.u32 %v6620_v9, 16  ;;  %v3276_v20 = vshll.u32 %v6620_v9, 16  ;;  %v6650_v1 = vld [vmem:[%s7873_s6 + $0x18] sm:$0xc] }
  0xad   : > { %7502 = vmatpush3.bf16.msra.mxu0 %v7760_v31  ;;  %7487 = vmatprep.mubr.msk.bf16.mxu1 %vm276_vm0, %v6636_v10  ;;  %v3253_v21 = vsel %vm8033_vm9, %v3244_v11, %v3252_v12  ;;  %v3261_v50 = vor.u32 %v3260_v13, %v3257_v5  ;;  %v3282_v23 = vshrl.u32 %v6621_v14, 16  ;;  %v3285_v24 = vshll.u32 %v6621_v14, 16  ;;  %v7762_v39 = vld [vmem:[%s9637_s1 + $0x1f0] sm:$0xff]   ;;  %v6651_v7 = vld [vmem:[%s7873_s6 + $0x1c] sm:$0x3] }
  0xae   : > { %7527 = vmatprep.subr.bf16.mxu0 %v8502_v62  ;;  %v3270_v8 = vor.u32 %v3269_v18, %v3266_v17  ;;  %v3275_v26 = vrot.slane %v3273_v19, 5  ;;  %v3278_v2 = vrot.slane %v3276_v20, 6  ;;  %v3291_v27 = vshrl.u32 %v6622_v16, 16  ;;  %v6652_v9 = vld [vmem:[%s7873_s6 + $0x20] sm:$0xc] }
  0xaf   : > { %v3262_v28 = vrot.slane %v3261_v50, 4  ;;  %v3284_v31 = vrot.slane %v3282_v23, 5  ;;  %v3287_v32 = vrot.slane %v3285_v24, 6  ;;  %v3294_v33 = vshll.u32 %v6622_v16, 16  ;;  %v6653_v10 = vld [vmem:[%s7873_s6 + $0x24] sm:$0x3] }
  0xb0   : > { %v3279_v34 = vor.u32 %v3278_v2, %v3275_v26  ;;  %v3293_v35 = vrot.slane %v3291_v27, 5  ;;  %v3300_v38 = vshrl.u32 %v6623_v22, 16  ;;  %v3303_v40 = vshll.u32 %v6623_v22, 16  ;;  %v6654_v16 = vld [vmem:[%s7873_s6 + $0x28] sm:$0xc] }
  0xb1   : > { %v3271_v41 = vsel %vm8033_vm9, %v3262_v28, %v3270_v8  ;;  %v3288_v43 = vor.u32 %v3287_v32, %v3284_v31  ;;  %v3296_v44 = vrot.slane %v3294_v33, 6  ;;  %v3309_v47 = vshrl.u32 %v6624_v29, 16  ;;  %v6655_v20 = vld [vmem:[%s7873_s6 + $0x2c] sm:$0x3]  ;;  %v7764_v32 = vld [vmem:[%s9637_s1 + $0x1f8] sm:$0xff]  }
  0xb2   : > { %v6637_v48 = vcombine.low %v3253_v21, %v3271_v41  ;;  %v3280_v49 = vrot.slane %v3279_v34, 4  ;;  %v3302_v51 = vrot.slane %v3300_v38, 5  ;;  %v3305_v52 = vrot.slane %v3303_v40, 6  ;;  %v6656_v38 = vld [vmem:[%s7873_s6 + $0x30] sm:$0xc] }
  0xb3   : > { %v3297_v54 = vor.u32 %v3296_v44, %v3293_v35  ;;  %v3311_v56 = vrot.slane %v3309_v47, 5  ;;  %v3312_v55 = vshll.u32 %v6624_v29, 16  ;;  %v3318_v57 = vshrl.u32 %v6625_v15, 16  ;;  %v6657_v44 = vld [vmem:[%s7873_s6 + $0x34] sm:$0x3] }
  0xb4   : > { %7488 = vmatmul.mubr.msk.bf16.vlgmr.msra.gmra.mrb[48].mxu1 %vm276_vm0, %v6637_v48  ;;  %v3289_v42 = vsel %vm8033_vm9, %v3280_v49, %v3288_v43  ;;  %v3306_v59 = vor.u32 %v3305_v52, %v3302_v51  ;;  %v3321_v25 = vshll.u32 %v6625_v15, 16  ;;  %v3327_v61 = vshrl.u32 %v6626_v46, 16  ;;  %v7769_v48 = vld [vmem:[%s9637_s1 + $0x220] sm:$0xff]   ;;  %v6659_v52 = vld [vmem:[%s7873_s6 + $0x3c] sm:$0x3] }
  0xb5   : > { %7512 = vmatpush3.bf16.msra.mxu1 %v8463_v60  ;;  %v3298_v3 = vrot.slane %v3297_v54, 4  ;;  %v3314_v4 = vrot.slane %v3312_v55, 6  ;;  %v3320_v5 = vrot.slane %v3318_v57, 5  ;;  %v3330_v6 = vshll.u32 %v6626_v46, 16  ;;  %v6658_v46 = vld [vmem:[%s7873_s6 + $0x38] sm:$0xc] }
  0xb6   : > { %v3323_v11 = vrot.slane %v3321_v25, 6  ;;  %v3329_v12 = vrot.slane %v3327_v61, 5  ;;  %v3336_v13 = vshrl.u32 %v6627_v53, 16  ;;  %v3339_v14 = vshll.u32 %v6627_v53, 16  ;;  %7513 = vmatprep.subr.bf16.mxu1 %v7761_v36  ;;  %v6660_v54 = vld [vmem:[%s7873_s6 + $0x40] sm:$0xc] }
  0xb7   : > { %v3307_v17 = vsel %vm8033_vm9, %v3298_v3, %v3306_v59  ;;  %v3315_v18 = vor.u32 %v3314_v4, %v3311_v56  ;;  %v3332_v19 = vrot.slane %v3330_v6, 6  ;;  %v6664_v60 = vrot.slane %v6648_v58, 10  ;;  %v7765_v56 = vld [vmem:[%s9637_s1 + $0x208] sm:$0xff]  }
  0xb8   : > { %v6638_v21 = vcombine.low %v3289_v42, %v3307_v17  ;;  %v3324_v50 = vor.u32 %v3323_v11, %v3320_v5  ;;  %v3338_v22 = vrot.slane %v3336_v13, 5  ;;  %v3341_v23 = vrot.slane %v3339_v14, 6  ;;  %v6661_v42 = vld [vmem:[%s7873_s6 + $0x44] sm:$0x3]  ;;  %v6662_v59 = vld [vmem:[%s7873_s6 + $0x48] sm:$0xc] }
  0xb9   : > { %v3316_v24 = vrot.slane %v3315_v18, 4  ;;  %v3333_v8 = vor.u32 %v3332_v19, %v3329_v12  ;;  %v3524_v26 = vrot.slane %v6649_v0, 6  ;;  %v6665_v2 = vrot.slane %v6650_v1, 10  ;;  %7514 = vmatpush3.bf16.msra.mxu1 %v7761_v36  ;;  %v6663_v1 = vld [vmem:[%s7873_s6 + $0x4c] sm:$0x3] }
  0xba   : > { %7491 = vmatprep.mubr.msk.bf16.mxu1 %vm276_vm0, %v6638_v21  ;;  %v3342_v27 = vor.u32 %v3341_v23, %v3338_v22  ;;  %v3528_v29 = vrot.slane %v6651_v7, 6  ;;  %v6666_v28 = vrot.slane %v6652_v9, 10  ;;  %v3532_v31 = vrot.slane %v6653_v10, 6  ;;  %7515 = vmatprep.subr.bf16.mxu1 %v7762_v39  ;;  %v7766_v7 = vld [vmem:[%s7873_s6 + $0x18] ss:$8 sps:$4 sm:$0xff]   ;;  %v7768_v9 = vld [vmem:[%s9637_s1 + $0x210] sm:$0xff]  }
  0xbb   : > { %v3325_v33 = vsel %vm8033_vm9, %v3316_v24, %v3324_v50  ;;  %v3334_v15 = vrot.slane %v3333_v8, 4  ;;  %v3525_v34 = vsel %vm8078_vm12, %v6664_v60, %v3524_v26  ;;  %v6667_v35 = vrot.slane %v6654_v16, 10  ;;  %v7767_v12 = vld [vmem:[%s7873_s6 + $0x28] ss:$8 sps:$4 sm:$0xff]   ;;  %v7771_v16 = vld [vmem:[%s7873_s6 + $0x38] ss:$8 sps:$4 sm:$0xff]  }
  0xbc   : > { %v3529_v40 = vsel %vm8078_vm12, %v6665_v2, %v3528_v29  ;;  %v3533_v41 = vsel %vm8078_vm12, %v6666_v28, %v3532_v31  ;;  %v3536_v43 = vrot.slane %v6655_v20, 6  ;;  %v6668_v47 = vrot.slane %v6656_v38, 10  ;;  %v7773_v14 = vld [vmem:[%s9637_s1 + $0x228] sm:$0xff]   ;;  %v6720_v17 = vld [vmem:[%s7873_s6 + $0x18] sm:$0xf]  ;;  %v7774_v50 = vld [vmem:[%s9637_s1 + $0x230] sm:$0xff]  }
  0xbd   : > { %v3343_v49 = vsel %vm8033_vm9, %v3334_v15, %v3342_v27  ;;  %v6680_v51 = vcombine.low %v3525_v34, %v3529_v40  ;;  %7516 = vmatpush3.bf16.msra.mxu1 %v7762_v39  ;;  %v3540_v53 = vrot.slane %v6657_v44, 6  ;;  %v6669_v36 = vrot.slane %v6658_v46, 10  ;;  %v6721_v18 = vld [vmem:[%s7873_s6 + $0x1c] sm:$0x1]  ;;  %v6722_v19 = vld [vmem:[%s7873_s6 + $0x20] sm:$0xf] }
  0xbe   : > { %v6639_v55 = vcombine.low %v3325_v33, %v3343_v49  ;;  %v3537_v57 = vsel %vm8078_vm12, %v6667_v35, %v3536_v43  ;;  %7517 = vmatprep.subr.bf16.mxu1 %v7764_v32  ;;  %v3544_v58 = vrot.slane %v6659_v52, 6  ;;  %v6670_v25 = vrot.slane %v6660_v54, 10  ;;  %v6723_v60 = vld [vmem:[%s7873_s6 + $0x24] sm:$0x1]  ;;  %v6724_v26 = vld [vmem:[%s7873_s6 + $0x28] sm:$0xf] }
  0xbf   : > { %7503 = vmatprep.mubr.msk.bf16.mxu0 %vm276_vm0, %v6680_v51  ;;  %v6681_v61 = vcombine.low %v3533_v41, %v3537_v57  ;;  %v3541_v0 = vsel %vm8078_vm12, %v6668_v47, %v3540_v53  ;;  %v3548_v39 = vrot.slane %v6661_v42, 6  ;;  %v6671_v3 = vrot.slane %v6662_v59, 10  ;;  %v8611_v2 = vld [vmem:[%s9637_s1 + $0x240] sm:$0xff]   ;;  %v7772_v27 = vld [vmem:[%s7873_s6 + $0x48] ss:$8 sps:$4 sm:$0xff]   ;;  %v7776_v51 = vld [vmem:[%s9637_s1 + $0x238] sm:$0xff]  }
  0xc0   : > { %7492 = vmatmul.mubr.msk.bf16.gmra.mrb[52].mxu1 %vm276_vm0, %v6639_v55  ;;  %v3545_v4 = vsel %vm8078_vm12, %v6669_v36, %v3544_v58  ;;  %v3552_v5 = vrot.slane %v6663_v1, 6  ;;  %v3880_v20 = vshrl.u32 %v6720_v17, 16  ;;  %v3883_v21 = vshll.u32 %v6720_v17, 16  ;;  %v6725_v31 = vld [vmem:[%s7873_s6 + $0x2c] sm:$0x1] }
  0xc1   : > { %7504 = vmatmul.mubr.msk.bf16.vlgmr.msra.gmra.mrb[56].mxu0 %vm276_vm0, %v6681_v61  ;;  %v6682_v6 = vcombine.low %v3541_v0, %v3545_v4  ;;  %7518 = vmatpush3.bf16.msra.mxu1 %v7764_v32  ;;  %v3549_v10 = vsel %vm8078_vm12, %v6670_v25, %v3548_v39  ;;  %v3889_v22 = vshll.u32 %v6721_v18, 16  ;;  %v3894_v23 = vshrl.u32 %v6722_v19, 16  ;;  %v6726_v32 = vld [vmem:[%s7873_s6 + $0x30] sm:$0xf]  ;;  %v6727_v38 = vld [vmem:[%s7873_s6 + $0x34] sm:$0x1] }
  0xc2   : > { %7528 = vmatpush3.bf16.msra.mxu0 %v8502_v62  ;;  %v3553_v11 = vsel %vm8078_vm12, %v6671_v3, %v3552_v5  ;;  %7543 = vmatprep.subr.bf16.mxu1 %v7769_v48  ;;  %v7770_v62 = vld [vmem:[%s9637_s1 + $0x218] sm:$0xff]   ;;  %v3897_v24 = vshll.u32 %v6722_v19, 16  ;;  %v3903_v8 = vshll.u32 %v6723_v60, 16  ;;  %v3882_v29 = vrot.slane %v3880_v20, 4  ;;  %v6730_v39 = vld [vmem:[%s7873_s6 + $0x40] sm:$0xf] }
  0xc3   : > { %7507 = vmatprep.mubr.msk.bf16.mxu0 %vm276_vm0, %v6682_v6  ;;  %7529 = vmatprep.subr.bf16.mxu0 %v7765_v56  ;;  %v6683_v13 = vcombine.low %v3549_v10, %v3553_v11  ;;  %v3885_v28 = vrot.slane %v3883_v21, 5  ;;  %v3891_v33 = vrot.slane %v3889_v22, 5  ;;  %v3896_v15 = vrot.slane %v3894_v23, 4  ;;  %v6728_v25 = vld [vmem:[%s7873_s6 + $0x38] sm:$0xf]  ;;  %v8635_v10 = vld [vmem:[%s9637_s1 + $0x260] sm:$0xff]  }
  0xc4   : > { %7519 = vmatprep.mubr.msk.bf16.mxu1 %vm276_vm0, %v7766_v7  ;;  %v3899_v34 = vrot.slane %v3897_v24, 5  ;;  %v3905_v35 = vrot.slane %v3903_v8, 5  ;;  %v3908_v41 = vshrl.u32 %v6724_v26, 16  ;;  %v3911_v43 = vshll.u32 %v6724_v26, 16  ;;  %v6729_v1 = vld [vmem:[%s7873_s6 + $0x3c] sm:$0x1] }
  0xc5   : > { %v3886_v40 = vor.u32 %v3885_v28, %v3882_v29  ;;  %v3917_v44 = vshll.u32 %v6725_v31, 16  ;;  %v3922_v47 = vshrl.u32 %v6726_v32, 16  ;;  %v3931_v49 = vshll.u32 %v6727_v38, 16  ;;  %v6731_v3 = vld [vmem:[%s7873_s6 + $0x44] sm:$0x1]  ;;  %v7777_v24 = vld [vmem:[%s9637_s1 + $0x248] sm:$0xff]  }
  0xc6   : > { %7530 = vmatpush3.bf16.msra.mxu0 %v7765_v56  ;;  %v3900_v46 = vor.u32 %v3899_v34, %v3896_v15  ;;  %v3910_v53 = vrot.slane %v3908_v41, 4  ;;  %v3913_v36 = vrot.slane %v3911_v43, 5  ;;  %v3936_v6 = vshrl.u32 %v6728_v25, 16  ;;  %v6734_v60 = vld [vmem:[%s7873_s6 + $0x50] sm:$0xf] }
  0xc7   : > { %7531 = vmatprep.subr.bf16.mxu0 %v7768_v9  ;;  %v3887_v52 = vrot.slane %v3886_v40, 4  ;;  %v3919_v54 = vrot.slane %v3917_v44, 5  ;;  %v3924_v55 = vrot.slane %v3922_v47, 4  ;;  %v3933_v58 = vrot.slane %v3931_v49, 5  ;;  %v6735_v23 = vld [vmem:[%s7873_s6 + $0x54] sm:$0x1] }
  0xc8   : > { %7520 = vmatmul.mubr.msk.bf16.vlgmr.msra.gmra.mrb[56].mxu1 %vm276_vm0, %v7767_v12  ;;  %v3901_v56 = vrot.slane %v3900_v46, 4  ;;  %v3914_v59 = vor.u32 %v3913_v36, %v3910_v53  ;;  %v3939_v7 = vshll.u32 %v6728_v25, 16  ;;  %v3945_v12 = vshll.u32 %v6729_v1, 16  ;;  %v6756_v15 = vld [vmem:[%s7873_s6 + $0x18] sm:$0xe] }
  0xc9   : > { %7508 = vmatmul.mubr.msk.bf16.gmra.mrb[60].mxu0 %vm276_vm0, %v6683_v13  ;;  %7544 = vmatpush3.bf16.msra.mxu1 %v7769_v48  ;;  %v3925_v48 = vshll.u32 %v6726_v32, 16  ;;  %v3892_v42 = vsel %vm7906_vm3, %v3887_v52, %v3891_v33  ;;  %v3950_v13 = vshrl.u32 %v6730_v39, 16  ;;  %v3938_v17 = vrot.slane %v3936_v6, 4  ;;  %v6757_v41 = vld [vmem:[%s7873_s6 + $0x1c] sm:$0x1] }
  0xca   : > { %7532 = vmatpush3.bf16.msra.mxu0 %v7768_v9  ;;  %7523 = vmatprep.mubr.msk.bf16.mxu1 %vm276_vm0, %v7771_v16  ;;  %v3906_v61 = vsel %vm7906_vm3, %v3901_v56, %v3905_v35  ;;  %v3915_v5 = vrot.slane %v3914_v59, 4  ;;  %v6732_v9 = vld [vmem:[%s7873_s6 + $0x48] sm:$0xf]  ;;  %v3941_v18 = vrot.slane %v3939_v7, 5  ;;  %v3959_v19 = vshll.u32 %v6731_v3, 16  ;;  %v7780_v7 = vld [vmem:[%s9637_s1 + $0x258] sm:$0xff]  }
  0xcb   : > { %7533 = vmatprep.subr.bf16.mxu0 %v7770_v62  ;;  %7545 = vmatprep.subr.bf16.mxu1 %v7773_v14  ;;  %v3927_v57 = vrot.slane %v3925_v48, 5  ;;  %v6744_v4 = vcombine.low %v3892_v42, %v3906_v61  ;;  %v3947_v21 = vrot.slane %v3945_v12, 5  ;;  %v3964_v29 = vshrl.u32 %v6732_v9, 16  ;;  %v6758_v48 = vld [vmem:[%s7873_s6 + $0x20] sm:$0xe] }
  0xcc   : > { %v3920_v16 = vsel %vm7906_vm3, %v3915_v5, %v3919_v54  ;;  %v3942_v26 = vor.u32 %v3941_v18, %v3938_v17  ;;  %v3967_v31 = vshll.u32 %v6732_v9, 16  ;;  %v3978_v33 = vshrl.u32 %v6734_v60, 16  ;;  %v6759_v53 = vld [vmem:[%s7873_s6 + $0x24] sm:$0x1]  ;;  %v6761_v42 = vld [vmem:[%s7873_s6 + $0x2c] sm:$0x1] }
  0xcd   : > { %7546 = vmatpush3.bf16.msra.mxu1 %v7773_v14  ;;  %v3928_v0 = vor.u32 %v3927_v57, %v3924_v55  ;;  %v6733_v14 = vld [vmem:[%s7873_s6 + $0x4c] sm:$0x1]  ;;  %7535 = vmatprep.mubr.msk.bf16.mxu0 %vm276_vm0, %v6744_v4  ;;  %v3966_v35 = vrot.slane %v3964_v29, 4  ;;  %v3981_v38 = vshll.u32 %v6734_v60, 16  ;;  %v3987_v40 = vshll.u32 %v6735_v23, 16 }
  0xce   : > { %7534 = vmatpush3.bf16.msra.mxu0 %v7770_v62  ;;  %7547 = vmatprep.subr.bf16.mxu1 %v7774_v50  ;;  %v3953_v62 = vshll.u32 %v6730_v39, 16  ;;  %v3973_v32 = vshll.u32 %v6733_v14, 16  ;;  %v3943_v34 = vrot.slane %v3942_v26, 4  ;;  %v3969_v44 = vrot.slane %v3967_v31, 5  ;;  %v6763_v1 = vld [vmem:[%s7873_s6 + $0x34] sm:$0x1] }
  0xcf   : > { %7559 = vmatprep.subr.bf16.mxu0 %v8611_v2  ;;  %v3929_v11 = vrot.slane %v3928_v0, 4  ;;  %v3980_v47 = vrot.slane %v3978_v33, 4  ;;  %v3989_v52 = vrot.slane %v3987_v40, 5  ;;  %v6772_v36 = vrot.slane %v6756_v15, 9  ;;  %v6762_v0 = vld [vmem:[%s7873_s6 + $0x30] sm:$0xe] }
  0xd0   : > { %7524 = vmatmul.mubr.msk.bf16.gmra.mrb[60].mxu1 %vm276_vm0, %v7772_v27  ;;  %v3955_v22 = vrot.slane %v3953_v62, 5  ;;  %v3961_v27 = vrot.slane %v3959_v19, 5  ;;  %v3975_v46 = vrot.slane %v3973_v32, 5  ;;  %v3948_v49 = vsel %vm7906_vm3, %v3943_v34, %v3947_v21  ;;  %v6764_v19 = vld [vmem:[%s7873_s6 + $0x38] sm:$0xe]  ;;  %v8691_v21 = vld [vmem:[%s9637_s1 + $0x280] sm:$0xff]  }
  0xd1   : > { %7548 = vmatpush3.bf16.msra.mxu1 %v7774_v50  ;;  %v3934_v20 = vsel %vm7906_vm3, %v3929_v11, %v3933_v58  ;;  %v3952_v50 = vrot.slane %v3950_v13, 4  ;;  %v3970_v56 = vor.u32 %v3969_v44, %v3966_v35  ;;  %v4171_v55 = vrot.slane %v6757_v41, 5  ;;  %v6760_v58 = vld [vmem:[%s7873_s6 + $0x28] sm:$0xe]  ;;  %v6765_v60 = vld [vmem:[%s7873_s6 + $0x3c] sm:$0x1] }
  0xd2   : > { %7549 = vmatprep.subr.bf16.mxu1 %v7776_v51  ;;  %v6745_v8 = vcombine.low %v3920_v16, %v3934_v20  ;;  %v6773_v57 = vrot.slane %v6758_v48, 9  ;;  %v4175_v61 = vrot.slane %v6759_v53, 5  ;;  %v6774_v39 = vrot.slane %v6760_v58, 9  ;;  %v7781_v16 = vld [vmem:[%s9637_s1 + $0x268] sm:$0xff]   ;;  %v6766_v20 = vld [vmem:[%s7873_s6 + $0x40] sm:$0xe] }
  0xd3   : > { %v3956_v28 = vor.u32 %v3955_v22, %v3952_v50  ;;  %v3971_v3 = vrot.slane %v3970_v56, 4  ;;  %v4172_v4 = vsel %vm7959_vm6, %v6772_v36, %v4171_v55  ;;  %v4179_v5 = vrot.slane %v6761_v42, 5  ;;  %v6767_v23 = vld [vmem:[%s7873_s6 + $0x44] sm:$0x1]  ;;  %v6768_v26 = vld [vmem:[%s7873_s6 + $0x48] sm:$0xe] }
  0xd4   : > { %7536 = vmatmul.mubr.msk.bf16.vlgmr.msra.gmra.mrb[64].mxu0 %vm276_vm0, %v6745_v8  ;;  %v6775_v6 = vrot.slane %v6762_v0, 9  ;;  %v4176_v11 = vsel %vm7959_vm6, %v6773_v57, %v4175_v61  ;;  %v4183_v12 = vrot.slane %v6763_v1, 5  ;;  %v4187_v8 = vrot.slane %v6765_v60, 5  ;;  %v6770_v31 = vld [vmem:[%s7873_s6 + $0x50] sm:$0xe]  ;;  %v7784_v58 = vld [vmem:[%s9637_s1 + $0x278] sm:$0xff]  }
  0xd5   : > { %7550 = vmatpush3.bf16.msra.mxu1 %v7776_v51  ;;  %7560 = vmatpush3.bf16.msra.mxu0 %v8611_v2  ;;  %v3957_v43 = vrot.slane %v3956_v28, 4  ;;  %v3983_v51 = vrot.slane %v3981_v38, 5  ;;  %v7778_v2 = vld [vmem:[%s9637_s1 + $0x250] sm:$0xff]   ;;  %v3976_v13 = vsel %vm7906_vm3, %v3971_v3, %v3975_v46  ;;  %v6788_v62 = vcombine.low %v4172_v4, %v4176_v11  ;;  %v6769_v28 = vld [vmem:[%s7873_s6 + $0x4c] sm:$0x1] }
  0xd6   : > { %7575 = vmatprep.subr.bf16.mxu1 %v8635_v10  ;;  %7561 = vmatprep.subr.bf16.mxu0 %v7777_v24  ;;  %v4180_v14 = vsel %vm7959_vm6, %v6774_v39, %v4179_v5  ;;  %v4184_v18 = vsel %vm7959_vm6, %v6775_v6, %v4183_v12  ;;  %v4191_v29 = vrot.slane %v6767_v23, 5  ;;  %v6771_v33 = vld [vmem:[%s7873_s6 + $0x54] sm:$0x1]  ;;  %v6778_v15 = vrot.slane %v6768_v26, 9  ;;  %v6801_v48 = vld [vmem:[%s7873_s6 + $0x1c] sm:$0x3] }
  0xd7   : > { %v3962_v54 = vsel %vm7906_vm3, %v3957_v43, %v3961_v27  ;;  %v3984_v25 = vor.u32 %v3983_v51, %v3980_v47  ;;  %7551 = vmatprep.mubr.msk.bf16.mxu1 %vm276_vm0, %v6788_v62  ;;  %v6789_v22 = vcombine.low %v4180_v14, %v4184_v18  ;;  %v6777_v27 = vrot.slane %v6766_v20, 9  ;;  %v7782_v38 = vld [vmem:[%s9637_s1 + $0x270] sm:$0xff]   ;;  %v6800_v47 = vld [vmem:[%s7873_s6 + $0x18] sm:$0xe]  ;;  %v6803_v51 = vld [vmem:[%s7873_s6 + $0x24] sm:$0x3] }
  0xd8   : > { %v6746_v59 = vcombine.low %v3948_v49, %v3962_v54  ;;  %v4195_v34 = vrot.slane %v6769_v28, 5  ;;  %v6779_v35 = vrot.slane %v6770_v31, 9  ;;  %v4199_v41 = vrot.slane %v6771_v33, 5  ;;  %v6802_v49 = vld [vmem:[%s7873_s6 + $0x20] sm:$0xe] }
  0xd9   : > { %7562 = vmatpush3.bf16.msra.mxu0 %v7777_v24  ;;  %v3985_v9 = vrot.slane %v3984_v25, 4  ;;  %v6776_v24 = vrot.slane %v6764_v19, 9  ;;  %7552 = vmatmul.mubr.msk.bf16.vlgmr.msra.gmra.mrb[64].mxu1 %vm276_vm0, %v6789_v22  ;;  %v4192_v40 = vsel %vm7959_vm6, %v6777_v27, %v4191_v29  ;;  %v4367_v53 = vshll.u32 %v6800_v47, 16  ;;  %v6804_v57 = vld [vmem:[%s7873_s6 + $0x28] sm:$0xe]  ;;  %v8733_v26 = vld [vmem:[%s9637_s1 + $0x2a0] sm:$0xff]  }
  0xda   : > { %7539 = vmatprep.mubr.msk.bf16.mxu0 %vm276_vm0, %v6746_v59  ;;  %7563 = vmatprep.subr.bf16.mxu0 %v7778_v2  ;;  %v4196_v46 = vsel %vm7959_vm6, %v6778_v15, %v4195_v34  ;;  %v4373_v36 = vshrl.u32 %v6801_v48, 16  ;;  %v4376_v54 = vshll.u32 %v6801_v48, 16  ;;  %v4382_v56 = vshrl.u32 %v6802_v49, 16  ;;  %v6805_v1 = vld [vmem:[%s7873_s6 + $0x2c] sm:$0x3] }
  0xdb   : > { %v3990_v17 = vsel %vm7906_vm3, %v3985_v9, %v3989_v52  ;;  %v4188_v32 = vsel %vm7959_vm6, %v6776_v24, %v4187_v8  ;;  %7576 = vmatpush3.bf16.msra.mxu1 %v8635_v10  ;;  %v4200_v10 = vsel %vm7959_vm6, %v6779_v35, %v4199_v41  ;;  %v4364_v52 = vshrl.u32 %v6800_v47, 16  ;;  %v6806_v6 = vld [vmem:[%s7873_s6 + $0x30] sm:$0xe]  ;;  %v6807_v11 = vld [vmem:[%s7873_s6 + $0x34] sm:$0x3] }
  0xdc   : > { %v6747_v50 = vcombine.low %v3976_v13, %v3990_v17  ;;  %v6790_v44 = vcombine.low %v4188_v32, %v4192_v40  ;;  %7577 = vmatprep.subr.bf16.mxu1 %v7781_v16  ;;  %v4385_v55 = vshll.u32 %v6802_v49, 16  ;;  %v4369_v25 = vrot.slane %v4367_v53, 6  ;;  %v6808_v35 = vld [vmem:[%s7873_s6 + $0x38] sm:$0xe]  ;;  %v6810_v47 = vld [vmem:[%s7873_s6 + $0x40] sm:$0xe] }
  0xdd   : > { %7564 = vmatpush3.bf16.msra.mxu0 %v7778_v2  ;;  %v6791_v2 = vcombine.low %v4196_v46, %v4200_v10  ;;  %v4366_v59 = vrot.slane %v4364_v52, 5  ;;  %v4375_v61 = vrot.slane %v4373_v36, 5  ;;  %v4391_v0 = vshrl.u32 %v6803_v51, 16  ;;  %v6809_v46 = vld [vmem:[%s7873_s6 + $0x3c] sm:$0x3] }
  0xde   : > { %7565 = vmatprep.subr.bf16.mxu0 %v7780_v7  ;;  %7540 = vmatmul.mubr.msk.bf16.gmra.mrb[68].mxu0 %vm276_vm0, %v6747_v50  ;;  %v4378_v39 = vrot.slane %v4376_v54, 6  ;;  %v4384_v3 = vrot.slane %v4382_v56, 5  ;;  %v4387_v4 = vrot.slane %v4385_v55, 6  ;;  %v4394_v5 = vshll.u32 %v6803_v51, 16  ;;  %v6811_v36 = vld [vmem:[%s7873_s6 + $0x44] sm:$0x3] }
  0xdf   : > { %7555 = vmatprep.mubr.msk.bf16.mxu1 %vm276_vm0, %v6790_v44  ;;  %7578 = vmatpush3.bf16.msra.mxu1 %v7781_v16  ;;  %v4393_v9 = vrot.slane %v4391_v0, 5  ;;  %v4400_v12 = vshrl.u32 %v6804_v57, 16  ;;  %v4403_v13 = vshll.u32 %v6804_v57, 16  ;;  %v4409_v18 = vshrl.u32 %v6805_v1, 16 }
  0xe0   : > { %7579 = vmatprep.subr.bf16.mxu1 %v7782_v38  ;;  %v4379_v14 = vor.u32 %v4378_v39, %v4375_v61  ;;  %v4388_v17 = vor.u32 %v4387_v4, %v4384_v3  ;;  %v4396_v16 = vrot.slane %v4394_v5, 6  ;;  %v4412_v50 = vshll.u32 %v6805_v1, 16  ;;  %v6813_v39 = vld [vmem:[%s7873_s6 + $0x4c] sm:$0x3] }
  0xe1   : > { %7566 = vmatpush3.bf16.msra.mxu0 %v7780_v7  ;;  %v4370_v7 = vor.u32 %v4369_v25, %v4366_v59  ;;  %7556 = vmatmul.mubr.msk.bf16.gmra.mrb[68].mxu1 %vm276_vm0, %v6791_v2  ;;  %v4402_v60 = vrot.slane %v4400_v12, 5  ;;  %v4405_v20 = vrot.slane %v4403_v13, 6  ;;  %v4411_v24 = vrot.slane %v4409_v18, 5  ;;  %v6814_v13 = vld [vmem:[%s7873_s6 + $0x50] sm:$0xe] }
  0xe2   : > { %7591 = vmatprep.subr.bf16.mxu0 %v8691_v21  ;;  %v4389_v22 = vrot.slane %v4388_v17, 4  ;;  %v4397_v23 = vor.u32 %v4396_v16, %v4393_v9  ;;  %v4418_v8 = vshrl.u32 %v6806_v6, 16  ;;  %v4414_v28 = vrot.slane %v4412_v50, 6 }
  0xe3   : > { %v4371_v19 = vrot.slane %v4370_v7, 4  ;;  %7580 = vmatpush3.bf16.msra.mxu1 %v7782_v38  ;;  %v4406_v29 = vor.u32 %v4405_v20, %v4402_v60  ;;  %v4421_v31 = vshll.u32 %v6806_v6, 16  ;;  %v4427_v15 = vshrl.u32 %v6807_v11, 16  ;;  %v7785_v7 = vld [vmem:[%s9637_s1 + $0x288] sm:$0xff]  }
  0xe4   : > { %7581 = vmatprep.subr.bf16.mxu1 %v7784_v58  ;;  %v4398_v32 = vsel %vm8033_vm9, %v4389_v22, %v4397_v23  ;;  %v4420_v33 = vrot.slane %v4418_v8, 5  ;;  %v4430_v34 = vshll.u32 %v6807_v11, 16  ;;  %v4436_v10 = vshrl.u32 %v6808_v35, 16 }
  0xe5   : > { %v4380_v27 = vsel %vm8033_vm9, %v4371_v19, %v4379_v14  ;;  %v4407_v41 = vrot.slane %v4406_v29, 4  ;;  %v4423_v44 = vrot.slane %v4421_v31, 6  ;;  %v4429_v48 = vrot.slane %v4427_v15, 5  ;;  %v6815_v19 = vld [vmem:[%s7873_s6 + $0x54] sm:$0x3] }
  0xe6   : > { %v6824_v40 = vcombine.low %v4380_v27, %v4398_v32  ;;  %v4432_v49 = vrot.slane %v4430_v34, 6  ;;  %v4439_v51 = vshll.u32 %v6808_v35, 16  ;;  %v4445_v2 = vshrl.u32 %v6809_v46, 16  ;;  %v6837_v31 = vld [vmem:[%s7873_s6 + $0x1c] sm:$0x3] }
  0xe7   : > { %7582 = vmatpush3.bf16.msra.mxu1 %v7784_v58  ;;  %v4424_v53 = vor.u32 %v4423_v44, %v4420_v33  ;;  %v4448_v54 = vshll.u32 %v6809_v46, 16  ;;  %v4438_v55 = vrot.slane %v4436_v10, 5  ;;  %v4454_v58 = vshrl.u32 %v6810_v47, 16  ;;  %v6838_v32 = vld [vmem:[%s7873_s6 + $0x20] sm:$0xc]  ;;  %v7786_v33 = vld [vmem:[%s9637_s1 + $0x290] sm:$0xff]  }
  0xe8   : > { %7607 = vmatprep.subr.bf16.mxu1 %v8733_v26  ;;  %7567 = vmatprep.mubr.msk.bf16.mxu0 %vm276_vm0, %v6824_v40  ;;  %v4433_v56 = vor.u32 %v4432_v49, %v4429_v48  ;;  %v4441_v57 = vrot.slane %v4439_v51, 6  ;;  %v4447_v61 = vrot.slane %v4445_v2, 5  ;;  %v4457_v1 = vshll.u32 %v6810_v47, 16  ;;  %v6839_v40 = vld [vmem:[%s7873_s6 + $0x24] sm:$0x3] }
  0xe9   : > { %v7281_v43 = vpop.f32.mrb[0].mxu0  ;;  %v4425_v25 = vrot.slane %v4424_v53, 4  ;;  %v4450_v0 = vrot.slane %v4448_v54, 6  ;;  %v4456_v4 = vrot.slane %v4454_v58, 5  ;;  %v4463_v5 = vshrl.u32 %v6811_v36, 16 }
  0xea   : > { %356 = vst.msk [vmem:[#allocation2 + $0x10] sm:$0xff] %vm276_vm0, %v7281_v43  ;;  %v323_v42 = vpop.f32.mrb[1].mxu0  ;;  %v4415_v43 = vor.u32 %v4414_v28, %v4411_v24  ;;  %v4442_v3 = vor.u32 %v4441_v57, %v4438_v55  ;;  %v4466_v6 = vshll.u32 %v6811_v36, 16  ;;  %v4459_v12 = vrot.slane %v4457_v1, 6  ;;  %v6836_v24 = vld [vmem:[%s7873_s6 + $0x18] sm:$0xc] }
  0xeb   : > { %354 = vst.msk [vmem:[#allocation2] sm:$0xff] %vm276_vm0, %v323_v42  ;;  %v7282_v62 = vpop.f32.mrb[2].mxu0  ;;  %v6812_v42 = vld [vmem:[%s7873_s6 + $0x48] sm:$0xe]  ;;  %v4434_v9 = vsel %vm8033_vm9, %v4425_v25, %v4433_v56  ;;  %v4451_v11 = vor.u32 %v4450_v0, %v4447_v61  ;;  %v4465_v16 = vrot.slane %v4463_v5, 5  ;;  %v4481_v23 = vshrl.u32 %v6813_v39, 16 }
  0xec   : > { %357 = vst.msk [vmem:[#allocation2 + $0x18] sm:$0xff] %vm276_vm0, %v7282_v62  ;;  %v326_v38 = vpop.f32.mrb[3].mxu0  ;;  %v4416_v52 = vsel %vm8033_vm9, %v4407_v41, %v4415_v43  ;;  %v4472_v62 = vshrl.u32 %v6812_v42, 16  ;;  %v4443_v17 = vrot.slane %v4442_v3, 4  ;;  %v4468_v18 = vrot.slane %v4466_v6, 6  ;;  %v7788_v25 = vld [vmem:[%s9637_s1 + $0x298] sm:$0xff]  }
  0xed   : > { %355 = vst.msk [vmem:[#allocation2 + $0x8] sm:$0xff] %vm276_vm0, %v326_v38  ;;  %v6825_v14 = vcombine.low %v4416_v52, %v4434_v9  ;;  %v4460_v20 = vor.u32 %v4459_v12, %v4456_v4  ;;  %v4475_v22 = vshll.u32 %v6812_v42, 16  ;;  %v4484_v29 = vshll.u32 %v6813_v39, 16  ;;  %v6840_v41 = vld [vmem:[%s7873_s6 + $0x28] sm:$0xc] }
  0xee   : > { %v4474_v50 = vrot.slane %v4472_v62, 5  ;;  %v4452_v8 = vsel %vm8033_vm9, %v4443_v17, %v4451_v11  ;;  %v4469_v27 = vor.u32 %v4468_v18, %v4465_v16  ;;  %v4490_v28 = vshrl.u32 %v6814_v13, 16  ;;  %v6841_v43 = vld [vmem:[%s7873_s6 + $0x2c] sm:$0x3]  ;;  %v6842_v49 = vld [vmem:[%s7873_s6 + $0x30] sm:$0xc] }
  0xef   : > { %7568 = vmatmul.mubr.msk.bf16.vlgmr.msra.gmra.mrb[72].mxu0 %vm276_vm0, %v6825_v14  ;;  %v4461_v15 = vrot.slane %v4460_v20, 4  ;;  %v4477_v34 = vrot.slane %v4475_v22, 6  ;;  %v4483_v35 = vrot.slane %v4481_v23, 5  ;;  %v4493_v38 = vshll.u32 %v6814_v13, 16  ;;  %v6843_v53 = vld [vmem:[%s7873_s6 + $0x34] sm:$0x3] }
  0xf0   : > { %7592 = vmatpush3.bf16.msra.mxu0 %v8691_v21  ;;  %v4486_v44 = vrot.slane %v4484_v29, 6  ;;  %v4492_v46 = vrot.slane %v4490_v28, 5  ;;  %v4499_v47 = vshrl.u32 %v6815_v19, 16  ;;  %v4502_v48 = vshll.u32 %v6815_v19, 16  ;;  %v6844_v9 = vld [vmem:[%s7873_s6 + $0x38] sm:$0xc] }
  0xf1   : > { %7593 = vmatprep.subr.bf16.mxu0 %v7785_v7  ;;  %v4470_v10 = vsel %vm8033_vm9, %v4461_v15, %v4469_v27  ;;  %v4478_v51 = vor.u32 %v4477_v34, %v4474_v50  ;;  %v4495_v52 = vrot.slane %v4493_v38, 6  ;;  %v6852_v21 = vrot.slane %v6836_v24, 10  ;;  %v617_v11 = vld [vmem:[#allocation2 + $0x10] sm:$0xff]  ;;  %v6845_v17 = vld [vmem:[%s7873_s6 + $0x3c] sm:$0x3]  ;;  %v7793_v19 = vld [vmem:[%s9637_s1 + $0x2c0] sm:$0xff]  }
  0xf2   : > { %v6826_v36 = vcombine.low %v4452_v8, %v4470_v10  ;;  %v4487_v2 = vor.u32 %v4486_v44, %v4483_v35  ;;  %v4501_v54 = vrot.slane %v4499_v47, 5  ;;  %v4504_v56 = vrot.slane %v4502_v48, 6  ;;  %v615_v12 = vld [vmem:[#allocation2] sm:$0xff]  ;;  %v6848_v8 = vld [vmem:[%s7873_s6 + $0x48] sm:$0xc] }
  0xf3   : > { %v4479_v55 = vrot.slane %v4478_v51, 4  ;;  %v4496_v57 = vor.u32 %v4495_v52, %v4492_v46  ;;  %v4687_v58 = vrot.slane %v6837_v31, 6  ;;  %v6853_v42 = vrot.slane %v6838_v32, 10  ;;  %v6846_v16 = vld [vmem:[%s7873_s6 + $0x40] sm:$0xc]  ;;  %v7789_v27 = vld [vmem:[%s9637_s1 + $0x2a8] sm:$0xff]  }
  0xf4   : > { %7594 = vmatpush3.bf16.msra.mxu0 %v7785_v7  ;;  %7571 = vmatprep.mubr.msk.bf16.mxu0 %vm276_vm0, %v6826_v36  ;;  %v4505_v61 = vor.u32 %v4504_v56, %v4501_v54  ;;  %v4691_v0 = vrot.slane %v6839_v40, 6  ;;  %v6854_v1 = vrot.slane %v6840_v41, 10  ;;  %v4695_v39 = vrot.slane %v6841_v43, 6  ;;  %v6847_v22 = vld [vmem:[%s7873_s6 + $0x44] sm:$0x3]  ;;  %v618_v48 = vld [vmem:[#allocation2 + $0x18] sm:$0xff] }
  0xf5   : > { %v8749_v59 = vpop.f32.mrb[0].mxu1  ;;  %7595 = vmatprep.subr.bf16.mxu0 %v7786_v33  ;;  %v4488_v4 = vsel %vm8033_vm9, %v4479_v55, %v4487_v2  ;;  %v4497_v5 = vrot.slane %v4496_v57, 4  ;;  %v4688_v6 = vsel %vm8078_vm12, %v6852_v21, %v4687_v58  ;;  %v6855_v7 = vrot.slane %v6842_v49, 10  ;;  %v6849_v32 = vld [vmem:[%s7873_s6 + $0x4c] sm:$0x3]  ;;  %v7792_v51 = vld [vmem:[%s9637_s1 + $0x2b0] sm:$0xff]  }
  0xf6   : > { %v8759_v60 = vpop.f32.mrb[1].mxu1  ;;  %v4692_v13 = vsel %vm8078_vm12, %v6853_v42, %v4691_v0  ;;  %v4696_v62 = vsel %vm8078_vm12, %v6854_v1, %v4695_v39  ;;  %v4699_v14 = vrot.slane %v6843_v53, 6  ;;  %v6856_v18 = vrot.slane %v6844_v9, 10  ;;  %v6850_v15 = vld [vmem:[%s7873_s6 + $0x50] sm:$0xc]  ;;  %v7794_v53 = vld [vmem:[%s9637_s1 + $0x2b8] sm:$0xff]  }
  0xf7   : > { %v7298_v3 = vpop.f32.mrb[2].mxu1  ;;  %v4506_v20 = vsel %vm8033_vm9, %v4497_v5, %v4505_v61  ;;  %v6868_v50 = vcombine.low %v4688_v6, %v4692_v13  ;;  %v4703_v23 = vrot.slane %v6845_v17, 6  ;;  %v6857_v24 = vrot.slane %v6846_v16, 10  ;;  %v6851_v38 = vld [vmem:[%s7873_s6 + $0x54] sm:$0x3]  ;;  %v7797_v36 = vld [vmem:[%s9637_s1 + $0x2c8] sm:$0xff]  }
  0xf8   : > { %7596 = vmatpush3.bf16.msra.mxu0 %v7786_v33  ;;  %v6827_v29 = vcombine.low %v4488_v4, %v4506_v20  ;;  %v4700_v28 = vsel %vm8078_vm12, %v6855_v7, %v4699_v14  ;;  %v4707_v31 = vrot.slane %v6847_v22, 6  ;;  %v6858_v34 = vrot.slane %v6848_v8, 10  ;;  %v7790_v10 = vld [vmem:[%s7873_s6 + $0x20] ss:$8 sps:$4 sm:$0xff]   ;;  %v6909_v56 = vld [vmem:[%s7873_s6 + $0x24] sm:$0x1] }
  0xf9   : > { %7597 = vmatprep.subr.bf16.mxu0 %v7788_v25  ;;  %7583 = vmatprep.mubr.msk.bf16.mxu1 %vm276_vm0, %v6868_v50  ;;  %v6869_v33 = vcombine.low %v4696_v62, %v4700_v28  ;;  %v4704_v35 = vsel %vm8078_vm12, %v6856_v18, %v4703_v23  ;;  %v4711_v40 = vrot.slane %v6849_v32, 6  ;;  %v6859_v41 = vrot.slane %v6850_v15, 10  ;;  %v7795_v2 = vld [vmem:[%s7873_s6 + $0x40] ss:$8 sps:$4 sm:$0xff]   ;;  %v6911_v57 = vld [vmem:[%s7873_s6 + $0x2c] sm:$0x1] }
  0xfa   : > { %7572 = vmatmul.mubr.msk.bf16.gmra.mrb[76].mxu0 %vm276_vm0, %v6827_v29  ;;  %v4708_v43 = vsel %vm8078_vm12, %v6857_v24, %v4707_v31  ;;  %v4715_v44 = vrot.slane %v6851_v38, 6  ;;  %v625_v46 = vadd.f32 %v8749_v59, %v617_v11  ;;  %v623_v47 = vadd.f32 %v615_v12, %v8759_v60  ;;  %v7791_v60 = vld [vmem:[%s7873_s6 + $0x30] ss:$8 sps:$4 sm:$0xff]   ;;  %v6908_v54 = vld [vmem:[%s7873_s6 + $0x20] sm:$0xf]  ;;  %v7285_v22 = vpop.f32.mrb[4].mxu0 }
  0xfb   : > { %7584 = vmatmul.mubr.msk.bf16.vlgmr.msra.gmra.mrb[72].mxu1 %vm276_vm0, %v6869_v33  ;;  %v6870_v49 = vcombine.low %v4704_v35, %v4708_v43  ;;  %v626_v52 = vadd.f32 %v7298_v3, %v618_v48  ;;  %v4712_v21 = vsel %vm8078_vm12, %v6858_v34, %v4711_v40  ;;  %7599 = vmatprep.mubr.msk.bf16.mxu0 %vm276_vm0, %v7790_v10  ;;  %v6910_v55 = vld [vmem:[%s7873_s6 + $0x28] sm:$0xf]  ;;  %v5043_v58 = vshrl.u32 %v6908_v54, 16  ;;  %v6912_v3 = vld [vmem:[%s7873_s6 + $0x30] sm:$0xf]  ;;  %v8852_v4 = vld [vmem:[%s9637_s1 + $0x2e0] sm:$0xff]  }
  0xfc   : > { %7598 = vmatpush3.bf16.msra.mxu0 %v7788_v25  ;;  %7608 = vmatpush3.bf16.msra.mxu1 %v8733_v26  ;;  %v4716_v59 = vsel %vm8078_vm12, %v6859_v41, %v4715_v44  ;;  %633 = vst.msk [vmem:[#allocation2 + $0x10] sm:$0xff] %vm276_vm0, %v625_v46  ;;  %631 = vst.msk [vmem:[#allocation2] sm:$0xff] %vm276_vm0, %v623_v47  ;;  %v5046_v42 = vshll.u32 %v6908_v54, 16  ;;  %v7798_v25 = vld [vmem:[%s9637_s1 + $0x2d0] sm:$0xff]   ;;  %v5052_v61 = vshll.u32 %v6909_v56, 16  ;;  %v5057_v0 = vshrl.u32 %v6910_v55, 16 }
  0xfd   : > { %7623 = vmatprep.subr.bf16.mxu0 %v7793_v19  ;;  %7587 = vmatprep.mubr.msk.bf16.mxu1 %vm276_vm0, %v6870_v49  ;;  %634 = vst.msk [vmem:[#allocation2 + $0x18] sm:$0xff] %vm276_vm0, %v626_v52  ;;  %v6871_v26 = vcombine.low %v4712_v21, %v4716_v59  ;;  %v5060_v1 = vshll.u32 %v6910_v55, 16  ;;  %v5066_v39 = vshll.u32 %v6911_v57, 16  ;;  %v7796_v5 = vld [vmem:[%s7873_s6 + $0x50] ss:$8 sps:$4 sm:$0xff]   ;;  %v5045_v6 = vrot.slane %v5043_v58, 4 }
  0xfe   : > { %7609 = vmatprep.subr.bf16.mxu1 %v7789_v27  ;;  %v5048_v7 = vrot.slane %v5046_v42, 5  ;;  %v6913_v9 = vld [vmem:[%s7873_s6 + $0x34] sm:$0x1]  ;;  %v6914_v11 = vld [vmem:[%s7873_s6 + $0x38] sm:$0xf]  ;;  %v5054_v12 = vrot.slane %v5052_v61, 5 }
  0xff   : > { %v5059_v13 = vrot.slane %v5057_v0, 4  ;;  %v5062_v62 = vrot.slane %v5060_v1, 5  ;;  %v5068_v14 = vrot.slane %v5066_v39, 5  ;;  %v6915_v17 = vld [vmem:[%s7873_s6 + $0x3c] sm:$0x1]  ;;  %v5071_v18 = vshrl.u32 %v6912_v3, 16 }
 0x100   : > { %7610 = vmatpush3.bf16.msra.mxu1 %v7789_v27  ;;  %v5049_v16 = vor.u32 %v5048_v7, %v5045_v6  ;;  %v5080_v20 = vshll.u32 %v6913_v9, 16  ;;  %v7800_v50 = vld [vmem:[%s9637_s1 + $0x2d8] sm:$0xff]   ;;  %v5085_v24 = vshrl.u32 %v6914_v11, 16  ;;  %v5088_v8 = vshll.u32 %v6914_v11, 16  ;;  %360 = vst.msk [vmem:[#allocation2 + $0x30] sm:$0xff] %vm276_vm0, %v7285_v22  ;;  %v8863_v29 = vpop.f32.mrb[3].mxu1 }
 0x101   : > { %7611 = vmatprep.subr.bf16.mxu1 %v7792_v51  ;;  %v5063_v23 = vor.u32 %v5062_v62, %v5059_v13  ;;  %v5094_v27 = vshll.u32 %v6915_v17, 16  ;;  %v5073_v31 = vrot.slane %v5071_v18, 4  ;;  %v6916_v43 = vld [vmem:[%s7873_s6 + $0x40] sm:$0xf]  ;;  %v6917_v47 = vld [vmem:[%s7873_s6 + $0x44] sm:$0x1] }
 0x102   : > { %7600 = vmatmul.mubr.msk.bf16.vlgmr.msra.gmra.mrb[80].mxu0 %vm276_vm0, %v7791_v60  ;;  %v5050_v28 = vrot.slane %v5049_v16, 4  ;;  %v5082_v15 = vrot.slane %v5080_v20, 5  ;;  %v5087_v33 = vrot.slane %v5085_v24, 4  ;;  %v5090_v35 = vrot.slane %v5088_v8, 5  ;;  %v6918_v48 = vld [vmem:[%s7873_s6 + $0x48] sm:$0xf] }
 0x103   : > { %7588 = vmatmul.mubr.msk.bf16.gmra.mrb[76].mxu1 %vm276_vm0, %v6871_v26  ;;  %7624 = vmatpush3.bf16.msra.mxu0 %v7793_v19  ;;  %v5074_v19 = vshll.u32 %v6912_v3, 16  ;;  %v5064_v34 = vrot.slane %v5063_v23, 4  ;;  %v5096_v38 = vrot.slane %v5094_v27, 5  ;;  %v6919_v49 = vld [vmem:[%s7873_s6 + $0x4c] sm:$0x1]  ;;  %v5099_v52 = vshrl.u32 %v6916_v43, 16 }
 0x104   : > { %7612 = vmatpush3.bf16.msra.mxu1 %v7792_v51  ;;  %7603 = vmatprep.mubr.msk.bf16.mxu0 %vm276_vm0, %v7795_v2  ;;  %v5055_v40 = vsel %vm7906_vm3, %v5050_v28, %v5054_v12  ;;  %v5091_v46 = vor.u32 %v5090_v35, %v5087_v33  ;;  %v5102_v21 = vshll.u32 %v6916_v43, 16  ;;  %v6920_v59 = vld [vmem:[%s7873_s6 + $0x50] sm:$0xf]  ;;  %v5108_v26 = vshll.u32 %v6917_v47, 16  ;;  %v6921_v2 = vld [vmem:[%s7873_s6 + $0x54] sm:$0x1] }
 0x105   : > { %7613 = vmatprep.subr.bf16.mxu1 %v7794_v53  ;;  %7625 = vmatprep.subr.bf16.mxu0 %v7797_v36  ;;  %v5076_v32 = vrot.slane %v5074_v19, 5  ;;  %v5069_v44 = vsel %vm7906_vm3, %v5064_v34, %v5068_v14  ;;  %v5101_v56 = vrot.slane %v5099_v52, 4  ;;  %v5122_v57 = vshll.u32 %v6919_v49, 16  ;;  %v6922_v58 = vld [vmem:[%s7873_s6 + $0x58] sm:$0xf]  ;;  %v7801_v42 = vld [vmem:[%s9637_s1 + $0x2e8] sm:$0xff]  }
 0x106   : > { %v6932_v10 = vcombine.low %v5055_v40, %v5069_v44  ;;  %v5092_v60 = vrot.slane %v5091_v46, 4  ;;  %v5104_v55 = vrot.slane %v5102_v21, 5  ;;  %v5110_v0 = vrot.slane %v5108_v26, 5  ;;  %v6923_v3 = vld [vmem:[%s7873_s6 + $0x5c] sm:$0x1]  ;;  %v7802_v23 = vld [vmem:[%s9637_s1 + $0x2f0] sm:$0xff]  }
 0x107   : > { %7626 = vmatpush3.bf16.msra.mxu0 %v7797_v36  ;;  %v5077_v41 = vor.u32 %v5076_v32, %v5073_v31  ;;  %v5116_v36 = vshll.u32 %v6918_v48, 16  ;;  %v5124_v9 = vrot.slane %v5122_v57, 5  ;;  %v5127_v11 = vshrl.u32 %v6920_v59, 16  ;;  %v6944_v17 = vld [vmem:[%s7873_s6 + $0x20] sm:$0xe]  ;;  %v7804_v21 = vld [vmem:[%s9637_s1 + $0x2f8] sm:$0xff]  }
 0x108   : > { %7614 = vmatpush3.bf16.msra.mxu1 %v7794_v53  ;;  %7627 = vmatprep.subr.bf16.mxu0 %v7798_v25  ;;  %v5113_v53 = vshrl.u32 %v6918_v48, 16  ;;  %v5097_v61 = vsel %vm7906_vm3, %v5092_v60, %v5096_v38  ;;  %v5105_v7 = vor.u32 %v5104_v55, %v5101_v56  ;;  %v5130_v13 = vshll.u32 %v6920_v59, 16  ;;  %v6945_v22 = vld [vmem:[%s7873_s6 + $0x24] sm:$0x1]  ;;  %v6946_v31 = vld [vmem:[%s7873_s6 + $0x28] sm:$0xe] }
 0x109   : > { %7639 = vmatprep.subr.bf16.mxu1 %v8852_v4  ;;  %v5078_v51 = vrot.slane %v5077_v41, 4  ;;  %7615 = vmatprep.mubr.msk.bf16.mxu1 %vm276_vm0, %v6932_v10  ;;  %v5118_v39 = vrot.slane %v5116_v36, 5  ;;  %v5136_v62 = vshll.u32 %v6921_v2, 16  ;;  %v5141_v14 = vshrl.u32 %v6922_v58, 16  ;;  %v6947_v33 = vld [vmem:[%s7873_s6 + $0x2c] sm:$0x1] }
 0x10a   : > { %7604 = vmatmul.mubr.msk.bf16.gmra.mrb[84].mxu0 %vm276_vm0, %v7796_v5  ;;  %v5115_v1 = vrot.slane %v5113_v53, 4  ;;  %v339_v5 = vpop.f32.mrb[5].mxu0  ;;  %v5106_v18 = vrot.slane %v5105_v7, 4  ;;  %v5129_v19 = vrot.slane %v5127_v11, 4  ;;  %v5144_v20 = vshll.u32 %v6922_v58, 16  ;;  %v616_v38 = vld [vmem:[#allocation2 + $0x8] sm:$0xff] }
 0x10b   : > { %7628 = vmatpush3.bf16.msra.mxu0 %v7798_v25  ;;  %v5083_v54 = vsel %vm7906_vm3, %v5078_v51, %v5082_v15  ;;  %v8887_v25 = vld [vmem:[%s9637_s1 + $0x300] sm:$0xff]   ;;  %358 = vst.msk [vmem:[#allocation2 + $0x20] sm:$0xff] %vm276_vm0, %v339_v5  ;;  %v7286_v16 = vpop.f32.mrb[6].mxu0  ;;  %v5132_v8 = vrot.slane %v5130_v13, 5  ;;  %v5138_v27 = vrot.slane %v5136_v62, 5  ;;  %v5143_v28 = vrot.slane %v5141_v14, 4 }
 0x10c   : > { %7629 = vmatprep.subr.bf16.mxu0 %v7800_v50  ;;  %v6933_v6 = vcombine.low %v5083_v54, %v5097_v61  ;;  %v5119_v12 = vor.u32 %v5118_v39, %v5115_v1  ;;  %361 = vst.msk [vmem:[#allocation2 + $0x38] sm:$0xff] %vm276_vm0, %v7286_v16  ;;  %v5111_v32 = vsel %vm7906_vm3, %v5106_v18, %v5110_v0  ;;  %v5146_v15 = vrot.slane %v5144_v20, 5  ;;  %v6948_v44 = vld [vmem:[%s7873_s6 + $0x30] sm:$0xe]  ;;  %v6949_v46 = vld [vmem:[%s7873_s6 + $0x34] sm:$0x1] }
 0x10d   : > { %v6960_v35 = vrot.slane %v6944_v17, 9  ;;  %v5133_v40 = vor.u32 %v5132_v8, %v5129_v19  ;;  %v5334_v41 = vrot.slane %v6945_v22, 5  ;;  %v6961_v43 = vrot.slane %v6946_v31, 9  ;;  %v6950_v10 = vld [vmem:[%s7873_s6 + $0x38] sm:$0xe]  ;;  %v342_v36 = vpop.f32.mrb[7].mxu0 }
 0x10e   : > { %7616 = vmatmul.mubr.msk.bf16.vlgmr.msra.gmra.mrb[80].mxu1 %vm276_vm0, %v6933_v6  ;;  %v5120_v24 = vrot.slane %v5119_v12, 4  ;;  %v5147_v48 = vor.u32 %v5146_v15, %v5143_v28  ;;  %v5338_v49 = vrot.slane %v6947_v33, 5  ;;  %v6951_v51 = vld [vmem:[%s7873_s6 + $0x3c] sm:$0x1]  ;;  %v6962_v52 = vrot.slane %v6948_v44, 9  ;;  %359 = vst.msk [vmem:[#allocation2 + $0x28] sm:$0xff] %vm276_vm0, %v342_v36 }
 0x10f   : > { %7630 = vmatpush3.bf16.msra.mxu0 %v7800_v50  ;;  %v5150_v50 = vshll.u32 %v6923_v3, 16  ;;  %7640 = vmatpush3.bf16.msra.mxu1 %v8852_v4  ;;  %v5134_v59 = vrot.slane %v5133_v40, 4  ;;  %v5335_v60 = vsel %vm7959_vm6, %v6960_v35, %v5334_v41  ;;  %v5342_v26 = vrot.slane %v6949_v46, 5  ;;  %v6953_v1 = vld [vmem:[%s7873_s6 + $0x44] sm:$0x1]  ;;  %v8947_v20 = vld [vmem:[%s9637_s1 + $0x308] sm:$0xff]  }
 0x110   : > { %7655 = vmatprep.subr.bf16.mxu0 %v8887_v25  ;;  %7641 = vmatprep.subr.bf16.mxu1 %v7801_v42  ;;  %v5125_v4 = vsel %vm7906_vm3, %v5120_v24, %v5124_v9  ;;  %v6963_v53 = vrot.slane %v6950_v10, 9  ;;  %v5148_v2 = vrot.slane %v5147_v48, 4  ;;  %v5339_v54 = vsel %vm7959_vm6, %v6961_v43, %v5338_v49  ;;  %v6954_v39 = vld [vmem:[%s7873_s6 + $0x48] sm:$0xe]  ;;  %v6955_v6 = vld [vmem:[%s7873_s6 + $0x4c] sm:$0x1] }
 0x111   : > { %v5152_v34 = vrot.slane %v5150_v50, 5  ;;  %v6934_v47 = vcombine.low %v5111_v32, %v5125_v4  ;;  %v5346_v56 = vrot.slane %v6951_v51, 5  ;;  %v624_v55 = vadd.f32 %v616_v38, %v8863_v29  ;;  %v6952_v29 = vld [vmem:[%s7873_s6 + $0x40] sm:$0xe]  ;;  %v6956_v9 = vld [vmem:[%s7873_s6 + $0x50] sm:$0xe] }
 0x112   : > { %v5139_v57 = vsel %vm7906_vm3, %v5134_v59, %v5138_v27  ;;  %v6976_v58 = vcombine.low %v5335_v60, %v5339_v54  ;;  %v6964_v7 = vrot.slane %v6952_v29, 9  ;;  %v5350_v37 = vrot.slane %v6953_v1, 5  ;;  %v6957_v13 = vld [vmem:[%s7873_s6 + $0x54] sm:$0x1]  ;;  %v6958_v62 = vld [vmem:[%s7873_s6 + $0x58] sm:$0xe] }
 0x113   : > { %7642 = vmatpush3.bf16.msra.mxu1 %v7801_v42  ;;  %7619 = vmatprep.mubr.msk.bf16.mxu1 %vm276_vm0, %v6934_v47  ;;  %v5343_v42 = vsel %vm7959_vm6, %v6962_v52, %v5342_v26  ;;  %v5153_v61 = vsel %vm7906_vm3, %v5148_v2, %v5152_v34  ;;  %v5347_v0 = vsel %vm7959_vm6, %v6963_v53, %v5346_v56  ;;  %v6965_v11 = vrot.slane %v6954_v39, 9  ;;  %v6959_v17 = vld [vmem:[%s7873_s6 + $0x5c] sm:$0x1]  ;;  %v621_v27 = vld [vmem:[#allocation2 + $0x30] sm:$0xff]  ;;  %v6988_v28 = vld [vmem:[%s7873_s6 + $0x20] sm:$0xe] }
 0x114   : > { %7643 = vmatprep.subr.bf16.mxu1 %v7802_v23  ;;  %632 = vst.msk [vmem:[#allocation2 + $0x8] sm:$0xff] %vm276_vm0, %v624_v55  ;;  %v6935_v3 = vcombine.low %v5139_v57, %v5153_v61  ;;  %7631 = vmatprep.mubr.msk.bf16.mxu0 %vm276_vm0, %v6976_v58  ;;  %v6977_v5 = vcombine.low %v5343_v42, %v5347_v0  ;;  %v5354_v12 = vrot.slane %v6955_v6, 5  ;;  %v6966_v16 = vrot.slane %v6956_v9, 9  ;;  %v6989_v31 = vld [vmem:[%s7873_s6 + $0x24] sm:$0x3]  ;;  %v7313_v29 = vpop.f32.mrb[8].mxu0 }
 0x115   : > { %v5351_v14 = vsel %vm7959_vm6, %v6964_v7, %v5350_v37  ;;  %v5358_v18 = vrot.slane %v6957_v13, 5  ;;  %v6967_v19 = vrot.slane %v6958_v62, 9  ;;  %v5362_v22 = vrot.slane %v6959_v17, 5  ;;  %v6990_v33 = vld [vmem:[%s7873_s6 + $0x28] sm:$0xe]  ;;  %v619_v46 = vld [vmem:[#allocation2 + $0x20] sm:$0xff] }
 0x116   : > { %7620 = vmatmul.mubr.msk.bf16.gmra.mrb[84].mxu1 %vm276_vm0, %v6935_v3  ;;  %7632 = vmatmul.mubr.msk.bf16.vlgmr.msra.gmra.mrb[88].mxu0 %vm276_vm0, %v6977_v5  ;;  %v5355_v50 = vsel %vm7959_vm6, %v6965_v11, %v5354_v12  ;;  %v6991_v35 = vld [vmem:[%s7873_s6 + $0x2c] sm:$0x3]  ;;  %v5527_v38 = vshrl.u32 %v6988_v28, 16  ;;  %v5530_v4 = vshll.u32 %v6988_v28, 16  ;;  %v5536_v41 = vshrl.u32 %v6989_v31, 16  ;;  %v622_v6 = vld [vmem:[#allocation2 + $0x38] sm:$0xff] }
 0x117   : > { %7644 = vmatpush3.bf16.msra.mxu1 %v7802_v23  ;;  %7656 = vmatpush3.bf16.msra.mxu0 %v8887_v25  ;;  %v7301_v23 = vpop.f32.mrb[4].mxu1  ;;  %v6978_v24 = vcombine.low %v5351_v14, %v5355_v50  ;;  %v5359_v8 = vsel %vm7959_vm6, %v6966_v16, %v5358_v18  ;;  %v5363_v15 = vsel %vm7959_vm6, %v6967_v19, %v5362_v22  ;;  %v5539_v43 = vshll.u32 %v6989_v31, 16  ;;  %v6992_v47 = vld [vmem:[%s7873_s6 + $0x30] sm:$0xe]  ;;  %v6993_v51 = vld [vmem:[%s7873_s6 + $0x34] sm:$0x3] }
 0x118   : > { %7645 = vmatprep.subr.bf16.mxu1 %v7804_v21  ;;  %7657 = vmatprep.subr.bf16.mxu0 %v8947_v20  ;;  %v600_v32 = vpop.f32.mrb[5].mxu1  ;;  %v629_v34 = vadd.f32 %v7301_v23, %v621_v27  ;;  %v6979_v40 = vcombine.low %v5359_v8, %v5363_v15  ;;  %v5545_v44 = vshrl.u32 %v6990_v33, 16  ;;  %v5529_v45 = vrot.slane %v5527_v38, 5  ;;  %v6994_v26 = vld [vmem:[%s7873_s6 + $0x38] sm:$0xe]  ;;  %v620_v12 = vld [vmem:[#allocation2 + $0x28] sm:$0xff] }
 0x119   : > { %7635 = vmatprep.mubr.msk.bf16.mxu0 %vm276_vm0, %v6978_v24  ;;  %v5532_v48 = vrot.slane %v5530_v4, 6  ;;  %v5548_v49 = vshll.u32 %v6990_v33, 16  ;;  %v5554_v10 = vshrl.u32 %v6991_v35, 16  ;;  %v5538_v52 = vrot.slane %v5536_v41, 5  ;;  %v6995_v56 = vld [vmem:[%s7873_s6 + $0x3c] sm:$0x3] }
 0x11a   : > { %637 = vst.msk [vmem:[#allocation2 + $0x30] sm:$0xff] %vm276_vm0, %v629_v34  ;;  %v5547_v59 = vrot.slane %v5545_v44, 5  ;;  %v5557_v60 = vshll.u32 %v6991_v35, 16  ;;  %v627_v54 = vadd.f32 %v619_v46, %v600_v32  ;;  %v7302_v55 = vpop.f32.mrb[6].mxu1  ;;  %v5563_v42 = vshrl.u32 %v6992_v47, 16  ;;  %v830_v13 = vld [vmem:[#allocation2 + $0x10] sm:$0xff] }
 0x11b   : > { %7646 = vmatpush3.bf16.msra.mxu1 %v7804_v21  ;;  %7658 = vmatpush3.bf16.msra.mxu0 %v8947_v20  ;;  %v5541_v21 = vrot.slane %v5539_v43, 6  ;;  %v5533_v53 = vor.u32 %v5532_v48, %v5529_v45  ;;  %v5550_v36 = vrot.slane %v5548_v49, 6  ;;  %v5556_v2 = vrot.slane %v5554_v10, 5  ;;  %v603_v0 = vpop.f32.mrb[7].mxu1  ;;  %v8974_v62 = vld [vmem:[%s9637_s1 + $0x310] sm:$0xff]   ;;  %v797_v19 = vpop.f32.mrb[9].mxu0 }
 0x11c   : > { %7671 = vmatprep.subr.bf16.mxu1 %v8887_v25  ;;  %v5559_v58 = vrot.slane %v5557_v60, 6  ;;  %v5566_v61 = vshll.u32 %v6992_v47, 16  ;;  %635 = vst.msk [vmem:[#allocation2 + $0x20] sm:$0xff] %vm276_vm0, %v627_v54  ;;  %v5572_v3 = vshrl.u32 %v6993_v51, 16  ;;  %v5575_v5 = vshll.u32 %v6993_v51, 16  ;;  %v828_v50 = vld [vmem:[#allocation2] sm:$0xff]  ;;  %7659 = vmatprep.subr.bf16.mxu0 %v8974_v62 }
 0x11d   : > { %v5542_v57 = vor.u32 %v5541_v21, %v5538_v52  ;;  %v5534_v1 = vrot.slane %v5533_v53, 4  ;;  %v5551_v39 = vor.u32 %v5550_v36, %v5547_v59  ;;  %v5565_v37 = vrot.slane %v5563_v42, 5  ;;  %v831_v22 = vld [vmem:[#allocation2 + $0x18] sm:$0xff]  ;;  %v7314_v28 = vpop.f32.mrb[10].mxu0  ;;  %v829_v31 = vld [vmem:[#allocation2 + $0x8] sm:$0xff] }
 0x11e   : > { %7636 = vmatmul.mubr.msk.bf16.gmra.mrb[92].mxu0 %vm276_vm0, %v6979_v40  ;;  %v5560_v7 = vor.u32 %v5559_v58, %v5556_v2  ;;  %v5568_v9 = vrot.slane %v5566_v61, 6  ;;  %v5581_v11 = vshrl.u32 %v6994_v26, 16  ;;  %v5574_v16 = vrot.slane %v5572_v3, 5  ;;  %v8982_v32 = vld [vmem:[%s9637_s1 + $0x318] sm:$0xff]   ;;  %v800_v38 = vpop.f32.mrb[11].mxu0 }
 0x11f   : > { %v5543_v14 = vsel %vm8033_vm9, %v5534_v1, %v5542_v57  ;;  %v5552_v17 = vrot.slane %v5551_v39, 4  ;;  %v5577_v18 = vrot.slane %v5575_v5, 6  ;;  %v5584_v8 = vshll.u32 %v6994_v26, 16  ;;  %7660 = vmatpush3.bf16.msra.mxu0 %v8974_v62  ;;  %v6996_v44 = vld [vmem:[%s7873_s6 + $0x40] sm:$0xe]  ;;  %v8989_v46 = vpop.f32.mrb[12].mxu0 }
 0x120   : > { %v5569_v23 = vor.u32 %v5568_v9, %v5565_v37  ;;  %v5583_v24 = vrot.slane %v5581_v11, 5  ;;  %v5590_v27 = vshrl.u32 %v6995_v56, 16  ;;  %v5593_v33 = vshll.u32 %v6995_v56, 16  ;;  %7661 = vmatprep.subr.bf16.mxu0 %v8982_v32  ;;  %v6997_v10 = vld [vmem:[%s7873_s6 + $0x44] sm:$0x3]  ;;  %v9002_v56 = vpop.f32.mrb[13].mxu0 }
 0x121   : > { %v5561_v15 = vsel %vm8033_vm9, %v5552_v17, %v5560_v7  ;;  %v5578_v34 = vor.u32 %v5577_v18, %v5574_v16  ;;  %v630_v35 = vadd.f32 %v7302_v55, %v622_v6  ;;  %v5586_v41 = vrot.slane %v5584_v8, 6  ;;  %v6998_v51 = vld [vmem:[%s7873_s6 + $0x48] sm:$0xe]  ;;  %v6999_v26 = vld [vmem:[%s7873_s6 + $0x4c] sm:$0x3] }
 0x122   : > { %v7012_v4 = vcombine.low %v5543_v14, %v5561_v15  ;;  %v5570_v40 = vrot.slane %v5569_v23, 4  ;;  %v5592_v43 = vrot.slane %v5590_v27, 5  ;;  %v5595_v47 = vrot.slane %v5593_v33, 6  ;;  %v7000_v39 = vld [vmem:[%s7873_s6 + $0x50] sm:$0xe] }
 0x123   : > { %638 = vst.msk [vmem:[#allocation2 + $0x38] sm:$0xff] %vm276_vm0, %v630_v35  ;;  %v628_v45 = vadd.f32 %v620_v12, %v603_v0  ;;  %v838_v48 = vadd.f32 %v7313_v29, %v830_v13  ;;  %v836_v49 = vadd.f32 %v828_v50, %v797_v19  ;;  %v5587_v21 = vor.u32 %v5586_v41, %v5583_v24  ;;  %v7001_v37 = vld [vmem:[%s7873_s6 + $0x54] sm:$0x3]  ;;  %v7002_v14 = vld [vmem:[%s7873_s6 + $0x58] sm:$0xe] }
 0x124   : > { %7647 = vmatprep.mubr.msk.bf16.mxu1 %vm276_vm0, %v7012_v4  ;;  %v5579_v52 = vsel %vm8033_vm9, %v5570_v40, %v5578_v34  ;;  %v839_v59 = vadd.f32 %v7314_v28, %v831_v22  ;;  %v837_v60 = vadd.f32 %v829_v31, %v800_v38  ;;  %v5596_v53 = vor.u32 %v5595_v47, %v5592_v43  ;;  %v7003_v18 = vld [vmem:[%s7873_s6 + $0x5c] sm:$0x3]  ;;  %v7024_v27 = vld [vmem:[%s7873_s6 + $0x20] sm:$0xc]  ;;  %v7025_v33 = vld [vmem:[%s7873_s6 + $0x24] sm:$0x3] }
 0x125   : > { %636 = vst.msk [vmem:[#allocation2 + $0x28] sm:$0xff] %vm276_vm0, %v628_v45  ;;  %846 = vst.msk [vmem:[#allocation2 + $0x10] sm:$0xff] %vm276_vm0, %v838_v48  ;;  %v5599_v36 = vshrl.u32 %v6996_v44, 16  ;;  %v5602_v2 = vshll.u32 %v6996_v44, 16  ;;  %v5608_v54 = vshrl.u32 %v6997_v10, 16  ;;  %7662 = vmatpush3.bf16.msra.mxu0 %v8982_v32  ;;  %v5588_v55 = vrot.slane %v5587_v21, 4 }
 0x126   : > { %844 = vst.msk [vmem:[#allocation2] sm:$0xff] %vm276_vm0, %v836_v49  ;;  %847 = vst.msk [vmem:[#allocation2 + $0x18] sm:$0xff] %vm276_vm0, %v839_v59  ;;  %v5611_v57 = vshll.u32 %v6997_v10, 16  ;;  %v5617_v58 = vshrl.u32 %v6998_v51, 16  ;;  %v5620_v42 = vshll.u32 %v6998_v51, 16  ;;  %v5626_v1 = vshrl.u32 %v6999_v26, 16 }
 0x127   : > { %845 = vst.msk [vmem:[#allocation2 + $0x8] sm:$0xff] %vm276_vm0, %v837_v60  ;;  %v5601_v61 = vrot.slane %v5599_v36, 5  ;;  %v5604_v0 = vrot.slane %v5602_v2, 6  ;;  %v5610_v29 = vrot.slane %v5608_v54, 5  ;;  %v5597_v3 = vsel %vm8033_vm9, %v5588_v55, %v5596_v53  ;;  %v7026_v35 = vld [vmem:[%s7873_s6 + $0x28] sm:$0xc] }
 0x128   : > { %v5613_v5 = vrot.slane %v5611_v57, 6  ;;  %v5619_v6 = vrot.slane %v5617_v58, 5  ;;  %v5622_v7 = vrot.slane %v5620_v42, 6  ;;  %v7013_v9 = vcombine.low %v5579_v52, %v5597_v3  ;;  %v7027_v38 = vld [vmem:[%s7873_s6 + $0x2c] sm:$0x3]  ;;  %v7318_v47 = vpop.f32.mrb[14].mxu0 }
 0x129   : > { %v5605_v11 = vor.u32 %v5604_v0, %v5601_v61  ;;  %v5628_v12 = vrot.slane %v5626_v1, 5  ;;  %v5629_v13 = vshll.u32 %v6999_v26, 16  ;;  %v5635_v19 = vshrl.u32 %v7000_v39, 16  ;;  %v7028_v44 = vld [vmem:[%s7873_s6 + $0x30] sm:$0xc]  ;;  %v816_v21 = vpop.f32.mrb[15].mxu0 }
 0x12a   : > { %v5614_v17 = vor.u32 %v5613_v5, %v5610_v29  ;;  %v5623_v16 = vor.u32 %v5622_v7, %v5619_v6  ;;  %v5638_v50 = vshll.u32 %v7000_v39, 16  ;;  %7648 = vmatmul.mubr.msk.bf16.vlgmr.msra.gmra.mrb[88].mxu1 %vm276_vm0, %v7013_v9  ;;  %v5644_v24 = vshrl.u32 %v7001_v37, 16  ;;  %v7029_v51 = vld [vmem:[%s7873_s6 + $0x34] sm:$0x3]  ;;  %v7030_v2 = vld [vmem:[%s7873_s6 + $0x38] sm:$0xc] }
 0x12b   : > { %v5606_v22 = vrot.slane %v5605_v11, 4  ;;  %v5631_v23 = vrot.slane %v5629_v13, 6  ;;  %v5647_v8 = vshll.u32 %v7001_v37, 16  ;;  %7675 = vmatpush3.bf16.msra.mxu1 %v8887_v25  ;;  %v5637_v31 = vrot.slane %v5635_v19, 5  ;;  %v7329_v25 = vpop.f32.mrb[8].mxu1  ;;  %v834_v36 = vld [vmem:[#allocation2 + $0x30] sm:$0xff] }
 0x12c   : > { %v5624_v28 = vrot.slane %v5623_v16, 4  ;;  %v5640_v15 = vrot.slane %v5638_v50, 6  ;;  %v5653_v34 = vshrl.u32 %v7002_v14, 16  ;;  %7672 = vmatprep.subr.bf16.mxu1 %v8947_v20  ;;  %v5646_v41 = vrot.slane %v5644_v24, 5  ;;  %v9023_v52 = vpop.f32.mrb[9].mxu1  ;;  %v832_v0 = vld [vmem:[#allocation2 + $0x20] sm:$0xff] }
 0x12d   : > { %v5615_v4 = vsel %vm8033_vm9, %v5606_v22, %v5614_v17  ;;  %v5632_v40 = vor.u32 %v5631_v23, %v5628_v12  ;;  %v5649_v43 = vrot.slane %v5647_v8, 6  ;;  %v5656_v49 = vshll.u32 %v7002_v14, 16  ;;  %v7031_v54 = vld [vmem:[%s7873_s6 + $0x3c] sm:$0x3]  ;;  %v9029_v55 = vpop.f32.mrb[10].mxu1  ;;  %v1139_v29 = vld [vmem:[#allocation2 + $0x10] sm:$0xff] }
 0x12e   : > { %v5641_v45 = vor.u32 %v5640_v15, %v5637_v31  ;;  %v5655_v48 = vrot.slane %v5653_v34, 5  ;;  %v5662_v10 = vshrl.u32 %v7003_v18, 16  ;;  %v5665_v26 = vshll.u32 %v7003_v18, 16  ;;  %v1109_v1 = vpop.f32.mrb[11].mxu1  ;;  %v835_v7 = vld [vmem:[#allocation2 + $0x38] sm:$0xff]  ;;  %v1137_v37 = vld [vmem:[#allocation2] sm:$0xff] }
 0x12f   : > { %v5633_v59 = vsel %vm8033_vm9, %v5624_v28, %v5632_v40  ;;  %v5650_v60 = vor.u32 %v5649_v43, %v5646_v41  ;;  %v7040_v53 = vrot.slane %v7024_v27, 10  ;;  %7676 = vmatpush3.bf16.msra.mxu1 %v8947_v20  ;;  %v5658_v42 = vrot.slane %v5656_v49, 6  ;;  %v833_v13 = vld [vmem:[#allocation2 + $0x28] sm:$0xff]  ;;  %v1140_v14 = vld [vmem:[#allocation2 + $0x18] sm:$0xff]  ;;  %v9037_v16 = vpop.f32.mrb[12].mxu1 }
 0x130   : > { %v7014_v57 = vcombine.low %v5615_v4, %v5633_v59  ;;  %v5642_v58 = vrot.slane %v5641_v45, 4  ;;  %v5664_v61 = vrot.slane %v5662_v10, 5  ;;  %v5667_v39 = vrot.slane %v5665_v26, 6  ;;  %7673 = vmatprep.subr.bf16.mxu1 %v8974_v62  ;;  %v1138_v17 = vld [vmem:[#allocation2 + $0x8] sm:$0xff]  ;;  %v7032_v23 = vld [vmem:[%s7873_s6 + $0x40] sm:$0xc] }
 0x131   : > { %v5850_v3 = vrot.slane %v7025_v33, 6  ;;  %v7041_v5 = vrot.slane %v7026_v35, 10  ;;  %v5854_v6 = vrot.slane %v7027_v38, 6  ;;  %v5659_v9 = vor.u32 %v5658_v42, %v5655_v48  ;;  %v7033_v24 = vld [vmem:[%s7873_s6 + $0x44] sm:$0x3] }
 0x132   : > { %7651 = vmatprep.mubr.msk.bf16.mxu1 %vm276_vm0, %v7014_v57  ;;  %v5651_v20 = vsel %vm8033_vm9, %v5642_v58, %v5650_v60  ;;  %v842_v11 = vadd.f32 %v8989_v46, %v834_v36  ;;  %v7042_v12 = vrot.slane %v7028_v44, 10  ;;  %v5668_v18 = vor.u32 %v5667_v39, %v5664_v61  ;;  %v7034_v8 = vld [vmem:[%s7873_s6 + $0x48] sm:$0xc]  ;;  %v9046_v46 = vpop.f32.mrb[13].mxu1  ;;  %v7035_v34 = vld [vmem:[%s7873_s6 + $0x4c] sm:$0x3] }
 0x133   : > { %v5851_v19 = vsel %vm8078_vm12, %v7040_v53, %v5850_v3  ;;  %v5855_v50 = vsel %vm8078_vm12, %v7041_v5, %v5854_v6  ;;  %v5858_v22 = vrot.slane %v7029_v51, 6  ;;  %v5660_v27 = vrot.slane %v5659_v9, 4  ;;  %7677 = vmatpush3.bf16.msra.mxu1 %v8974_v62  ;;  %v9051_v33 = vpop.f32.mrb[14].mxu1  ;;  %v7036_v41 = vld [vmem:[%s7873_s6 + $0x50] sm:$0xc]  ;;  %v9059_v44 = vpop.f32.mrb[16].mxu0 }
 0x134   : > { %v7056_v28 = vcombine.low %v5851_v19, %v5855_v50  ;;  %850 = vst.msk [vmem:[#allocation2 + $0x30] sm:$0xff] %vm276_vm0, %v842_v11  ;;  %v7043_v31 = vrot.slane %v7030_v2, 10  ;;  %v5862_v15 = vrot.slane %v7031_v54, 6  ;;  %v840_v38 = vadd.f32 %v832_v0, %v9002_v56  ;;  %7674 = vmatprep.subr.bf16.mxu1 %v8982_v32  ;;  %v7037_v43 = vld [vmem:[%s7873_s6 + $0x54] sm:$0x3]  ;;  %v9061_v45 = vpop.f32.mrb[15].mxu1 }
 0x135   : > { %v5859_v35 = vsel %vm8078_vm12, %v7042_v12, %v5858_v22  ;;  %v1147_v4 = vadd.f32 %v7329_v25, %v1139_v29  ;;  %v843_v40 = vadd.f32 %v7318_v47, %v835_v7  ;;  %v5669_v62 = vsel %vm8033_vm9, %v5660_v27, %v5668_v18  ;;  %v7038_v47 = vld [vmem:[%s7873_s6 + $0x58] sm:$0xc]  ;;  %v7039_v49 = vld [vmem:[%s7873_s6 + $0x5c] sm:$0x3]  ;;  %v1319_v10 = vpop.f32.mrb[17].mxu0  ;;  %v9071_v51 = vpop.f32.mrb[16].mxu1 }
 0x136   : > { %7663 = vmatprep.mubr.msk.bf16.mxu0 %vm276_vm0, %v7056_v28  ;;  %v5863_v48 = vsel %vm8078_vm12, %v7043_v31, %v5862_v15  ;;  %v1145_v56 = vadd.f32 %v1137_v37, %v9023_v52  ;;  %v841_v25 = vadd.f32 %v833_v13, %v816_v21  ;;  %v7015_v59 = vcombine.low %v5651_v20, %v5669_v62  ;;  %v7346_v53 = vpop.f32.mrb[18].mxu0  ;;  %v9077_v36 = vpop.f32.mrb[17].mxu1  ;;  %s7070_s6 = sshll.u32 %s9650_s16, 6 }
 0x137   : > { %v7057_v60 = vcombine.low %v5859_v35, %v5863_v48  ;;  %848 = vst.msk [vmem:[#allocation2 + $0x20] sm:$0xff] %vm276_vm0, %v840_v38  ;;  %1155 = vst.msk [vmem:[#allocation2 + $0x10] sm:$0xff] %vm276_vm0, %v1147_v4  ;;  %v1148_v63 = vadd.f32 %v9029_v55, %v1140_v14  ;;  %v1146_v26 = vadd.f32 %v1138_v17, %v1109_v1  ;;  %7678 = vmatpush3.bf16.msra.mxu1 %v8982_v32  ;;  %v1322_v57 = vpop.f32.mrb[19].mxu0  ;;  %v9082_v58 = vpop.f32.mrb[18].mxu1  ;;  %s9587_s13 = scalar_lea.vmem %s9638_s2, %s7070_s6 }
 0x138   : > { %851 = vst.msk [vmem:[#allocation2 + $0x38] sm:$0xff] %vm276_vm0, %v843_v40  ;;  %1153 = vst.msk [vmem:[#allocation2] sm:$0xff] %vm276_vm0, %v1145_v56  ;;  %v7044_v52 = vrot.slane %v7032_v23, 10  ;;  %v5866_v21 = vrot.slane %v7033_v24, 6  ;;  %v7045_v2 = vrot.slane %v7034_v8, 10  ;;  %v5870_v54 = vrot.slane %v7035_v34, 6  ;;  %7652 = vmatmul.mubr.msk.bf16.gmra.mrb[92].mxu1 %vm276_vm0, %v7015_v59 }
 0x139   : > { %849 = vst.msk [vmem:[#allocation2 + $0x28] sm:$0xff] %vm276_vm0, %v841_v25  ;;  %7664 = vmatmul.mubr.msk.bf16.vlgmr.msra.gmra.mrb[96].mxu0 %vm276_vm0, %v7057_v60  ;;  %1156 = vst.msk [vmem:[#allocation2 + $0x18] sm:$0xff] %vm276_vm0, %v1148_v63  ;;  %v7046_v55 = vrot.slane %v7036_v41, 10  ;;  %v5874_v42 = vrot.slane %v7037_v43, 6  ;;  %v7047_v61 = vrot.slane %v7038_v47, 10  ;;  %v5878_v0 = vrot.slane %v7039_v49, 6 }
 0x13a   : > { %1154 = vst.msk [vmem:[#allocation2 + $0x8] sm:$0xff] %vm276_vm0, %v1146_v26  ;;  %v7349_v32 = vpop.f32.mrb[20].mxu0  ;;  %v9088_v29 = vpop.f32.mrb[19].mxu1  ;;  %v5867_v1 = vsel %vm8078_vm12, %v7044_v52, %v5866_v21  ;;  %v5871_v39 = vsel %vm8078_vm12, %v7045_v2, %v5870_v54 }
 0x13b   : > { %v9094_v3 = vpop.f32.mrb[21].mxu0  ;;  %v9096_v5 = vpop.f32.mrb[20].mxu1  ;;  %v7058_v6 = vcombine.low %v5867_v1, %v5871_v39  ;;  %v5875_v7 = vsel %vm8078_vm12, %v7046_v55, %v5874_v42  ;;  %v5879_v37 = vsel %vm8078_vm12, %v7047_v61, %v5878_v0  ;;  %v1143_v20 = vld [vmem:[#allocation2 + $0x30] sm:$0xff] }
 0x13c   : > { %v7350_v9 = vpop.f32.mrb[22].mxu0  ;;  %v9102_v11 = vpop.f32.mrb[21].mxu1  ;;  %v1151_v12 = vadd.f32 %v9037_v16, %v1143_v20  ;;  %v7059_v17 = vcombine.low %v5875_v7, %v5879_v37 }
 0x13d   : > { %v9105_v13 = vpop.f32.mrb[23].mxu0  ;;  %v9107_v14 = vpop.f32.mrb[22].mxu1  ;;  %7667 = vmatprep.mubr.msk.bf16.mxu1 %vm276_vm0, %v7058_v6 }
 0x13e   : > { %v9110_v18 = vpop.f32.mrb[24].mxu0  ;;  %v9112_v19 = vpop.f32.mrb[23].mxu1  ;;  %1159 = vst.msk [vmem:[#allocation2 + $0x30] sm:$0xff] %vm276_vm0, %v1151_v12  ;;  %v1141_v30 = vld [vmem:[#allocation2 + $0x20] sm:$0xff]  ;;  %v1352_v22 = vld [vmem:[#allocation2 + $0x10] sm:$0xff] }
 0x13f   : > { %v1144_v50 = vld [vmem:[#allocation2 + $0x38] sm:$0xff]  ;;  %v9115_v23 = vpop.f32.mrb[25].mxu0  ;;  %v9117_v24 = vpop.f32.mrb[24].mxu1  ;;  %v1149_v16 = vadd.f32 %v1141_v30, %v9046_v46  ;;  %v1360_v27 = vadd.f32 %v9059_v44, %v1352_v22  ;;  %v1350_v31 = vld [vmem:[#allocation2] sm:$0xff] }
 0x140   : > { %v1152_v8 = vadd.f32 %v9051_v33, %v1144_v50  ;;  %v1142_v28 = vld [vmem:[#allocation2 + $0x28] sm:$0xff]  ;;  %v9122_v15 = vpop.f32.mrb[26].mxu0  ;;  %v9124_v34 = vpop.f32.mrb[25].mxu1  ;;  %v1358_v38 = vadd.f32 %v1350_v31, %v1319_v10  ;;  %v1353_v4 = vld [vmem:[#allocation2 + $0x18] sm:$0xff]  ;;  %7668 = vmatmul.mubr.msk.bf16.vlgmr.msra.gmra.mrb[96].mxu1 %vm276_vm0, %v7059_v17 }
 0x141   : > { %v1150_v35 = vadd.f32 %v1142_v28, %v9061_v45  ;;  %v1351_v40 = vld [vmem:[#allocation2 + $0x8] sm:$0xff]  ;;  %v9127_v41 = vpop.f32.mrb[27].mxu0  ;;  %v9129_v43 = vpop.f32.mrb[26].mxu1  ;;  %1157 = vst.msk [vmem:[#allocation2 + $0x20] sm:$0xff] %vm276_vm0, %v1149_v16  ;;  %1368 = vst.msk [vmem:[#allocation2 + $0x10] sm:$0xff] %vm276_vm0, %v1360_v27  ;;  %v1361_v46 = vadd.f32 %v7346_v53, %v1353_v4 }
 0x142   : > { %1160 = vst.msk [vmem:[#allocation2 + $0x38] sm:$0xff] %vm276_vm0, %v1152_v8  ;;  %v1359_v33 = vadd.f32 %v1351_v40, %v1322_v57  ;;  %v9135_v44 = vpop.f32.mrb[28].mxu0  ;;  %v9137_v45 = vpop.f32.mrb[27].mxu1  ;;  %1366 = vst.msk [vmem:[#allocation2] sm:$0xff] %vm276_vm0, %v1358_v38 }
 0x143   : > { %1158 = vst.msk [vmem:[#allocation2 + $0x28] sm:$0xff] %vm276_vm0, %v1150_v35  ;;  %v9141_v62 = vpop.f32.mrb[29].mxu0  ;;  %v9143_v48 = vpop.f32.mrb[28].mxu1  ;;  %1369 = vst.msk [vmem:[#allocation2 + $0x18] sm:$0xff] %vm276_vm0, %v1361_v46 }
 0x144   : > { %1367 = vst.msk [vmem:[#allocation2 + $0x8] sm:$0xff] %vm276_vm0, %v1359_v33  ;;  %v9147_v56 = vpop.f32.mrb[30].mxu0  ;;  %v9149_v25 = vpop.f32.mrb[29].mxu1 }
 0x145   : > { %v9151_v47 = vpop.f32.mrb[31].mxu0  ;;  %v9153_v49 = vpop.f32.mrb[30].mxu1  ;;  %v1356_v10 = vld [vmem:[#allocation2 + $0x30] sm:$0xff] }
 0x146   : > { %v9157_v60 = vpop.f32.mrb[31].mxu1  ;;  %v1364_v63 = vadd.f32 %v7349_v32, %v1356_v10 }
 0x148   : > { %1372 = vst.msk [vmem:[#allocation2 + $0x30] sm:$0xff] %vm276_vm0, %v1364_v63  ;;  %v1354_v2 = vld [vmem:[#allocation2 + $0x20] sm:$0xff]  ;;  %v1515_v57 = vld [vmem:[#allocation2 + $0x10] sm:$0xff] }
 0x149   : > { %v1357_v54 = vld [vmem:[#allocation2 + $0x38] sm:$0xff]  ;;  %v1362_v61 = vadd.f32 %v1354_v2, %v9094_v3  ;;  %v1523_v32 = vadd.f32 %v9071_v51, %v1515_v57  ;;  %v1513_v39 = vld [vmem:[#allocation2] sm:$0xff] }
 0x14a   : > { %v1365_v0 = vadd.f32 %v7350_v9, %v1357_v54  ;;  %v1355_v1 = vld [vmem:[#allocation2 + $0x28] sm:$0xff]  ;;  %v1521_v20 = vadd.f32 %v1513_v39, %v9077_v36  ;;  %v1516_v12 = vld [vmem:[#allocation2 + $0x18] sm:$0xff] }
 0x14b   : > { %v1363_v37 = vadd.f32 %v1355_v1, %v9105_v13  ;;  %v1514_v17 = vld [vmem:[#allocation2 + $0x8] sm:$0xff]  ;;  %1370 = vst.msk [vmem:[#allocation2 + $0x20] sm:$0xff] %vm276_vm0, %v1362_v61  ;;  %1531 = vst.msk [vmem:[#allocation2 + $0x10] sm:$0xff] %vm276_vm0, %v1523_v32  ;;  %v1524_v51 = vadd.f32 %v9082_v58, %v1516_v12 }
 0x14c   : > { %1373 = vst.msk [vmem:[#allocation2 + $0x38] sm:$0xff] %vm276_vm0, %v1365_v0  ;;  %v1522_v3 = vadd.f32 %v1514_v17, %v9088_v29  ;;  %1529 = vst.msk [vmem:[#allocation2] sm:$0xff] %vm276_vm0, %v1521_v20 }
 0x14d   : > { %v9155_v59 = vpop.f32.mrb[32].mxu0  ;;  %1371 = vst.msk [vmem:[#allocation2 + $0x28] sm:$0xff] %vm276_vm0, %v1363_v37  ;;  %1532 = vst.msk [vmem:[#allocation2 + $0x18] sm:$0xff] %vm276_vm0, %v1524_v51 }
 0x14e   : > { %v9159_v26 = vpop.f32.mrb[33].mxu0  ;;  %1530 = vst.msk [vmem:[#allocation2 + $0x8] sm:$0xff] %vm276_vm0, %v1522_v3 }
 0x14f   : > { %v9163_v52 = vpop.f32.mrb[34].mxu0  ;;  %v1519_v8 = vld [vmem:[#allocation2 + $0x30] sm:$0xff] }
 0x150   : > { %v9168_v55 = vpop.f32.mrb[35].mxu0  ;;  %v1527_v28 = vadd.f32 %v9096_v5, %v1519_v8 }
 0x152   : > { %1535 = vst.msk [vmem:[#allocation2 + $0x30] sm:$0xff] %vm276_vm0, %v1527_v28  ;;  %v1517_v38 = vld [vmem:[#allocation2 + $0x20] sm:$0xff]  ;;  %v1789_v40 = vld [vmem:[#allocation2 + $0x10] sm:$0xff] }
 0x153   : > { %v1520_v4 = vld [vmem:[#allocation2 + $0x38] sm:$0xff]  ;;  %v1525_v10 = vadd.f32 %v1517_v38, %v9102_v11  ;;  %v1797_v2 = vadd.f32 %v9110_v18, %v1789_v40  ;;  %v1787_v54 = vld [vmem:[#allocation2] sm:$0xff] }
 0x154   : > { %v1528_v63 = vadd.f32 %v9107_v14, %v1520_v4  ;;  %v1518_v5 = vld [vmem:[#allocation2 + $0x28] sm:$0xff]  ;;  %v1795_v32 = vadd.f32 %v1787_v54, %v9115_v23  ;;  %v1790_v1 = vld [vmem:[#allocation2 + $0x18] sm:$0xff] }
 0x155   : > { %v1526_v0 = vadd.f32 %v1518_v5, %v9112_v19  ;;  %v1788_v39 = vld [vmem:[#allocation2 + $0x8] sm:$0xff]  ;;  %1533 = vst.msk [vmem:[#allocation2 + $0x20] sm:$0xff] %vm276_vm0, %v1525_v10  ;;  %1805 = vst.msk [vmem:[#allocation2 + $0x10] sm:$0xff] %vm276_vm0, %v1797_v2  ;;  %v1798_v11 = vadd.f32 %v9122_v15, %v1790_v1 }
 0x156   : > { %1536 = vst.msk [vmem:[#allocation2 + $0x38] sm:$0xff] %vm276_vm0, %v1528_v63  ;;  %v1796_v14 = vadd.f32 %v1788_v39, %v9127_v41  ;;  %1803 = vst.msk [vmem:[#allocation2] sm:$0xff] %vm276_vm0, %v1795_v32 }
 0x157   : > { %1534 = vst.msk [vmem:[#allocation2 + $0x28] sm:$0xff] %vm276_vm0, %v1526_v0  ;;  %1806 = vst.msk [vmem:[#allocation2 + $0x18] sm:$0xff] %vm276_vm0, %v1798_v11 }
 0x158   : > { %1804 = vst.msk [vmem:[#allocation2 + $0x8] sm:$0xff] %vm276_vm0, %v1796_v14 }
 0x159   : > { %v9174_v6 = vpop.f32.mrb[36].mxu0  ;;  %v1793_v19 = vld [vmem:[#allocation2 + $0x30] sm:$0xff] }
 0x15a   : > { %v9161_v53 = vpop.f32.mrb[32].mxu1  ;;  %v9180_v30 = vpop.f32.mrb[37].mxu0  ;;  %v1801_v23 = vadd.f32 %v9135_v44, %v1793_v19 }
 0x15b   : > { %v9165_v21 = vpop.f32.mrb[33].mxu1  ;;  %v9189_v9 = vpop.f32.mrb[38].mxu0 }
 0x15c   : > { %v9170_v42 = vpop.f32.mrb[34].mxu1  ;;  %v9195_v36 = vpop.f32.mrb[39].mxu0  ;;  %1809 = vst.msk [vmem:[#allocation2 + $0x30] sm:$0xff] %vm276_vm0, %v1801_v23  ;;  %v1791_v12 = vld [vmem:[#allocation2 + $0x20] sm:$0xff]  ;;  %v1999_v15 = vld [vmem:[#allocation2 + $0x10] sm:$0xff] }
 0x15d   : > { %v9176_v7 = vpop.f32.mrb[35].mxu1  ;;  %v1794_v17 = vld [vmem:[#allocation2 + $0x38] sm:$0xff]  ;;  %v1799_v41 = vadd.f32 %v1791_v12, %v9141_v62  ;;  %v2007_v3 = vadd.f32 %v9117_v24, %v1999_v15  ;;  %v1997_v28 = vld [vmem:[#allocation2] sm:$0xff] }
 0x15e   : > { %v1802_v51 = vadd.f32 %v9147_v56, %v1794_v17  ;;  %v1792_v8 = vld [vmem:[#allocation2 + $0x28] sm:$0xff]  ;;  %v2005_v44 = vadd.f32 %v1997_v28, %v9124_v34  ;;  %v2000_v10 = vld [vmem:[#allocation2 + $0x18] sm:$0xff] }
 0x15f   : > { %v1800_v40 = vadd.f32 %v1792_v8, %v9151_v47  ;;  %v1998_v63 = vld [vmem:[#allocation2 + $0x8] sm:$0xff]  ;;  %1807 = vst.msk [vmem:[#allocation2 + $0x20] sm:$0xff] %vm276_vm0, %v1799_v41  ;;  %2015 = vst.msk [vmem:[#allocation2 + $0x10] sm:$0xff] %vm276_vm0, %v2007_v3  ;;  %v2008_v24 = vadd.f32 %v9129_v43, %v2000_v10 }
 0x160   : > { %1810 = vst.msk [vmem:[#allocation2 + $0x38] sm:$0xff] %vm276_vm0, %v1802_v51  ;;  %v2006_v62 = vadd.f32 %v1998_v63, %v9137_v45  ;;  %2013 = vst.msk [vmem:[#allocation2] sm:$0xff] %vm276_vm0, %v2005_v44 }
 0x161   : > { %v9201_v16 = vpop.f32.mrb[40].mxu0  ;;  %1808 = vst.msk [vmem:[#allocation2 + $0x28] sm:$0xff] %vm276_vm0, %v1800_v40  ;;  %2016 = vst.msk [vmem:[#allocation2 + $0x18] sm:$0xff] %vm276_vm0, %v2008_v24 }
 0x162   : > { %v9182_v50 = vpop.f32.mrb[36].mxu1  ;;  %v9205_v29 = vpop.f32.mrb[41].mxu0  ;;  %2014 = vst.msk [vmem:[#allocation2 + $0x8] sm:$0xff] %vm276_vm0, %v2006_v62 }
 0x163   : > { %v9191_v13 = vpop.f32.mrb[37].mxu1  ;;  %v9207_v27 = vpop.f32.mrb[42].mxu0  ;;  %v2003_v0 = vld [vmem:[#allocation2 + $0x30] sm:$0xff] }
 0x164   : > { %v9197_v22 = vpop.f32.mrb[38].mxu1  ;;  %v9210_v31 = vpop.f32.mrb[43].mxu0  ;;  %v2011_v43 = vadd.f32 %v9143_v48, %v2003_v0 }
 0x165   : > { %v9203_v58 = vpop.f32.mrb[39].mxu1 }
 0x166   : > { %2019 = vst.msk [vmem:[#allocation2 + $0x30] sm:$0xff] %vm276_vm0, %v2011_v43  ;;  %v2001_v32 = vld [vmem:[#allocation2 + $0x20] sm:$0xff]  ;;  %v2305_v39 = vld [vmem:[#allocation2 + $0x10] sm:$0xff] }
 0x167   : > { %v2004_v1 = vld [vmem:[#allocation2 + $0x38] sm:$0xff]  ;;  %v2009_v14 = vadd.f32 %v2001_v32, %v9149_v25  ;;  %v2313_v23 = vadd.f32 %v9155_v59, %v2305_v39  ;;  %v2303_v17 = vld [vmem:[#allocation2] sm:$0xff] }
 0x168   : > { %v2012_v19 = vadd.f32 %v9153_v49, %v2004_v1  ;;  %v2002_v12 = vld [vmem:[#allocation2 + $0x28] sm:$0xff]  ;;  %v2311_v41 = vadd.f32 %v2303_v17, %v9159_v26  ;;  %v2306_v51 = vld [vmem:[#allocation2 + $0x18] sm:$0xff] }
 0x169   : > { %v9212_v35 = vpop.f32.mrb[44].mxu0  ;;  %v2010_v48 = vadd.f32 %v2002_v12, %v9157_v60  ;;  %v2304_v3 = vld [vmem:[#allocation2 + $0x8] sm:$0xff]  ;;  %2017 = vst.msk [vmem:[#allocation2 + $0x20] sm:$0xff] %vm276_vm0, %v2009_v14  ;;  %2321 = vst.msk [vmem:[#allocation2 + $0x10] sm:$0xff] %vm276_vm0, %v2313_v23  ;;  %v2314_v25 = vadd.f32 %v9163_v52, %v2306_v51 }
 0x16a   : > { %v9215_v46 = vpop.f32.mrb[45].mxu0  ;;  %2020 = vst.msk [vmem:[#allocation2 + $0x38] sm:$0xff] %vm276_vm0, %v2012_v19  ;;  %v2312_v49 = vadd.f32 %v2304_v3, %v9168_v55  ;;  %2319 = vst.msk [vmem:[#allocation2] sm:$0xff] %vm276_vm0, %v2311_v41 }
 0x16b   : > { %v9222_v57 = vpop.f32.mrb[46].mxu0  ;;  %2018 = vst.msk [vmem:[#allocation2 + $0x28] sm:$0xff] %vm276_vm0, %v2010_v48  ;;  %2322 = vst.msk [vmem:[#allocation2 + $0x18] sm:$0xff] %vm276_vm0, %v2314_v25 }
 0x16c   : > { %v9228_v37 = vpop.f32.mrb[47].mxu0  ;;  %2320 = vst.msk [vmem:[#allocation2 + $0x8] sm:$0xff] %vm276_vm0, %v2312_v49 }
 0x16d   : > { %v9217_v33 = vpop.f32.mrb[40].mxu1  ;;  %v2309_v59 = vld [vmem:[#allocation2 + $0x30] sm:$0xff] }
 0x16e   : > { %v9224_v61 = vpop.f32.mrb[41].mxu1  ;;  %v2317_v60 = vadd.f32 %v9174_v6, %v2309_v59 }
 0x16f   : > { %v9230_v20 = vpop.f32.mrb[42].mxu1 }
 0x170   : > { %v9237_v18 = vpop.f32.mrb[43].mxu1  ;;  %2325 = vst.msk [vmem:[#allocation2 + $0x30] sm:$0xff] %vm276_vm0, %v2317_v60  ;;  %v2307_v26 = vld [vmem:[#allocation2 + $0x20] sm:$0xff]  ;;  %v2515_v40 = vld [vmem:[#allocation2 + $0x10] sm:$0xff] }
 0x171   : > { %v2310_v28 = vld [vmem:[#allocation2 + $0x38] sm:$0xff]  ;;  %v2315_v52 = vadd.f32 %v2307_v26, %v9180_v30  ;;  %v2523_v44 = vadd.f32 %v9161_v53, %v2515_v40  ;;  %v2513_v63 = vld [vmem:[#allocation2] sm:$0xff] }
 0x172   : > { %v9250_v4 = vpop.f32.mrb[48].mxu0  ;;  %v2318_v55 = vadd.f32 %v9189_v9, %v2310_v28  ;;  %v2308_v10 = vld [vmem:[#allocation2 + $0x28] sm:$0xff]  ;;  %v2521_v62 = vadd.f32 %v2513_v63, %v9165_v21  ;;  %v2516_v0 = vld [vmem:[#allocation2 + $0x18] sm:$0xff] }
 0x173   : > { %v9256_v5 = vpop.f32.mrb[49].mxu0  ;;  %v2316_v24 = vadd.f32 %v2308_v10, %v9195_v36  ;;  %v2514_v43 = vld [vmem:[#allocation2 + $0x8] sm:$0xff]  ;;  %2323 = vst.msk [vmem:[#allocation2 + $0x20] sm:$0xff] %vm276_vm0, %v2315_v52  ;;  %2531 = vst.msk [vmem:[#allocation2 + $0x10] sm:$0xff] %vm276_vm0, %v2523_v44  ;;  %v2524_v6 = vadd.f32 %v9170_v42, %v2516_v0 }
 0x174   : > { %v9265_v47 = vpop.f32.mrb[50].mxu0  ;;  %2326 = vst.msk [vmem:[#allocation2 + $0x38] sm:$0xff] %vm276_vm0, %v2318_v55  ;;  %v2522_v30 = vadd.f32 %v2514_v43, %v9176_v7  ;;  %2529 = vst.msk [vmem:[#allocation2] sm:$0xff] %vm276_vm0, %v2521_v62 }
 0x175   : > { %v9271_v54 = vpop.f32.mrb[51].mxu0  ;;  %2324 = vst.msk [vmem:[#allocation2 + $0x28] sm:$0xff] %vm276_vm0, %v2316_v24  ;;  %2532 = vst.msk [vmem:[#allocation2 + $0x18] sm:$0xff] %vm276_vm0, %v2524_v6 }
 0x176   : > { %2530 = vst.msk [vmem:[#allocation2 + $0x8] sm:$0xff] %vm276_vm0, %v2522_v30 }
 0x177   : > { %v9248_v38 = vpop.f32.mrb[44].mxu1  ;;  %v2519_v32 = vld [vmem:[#allocation2 + $0x30] sm:$0xff] }
 0x178   : > { %v9254_v2 = vpop.f32.mrb[45].mxu1  ;;  %v2527_v42 = vadd.f32 %v9182_v50, %v2519_v32 }
 0x179   : > { %v9263_v56 = vpop.f32.mrb[46].mxu1 }
 0x17a   : > { %v9269_v34 = vpop.f32.mrb[47].mxu1  ;;  %v9276_v45 = vpop.f32.mrb[52].mxu0  ;;  %2535 = vst.msk [vmem:[#allocation2 + $0x30] sm:$0xff] %vm276_vm0, %v2527_v42  ;;  %v2517_v7 = vld [vmem:[#allocation2 + $0x20] sm:$0xff]  ;;  %v2678_v39 = vld [vmem:[#allocation2 + $0x10] sm:$0xff] }
 0x17b   : > { %v9279_v11 = vpop.f32.mrb[53].mxu0  ;;  %v2520_v1 = vld [vmem:[#allocation2 + $0x38] sm:$0xff]  ;;  %v2525_v14 = vadd.f32 %v2517_v7, %v9191_v13  ;;  %v2686_v23 = vadd.f32 %v9201_v16, %v2678_v39  ;;  %v2676_v17 = vld [vmem:[#allocation2] sm:$0xff] }
 0x17c   : > { %v9284_v15 = vpop.f32.mrb[54].mxu0  ;;  %v2528_v19 = vadd.f32 %v9197_v22, %v2520_v1  ;;  %v2518_v12 = vld [vmem:[#allocation2 + $0x28] sm:$0xff]  ;;  %v2684_v41 = vadd.f32 %v2676_v17, %v9205_v29  ;;  %v2679_v51 = vld [vmem:[#allocation2 + $0x18] sm:$0xff] }
 0x17d   : > { %v9288_v8 = vpop.f32.mrb[55].mxu0  ;;  %v2526_v48 = vadd.f32 %v2518_v12, %v9203_v58  ;;  %v2677_v3 = vld [vmem:[#allocation2 + $0x8] sm:$0xff]  ;;  %2533 = vst.msk [vmem:[#allocation2 + $0x20] sm:$0xff] %vm276_vm0, %v2525_v14  ;;  %2694 = vst.msk [vmem:[#allocation2 + $0x10] sm:$0xff] %vm276_vm0, %v2686_v23  ;;  %v2687_v50 = vadd.f32 %v9207_v27, %v2679_v51 }
 0x17e   : > { %2536 = vst.msk [vmem:[#allocation2 + $0x38] sm:$0xff] %vm276_vm0, %v2528_v19  ;;  %v2685_v13 = vadd.f32 %v2677_v3, %v9210_v31  ;;  %2692 = vst.msk [vmem:[#allocation2] sm:$0xff] %vm276_vm0, %v2684_v41 }
 0x17f   : > { %2534 = vst.msk [vmem:[#allocation2 + $0x28] sm:$0xff] %vm276_vm0, %v2526_v48  ;;  %2695 = vst.msk [vmem:[#allocation2 + $0x18] sm:$0xff] %vm276_vm0, %v2687_v50 }
 0x180   : > { %2693 = vst.msk [vmem:[#allocation2 + $0x8] sm:$0xff] %vm276_vm0, %v2685_v13 }
 0x181   : > { %v2682_v29 = vld [vmem:[#allocation2 + $0x30] sm:$0xff] }
 0x182   : > { %v2690_v31 = vadd.f32 %v9212_v35, %v2682_v29 }
 0x184   : > { %2698 = vst.msk [vmem:[#allocation2 + $0x30] sm:$0xff] %vm276_vm0, %v2690_v31  ;;  %v2680_v26 = vld [vmem:[#allocation2 + $0x20] sm:$0xff]  ;;  %v2952_v40 = vld [vmem:[#allocation2 + $0x10] sm:$0xff] }
 0x185   : > { %v2683_v28 = vld [vmem:[#allocation2 + $0x38] sm:$0xff]  ;;  %v2688_v52 = vadd.f32 %v2680_v26, %v9215_v46  ;;  %v2960_v44 = vadd.f32 %v9217_v33, %v2952_v40  ;;  %v2950_v63 = vld [vmem:[#allocation2] sm:$0xff] }
 0x186   : > { %v2691_v55 = vadd.f32 %v9222_v57, %v2683_v28  ;;  %v2681_v10 = vld [vmem:[#allocation2 + $0x28] sm:$0xff]  ;;  %v2958_v24 = vadd.f32 %v2950_v63, %v9224_v61  ;;  %v2953_v62 = vld [vmem:[#allocation2 + $0x18] sm:$0xff] }
 0x187   : > { %v9311_v9 = vpop.f32.mrb[48].mxu1  ;;  %v2689_v35 = vadd.f32 %v2681_v10, %v9228_v37  ;;  %v2951_v0 = vld [vmem:[#allocation2 + $0x8] sm:$0xff]  ;;  %2696 = vst.msk [vmem:[#allocation2 + $0x20] sm:$0xff] %vm276_vm0, %v2688_v52  ;;  %2968 = vst.msk [vmem:[#allocation2 + $0x10] sm:$0xff] %vm276_vm0, %v2960_v44  ;;  %v2961_v46 = vadd.f32 %v9230_v20, %v2953_v62 }
 0x188   : > { %v9315_v53 = vpop.f32.mrb[49].mxu1  ;;  %2699 = vst.msk [vmem:[#allocation2 + $0x38] sm:$0xff] %vm276_vm0, %v2691_v55  ;;  %v2959_v57 = vadd.f32 %v2951_v0, %v9237_v18  ;;  %2966 = vst.msk [vmem:[#allocation2] sm:$0xff] %vm276_vm0, %v2958_v24 }
 0x189   : > { %v9319_v21 = vpop.f32.mrb[50].mxu1  ;;  %2697 = vst.msk [vmem:[#allocation2 + $0x28] sm:$0xff] %vm276_vm0, %v2689_v35  ;;  %2969 = vst.msk [vmem:[#allocation2 + $0x18] sm:$0xff] %vm276_vm0, %v2961_v46 }
 0x18a   : > { %v9321_v36 = vpop.f32.mrb[51].mxu1  ;;  %2967 = vst.msk [vmem:[#allocation2 + $0x8] sm:$0xff] %vm276_vm0, %v2959_v57 }
 0x18b   : > { %v2956_v30 = vld [vmem:[#allocation2 + $0x30] sm:$0xff] }
 0x18c   : > { %v2964_v42 = vadd.f32 %v9248_v38, %v2956_v30 }
 0x18e   : > { %2972 = vst.msk [vmem:[#allocation2 + $0x30] sm:$0xff] %vm276_vm0, %v2964_v42  ;;  %v2954_v7 = vld [vmem:[#allocation2 + $0x20] sm:$0xff]  ;;  %v3162_v39 = vld [vmem:[#allocation2 + $0x10] sm:$0xff] }
 0x18f   : > { %v2957_v1 = vld [vmem:[#allocation2 + $0x38] sm:$0xff]  ;;  %v2962_v14 = vadd.f32 %v2954_v7, %v9254_v2  ;;  %v3170_v23 = vadd.f32 %v9250_v4, %v3162_v39  ;;  %v3160_v17 = vld [vmem:[#allocation2] sm:$0xff] }
 0x190   : > { %v2965_v19 = vadd.f32 %v9263_v56, %v2957_v1  ;;  %v2955_v12 = vld [vmem:[#allocation2 + $0x28] sm:$0xff]  ;;  %v3168_v51 = vadd.f32 %v3160_v17, %v9256_v5  ;;  %v3163_v38 = vld [vmem:[#allocation2 + $0x18] sm:$0xff] }
 0x191   : > { %v2963_v41 = vadd.f32 %v2955_v12, %v9269_v34  ;;  %v3161_v3 = vld [vmem:[#allocation2 + $0x8] sm:$0xff]  ;;  %2970 = vst.msk [vmem:[#allocation2 + $0x20] sm:$0xff] %vm276_vm0, %v2962_v14  ;;  %3178 = vst.msk [vmem:[#allocation2 + $0x10] sm:$0xff] %vm276_vm0, %v3170_v23  ;;  %v3171_v4 = vadd.f32 %v9265_v47, %v3163_v38 }
 0x192   : > { %2973 = vst.msk [vmem:[#allocation2 + $0x38] sm:$0xff] %vm276_vm0, %v2965_v19  ;;  %v3169_v2 = vadd.f32 %v3161_v3, %v9271_v54  ;;  %3176 = vst.msk [vmem:[#allocation2] sm:$0xff] %vm276_vm0, %v3168_v51 }
 0x193   : > { %v9339_v22 = vpop.f32.mrb[52].mxu1  ;;  %2971 = vst.msk [vmem:[#allocation2 + $0x28] sm:$0xff] %vm276_vm0, %v2963_v41  ;;  %3179 = vst.msk [vmem:[#allocation2 + $0x18] sm:$0xff] %vm276_vm0, %v3171_v4 }
 0x194   : > { %v9341_v16 = vpop.f32.mrb[53].mxu1  ;;  %v9343_v58 = vpop.f32.mrb[56].mxu0  ;;  %3177 = vst.msk [vmem:[#allocation2 + $0x8] sm:$0xff] %vm276_vm0, %v3169_v2 }
 0x195   : > { %v9345_v25 = vpop.f32.mrb[54].mxu1  ;;  %v9347_v27 = vpop.f32.mrb[57].mxu0  ;;  %v3166_v34 = vld [vmem:[#allocation2 + $0x30] sm:$0xff] }
 0x196   : > { %v9350_v49 = vpop.f32.mrb[55].mxu1  ;;  %v9352_v59 = vpop.f32.mrb[58].mxu0  ;;  %v3174_v13 = vadd.f32 %v9276_v45, %v3166_v34 }
 0x197   : > { %v9354_v60 = vpop.f32.mrb[59].mxu0 }
 0x198   : > { %3182 = vst.msk [vmem:[#allocation2 + $0x30] sm:$0xff] %vm276_vm0, %v3174_v13  ;;  %v3164_v47 = vld [vmem:[#allocation2 + $0x20] sm:$0xff]  ;;  %v3468_v31 = vld [vmem:[#allocation2 + $0x10] sm:$0xff] }
 0x199   : > { %v3167_v54 = vld [vmem:[#allocation2 + $0x38] sm:$0xff]  ;;  %v3172_v28 = vadd.f32 %v3164_v47, %v9279_v11  ;;  %v3476_v52 = vadd.f32 %v9311_v9, %v3468_v31  ;;  %v3466_v44 = vld [vmem:[#allocation2] sm:$0xff] }
 0x19a   : > { %v3175_v40 = vadd.f32 %v9284_v15, %v3167_v54  ;;  %v3165_v55 = vld [vmem:[#allocation2 + $0x28] sm:$0xff]  ;;  %v3474_v63 = vadd.f32 %v3466_v44, %v9315_v53  ;;  %v3469_v35 = vld [vmem:[#allocation2 + $0x18] sm:$0xff] }
 0x19b   : > { %v9367_v43 = vpop.f32.mrb[56].mxu1  ;;  %v3173_v45 = vadd.f32 %v3165_v55, %v9288_v8  ;;  %v3467_v24 = vld [vmem:[#allocation2 + $0x8] sm:$0xff]  ;;  %3180 = vst.msk [vmem:[#allocation2 + $0x20] sm:$0xff] %vm276_vm0, %v3172_v28  ;;  %3484 = vst.msk [vmem:[#allocation2 + $0x10] sm:$0xff] %vm276_vm0, %v3476_v52  ;;  %v3477_v11 = vadd.f32 %v9319_v21, %v3469_v35 }
 0x19c   : > { %v9371_v33 = vpop.f32.mrb[60].mxu0  ;;  %v9373_v61 = vpop.f32.mrb[57].mxu1  ;;  %3183 = vst.msk [vmem:[#allocation2 + $0x38] sm:$0xff] %vm276_vm0, %v3175_v40  ;;  %v3475_v15 = vadd.f32 %v3467_v24, %v9321_v36  ;;  %3482 = vst.msk [vmem:[#allocation2] sm:$0xff] %vm276_vm0, %v3474_v63 }
 0x19d   : > { %v9377_v37 = vpop.f32.mrb[61].mxu0  ;;  %v9379_v6 = vpop.f32.mrb[58].mxu1  ;;  %3181 = vst.msk [vmem:[#allocation2 + $0x28] sm:$0xff] %vm276_vm0, %v3173_v45  ;;  %3485 = vst.msk [vmem:[#allocation2 + $0x18] sm:$0xff] %vm276_vm0, %v3477_v11 }
 0x19e   : > { %v9381_v20 = vpop.f32.mrb[62].mxu0  ;;  %v9383_v18 = vpop.f32.mrb[59].mxu1  ;;  %3483 = vst.msk [vmem:[#allocation2 + $0x8] sm:$0xff] %vm276_vm0, %v3475_v15 }
 0x19f   : > { %v9385_v32 = vpop.f32.mrb[63].mxu0  ;;  %v3472_v8 = vld [vmem:[#allocation2 + $0x30] sm:$0xff] }
 0x1a0   : > { %v3480_v9 = vadd.f32 %v9339_v22, %v3472_v8 }
 0x1a2   : > { %3488 = vst.msk [vmem:[#allocation2 + $0x30] sm:$0xff] %vm276_vm0, %v3480_v9  ;;  %v3470_v53 = vld [vmem:[#allocation2 + $0x20] sm:$0xff]  ;;  %v3678_v46 = vld [vmem:[#allocation2 + $0x10] sm:$0xff] }
 0x1a3   : > { %v9392_v48 = vpop.f32.mrb[60].mxu1  ;;  %v3473_v0 = vld [vmem:[#allocation2 + $0x38] sm:$0xff]  ;;  %v3478_v36 = vadd.f32 %v3470_v53, %v9341_v16  ;;  %v3686_v42 = vadd.f32 %v9343_v58, %v3678_v46  ;;  %v3676_v1 = vld [vmem:[#allocation2] sm:$0xff] }
 0x1a4   : > { %v9396_v50 = vpop.f32.mrb[61].mxu1  ;;  %v3481_v30 = vadd.f32 %v9345_v25, %v3473_v0  ;;  %v3471_v7 = vld [vmem:[#allocation2 + $0x28] sm:$0xff]  ;;  %v3684_v19 = vadd.f32 %v3676_v1, %v9347_v27  ;;  %v3679_v23 = vld [vmem:[#allocation2 + $0x18] sm:$0xff] }
 0x1a5   : > { %v9403_v56 = vpop.f32.mrb[62].mxu1  ;;  %v3479_v14 = vadd.f32 %v3471_v7, %v9350_v49  ;;  %v3677_v12 = vld [vmem:[#allocation2 + $0x8] sm:$0xff]  ;;  %3486 = vst.msk [vmem:[#allocation2 + $0x20] sm:$0xff] %vm276_vm0, %v3478_v36  ;;  %3694 = vst.msk [vmem:[#allocation2 + $0x10] sm:$0xff] %vm276_vm0, %v3686_v42  ;;  %v3687_v16 = vadd.f32 %v9352_v59, %v3679_v23 }
 0x1a6   : > { %v9407_v5 = vpop.f32.mrb[63].mxu1  ;;  %3489 = vst.msk [vmem:[#allocation2 + $0x38] sm:$0xff] %vm276_vm0, %v3481_v30  ;;  %v3685_v58 = vadd.f32 %v3677_v12, %v9354_v60  ;;  %3692 = vst.msk [vmem:[#allocation2] sm:$0xff] %vm276_vm0, %v3684_v19 }
 0x1a7   : > { %v9412_v29 = vpop.f32.mrb[64].mxu0  ;;  %3487 = vst.msk [vmem:[#allocation2 + $0x28] sm:$0xff] %vm276_vm0, %v3479_v14  ;;  %3695 = vst.msk [vmem:[#allocation2 + $0x18] sm:$0xff] %vm276_vm0, %v3687_v16 }
 0x1a8   : > { %v9415_v26 = vpop.f32.mrb[65].mxu0  ;;  %3693 = vst.msk [vmem:[#allocation2 + $0x8] sm:$0xff] %vm276_vm0, %v3685_v58 }
 0x1a9   : > { %v9420_v10 = vpop.f32.mrb[66].mxu0  ;;  %v3682_v27 = vld [vmem:[#allocation2 + $0x30] sm:$0xff] }
 0x1aa   : > { %v9424_v62 = vpop.f32.mrb[67].mxu0  ;;  %v3690_v51 = vadd.f32 %v9371_v33, %v3682_v27 }
 0x1ac   : > { %v9439_v21 = vpop.f32.mrb[64].mxu1  ;;  %3698 = vst.msk [vmem:[#allocation2 + $0x30] sm:$0xff] %vm276_vm0, %v3690_v51  ;;  %v3680_v60 = vld [vmem:[#allocation2 + $0x20] sm:$0xff]  ;;  %v3841_v4 = vld [vmem:[#allocation2 + $0x10] sm:$0xff] }
 0x1ad   : > { %v9446_v22 = vpop.f32.mrb[65].mxu1  ;;  %v3683_v3 = vld [vmem:[#allocation2 + $0x38] sm:$0xff]  ;;  %v3688_v34 = vadd.f32 %v3680_v60, %v9377_v37  ;;  %v3849_v47 = vadd.f32 %v9367_v43, %v3841_v4  ;;  %v3839_v31 = vld [vmem:[#allocation2] sm:$0xff] }
 0x1ae   : > { %v9452_v41 = vpop.f32.mrb[66].mxu1  ;;  %v3691_v13 = vadd.f32 %v9381_v20, %v3683_v3  ;;  %v3681_v54 = vld [vmem:[#allocation2 + $0x28] sm:$0xff]  ;;  %v3847_v40 = vadd.f32 %v3839_v31, %v9373_v61  ;;  %v3842_v52 = vld [vmem:[#allocation2 + $0x18] sm:$0xff] }
 0x1af   : > { %v9461_v49 = vpop.f32.mrb[67].mxu1  ;;  %v3689_v28 = vadd.f32 %v3681_v54, %v9385_v32  ;;  %v3840_v55 = vld [vmem:[#allocation2 + $0x8] sm:$0xff]  ;;  %3696 = vst.msk [vmem:[#allocation2 + $0x20] sm:$0xff] %vm276_vm0, %v3688_v34  ;;  %3857 = vst.msk [vmem:[#allocation2 + $0x10] sm:$0xff] %vm276_vm0, %v3849_v47  ;;  %v3850_v37 = vadd.f32 %v9379_v6, %v3842_v52 }
 0x1b0   : > { %3699 = vst.msk [vmem:[#allocation2 + $0x38] sm:$0xff] %vm276_vm0, %v3691_v13  ;;  %v3848_v43 = vadd.f32 %v3840_v55, %v9383_v18  ;;  %3855 = vst.msk [vmem:[#allocation2] sm:$0xff] %vm276_vm0, %v3847_v40 }
 0x1b1   : > { %v9437_v57 = vpop.f32.mrb[68].mxu0  ;;  %3697 = vst.msk [vmem:[#allocation2 + $0x28] sm:$0xff] %vm276_vm0, %v3689_v28  ;;  %3858 = vst.msk [vmem:[#allocation2 + $0x18] sm:$0xff] %vm276_vm0, %v3850_v37 }
 0x1b2   : > { %v9444_v39 = vpop.f32.mrb[69].mxu0  ;;  %3856 = vst.msk [vmem:[#allocation2 + $0x8] sm:$0xff] %vm276_vm0, %v3848_v43 }
 0x1b3   : > { %v9450_v17 = vpop.f32.mrb[70].mxu0  ;;  %v3845_v61 = vld [vmem:[#allocation2 + $0x30] sm:$0xff] }
 0x1b4   : > { %v9459_v25 = vpop.f32.mrb[71].mxu0  ;;  %v9468_v38 = vpop.f32.mrb[68].mxu1  ;;  %v3853_v20 = vadd.f32 %v9392_v48, %v3845_v61 }
 0x1b5   : > { %v9470_v59 = vpop.f32.mrb[69].mxu1 }
 0x1b6   : > { %v9473_v2 = vpop.f32.mrb[70].mxu1  ;;  %3861 = vst.msk [vmem:[#allocation2 + $0x30] sm:$0xff] %vm276_vm0, %v3853_v20  ;;  %v3843_v32 = vld [vmem:[#allocation2 + $0x20] sm:$0xff]  ;;  %v4115_v45 = vld [vmem:[#allocation2 + $0x10] sm:$0xff] }
 0x1b7   : > { %v9478_v33 = vpop.f32.mrb[71].mxu1  ;;  %v3846_v44 = vld [vmem:[#allocation2 + $0x38] sm:$0xff]  ;;  %v3851_v6 = vadd.f32 %v3843_v32, %v9396_v50  ;;  %v4123_v63 = vadd.f32 %v9412_v29, %v4115_v45  ;;  %v4113_v24 = vld [vmem:[#allocation2] sm:$0xff] }
 0x1b8   : > { %v3854_v18 = vadd.f32 %v9403_v56, %v3846_v44  ;;  %v3844_v35 = vld [vmem:[#allocation2 + $0x28] sm:$0xff]  ;;  %v4121_v15 = vadd.f32 %v4113_v24, %v9415_v26  ;;  %v4116_v8 = vld [vmem:[#allocation2 + $0x18] sm:$0xff] }
 0x1b9   : > { %v3852_v11 = vadd.f32 %v3844_v35, %v9407_v5  ;;  %v4114_v9 = vld [vmem:[#allocation2 + $0x8] sm:$0xff]  ;;  %3859 = vst.msk [vmem:[#allocation2 + $0x20] sm:$0xff] %vm276_vm0, %v3851_v6  ;;  %4131 = vst.msk [vmem:[#allocation2 + $0x10] sm:$0xff] %vm276_vm0, %v4123_v63  ;;  %v4124_v50 = vadd.f32 %v9420_v10, %v4116_v8 }
 0x1ba   : > { %3862 = vst.msk [vmem:[#allocation2 + $0x38] sm:$0xff] %vm276_vm0, %v3854_v18  ;;  %v4122_v56 = vadd.f32 %v4114_v9, %v9424_v62  ;;  %4129 = vst.msk [vmem:[#allocation2] sm:$0xff] %vm276_vm0, %v4121_v15 }
 0x1bb   : > { %3860 = vst.msk [vmem:[#allocation2 + $0x28] sm:$0xff] %vm276_vm0, %v3852_v11  ;;  %4132 = vst.msk [vmem:[#allocation2 + $0x18] sm:$0xff] %vm276_vm0, %v4124_v50 }
 0x1bc   : > { %4130 = vst.msk [vmem:[#allocation2 + $0x8] sm:$0xff] %vm276_vm0, %v4122_v56 }
 0x1bd   : > { %v4119_v53 = vld [vmem:[#allocation2 + $0x30] sm:$0xff] }
 0x1be   : > { %v4127_v0 = vadd.f32 %v9437_v57, %v4119_v53 }
 0x1c0   : > { %4135 = vst.msk [vmem:[#allocation2 + $0x30] sm:$0xff] %vm276_vm0, %v4127_v0  ;;  %v4117_v46 = vld [vmem:[#allocation2 + $0x20] sm:$0xff]  ;;  %v4325_v36 = vld [vmem:[#allocation2 + $0x10] sm:$0xff] }
 0x1c1   : > { %v4120_v10 = vld [vmem:[#allocation2 + $0x38] sm:$0xff]  ;;  %v4125_v62 = vadd.f32 %v4117_v46, %v9444_v39  ;;  %v4333_v42 = vadd.f32 %v9439_v21, %v4325_v36  ;;  %v4323_v1 = vld [vmem:[#allocation2] sm:$0xff] }
 0x1c2   : > { %v7569_v48 = vpop.f32.mrb[72].mxu0  ;;  %v4128_v30 = vadd.f32 %v9450_v17, %v4120_v10  ;;  %v4118_v7 = vld [vmem:[#allocation2 + $0x28] sm:$0xff]  ;;  %v4331_v19 = vadd.f32 %v4323_v1, %v9446_v22  ;;  %v4326_v23 = vld [vmem:[#allocation2 + $0x18] sm:$0xff] }
 0x1c3   : > { %v4598_v29 = vpop.f32.mrb[73].mxu0  ;;  %v4126_v14 = vadd.f32 %v4118_v7, %v9459_v25  ;;  %v4324_v12 = vld [vmem:[#allocation2 + $0x8] sm:$0xff]  ;;  %4133 = vst.msk [vmem:[#allocation2 + $0x20] sm:$0xff] %vm276_vm0, %v4125_v62  ;;  %4341 = vst.msk [vmem:[#allocation2 + $0x10] sm:$0xff] %vm276_vm0, %v4333_v42  ;;  %v4334_v57 = vadd.f32 %v9452_v41, %v4326_v23 }
 0x1c4   : > { %v7570_v5 = vpop.f32.mrb[74].mxu0  ;;  %4136 = vst.msk [vmem:[#allocation2 + $0x38] sm:$0xff] %vm276_vm0, %v4128_v30  ;;  %v4332_v39 = vadd.f32 %v4324_v12, %v9461_v49  ;;  %4339 = vst.msk [vmem:[#allocation2] sm:$0xff] %vm276_vm0, %v4331_v19 }
 0x1c5   : > { %v4601_v26 = vpop.f32.mrb[75].mxu0  ;;  %4134 = vst.msk [vmem:[#allocation2 + $0x28] sm:$0xff] %vm276_vm0, %v4126_v14  ;;  %4342 = vst.msk [vmem:[#allocation2 + $0x18] sm:$0xff] %vm276_vm0, %v4334_v57 }
 0x1c6   : > { %4340 = vst.msk [vmem:[#allocation2 + $0x8] sm:$0xff] %vm276_vm0, %v4332_v39 }
 0x1c7   : > { %v4329_v25 = vld [vmem:[#allocation2 + $0x30] sm:$0xff] }
 0x1c8   : > { %v4337_v41 = vadd.f32 %v9468_v38, %v4329_v25 }
 0x1ca   : > { %4345 = vst.msk [vmem:[#allocation2 + $0x30] sm:$0xff] %vm276_vm0, %v4337_v41  ;;  %v4327_v49 = vld [vmem:[#allocation2 + $0x20] sm:$0xff]  ;;  %v4631_v4 = vld [vmem:[#allocation2 + $0x10] sm:$0xff] }
 0x1cb   : > { %v4330_v3 = vld [vmem:[#allocation2 + $0x38] sm:$0xff]  ;;  %v4335_v34 = vadd.f32 %v4327_v49, %v9470_v59  ;;  %v4639_v47 = vadd.f32 %v7569_v48, %v4631_v4  ;;  %v4629_v31 = vld [vmem:[#allocation2] sm:$0xff] }
 0x1cc   : > { %v4338_v13 = vadd.f32 %v9473_v2, %v4330_v3  ;;  %v4328_v54 = vld [vmem:[#allocation2 + $0x28] sm:$0xff]  ;;  %v4637_v40 = vadd.f32 %v4629_v31, %v4598_v29  ;;  %v4632_v52 = vld [vmem:[#allocation2 + $0x18] sm:$0xff] }
 0x1cd   : > { %v7573_v21 = vpop.f32.mrb[76].mxu0  ;;  %v4336_v28 = vadd.f32 %v4328_v54, %v9478_v33  ;;  %v4630_v55 = vld [vmem:[#allocation2 + $0x8] sm:$0xff]  ;;  %4343 = vst.msk [vmem:[#allocation2 + $0x20] sm:$0xff] %vm276_vm0, %v4335_v34  ;;  %4647 = vst.msk [vmem:[#allocation2 + $0x10] sm:$0xff] %vm276_vm0, %v4639_v47  ;;  %v4640_v38 = vadd.f32 %v7570_v5, %v4632_v52 }
 0x1ce   : > { %v4614_v22 = vpop.f32.mrb[77].mxu0  ;;  %v7585_v17 = vpop.f32.mrb[72].mxu1  ;;  %4346 = vst.msk [vmem:[#allocation2 + $0x38] sm:$0xff] %vm276_vm0, %v4338_v13  ;;  %v4638_v43 = vadd.f32 %v4630_v55, %v4601_v26  ;;  %4645 = vst.msk [vmem:[#allocation2] sm:$0xff] %vm276_vm0, %v4637_v40 }
 0x1cf   : > { %v7574_v16 = vpop.f32.mrb[78].mxu0  ;;  %v4808_v58 = vpop.f32.mrb[73].mxu1  ;;  %4344 = vst.msk [vmem:[#allocation2 + $0x28] sm:$0xff] %vm276_vm0, %v4336_v28  ;;  %4648 = vst.msk [vmem:[#allocation2 + $0x18] sm:$0xff] %vm276_vm0, %v4640_v38 }
 0x1d0   : > { %v4617_v27 = vpop.f32.mrb[79].mxu0  ;;  %v7586_v51 = vpop.f32.mrb[74].mxu1  ;;  %4646 = vst.msk [vmem:[#allocation2 + $0x8] sm:$0xff] %vm276_vm0, %v4638_v43 }
 0x1d1   : > { %v4811_v60 = vpop.f32.mrb[75].mxu1  ;;  %v4635_v45 = vld [vmem:[#allocation2 + $0x30] sm:$0xff] }
 0x1d2   : > { %v4643_v6 = vadd.f32 %v7573_v21, %v4635_v45 }
 0x1d4   : > { %4651 = vst.msk [vmem:[#allocation2 + $0x30] sm:$0xff] %vm276_vm0, %v4643_v6  ;;  %v4633_v18 = vld [vmem:[#allocation2 + $0x20] sm:$0xff]  ;;  %v4841_v35 = vld [vmem:[#allocation2 + $0x10] sm:$0xff] }
 0x1d5   : > { %v7601_v37 = vpop.f32.mrb[80].mxu0  ;;  %v4636_v63 = vld [vmem:[#allocation2 + $0x38] sm:$0xff]  ;;  %v4641_v11 = vadd.f32 %v4633_v18, %v4614_v22  ;;  %v4849_v8 = vadd.f32 %v7585_v17, %v4841_v35  ;;  %v4839_v48 = vld [vmem:[#allocation2] sm:$0xff] }
 0x1d6   : > { %v7589_v59 = vpop.f32.mrb[76].mxu1  ;;  %v4971_v61 = vpop.f32.mrb[81].mxu0  ;;  %v4644_v15 = vadd.f32 %v7574_v16, %v4636_v63  ;;  %v4634_v9 = vld [vmem:[#allocation2 + $0x28] sm:$0xff]  ;;  %v4847_v29 = vadd.f32 %v4839_v48, %v4808_v58  ;;  %v4842_v5 = vld [vmem:[#allocation2 + $0x18] sm:$0xff] }
 0x1d7   : > { %v4824_v2 = vpop.f32.mrb[77].mxu1  ;;  %v7602_v33 = vpop.f32.mrb[82].mxu0  ;;  %v4642_v56 = vadd.f32 %v4634_v9, %v4617_v27  ;;  %v4840_v26 = vld [vmem:[#allocation2 + $0x8] sm:$0xff]  ;;  %4649 = vst.msk [vmem:[#allocation2 + $0x20] sm:$0xff] %vm276_vm0, %v4641_v11  ;;  %4857 = vst.msk [vmem:[#allocation2 + $0x10] sm:$0xff] %vm276_vm0, %v4849_v8  ;;  %v4850_v0 = vadd.f32 %v7586_v51, %v4842_v5 }
 0x1d8   : > { %v7590_v20 = vpop.f32.mrb[78].mxu1  ;;  %v4974_v32 = vpop.f32.mrb[83].mxu0  ;;  %4652 = vst.msk [vmem:[#allocation2 + $0x38] sm:$0xff] %vm276_vm0, %v4644_v15  ;;  %v4848_v46 = vadd.f32 %v4840_v26, %v4811_v60  ;;  %4855 = vst.msk [vmem:[#allocation2] sm:$0xff] %vm276_vm0, %v4847_v29 }
 0x1d9   : > { %v4827_v44 = vpop.f32.mrb[79].mxu1  ;;  %4650 = vst.msk [vmem:[#allocation2 + $0x28] sm:$0xff] %vm276_vm0, %v4642_v56  ;;  %4858 = vst.msk [vmem:[#allocation2 + $0x18] sm:$0xff] %vm276_vm0, %v4850_v0 }
 0x1da   : > { %4856 = vst.msk [vmem:[#allocation2 + $0x8] sm:$0xff] %vm276_vm0, %v4848_v46 }
 0x1db   : > { %v4845_v36 = vld [vmem:[#allocation2 + $0x30] sm:$0xff] }
 0x1dc   : > { %v4853_v62 = vadd.f32 %v7589_v59, %v4845_v36 }
 0x1dd   : > { %v7605_v24 = vpop.f32.mrb[84].mxu0 }
 0x1de   : > { %v4987_v50 = vpop.f32.mrb[85].mxu0  ;;  %4861 = vst.msk [vmem:[#allocation2 + $0x30] sm:$0xff] %vm276_vm0, %v4853_v62  ;;  %v4843_v7 = vld [vmem:[#allocation2 + $0x20] sm:$0xff]  ;;  %v5004_v14 = vld [vmem:[#allocation2 + $0x10] sm:$0xff] }
 0x1df   : > { %v7606_v53 = vpop.f32.mrb[86].mxu0  ;;  %v4846_v1 = vld [vmem:[#allocation2 + $0x38] sm:$0xff]  ;;  %v4851_v23 = vadd.f32 %v4843_v7, %v4824_v2  ;;  %v5012_v57 = vadd.f32 %v7601_v37, %v5004_v14  ;;  %v5002_v21 = vld [vmem:[#allocation2] sm:$0xff] }
 0x1e0   : > { %v4990_v10 = vpop.f32.mrb[87].mxu0  ;;  %v4854_v12 = vadd.f32 %v7590_v20, %v4846_v1  ;;  %v4844_v39 = vld [vmem:[#allocation2 + $0x28] sm:$0xff]  ;;  %v5010_v16 = vadd.f32 %v5002_v21, %v4971_v61  ;;  %v5005_v58 = vld [vmem:[#allocation2 + $0x18] sm:$0xff] }
 0x1e1   : > { %v7617_v30 = vpop.f32.mrb[80].mxu1  ;;  %v4852_v17 = vadd.f32 %v4844_v39, %v4827_v44  ;;  %v5003_v25 = vld [vmem:[#allocation2 + $0x8] sm:$0xff]  ;;  %4859 = vst.msk [vmem:[#allocation2 + $0x20] sm:$0xff] %vm276_vm0, %v4851_v23  ;;  %5020 = vst.msk [vmem:[#allocation2 + $0x10] sm:$0xff] %vm276_vm0, %v5012_v57  ;;  %v5013_v27 = vadd.f32 %v7602_v33, %v5005_v58 }
 0x1e2   : > { %v5245_v42 = vpop.f32.mrb[81].mxu1  ;;  %4862 = vst.msk [vmem:[#allocation2 + $0x38] sm:$0xff] %vm276_vm0, %v4854_v12  ;;  %v5011_v51 = vadd.f32 %v5003_v25, %v4974_v32  ;;  %5018 = vst.msk [vmem:[#allocation2] sm:$0xff] %vm276_vm0, %v5010_v16 }
 0x1e3   : > { %v7618_v19 = vpop.f32.mrb[82].mxu1  ;;  %4860 = vst.msk [vmem:[#allocation2 + $0x28] sm:$0xff] %vm276_vm0, %v4852_v17  ;;  %5021 = vst.msk [vmem:[#allocation2 + $0x18] sm:$0xff] %vm276_vm0, %v5013_v27 }
 0x1e4   : > { %v5248_v22 = vpop.f32.mrb[83].mxu1  ;;  %5019 = vst.msk [vmem:[#allocation2 + $0x8] sm:$0xff] %vm276_vm0, %v5011_v51 }
 0x1e5   : > { %v5008_v41 = vld [vmem:[#allocation2 + $0x30] sm:$0xff] }
 0x1e6   : > { %v5016_v60 = vadd.f32 %v7605_v24, %v5008_v41 }
 0x1e8   : > { %5024 = vst.msk [vmem:[#allocation2 + $0x30] sm:$0xff] %vm276_vm0, %v5016_v60  ;;  %v5006_v4 = vld [vmem:[#allocation2 + $0x20] sm:$0xff]  ;;  %v5278_v13 = vld [vmem:[#allocation2 + $0x10] sm:$0xff] }
 0x1e9   : > { %v7621_v49 = vpop.f32.mrb[84].mxu1  ;;  %v7633_v3 = vpop.f32.mrb[88].mxu0  ;;  %v5009_v34 = vld [vmem:[#allocation2 + $0x38] sm:$0xff]  ;;  %v5014_v31 = vadd.f32 %v5006_v4, %v4987_v50  ;;  %v5286_v40 = vadd.f32 %v7617_v30, %v5278_v13  ;;  %v5276_v55 = vld [vmem:[#allocation2] sm:$0xff] }
 0x1ea   : > { %v5261_v47 = vpop.f32.mrb[85].mxu1  ;;  %v5455_v54 = vpop.f32.mrb[89].mxu0  ;;  %v5017_v28 = vadd.f32 %v7606_v53, %v5009_v34  ;;  %v5007_v52 = vld [vmem:[#allocation2 + $0x28] sm:$0xff]  ;;  %v5284_v59 = vadd.f32 %v5276_v55, %v5245_v42  ;;  %v5279_v61 = vld [vmem:[#allocation2 + $0x18] sm:$0xff] }
 0x1eb   : > { %v7622_v37 = vpop.f32.mrb[86].mxu1  ;;  %v7634_v38 = vpop.f32.mrb[90].mxu0  ;;  %v5015_v43 = vadd.f32 %v5007_v52, %v4990_v10  ;;  %v5277_v2 = vld [vmem:[#allocation2 + $0x8] sm:$0xff]  ;;  %5022 = vst.msk [vmem:[#allocation2 + $0x20] sm:$0xff] %vm276_vm0, %v5014_v31  ;;  %5294 = vst.msk [vmem:[#allocation2 + $0x10] sm:$0xff] %vm276_vm0, %v5286_v40  ;;  %v5287_v32 = vadd.f32 %v7618_v19, %v5279_v61 }
 0x1ec   : > { %v5264_v33 = vpop.f32.mrb[87].mxu1  ;;  %v5458_v20 = vpop.f32.mrb[91].mxu0  ;;  %5025 = vst.msk [vmem:[#allocation2 + $0x38] sm:$0xff] %vm276_vm0, %v5017_v28  ;;  %v5285_v44 = vadd.f32 %v5277_v2, %v5248_v22  ;;  %5292 = vst.msk [vmem:[#allocation2] sm:$0xff] %vm276_vm0, %v5284_v59 }
 0x1ed   : > { %5023 = vst.msk [vmem:[#allocation2 + $0x28] sm:$0xff] %vm276_vm0, %v5015_v43  ;;  %5295 = vst.msk [vmem:[#allocation2 + $0x18] sm:$0xff] %vm276_vm0, %v5287_v32 }
 0x1ee   : > { %5293 = vst.msk [vmem:[#allocation2 + $0x8] sm:$0xff] %vm276_vm0, %v5285_v44 }
 0x1ef   : > { %v5282_v45 = vld [vmem:[#allocation2 + $0x30] sm:$0xff] }
 0x1f0   : > { %v5290_v18 = vadd.f32 %v7621_v49, %v5282_v45 }
 0x1f1   : > { %v7637_v6 = vpop.f32.mrb[92].mxu0 }
 0x1f2   : > { %v5471_v63 = vpop.f32.mrb[93].mxu0  ;;  %5298 = vst.msk [vmem:[#allocation2 + $0x30] sm:$0xff] %vm276_vm0, %v5290_v18  ;;  %v5280_v24 = vld [vmem:[#allocation2 + $0x20] sm:$0xff]  ;;  %v5488_v15 = vld [vmem:[#allocation2 + $0x10] sm:$0xff] }
 0x1f3   : > { %v7638_v35 = vpop.f32.mrb[94].mxu0  ;;  %v5283_v11 = vld [vmem:[#allocation2 + $0x38] sm:$0xff]  ;;  %v5288_v9 = vadd.f32 %v5280_v24, %v5261_v47  ;;  %v5496_v50 = vadd.f32 %v7633_v3, %v5488_v15  ;;  %v5486_v29 = vld [vmem:[#allocation2] sm:$0xff] }
 0x1f4   : > { %v5474_v8 = vpop.f32.mrb[95].mxu0  ;;  %v5291_v48 = vadd.f32 %v7622_v37, %v5283_v11  ;;  %v5281_v56 = vld [vmem:[#allocation2 + $0x28] sm:$0xff]  ;;  %v5494_v26 = vadd.f32 %v5486_v29, %v5455_v54  ;;  %v5489_v53 = vld [vmem:[#allocation2 + $0x18] sm:$0xff] }
 0x1f5   : > { %v5289_v5 = vadd.f32 %v5281_v56, %v5264_v33  ;;  %v5487_v0 = vld [vmem:[#allocation2 + $0x8] sm:$0xff]  ;;  %5296 = vst.msk [vmem:[#allocation2 + $0x20] sm:$0xff] %vm276_vm0, %v5288_v9  ;;  %5504 = vst.msk [vmem:[#allocation2 + $0x10] sm:$0xff] %vm276_vm0, %v5496_v50  ;;  %v5497_v46 = vadd.f32 %v7634_v38, %v5489_v53 }
 0x1f6   : > { %5299 = vst.msk [vmem:[#allocation2 + $0x38] sm:$0xff] %vm276_vm0, %v5291_v48  ;;  %v5495_v10 = vadd.f32 %v5487_v0, %v5458_v20  ;;  %5502 = vst.msk [vmem:[#allocation2] sm:$0xff] %vm276_vm0, %v5494_v26 }
 0x1f7   : > { %5297 = vst.msk [vmem:[#allocation2 + $0x28] sm:$0xff] %vm276_vm0, %v5289_v5  ;;  %5505 = vst.msk [vmem:[#allocation2 + $0x18] sm:$0xff] %vm276_vm0, %v5497_v46 }
 0x1f8   : > { %5503 = vst.msk [vmem:[#allocation2 + $0x8] sm:$0xff] %vm276_vm0, %v5495_v10 }
 0x1f9   : > { %v5492_v36 = vld [vmem:[#allocation2 + $0x30] sm:$0xff] }
 0x1fa   : > { %v5500_v62 = vadd.f32 %v7637_v6, %v5492_v36 }
 0x1fc   : > { %5508 = vst.msk [vmem:[#allocation2 + $0x30] sm:$0xff] %vm276_vm0, %v5500_v62  ;;  %v5490_v30 = vld [vmem:[#allocation2 + $0x20] sm:$0xff]  ;;  %v5794_v7 = vld [vmem:[#allocation2 + $0x10] sm:$0xff] }
 0x1fd   : > { %v5493_v42 = vld [vmem:[#allocation2 + $0x38] sm:$0xff]  ;;  %v5498_v1 = vadd.f32 %v5490_v30, %v5471_v63  ;;  %v5792_v23 = vld [vmem:[#allocation2] sm:$0xff]  ;;  %v7649_v12 = vpop.f32.mrb[88].mxu1 }
 0x1fe   : > { %v5501_v14 = vadd.f32 %v7638_v35, %v5493_v42  ;;  %v5491_v19 = vld [vmem:[#allocation2 + $0x28] sm:$0xff]  ;;  %v5795_v39 = vld [vmem:[#allocation2 + $0x18] sm:$0xff]  ;;  %v5802_v21 = vadd.f32 %v7649_v12, %v5794_v7  ;;  %v5761_v22 = vpop.f32.mrb[89].mxu1 }
 0x1ff   : > { %v5499_v57 = vadd.f32 %v5491_v19, %v5474_v8  ;;  %5506 = vst.msk [vmem:[#allocation2 + $0x20] sm:$0xff] %vm276_vm0, %v5498_v1  ;;  %v5793_v17 = vld [vmem:[#allocation2 + $0x8] sm:$0xff]  ;;  %v5800_v16 = vadd.f32 %v5792_v23, %v5761_v22  ;;  %v7650_v58 = vpop.f32.mrb[90].mxu1 }
 0x200   : > { %5509 = vst.msk [vmem:[#allocation2 + $0x38] sm:$0xff] %vm276_vm0, %v5501_v14  ;;  %5810 = vst.msk [vmem:[#allocation2 + $0x10] sm:$0xff] %vm276_vm0, %v5802_v21  ;;  %v5803_v25 = vadd.f32 %v7650_v58, %v5795_v39  ;;  %v5764_v27 = vpop.f32.mrb[91].mxu1 }
 0x201   : > { %5507 = vst.msk [vmem:[#allocation2 + $0x28] sm:$0xff] %vm276_vm0, %v5499_v57  ;;  %5808 = vst.msk [vmem:[#allocation2] sm:$0xff] %vm276_vm0, %v5800_v16  ;;  %v5801_v51 = vadd.f32 %v5793_v17, %v5764_v27 }
 0x202   : > { %5811 = vst.msk [vmem:[#allocation2 + $0x18] sm:$0xff] %vm276_vm0, %v5803_v25 }
 0x203   : > { %5809 = vst.msk [vmem:[#allocation2 + $0x8] sm:$0xff] %vm276_vm0, %v5801_v51  ;;  %v5798_v41 = vld [vmem:[#allocation2 + $0x30] sm:$0xff] }
 0x206   : > { %v5796_v49 = vld [vmem:[#allocation2 + $0x20] sm:$0xff] }
 0x207   : > { %v6004_v60 = vld [vmem:[#allocation2 + $0x10] sm:$0xff]  ;;  %v5799_v34 = vld [vmem:[#allocation2 + $0x38] sm:$0xff] }
 0x208   : > { %v6002_v3 = vld [vmem:[#allocation2] sm:$0xff]  ;;  %v5797_v40 = vld [vmem:[#allocation2 + $0x28] sm:$0xff] }
 0x209   : > { %v6005_v47 = vld [vmem:[#allocation2 + $0x18] sm:$0xff] }
 0x20a   : > { %v6003_v55 = vld [vmem:[#allocation2 + $0x8] sm:$0xff] }
 0x20b   : > { %v7653_v4 = vpop.f32.mrb[92].mxu1 }
 0x20c   : > { %v7665_v13 = vpop.f32.mrb[96].mxu0  ;;  %v5806_v54 = vadd.f32 %v7653_v4, %v5798_v41  ;;  %v5777_v31 = vpop.f32.mrb[93].mxu1 }
 0x20d   : > { %v6012_v28 = vadd.f32 %v7665_v13, %v6004_v60  ;;  %v5971_v52 = vpop.f32.mrb[97].mxu0  ;;  %v5804_v37 = vadd.f32 %v5796_v49, %v5777_v31  ;;  %v7654_v38 = vpop.f32.mrb[94].mxu1 }
 0x20e   : > { %v6010_v43 = vadd.f32 %v6002_v3, %v5971_v52  ;;  %v7666_v59 = vpop.f32.mrb[98].mxu0  ;;  %5814 = vst.msk [vmem:[#allocation2 + $0x30] sm:$0xff] %vm276_vm0, %v5806_v54  ;;  %v5807_v61 = vadd.f32 %v7654_v38, %v5799_v34  ;;  %v5780_v2 = vpop.f32.mrb[95].mxu1 }
 0x20f   : > { %6020 = vst.msk [vmem:[#allocation2 + $0x10] sm:$0xff] %vm276_vm0, %v6012_v28  ;;  %v6013_v33 = vadd.f32 %v7666_v59, %v6005_v47  ;;  %v5974_v20 = vpop.f32.mrb[99].mxu0  ;;  %5812 = vst.msk [vmem:[#allocation2 + $0x20] sm:$0xff] %vm276_vm0, %v5804_v37  ;;  %v5805_v32 = vadd.f32 %v5797_v40, %v5780_v2 }
 0x210   : > { %6018 = vst.msk [vmem:[#allocation2] sm:$0xff] %vm276_vm0, %v6010_v43  ;;  %v6011_v44 = vadd.f32 %v6003_v55, %v5974_v20  ;;  %5815 = vst.msk [vmem:[#allocation2 + $0x38] sm:$0xff] %vm276_vm0, %v5807_v61 }
 0x211   : > { %6021 = vst.msk [vmem:[#allocation2 + $0x18] sm:$0xff] %vm276_vm0, %v6013_v33  ;;  %5813 = vst.msk [vmem:[#allocation2 + $0x28] sm:$0xff] %vm276_vm0, %v5805_v32 }
 0x212   : > { %6019 = vst.msk [vmem:[#allocation2 + $0x8] sm:$0xff] %vm276_vm0, %v6011_v44 }
 0x213   : > { %v7669_v45 = vpop.f32.mrb[96].mxu1 }
 0x214   : > { %v5987_v6 = vpop.f32.mrb[97].mxu1 }
 0x215   : > { %v6008_v63 = vld [vmem:[#allocation2 + $0x30] sm:$0xff]  ;;  %v7670_v35 = vpop.f32.mrb[98].mxu1 }
 0x216   : > { %v6028_v18 = vld [vmem:[#allocation2 + $0x10] sm:$0xff]  ;;  %v6016_v11 = vadd.f32 %v7669_v45, %v6008_v63  ;;  %v6006_v15 = vld [vmem:[#allocation2 + $0x20] sm:$0xff]  ;;  %v5990_v8 = vpop.f32.mrb[99].mxu1 }
 0x217   : > { %6036 = vst.msk [vmem:[%s9587_s13 + $0x10] sm:$0xff] %vm276_vm0, %v6028_v18  ;;  %v6026_v24 = vld [vmem:[#allocation2] sm:$0xff]  ;;  %v6014_v50 = vadd.f32 %v6006_v15, %v5987_v6  ;;  %v6009_v56 = vld [vmem:[#allocation2 + $0x38] sm:$0xff]  ;;  %v6067_v29 = vmul.f32 %v6028_v18, %v6028_v18  ;;  %v6045_v30 = vsel %vm276_vm0, %v6028_v18, 0.0 }
 0x218   : > { %6034 = vst.msk [vmem:[%s9587_s13] sm:$0xff] %vm276_vm0, %v6026_v24  ;;  %v6065_v9 = vmul.f32 %v6026_v24, %v6026_v24  ;;  %v6029_v48 = vld [vmem:[#allocation2 + $0x18] sm:$0xff]  ;;  %6024 = vst.msk [vmem:[#allocation2 + $0x30] sm:$0xff] %vm276_vm0, %v6016_v11  ;;  %v6017_v26 = vadd.f32 %v7670_v35, %v6009_v56  ;;  %v6007_v53 = vld [vmem:[#allocation2 + $0x28] sm:$0xff]  ;;  %v6042_v0 = vsel %vm276_vm0, %v6026_v24, 0.0 }
 0x219   : > { %6037 = vst.msk [vmem:[%s9587_s13 + $0x18] sm:$0xff] %vm276_vm0, %v6029_v48  ;;  %v6027_v5 = vld [vmem:[#allocation2 + $0x8] sm:$0xff]  ;;  %6022 = vst.msk [vmem:[#allocation2 + $0x20] sm:$0xff] %vm276_vm0, %v6014_v50  ;;  %v6015_v36 = vadd.f32 %v6007_v53, %v5990_v8  ;;  %v6068_v7 = vmul.f32 %v6029_v48, %v6029_v48  ;;  %v6076_v23 = vsel %vm276_vm0, %v6067_v29, 0.0  ;;  %v6047_v12 = vsel %vm276_vm0, %v6029_v48, 0.0 }
 0x21a   : > { %6035 = vst.msk [vmem:[%s9587_s13 + $0x8] sm:$0xff] %vm276_vm0, %v6027_v5  ;;  %v6043_v46 = vsel %vm276_vm0, %v6027_v5, 0.0  ;;  %v6066_v10 = vmul.f32 %v6027_v5, %v6027_v5  ;;  %6025 = vst.msk [vmem:[#allocation2 + $0x38] sm:$0xff] %vm276_vm0, %v6017_v26  ;;  %v6073_v42 = vsel %vm276_vm0, %v6065_v9, 0.0 }
 0x21b   : > { %v6044_v62 = vadd.f32 %v6043_v46, %v6042_v0  ;;  %6023 = vst.msk [vmem:[#allocation2 + $0x28] sm:$0xff] %vm276_vm0, %v6015_v36  ;;  %v6078_v21 = vsel %vm276_vm0, %v6068_v7, 0.0 }
 0x21c   : > { %v6074_v1 = vsel %vm276_vm0, %v6066_v10, 0.0 }
 0x21d   : > { %v6046_v14 = vadd.f32 %v6045_v30, %v6044_v62  ;;  %v6075_v19 = vadd.f32 %v6074_v1, %v6073_v42 }
 0x21f   : > { %v6077_v57 = vadd.f32 %v6076_v23, %v6075_v19  ;;  %v6048_v39 = vadd.f32 %v6047_v12, %v6046_v14  ;;  %v6032_v22 = vld [vmem:[#allocation2 + $0x30] sm:$0xff] }
 0x220   : > { %6040 = vst.msk [vmem:[%s9587_s13 + $0x30] sm:$0xff] %vm276_vm0, %v6032_v22  ;;  %v6030_v17 = vld [vmem:[#allocation2 + $0x20] sm:$0xff]  ;;  %v6071_v60 = vmul.f32 %v6032_v22, %v6032_v22  ;;  %v6053_v47 = vsel %vm276_vm0, %v6032_v22, 0.0 }
 0x221   : > { %v6079_v16 = vadd.f32 %v6078_v21, %v6077_v57  ;;  %6038 = vst.msk [vmem:[%s9587_s13 + $0x20] sm:$0xff] %vm276_vm0, %v6030_v17  ;;  %v6049_v58 = vsel %vm276_vm0, %v6030_v17, 0.0  ;;  %v6069_v25 = vmul.f32 %v6030_v17, %v6030_v17  ;;  %v6033_v27 = vld [vmem:[#allocation2 + $0x38] sm:$0xff] }
 0x222   : > { %v6050_v51 = vadd.f32 %v6049_v58, %v6048_v39  ;;  %6041 = vst.msk [vmem:[%s9587_s13 + $0x38] sm:$0xff] %vm276_vm0, %v6033_v27  ;;  %v6031_v41 = vld [vmem:[#allocation2 + $0x28] sm:$0xff]  ;;  %v6072_v54 = vmul.f32 %v6033_v27, %v6033_v27  ;;  %v6084_v52 = vsel %vm276_vm0, %v6071_v60, 0.0  ;;  %v6055_v55 = vsel %vm276_vm0, %v6033_v27, 0.0 }
 0x223   : > { %v6080_v49 = vsel %vm276_vm0, %v6069_v25, 0.0  ;;  %6039 = vst.msk [vmem:[%s9587_s13 + $0x28] sm:$0xff] %vm276_vm0, %v6031_v41  ;;  %v6051_v3 = vsel %vm276_vm0, %v6031_v41, 0.0  ;;  %v6070_v4 = vmul.f32 %v6031_v41, %v6031_v41 }
 0x224   : > { %v6081_v34 = vadd.f32 %v6080_v49, %v6079_v16  ;;  %v6052_v13 = vadd.f32 %v6051_v3, %v6050_v51  ;;  %v6086_v43 = vsel %vm276_vm0, %v6072_v54, 0.0 }
 0x225   : > { %v6082_v31 = vsel %vm276_vm0, %v6070_v4, 0.0 }
 0x226   : > { %v6054_v28 = vadd.f32 %v6053_v47, %v6052_v13  ;;  %v6083_v40 = vadd.f32 %v6082_v31, %v6081_v34 }
 0x228   : > { %v6056_v37 = vadd.f32 %v6055_v55, %v6054_v28  ;;  %v6085_v38 = vadd.f32 %v6084_v52, %v6083_v40 }
 0x22a   : > { %v6057_v59 = vrot.slane %v6056_v37, 4  ;;  %v6087_v61 = vadd.f32 %v6086_v43, %v6085_v38 }
 0x22c   : > { %v6058_v2 = vadd.f32 %v6057_v59, %v6056_v37  ;;  %v6088_v33 = vrot.slane %v6087_v61, 4 }
 0x22e   : > { %v6059_v20 = vrot.slane %v6058_v2, 2  ;;  %v6089_v32 = vadd.f32 %v6088_v33, %v6087_v61 }
 0x230   : > { %v6060_v44 = vadd.f32 %v6059_v20, %v6058_v2  ;;  %v6090_v45 = vrot.slane %v6089_v32, 2 }
 0x232   : > { %v6061_v6 = vrot.slane %v6060_v44, 1  ;;  %v6091_v18 = vadd.f32 %v6090_v45, %v6089_v32 }
 0x234   : > { %v6062_v63 = vadd.f32 %v6061_v6, %v6060_v44  ;;  %v6092_v35 = vrot.slane %v6091_v18, 1 }
 0x236   : > { %6064 = vst.msk [vmem:[%s211_s18] sm:$0x1] %vm6063_vm13, %v6062_v63  ;;  %v6093_v24 = vadd.f32 %v6092_v35, %v6091_v18 }
 0x238   : > { %6094 = vst.msk [vmem:[%s214_s21] sm:$0x1] %vm6063_vm13, %v6093_v24 }
 0x239 PF: > { %s15_s15 = sadd.s32 1, %s7814_s15  }
 0x23a   : > { %p12_p4 = scmp.ge.s32.totalorder %s15_s15, 4  }
 0x23c   :  { %14 = sbr.rel (!%p12_p4) target bundleno = 1 (0x1), region = 110 }

</bundles_post_ra>
